<compile_context>
chip_gen: v5e
topology: v5e:2x2
jax: 0.10.0
libtpu: 0.0.40
codegen_flags: <defaults>
</compile_context>

<pallas_src>
import functools

import jax
import jax.numpy as jnp
from jax import lax
from jax.experimental import pallas as pl
from jax.experimental.pallas import tpu as pltpu


def _round_up(x, m):
    return -(-x // m) * m


# ----------------------------------------------------------------------------
# Fused  out = (sum_q A[q] @ B[q]) * scale + shift (+ residual) (+ ReLU)
# ----------------------------------------------------------------------------
def _fused_mm_kernel(*refs, relu, has_residual):
    if has_residual:
        a_ref, b_ref, s_ref, t_ref, r_ref, o_ref, acc_ref = refs
    else:
        a_ref, b_ref, s_ref, t_ref, o_ref, acc_ref = refs
        r_ref = None
    q = pl.program_id(2)

    @pl.when(q == 0)
    def _():
        acc_ref[...] = jnp.zeros_like(acc_ref)

    # bf16 operands, f32 accumulation on the MXU.
    acc_ref[...] += jnp.dot(a_ref[0], b_ref[0],
                            preferred_element_type=jnp.float32)

    @pl.when(q == pl.num_programs(2) - 1)
    def _():
        # Epilogue in f32 (BN affine / bias, residual add, ReLU), cast at store.
        y = acc_ref[...] * s_ref[...] + t_ref[...]
        if has_residual:
            y = y + r_ref[...].astype(jnp.float32)
        if relu:
            y = jnp.maximum(y, 0.0)
        o_ref[...] = y.astype(o_ref.dtype)


def fused_matmul(a, b, scale, shift, residual=None, relu=False,
                 out_dtype=jnp.bfloat16, tm_cap=256, tn_cap=256):
    """a: (T, M, K) bf16, b: (T, K, N) bf16, scale/shift: (1, N) f32,
    residual: (M, N) or None.  Returns (M, N) in out_dtype."""
    T, M, K = a.shape
    Nout = b.shape[-1]

    # Right-size the M tile: no padding of tiny M up to 128.
    if M <= tm_cap:
        tm = _round_up(M, 8)
        Mp = tm
    else:
        tm = tm_cap
        Mp = _round_up(M, tm)
    if Mp != M:
        a = jnp.pad(a, ((0, 0), (0, Mp - M), (0, 0)))
        if residual is not None:
            residual = jnp.pad(residual, ((0, Mp - M), (0, 0)))

    tn = min(tn_cap, Nout)
    assert Nout % tn == 0

    in_specs = [pl.BlockSpec((1, tm, K), lambda i, j, q: (q, i, 0)),
                pl.BlockSpec((1, K, tn), lambda i, j, q: (q, 0, j)),
                pl.BlockSpec((1, tn), lambda i, j, q: (0, j)),
                pl.BlockSpec((1, tn), lambda i, j, q: (0, j))]
    args = [a, b, scale, shift]
    if residual is not None:
        in_specs.append(pl.BlockSpec((tm, tn), lambda i, j, q: (i, j)))
        args.append(residual)

    kern = functools.partial(_fused_mm_kernel, relu=relu,
                             has_residual=residual is not None)
    out = pl.pallas_call(
        kern,
        out_shape=jax.ShapeDtypeStruct((Mp, Nout), out_dtype),
        grid_spec=pltpu.PrefetchScalarGridSpec(
            num_scalar_prefetch=0,
            grid=(Mp // tm, Nout // tn, T),
            in_specs=in_specs,
            out_specs=pl.BlockSpec((tm, tn), lambda i, j, q: (i, j)),
            scratch_shapes=[pltpu.VMEM((tm, tn), jnp.float32)]),
        compiler_params=pltpu.CompilerParams(
            dimension_semantics=("parallel", "parallel", "arbitrary")),
    )(*args)
    return out[:M] if Mp != M else out


# ----------------------------------------------------------------------------
# Pooling kernels (gridded)
# ----------------------------------------------------------------------------
def _window_max_kernel(x_ref, o_ref):
    o_ref[...] = jnp.max(x_ref[...].astype(jnp.float32), axis=0).astype(o_ref.dtype)


def _avgpool_kernel(x_ref, o_ref):
    o_ref[...] = jnp.mean(x_ref[...].astype(jnp.float32), axis=1, keepdims=True)


# ----------------------------------------------------------------------------
# XLA glue: shifted strided tap views (no transpose, 1x data per tap)
# ----------------------------------------------------------------------------
def _shifted_taps(x, kh, kw, stride, pad, pad_value=0.0, group_all=False):
    """x: NHWC.  Returns (A, (N, OH, OW)):
       per-tap A = (kh*kw, M, C)   (window taps as a reduction grid axis), or
       group_all A = (1, M, kh*kw*C) (classic im2col; only used for the Cin=3 stem)."""
    N, H, W, C = x.shape
    xp = jnp.pad(x, ((0, 0), (pad, pad), (pad, pad), (0, 0)),
                 constant_values=pad_value) if pad > 0 else x
    OH = (H + 2 * pad - kh) // stride + 1
    OW = (W + 2 * pad - kw) // stride + 1
    taps = []
    for i in range(kh):
        for j in range(kw):
            p = lax.slice(xp, (0, i, j, 0),
                          (N, i + (OH - 1) * stride + 1,
                           j + (OW - 1) * stride + 1, C),
                          (1, stride, stride, 1))
            taps.append(p.reshape(N * OH * OW, C))
    if group_all:
        A = jnp.concatenate(taps, axis=-1)[None]   # (1, M, kh*kw*C)
    else:
        A = jnp.stack(taps, axis=0)                # (kh*kw, M, C)
    return A, (N, OH, OW)


# ----------------------------------------------------------------------------
# Layer wrappers
# ----------------------------------------------------------------------------
def conv_bn(x, cp, relu, residual=None, out_dtype=jnp.bfloat16):
    """conv (+BN affine) (+residual) (+ReLU), fully fused into one pallas_call."""
    A, (N, OH, OW) = _shifted_taps(x, cp['kh'], cp['kw'], cp['stride'],
                                   cp['pad'], group_all=cp['group_all'])
    k_needed = cp['w'].shape[1]
    if A.shape[-1] != k_needed:       # stem: pad K 147 -> 256 (lane-aligned)
        A = jnp.pad(A, ((0, 0), (0, 0), (0, k_needed - A.shape[-1])))
    cout = cp['w'].shape[-1]
    r2 = residual.reshape(N * OH * OW, cout) if residual is not None else None
    y = fused_matmul(A, cp['w'], cp['scale'], cp['shift'],
                     residual=r2, relu=relu, out_dtype=out_dtype)
    return y.reshape(N, OH, OW, cout)


def maxpool3x3s2(x):
    stacked, (N, OH, OW) = _shifted_taps(x, 3, 3, 2, 1, pad_value=-jnp.inf)
    T, M, C = stacked.shape
    Mp = _round_up(M, 8)
    tm = Mp if Mp <= 512 else 512
    Mp = _round_up(Mp, tm)
    if Mp != M:
        stacked = jnp.pad(stacked, ((0, 0), (0, Mp - M), (0, 0)),
                          constant_values=-jnp.inf)
    y = pl.pallas_call(
        _window_max_kernel,
        out_shape=jax.ShapeDtypeStruct((Mp, C), x.dtype),
        grid_spec=pltpu.PrefetchScalarGridSpec(
            num_scalar_prefetch=0,
            grid=(Mp // tm,),
            in_specs=[pl.BlockSpec((T, tm, C), lambda i: (0, i, 0))],
            out_specs=pl.BlockSpec((tm, C), lambda i: (i, 0))),
        compiler_params=pltpu.CompilerParams(
            dimension_semantics=("parallel",)),
    )(stacked)
    return y[:M].reshape(N, OH, OW, C)


def global_avgpool(x):  # NHWC -> (N, C) f32
    N, H, W, C = x.shape
    x3 = x.reshape(N, H * W, C)
    out = pl.pallas_call(
        _avgpool_kernel,
        out_shape=jax.ShapeDtypeStruct((N, 1, C), jnp.float32),
        grid_spec=pltpu.PrefetchScalarGridSpec(
            num_scalar_prefetch=0,
            grid=(N,),
            in_specs=[pl.BlockSpec((1, H * W, C), lambda n: (n, 0, 0))],
            out_specs=pl.BlockSpec((1, 1, C), lambda n: (n, 0, 0))),
        compiler_params=pltpu.CompilerParams(
            dimension_semantics=("parallel",)),
    )(x3)
    return out.reshape(N, C)


def linear_fused(x2, fc, relu, out_dtype):
    a = x2.astype(jnp.bfloat16)[None]       # (1, M, K)
    return fused_matmul(a, fc['w'], fc['scale'], fc['shift'],
                        relu=relu, out_dtype=out_dtype)


# ----------------------------------------------------------------------------
# Parameters (deterministic, mirroring PyTorch __init__ shapes / init scheme).
# Weights are pre-reshaped / pre-padded / pre-cast to bf16 once, here.
# ----------------------------------------------------------------------------
def _kaiming_conv(key, kh, kw, cin, cout):
    fan_out = kh * kw * cout
    std = (2.0 / fan_out) ** 0.5
    return jax.random.normal(key, (kh, kw, cin, cout), jnp.float32) * std


def _bn_scale_shift(c, eps=1e-5):
    gamma = jnp.ones((1, c), jnp.float32)
    beta = jnp.zeros((1, c), jnp.float32)
    mean = jnp.zeros((1, c), jnp.float32)
    var = jnp.ones((1, c), jnp.float32)
    scale = gamma / jnp.sqrt(var + eps)
    shift = beta - mean * scale
    return scale, shift


def _conv_params(key, kh, kw, cin, cout, stride, pad, group_all=False):
    w = _kaiming_conv(key, kh, kw, cin, cout)
    if group_all:
        kg = kh * kw * cin
        kg_pad = _round_up(kg, 128) if kg > 128 else kg
        wq = w.reshape(1, kg, cout)
        wq = jnp.pad(wq, ((0, 0), (0, kg_pad - kg), (0, 0)))
    else:
        wq = w.reshape(kh * kw, cin, cout)
    scale, shift = _bn_scale_shift(cout)
    return {'w': wq.astype(jnp.bfloat16), 'scale': scale, 'shift': shift,
            'kh': kh, 'kw': kw, 'stride': stride, 'pad': pad,
            'group_all': group_all}


def _linear_params(key, cin, cout, cout_pad=None):
    cout_pad = cout if cout_pad is None else cout_pad
    k1, k2 = jax.random.split(key)
    bound = 1.0 / (cin ** 0.5)
    w = jax.random.uniform(k1, (cin, cout), jnp.float32, -bound, bound)
    b = jax.random.uniform(k2, (1, cout), jnp.float32, -bound, bound)
    w = jnp.pad(w, ((0, 0), (0, cout_pad - cout)))
    b = jnp.pad(b, ((0, 0), (0, cout_pad - cout)))
    return {'w': w.astype(jnp.bfloat16)[None],                # (1, cin, cout_pad)
            'scale': jnp.ones((1, cout_pad), jnp.float32),    # bias via epilogue
            'shift': b}


def make_params(key, num_classes=10, layers=(2, 2, 2, 2)):
    keys = iter(jax.random.split(key, 64))
    params = {'num_classes': num_classes,
              'conv1': _conv_params(next(keys), 7, 7, 3, 64, stride=2, pad=3,
                                    group_all=True)}
    inplanes = 64
    stages = []
    for s_idx, (planes, nblocks) in enumerate(zip((64, 128, 256, 512), layers)):
        stage_stride = 1 if s_idx == 0 else 2
        blocks = []
        for b in range(nblocks):
            stride = stage_stride if b == 0 else 1
            blk = {'conv1': _conv_params(next(keys), 3, 3, inplanes, planes,
                                         stride=stride, pad=1),
                   'conv2': _conv_params(next(keys), 3, 3, planes, planes,
                                         stride=1, pad=1)}
            if stride != 1 or inplanes != planes:
                blk['down'] = _conv_params(next(keys), 1, 1, inplanes, planes,
                                           stride=stride, pad=0)
            blocks.append(blk)
            inplanes = planes
        stages.append(blocks)
    params['stages'] = stages
    params['fc1'] = _linear_params(next(keys), 512, 512)                 # class_classifier1
    params['fc2'] = _linear_params(next(keys), 512, num_classes,
                                   cout_pad=_round_up(num_classes, 128)) # class_classifier2
    return params


# ----------------------------------------------------------------------------
# Forward pass (sep=False path of ResNetSepFc2OFC.forward)
# ----------------------------------------------------------------------------
def basic_block(x, blk):
    out = conv_bn(x, blk['conv1'], relu=True)                     # conv1+bn1+relu fused
    if 'down' in blk:
        identity = conv_bn(x, blk['down'], relu=False)            # downsample conv+bn fused
    else:
        identity = x
    # conv2 + bn2 + residual add + relu, all in the matmul epilogue
    return conv_bn(out, blk['conv2'], relu=True, residual=identity)


def forward(params, x_nchw):
    x = jnp.transpose(x_nchw, (0, 2, 3, 1)).astype(jnp.bfloat16)  # NCHW -> NHWC bf16
    x = conv_bn(x, params['conv1'], relu=True)                    # stem conv+bn+relu
    x = maxpool3x3s2(x)
    for stage in params['stages']:
        for blk in stage:
            x = basic_block(x, blk)
    feat = global_avgpool(x)                                      # AdaptiveAvgPool2d + flatten
    h = linear_fused(feat, params['fc1'], relu=True, out_dtype=jnp.bfloat16)
    out = linear_fused(h, params['fc2'], relu=False, out_dtype=jnp.float32)
    return out[:, :params['num_classes']]
    # TODO(synk): sep=True grouped-classifier branch (data-dependent boolean routing
    # by group_idx) is not implemented; only the sep=False path is.


if __name__ == "__main__":
    key = jax.random.PRNGKey(0)
    pkey, xkey = jax.random.split(key)
    num_classes = 10
    params = make_params(pkey, num_classes=num_classes)
    x = jax.random.normal(xkey, (2, 3, 32, 32), jnp.float32)      # small NCHW input
    fwd = jax.jit(functools.partial(forward, params))
    out = jax.block_until_ready(fwd(x))
    assert out.shape == (2, num_classes)
    assert bool(jnp.all(jnp.isfinite(out)))
    print("KERNEL_OK")
</pallas_src>

<mosaic_0001>
module attributes {stable_mosaic.version = 11 : i64} {
  func.func @_fused_mm_kernel(%arg0: i32, %arg1: i32, %arg2: i32, %arg3: memref<1x256x256xbf16, #tpu.memory_space<vmem>>, %arg4: memref<1x256x64xbf16, #tpu.memory_space<vmem>>, %arg5: memref<1x64xf32, #tpu.memory_space<vmem>>, %arg6: memref<1x64xf32, #tpu.memory_space<vmem>>, %arg7: memref<256x64xbf16, #tpu.memory_space<vmem>>, %arg8: memref<256x64xf32, #tpu.memory_space<vmem>>) attributes {dimension_semantics = [#tpu.dimension_semantics<parallel>, #tpu.dimension_semantics<parallel>, #tpu.dimension_semantics<arbitrary>], iteration_bounds = array<i64: 2, 1, 1>, scalar_prefetch = 0 : i64, scratch_operands = 1 : i64, tpu.core_type = #tpu.core_type<tc>, window_params = [{transform_indices = @transform_0, window_bounds = array<i64: 1, 256, 256>}, {transform_indices = @transform_1, window_bounds = array<i64: 1, 256, 64>}, {transform_indices = @transform_2, window_bounds = array<i64: 1, 64>}, {transform_indices = @transform_3, window_bounds = array<i64: 1, 64>}, {transform_indices = @transform_4, window_bounds = array<i64: 256, 64>}]} {
    %c0_i32 = arith.constant 0 : i32
    %0 = arith.cmpi eq, %arg2, %c0_i32 : i32
    %1 = arith.extui %0 : i1 to i32
    %c0_i32_0 = arith.constant 0 : i32
    %2 = arith.cmpi ne, %1, %c0_i32_0 : i32
    scf.if %2 {
      %cst_12 = arith.constant 0.000000e+00 : f32
      %14 = vector.broadcast %cst_12 : f32 to vector<256x64xf32>
      %c0_13 = arith.constant 0 : index
      %c0_14 = arith.constant 0 : index
      %15 = vector.load %arg8[%c0_13, %c0_14] : memref<256x64xf32, #tpu.memory_space<vmem>>, vector<256x64xf32>
      tpu.vector_store %arg8[%c0_13, %c0_14], %14 {strides = array<i32>} : memref<256x64xf32, #tpu.memory_space<vmem>>, vector<256x64xf32>,
    } else {
    }
    %c0 = arith.constant 0 : index
    %c0_1 = arith.constant 0 : index
    %3 = vector.load %arg8[%c0, %c0_1] : memref<256x64xf32, #tpu.memory_space<vmem>>, vector<256x64xf32>
    %c0_2 = arith.constant 0 : index
    %c0_3 = arith.constant 0 : index
    %c0_4 = arith.constant 0 : index
    %4 = vector.load %arg3[%c0_2, %c0_3, %c0_4] : memref<1x256x256xbf16, #tpu.memory_space<vmem>>, vector<1x256x256xbf16>
    %5 = vector.shape_cast %4 : vector<1x256x256xbf16> to vector<256x256xbf16>
    %c0_5 = arith.constant 0 : index
    %c0_6 = arith.constant 0 : index
    %c0_7 = arith.constant 0 : index
    %6 = vector.load %arg4[%c0_5, %c0_6, %c0_7] : memref<1x256x64xbf16, #tpu.memory_space<vmem>>, vector<1x256x64xbf16>
    %7 = vector.shape_cast %6 : vector<1x256x64xbf16> to vector<256x64xbf16>
    %cst = arith.constant dense<0.000000e+00> : vector<256x64xf32>
    %8 = tpu.matmul %5, %7, %cst {dimension_numbers = #tpu.dot_dimension_numbers<[1], [0], [0], [1], [0, 0, 1, 1], [], []>} : vector<256x256xbf16>, vector<256x64xbf16>, vector<256x64xf32> -> vector<256x64xf32>
    %9 = arith.addf %3, %8 : vector<256x64xf32>
    %c0_8 = arith.constant 0 : index
    %c0_9 = arith.constant 0 : index
    %10 = vector.load %arg8[%c0_8, %c0_9] : memref<256x64xf32, #tpu.memory_space<vmem>>, vector<256x64xf32>
    tpu.vector_store %arg8[%c0_8, %c0_9], %9 {strides = array<i32>} : memref<256x64xf32, #tpu.memory_space<vmem>>, vector<256x64xf32>,
    %c0_i32_10 = arith.constant 0 : i32
    %11 = arith.cmpi eq, %arg2, %c0_i32_10 : i32
    %12 = arith.extui %11 : i1 to i32
    %c0_i32_11 = arith.constant 0 : i32
    %13 = arith.cmpi ne, %12, %c0_i32_11 : i32
    scf.if %13 {
      %c0_12 = arith.constant 0 : index
      %c0_13 = arith.constant 0 : index
      %14 = vector.load %arg8[%c0_12, %c0_13] : memref<256x64xf32, #tpu.memory_space<vmem>>, vector<256x64xf32>
      %c0_14 = arith.constant 0 : index
      %c0_15 = arith.constant 0 : index
      %15 = vector.load %arg5[%c0_14, %c0_15] : memref<1x64xf32, #tpu.memory_space<vmem>>, vector<1x64xf32>
      %16 = vector.broadcast %15 : vector<1x64xf32> to vector<256x64xf32>
      %17 = arith.mulf %14, %16 : vector<256x64xf32>
      %c0_16 = arith.constant 0 : index
      %c0_17 = arith.constant 0 : index
      %18 = vector.load %arg6[%c0_16, %c0_17] : memref<1x64xf32, #tpu.memory_space<vmem>>, vector<1x64xf32>
      %19 = vector.broadcast %18 : vector<1x64xf32> to vector<256x64xf32>
      %20 = arith.addf %17, %19 : vector<256x64xf32>
      %cst_18 = arith.constant 0.000000e+00 : f32
      %21 = vector.broadcast %cst_18 : f32 to vector<256x64xf32>
      %22 = arith.maximumf %20, %21 : vector<256x64xf32>
      %23 = arith.truncf %22 : vector<256x64xf32> to vector<256x64xbf16>
      %c0_19 = arith.constant 0 : index
      %c0_20 = arith.constant 0 : index
      %24 = vector.load %arg7[%c0_19, %c0_20] : memref<256x64xbf16, #tpu.memory_space<vmem>>, vector<256x64xbf16>
      tpu.vector_store %arg7[%c0_19, %c0_20], %23 {strides = array<i32>} : memref<256x64xbf16, #tpu.memory_space<vmem>>, vector<256x64xbf16>,
    } else {
    }
    return
  }
  func.func @transform_0(%arg0: i32, %arg1: i32, %arg2: i32) -> (i32, i32, i32) {
    %c0_i32 = arith.constant 0 : i32
    %c0_i32_0 = arith.constant 0 : i32
    return %arg2, %arg0, %c0_i32 : i32, i32, i32
  }
  func.func @transform_1(%arg0: i32, %arg1: i32, %arg2: i32) -> (i32, i32, i32) {
    %c0_i32 = arith.constant 0 : i32
    %c0_i32_0 = arith.constant 0 : i32
    return %arg2, %c0_i32, %arg1 : i32, i32, i32
  }
  func.func @transform_2(%arg0: i32, %arg1: i32, %arg2: i32) -> (i32, i32) {
    %c0_i32 = arith.constant 0 : i32
    %c0_i32_0 = arith.constant 0 : i32
    return %c0_i32, %arg1 : i32, i32
  }
  func.func @transform_3(%arg0: i32, %arg1: i32, %arg2: i32) -> (i32, i32) {
    %c0_i32 = arith.constant 0 : i32
    %c0_i32_0 = arith.constant 0 : i32
    return %c0_i32, %arg1 : i32, i32
  }
  func.func @transform_4(%arg0: i32, %arg1: i32, %arg2: i32) -> (i32, i32) {
    %c0_i32 = arith.constant 0 : i32
    return %arg0, %arg1 : i32, i32
  }
}

module attributes {stable_mosaic.version = 11 : i64} {
  func.func @_window_max_kernel(%arg0: i32, %arg1: memref<9x128x64xbf16, #tpu.memory_space<vmem>>, %arg2: memref<128x64xbf16, #tpu.memory_space<vmem>>) attributes {dimension_semantics = [#tpu.dimension_semantics<parallel>], iteration_bounds = array<i64: 1>, scalar_prefetch = 0 : i64, scratch_operands = 0 : i64, tpu.core_type = #tpu.core_type<tc>, window_params = [{transform_indices = @transform_0, window_bounds = array<i64: 9, 128, 64>}, {transform_indices = @transform_1, window_bounds = array<i64: 128, 64>}]} {
    %c0 = arith.constant 0 : index
    %c0_0 = arith.constant 0 : index
    %c0_1 = arith.constant 0 : index
    %0 = vector.load %arg1[%c0, %c0_0, %c0_1] : memref<9x128x64xbf16, #tpu.memory_space<vmem>>, vector<9x128x64xbf16>
    %1 = arith.extf %0 : vector<9x128x64xbf16> to vector<9x128x64xf32>
    %cst = arith.constant dense<0xFF800000> : vector<128x64xf32>
    %2 = vector.multi_reduction <maximumf>, %1, %cst [0] : vector<9x128x64xf32> to vector<128x64xf32>
    %3 = arith.truncf %2 : vector<128x64xf32> to vector<128x64xbf16>
    %c0_2 = arith.constant 0 : index
    %c0_3 = arith.constant 0 : index
    %4 = vector.load %arg2[%c0_2, %c0_3] : memref<128x64xbf16, #tpu.memory_space<vmem>>, vector<128x64xbf16>
    tpu.vector_store %arg2[%c0_2, %c0_3], %3 {strides = array<i32>} : memref<128x64xbf16, #tpu.memory_space<vmem>>, vector<128x64xbf16>,
    return
  }
  func.func @transform_0(%arg0: i32) -> (i32, i32, i32) {
    %c0_i32 = arith.constant 0 : i32
    %c0_i32_0 = arith.constant 0 : i32
    %c0_i32_1 = arith.constant 0 : i32
    return %c0_i32, %arg0, %c0_i32_0 : i32, i32, i32
  }
  func.func @transform_1(%arg0: i32) -> (i32, i32) {
    %c0_i32 = arith.constant 0 : i32
    %c0_i32_0 = arith.constant 0 : i32
    return %arg0, %c0_i32 : i32, i32
  }
}

module attributes {stable_mosaic.version = 11 : i64} {
  func.func @_fused_mm_kernel(%arg0: i32, %arg1: i32, %arg2: i32, %arg3: memref<1x128x64xbf16, #tpu.memory_space<vmem>>, %arg4: memref<1x64x64xbf16, #tpu.memory_space<vmem>>, %arg5: memref<1x64xf32, #tpu.memory_space<vmem>>, %arg6: memref<1x64xf32, #tpu.memory_space<vmem>>, %arg7: memref<128x64xbf16, #tpu.memory_space<vmem>>, %arg8: memref<128x64xbf16, #tpu.memory_space<vmem>>, %arg9: memref<128x64xf32, #tpu.memory_space<vmem>>) attributes {dimension_semantics = [#tpu.dimension_semantics<parallel>, #tpu.dimension_semantics<parallel>, #tpu.dimension_semantics<arbitrary>], iteration_bounds = array<i64: 1, 1, 9>, scalar_prefetch = 0 : i64, scratch_operands = 1 : i64, tpu.core_type = #tpu.core_type<tc>, window_params = [{transform_indices = @transform_0, window_bounds = array<i64: 1, 128, 64>}, {transform_indices = @transform_1, window_bounds = array<i64: 1, 64, 64>}, {transform_indices = @transform_2, window_bounds = array<i64: 1, 64>}, {transform_indices = @transform_3, window_bounds = array<i64: 1, 64>}, {transform_indices = @transform_4, window_bounds = array<i64: 128, 64>}, {transform_indices = @transform_5, window_bounds = array<i64: 128, 64>}]} {
    %c0_i32 = arith.constant 0 : i32
    %0 = arith.cmpi eq, %arg2, %c0_i32 : i32
    %1 = arith.extui %0 : i1 to i32
    %c0_i32_0 = arith.constant 0 : i32
    %2 = arith.cmpi ne, %1, %c0_i32_0 : i32
    scf.if %2 {
      %cst_11 = arith.constant 0.000000e+00 : f32
      %14 = vector.broadcast %cst_11 : f32 to vector<128x64xf32>
      %c0_12 = arith.constant 0 : index
      %c0_13 = arith.constant 0 : index
      %15 = vector.load %arg9[%c0_12, %c0_13] : memref<128x64xf32, #tpu.memory_space<vmem>>, vector<128x64xf32>
      tpu.vector_store %arg9[%c0_12, %c0_13], %14 {strides = array<i32>} : memref<128x64xf32, #tpu.memory_space<vmem>>, vector<128x64xf32>,
    } else {
    }
    %c0 = arith.constant 0 : index
    %c0_1 = arith.constant 0 : index
    %3 = vector.load %arg9[%c0, %c0_1] : memref<128x64xf32, #tpu.memory_space<vmem>>, vector<128x64xf32>
    %c0_2 = arith.constant 0 : index
    %c0_3 = arith.constant 0 : index
    %c0_4 = arith.constant 0 : index
    %4 = vector.load %arg3[%c0_2, %c0_3, %c0_4] : memref<1x128x64xbf16, #tpu.memory_space<vmem>>, vector<1x128x64xbf16>
    %5 = vector.shape_cast %4 : vector<1x128x64xbf16> to vector<128x64xbf16>
    %c0_5 = arith.constant 0 : index
    %c0_6 = arith.constant 0 : index
    %c0_7 = arith.constant 0 : index
    %6 = vector.load %arg4[%c0_5, %c0_6, %c0_7] : memref<1x64x64xbf16, #tpu.memory_space<vmem>>, vector<1x64x64xbf16>
    %7 = vector.shape_cast %6 : vector<1x64x64xbf16> to vector<64x64xbf16>
    %cst = arith.constant dense<0.000000e+00> : vector<128x64xf32>
    %8 = tpu.matmul %5, %7, %cst {dimension_numbers = #tpu.dot_dimension_numbers<[1], [0], [0], [1], [0, 0, 1, 1], [], []>} : vector<128x64xbf16>, vector<64x64xbf16>, vector<128x64xf32> -> vector<128x64xf32>
    %9 = arith.addf %3, %8 : vector<128x64xf32>
    %c0_8 = arith.constant 0 : index
    %c0_9 = arith.constant 0 : index
    %10 = vector.load %arg9[%c0_8, %c0_9] : memref<128x64xf32, #tpu.memory_space<vmem>>, vector<128x64xf32>
    tpu.vector_store %arg9[%c0_8, %c0_9], %9 {strides = array<i32>} : memref<128x64xf32, #tpu.memory_space<vmem>>, vector<128x64xf32>,
    %c8_i32 = arith.constant 8 : i32
    %11 = arith.cmpi eq, %arg2, %c8_i32 : i32
    %12 = arith.extui %11 : i1 to i32
    %c0_i32_10 = arith.constant 0 : i32
    %13 = arith.cmpi ne, %12, %c0_i32_10 : i32
    scf.if %13 {
      %c0_11 = arith.constant 0 : index
      %c0_12 = arith.constant 0 : index
      %14 = vector.load %arg9[%c0_11, %c0_12] : memref<128x64xf32, #tpu.memory_space<vmem>>, vector<128x64xf32>
      %c0_13 = arith.constant 0 : index
      %c0_14 = arith.constant 0 : index
      %15 = vector.load %arg5[%c0_13, %c0_14] : memref<1x64xf32, #tpu.memory_space<vmem>>, vector<1x64xf32>
      %16 = vector.broadcast %15 : vector<1x64xf32> to vector<128x64xf32>
      %17 = arith.mulf %14, %16 : vector<128x64xf32>
      %c0_15 = arith.constant 0 : index
      %c0_16 = arith.constant 0 : index
      %18 = vector.load %arg6[%c0_15, %c0_16] : memref<1x64xf32, #tpu.memory_space<vmem>>, vector<1x64xf32>
      %19 = vector.broadcast %18 : vector<1x64xf32> to vector<128x64xf32>
      %20 = arith.addf %17, %19 : vector<128x64xf32>
      %c0_17 = arith.constant 0 : index
      %c0_18 = arith.constant 0 : index
      %21 = vector.load %arg7[%c0_17, %c0_18] : memref<128x64xbf16, #tpu.memory_space<vmem>>, vector<128x64xbf16>
      %22 = arith.extf %21 : vector<128x64xbf16> to vector<128x64xf32>
      %23 = arith.addf %20, %22 : vector<128x64xf32>
      %cst_19 = arith.constant 0.000000e+00 : f32
      %24 = vector.broadcast %cst_19 : f32 to vector<128x64xf32>
      %25 = arith.maximumf %23, %24 : vector<128x64xf32>
      %26 = arith.truncf %25 : vector<128x64xf32> to vector<128x64xbf16>
      %c0_20 = arith.constant 0 : index
      %c0_21 = arith.constant 0 : index
      %27 = vector.load %arg8[%c0_20, %c0_21] : memref<128x64xbf16, #tpu.memory_space<vmem>>, vector<128x64xbf16>
      tpu.vector_store %arg8[%c0_20, %c0_21], %26 {strides = array<i32>} : memref<128x64xbf16, #tpu.memory_space<vmem>>, vector<128x64xbf16>,
    } else {
    }
    return
  }
  func.func @transform_0(%arg0: i32, %arg1: i32, %arg2: i32) -> (i32, i32, i32) {
    %c0_i32 = arith.constant 0 : i32
    %c0_i32_0 = arith.constant 0 : i32
    return %arg2, %arg0, %c0_i32 : i32, i32, i32
  }
  func.func @transform_1(%arg0: i32, %arg1: i32, %arg2: i32) -> (i32, i32, i32) {
    %c0_i32 = arith.constant 0 : i32
    %c0_i32_0 = arith.constant 0 : i32
    return %arg2, %c0_i32, %arg1 : i32, i32, i32
  }
  func.func @transform_2(%arg0: i32, %arg1: i32, %arg2: i32) -> (i32, i32) {
    %c0_i32 = arith.constant 0 : i32
    %c0_i32_0 = arith.constant 0 : i32
    return %c0_i32, %arg1 : i32, i32
  }
  func.func @transform_3(%arg0: i32, %arg1: i32, %arg2: i32) -> (i32, i32) {
    %c0_i32 = arith.constant 0 : i32
    %c0_i32_0 = arith.constant 0 : i32
    return %c0_i32, %arg1 : i32, i32
  }
  func.func @transform_4(%arg0: i32, %arg1: i32, %arg2: i32) -> (i32, i32) {
    %c0_i32 = arith.constant 0 : i32
    return %arg0, %arg1 : i32, i32
  }
  func.func @transform_5(%arg0: i32, %arg1: i32, %arg2: i32) -> (i32, i32) {
    %c0_i32 = arith.constant 0 : i32
    return %arg0, %arg1 : i32, i32
  }
}

module attributes {stable_mosaic.version = 11 : i64} {
  func.func @_fused_mm_kernel(%arg0: i32, %arg1: i32, %arg2: i32, %arg3: memref<1x128x64xbf16, #tpu.memory_space<vmem>>, %arg4: memref<1x64x64xbf16, #tpu.memory_space<vmem>>, %arg5: memref<1x64xf32, #tpu.memory_space<vmem>>, %arg6: memref<1x64xf32, #tpu.memory_space<vmem>>, %arg7: memref<128x64xbf16, #tpu.memory_space<vmem>>, %arg8: memref<128x64xf32, #tpu.memory_space<vmem>>) attributes {dimension_semantics = [#tpu.dimension_semantics<parallel>, #tpu.dimension_semantics<parallel>, #tpu.dimension_semantics<arbitrary>], iteration_bounds = array<i64: 1, 1, 9>, scalar_prefetch = 0 : i64, scratch_operands = 1 : i64, tpu.core_type = #tpu.core_type<tc>, window_params = [{transform_indices = @transform_0, window_bounds = array<i64: 1, 128, 64>}, {transform_indices = @transform_1, window_bounds = array<i64: 1, 64, 64>}, {transform_indices = @transform_2, window_bounds = array<i64: 1, 64>}, {transform_indices = @transform_3, window_bounds = array<i64: 1, 64>}, {transform_indices = @transform_4, window_bounds = array<i64: 128, 64>}]} {
    %c0_i32 = arith.constant 0 : i32
    %0 = arith.cmpi eq, %arg2, %c0_i32 : i32
    %1 = arith.extui %0 : i1 to i32
    %c0_i32_0 = arith.constant 0 : i32
    %2 = arith.cmpi ne, %1, %c0_i32_0 : i32
    scf.if %2 {
      %cst_11 = arith.constant 0.000000e+00 : f32
      %14 = vector.broadcast %cst_11 : f32 to vector<128x64xf32>
      %c0_12 = arith.constant 0 : index
      %c0_13 = arith.constant 0 : index
      %15 = vector.load %arg8[%c0_12, %c0_13] : memref<128x64xf32, #tpu.memory_space<vmem>>, vector<128x64xf32>
      tpu.vector_store %arg8[%c0_12, %c0_13], %14 {strides = array<i32>} : memref<128x64xf32, #tpu.memory_space<vmem>>, vector<128x64xf32>,
    } else {
    }
    %c0 = arith.constant 0 : index
    %c0_1 = arith.constant 0 : index
    %3 = vector.load %arg8[%c0, %c0_1] : memref<128x64xf32, #tpu.memory_space<vmem>>, vector<128x64xf32>
    %c0_2 = arith.constant 0 : index
    %c0_3 = arith.constant 0 : index
    %c0_4 = arith.constant 0 : index
    %4 = vector.load %arg3[%c0_2, %c0_3, %c0_4] : memref<1x128x64xbf16, #tpu.memory_space<vmem>>, vector<1x128x64xbf16>
    %5 = vector.shape_cast %4 : vector<1x128x64xbf16> to vector<128x64xbf16>
    %c0_5 = arith.constant 0 : index
    %c0_6 = arith.constant 0 : index
    %c0_7 = arith.constant 0 : index
    %6 = vector.load %arg4[%c0_5, %c0_6, %c0_7] : memref<1x64x64xbf16, #tpu.memory_space<vmem>>, vector<1x64x64xbf16>
    %7 = vector.shape_cast %6 : vector<1x64x64xbf16> to vector<64x64xbf16>
    %cst = arith.constant dense<0.000000e+00> : vector<128x64xf32>
    %8 = tpu.matmul %5, %7, %cst {dimension_numbers = #tpu.dot_dimension_numbers<[1], [0], [0], [1], [0, 0, 1, 1], [], []>} : vector<128x64xbf16>, vector<64x64xbf16>, vector<128x64xf32> -> vector<128x64xf32>
    %9 = arith.addf %3, %8 : vector<128x64xf32>
    %c0_8 = arith.constant 0 : index
    %c0_9 = arith.constant 0 : index
    %10 = vector.load %arg8[%c0_8, %c0_9] : memref<128x64xf32, #tpu.memory_space<vmem>>, vector<128x64xf32>
    tpu.vector_store %arg8[%c0_8, %c0_9], %9 {strides = array<i32>} : memref<128x64xf32, #tpu.memory_space<vmem>>, vector<128x64xf32>,
    %c8_i32 = arith.constant 8 : i32
    %11 = arith.cmpi eq, %arg2, %c8_i32 : i32
    %12 = arith.extui %11 : i1 to i32
    %c0_i32_10 = arith.constant 0 : i32
    %13 = arith.cmpi ne, %12, %c0_i32_10 : i32
    scf.if %13 {
      %c0_11 = arith.constant 0 : index
      %c0_12 = arith.constant 0 : index
      %14 = vector.load %arg8[%c0_11, %c0_12] : memref<128x64xf32, #tpu.memory_space<vmem>>, vector<128x64xf32>
      %c0_13 = arith.constant 0 : index
      %c0_14 = arith.constant 0 : index
      %15 = vector.load %arg5[%c0_13, %c0_14] : memref<1x64xf32, #tpu.memory_space<vmem>>, vector<1x64xf32>
      %16 = vector.broadcast %15 : vector<1x64xf32> to vector<128x64xf32>
      %17 = arith.mulf %14, %16 : vector<128x64xf32>
      %c0_15 = arith.constant 0 : index
      %c0_16 = arith.constant 0 : index
      %18 = vector.load %arg6[%c0_15, %c0_16] : memref<1x64xf32, #tpu.memory_space<vmem>>, vector<1x64xf32>
      %19 = vector.broadcast %18 : vector<1x64xf32> to vector<128x64xf32>
      %20 = arith.addf %17, %19 : vector<128x64xf32>
      %cst_17 = arith.constant 0.000000e+00 : f32
      %21 = vector.broadcast %cst_17 : f32 to vector<128x64xf32>
      %22 = arith.maximumf %20, %21 : vector<128x64xf32>
      %23 = arith.truncf %22 : vector<128x64xf32> to vector<128x64xbf16>
      %c0_18 = arith.constant 0 : index
      %c0_19 = arith.constant 0 : index
      %24 = vector.load %arg7[%c0_18, %c0_19] : memref<128x64xbf16, #tpu.memory_space<vmem>>, vector<128x64xbf16>
      tpu.vector_store %arg7[%c0_18, %c0_19], %23 {strides = array<i32>} : memref<128x64xbf16, #tpu.memory_space<vmem>>, vector<128x64xbf16>,
    } else {
    }
    return
  }
  func.func @transform_0(%arg0: i32, %arg1: i32, %arg2: i32) -> (i32, i32, i32) {
    %c0_i32 = arith.constant 0 : i32
    %c0_i32_0 = arith.constant 0 : i32
    return %arg2, %arg0, %c0_i32 : i32, i32, i32
  }
  func.func @transform_1(%arg0: i32, %arg1: i32, %arg2: i32) -> (i32, i32, i32) {
    %c0_i32 = arith.constant 0 : i32
    %c0_i32_0 = arith.constant 0 : i32
    return %arg2, %c0_i32, %arg1 : i32, i32, i32
  }
  func.func @transform_2(%arg0: i32, %arg1: i32, %arg2: i32) -> (i32, i32) {
    %c0_i32 = arith.constant 0 : i32
    %c0_i32_0 = arith.constant 0 : i32
    return %c0_i32, %arg1 : i32, i32
  }
  func.func @transform_3(%arg0: i32, %arg1: i32, %arg2: i32) -> (i32, i32) {
    %c0_i32 = arith.constant 0 : i32
    %c0_i32_0 = arith.constant 0 : i32
    return %c0_i32, %arg1 : i32, i32
  }
  func.func @transform_4(%arg0: i32, %arg1: i32, %arg2: i32) -> (i32, i32) {
    %c0_i32 = arith.constant 0 : i32
    return %arg0, %arg1 : i32, i32
  }
}

module attributes {stable_mosaic.version = 11 : i64} {
  func.func @_fused_mm_kernel(%arg0: i32, %arg1: i32, %arg2: i32, %arg3: memref<1x32x64xbf16, #tpu.memory_space<vmem>>, %arg4: memref<1x64x128xbf16, #tpu.memory_space<vmem>>, %arg5: memref<1x128xf32, #tpu.memory_space<vmem>>, %arg6: memref<1x128xf32, #tpu.memory_space<vmem>>, %arg7: memref<32x128xbf16, #tpu.memory_space<vmem>>, %arg8: memref<32x128xf32, #tpu.memory_space<vmem>>) attributes {dimension_semantics = [#tpu.dimension_semantics<parallel>, #tpu.dimension_semantics<parallel>, #tpu.dimension_semantics<arbitrary>], iteration_bounds = array<i64: 1, 1, 9>, scalar_prefetch = 0 : i64, scratch_operands = 1 : i64, tpu.core_type = #tpu.core_type<tc>, window_params = [{transform_indices = @transform_0, window_bounds = array<i64: 1, 32, 64>}, {transform_indices = @transform_1, window_bounds = array<i64: 1, 64, 128>}, {transform_indices = @transform_2, window_bounds = array<i64: 1, 128>}, {transform_indices = @transform_3, window_bounds = array<i64: 1, 128>}, {transform_indices = @transform_4, window_bounds = array<i64: 32, 128>}]} {
    %c0_i32 = arith.constant 0 : i32
    %0 = arith.cmpi eq, %arg2, %c0_i32 : i32
    %1 = arith.extui %0 : i1 to i32
    %c0_i32_0 = arith.constant 0 : i32
    %2 = arith.cmpi ne, %1, %c0_i32_0 : i32
    scf.if %2 {
      %cst_11 = arith.constant 0.000000e+00 : f32
      %14 = vector.broadcast %cst_11 : f32 to vector<32x128xf32>
      %c0_12 = arith.constant 0 : index
      %c0_13 = arith.constant 0 : index
      %15 = vector.load %arg8[%c0_12, %c0_13] : memref<32x128xf32, #tpu.memory_space<vmem>>, vector<32x128xf32>
      tpu.vector_store %arg8[%c0_12, %c0_13], %14 {strides = array<i32>} : memref<32x128xf32, #tpu.memory_space<vmem>>, vector<32x128xf32>,
    } else {
    }
    %c0 = arith.constant 0 : index
    %c0_1 = arith.constant 0 : index
    %3 = vector.load %arg8[%c0, %c0_1] : memref<32x128xf32, #tpu.memory_space<vmem>>, vector<32x128xf32>
    %c0_2 = arith.constant 0 : index
    %c0_3 = arith.constant 0 : index
    %c0_4 = arith.constant 0 : index
    %4 = vector.load %arg3[%c0_2, %c0_3, %c0_4] : memref<1x32x64xbf16, #tpu.memory_space<vmem>>, vector<1x32x64xbf16>
    %5 = vector.shape_cast %4 : vector<1x32x64xbf16> to vector<32x64xbf16>
    %c0_5 = arith.constant 0 : index
    %c0_6 = arith.constant 0 : index
    %c0_7 = arith.constant 0 : index
    %6 = vector.load %arg4[%c0_5, %c0_6, %c0_7] : memref<1x64x128xbf16, #tpu.memory_space<vmem>>, vector<1x64x128xbf16>
    %7 = vector.shape_cast %6 : vector<1x64x128xbf16> to vector<64x128xbf16>
    %cst = arith.constant dense<0.000000e+00> : vector<32x128xf32>
    %8 = tpu.matmul %5, %7, %cst {dimension_numbers = #tpu.dot_dimension_numbers<[1], [0], [0], [1], [0, 0, 1, 1], [], []>} : vector<32x64xbf16>, vector<64x128xbf16>, vector<32x128xf32> -> vector<32x128xf32>
    %9 = arith.addf %3, %8 : vector<32x128xf32>
    %c0_8 = arith.constant 0 : index
    %c0_9 = arith.constant 0 : index
    %10 = vector.load %arg8[%c0_8, %c0_9] : memref<32x128xf32, #tpu.memory_space<vmem>>, vector<32x128xf32>
    tpu.vector_store %arg8[%c0_8, %c0_9], %9 {strides = array<i32>} : memref<32x128xf32, #tpu.memory_space<vmem>>, vector<32x128xf32>,
    %c8_i32 = arith.constant 8 : i32
    %11 = arith.cmpi eq, %arg2, %c8_i32 : i32
    %12 = arith.extui %11 : i1 to i32
    %c0_i32_10 = arith.constant 0 : i32
    %13 = arith.cmpi ne, %12, %c0_i32_10 : i32
    scf.if %13 {
      %c0_11 = arith.constant 0 : index
      %c0_12 = arith.constant 0 : index
      %14 = vector.load %arg8[%c0_11, %c0_12] : memref<32x128xf32, #tpu.memory_space<vmem>>, vector<32x128xf32>
      %c0_13 = arith.constant 0 : index
      %c0_14 = arith.constant 0 : index
      %15 = vector.load %arg5[%c0_13, %c0_14] : memref<1x128xf32, #tpu.memory_space<vmem>>, vector<1x128xf32>
      %16 = vector.broadcast %15 : vector<1x128xf32> to vector<32x128xf32>
      %17 = arith.mulf %14, %16 : vector<32x128xf32>
      %c0_15 = arith.constant 0 : index
      %c0_16 = arith.constant 0 : index
      %18 = vector.load %arg6[%c0_15, %c0_16] : memref<1x128xf32, #tpu.memory_space<vmem>>, vector<1x128xf32>
      %19 = vector.broadcast %18 : vector<1x128xf32> to vector<32x128xf32>
      %20 = arith.addf %17, %19 : vector<32x128xf32>
      %cst_17 = arith.constant 0.000000e+00 : f32
      %21 = vector.broadcast %cst_17 : f32 to vector<32x128xf32>
      %22 = arith.maximumf %20, %21 : vector<32x128xf32>
      %23 = arith.truncf %22 : vector<32x128xf32> to vector<32x128xbf16>
      %c0_18 = arith.constant 0 : index
      %c0_19 = arith.constant 0 : index
      %24 = vector.load %arg7[%c0_18, %c0_19] : memref<32x128xbf16, #tpu.memory_space<vmem>>, vector<32x128xbf16>
      tpu.vector_store %arg7[%c0_18, %c0_19], %23 {strides = array<i32>} : memref<32x128xbf16, #tpu.memory_space<vmem>>, vector<32x128xbf16>,
    } else {
    }
    return
  }
  func.func @transform_0(%arg0: i32, %arg1: i32, %arg2: i32) -> (i32, i32, i32) {
    %c0_i32 = arith.constant 0 : i32
    %c0_i32_0 = arith.constant 0 : i32
    return %arg2, %arg0, %c0_i32 : i32, i32, i32
  }
  func.func @transform_1(%arg0: i32, %arg1: i32, %arg2: i32) -> (i32, i32, i32) {
    %c0_i32 = arith.constant 0 : i32
    %c0_i32_0 = arith.constant 0 : i32
    return %arg2, %c0_i32, %arg1 : i32, i32, i32
  }
  func.func @transform_2(%arg0: i32, %arg1: i32, %arg2: i32) -> (i32, i32) {
    %c0_i32 = arith.constant 0 : i32
    %c0_i32_0 = arith.constant 0 : i32
    return %c0_i32, %arg1 : i32, i32
  }
  func.func @transform_3(%arg0: i32, %arg1: i32, %arg2: i32) -> (i32, i32) {
    %c0_i32 = arith.constant 0 : i32
    %c0_i32_0 = arith.constant 0 : i32
    return %c0_i32, %arg1 : i32, i32
  }
  func.func @transform_4(%arg0: i32, %arg1: i32, %arg2: i32) -> (i32, i32) {
    %c0_i32 = arith.constant 0 : i32
    return %arg0, %arg1 : i32, i32
  }
}

module attributes {stable_mosaic.version = 11 : i64} {
  func.func @_fused_mm_kernel(%arg0: i32, %arg1: i32, %arg2: i32, %arg3: memref<1x32x128xbf16, #tpu.memory_space<vmem>>, %arg4: memref<1x128x128xbf16, #tpu.memory_space<vmem>>, %arg5: memref<1x128xf32, #tpu.memory_space<vmem>>, %arg6: memref<1x128xf32, #tpu.memory_space<vmem>>, %arg7: memref<32x128xbf16, #tpu.memory_space<vmem>>, %arg8: memref<32x128xbf16, #tpu.memory_space<vmem>>, %arg9: memref<32x128xf32, #tpu.memory_space<vmem>>) attributes {dimension_semantics = [#tpu.dimension_semantics<parallel>, #tpu.dimension_semantics<parallel>, #tpu.dimension_semantics<arbitrary>], iteration_bounds = array<i64: 1, 1, 9>, scalar_prefetch = 0 : i64, scratch_operands = 1 : i64, tpu.core_type = #tpu.core_type<tc>, window_params = [{transform_indices = @transform_0, window_bounds = array<i64: 1, 32, 128>}, {transform_indices = @transform_1, window_bounds = array<i64: 1, 128, 128>}, {transform_indices = @transform_2, window_bounds = array<i64: 1, 128>}, {transform_indices = @transform_3, window_bounds = array<i64: 1, 128>}, {transform_indices = @transform_4, window_bounds = array<i64: 32, 128>}, {transform_indices = @transform_5, window_bounds = array<i64: 32, 128>}]} {
    %c0_i32 = arith.constant 0 : i32
    %0 = arith.cmpi eq, %arg2, %c0_i32 : i32
    %1 = arith.extui %0 : i1 to i32
    %c0_i32_0 = arith.constant 0 : i32
    %2 = arith.cmpi ne, %1, %c0_i32_0 : i32
    scf.if %2 {
      %cst_11 = arith.constant 0.000000e+00 : f32
      %14 = vector.broadcast %cst_11 : f32 to vector<32x128xf32>
      %c0_12 = arith.constant 0 : index
      %c0_13 = arith.constant 0 : index
      %15 = vector.load %arg9[%c0_12, %c0_13] : memref<32x128xf32, #tpu.memory_space<vmem>>, vector<32x128xf32>
      tpu.vector_store %arg9[%c0_12, %c0_13], %14 {strides = array<i32>} : memref<32x128xf32, #tpu.memory_space<vmem>>, vector<32x128xf32>,
    } else {
    }
    %c0 = arith.constant 0 : index
    %c0_1 = arith.constant 0 : index
    %3 = vector.load %arg9[%c0, %c0_1] : memref<32x128xf32, #tpu.memory_space<vmem>>, vector<32x128xf32>
    %c0_2 = arith.constant 0 : index
    %c0_3 = arith.constant 0 : index
    %c0_4 = arith.constant 0 : index
    %4 = vector.load %arg3[%c0_2, %c0_3, %c0_4] : memref<1x32x128xbf16, #tpu.memory_space<vmem>>, vector<1x32x128xbf16>
    %5 = vector.shape_cast %4 : vector<1x32x128xbf16> to vector<32x128xbf16>
    %c0_5 = arith.constant 0 : index
    %c0_6 = arith.constant 0 : index
    %c0_7 = arith.constant 0 : index
    %6 = vector.load %arg4[%c0_5, %c0_6, %c0_7] : memref<1x128x128xbf16, #tpu.memory_space<vmem>>, vector<1x128x128xbf16>
    %7 = vector.shape_cast %6 : vector<1x128x128xbf16> to vector<128x128xbf16>
    %cst = arith.constant dense<0.000000e+00> : vector<32x128xf32>
    %8 = tpu.matmul %5, %7, %cst {dimension_numbers = #tpu.dot_dimension_numbers<[1], [0], [0], [1], [0, 0, 1, 1], [], []>} : vector<32x128xbf16>, vector<128x128xbf16>, vector<32x128xf32> -> vector<32x128xf32>
    %9 = arith.addf %3, %8 : vector<32x128xf32>
    %c0_8 = arith.constant 0 : index
    %c0_9 = arith.constant 0 : index
    %10 = vector.load %arg9[%c0_8, %c0_9] : memref<32x128xf32, #tpu.memory_space<vmem>>, vector<32x128xf32>
    tpu.vector_store %arg9[%c0_8, %c0_9], %9 {strides = array<i32>} : memref<32x128xf32, #tpu.memory_space<vmem>>, vector<32x128xf32>,
    %c8_i32 = arith.constant 8 : i32
    %11 = arith.cmpi eq, %arg2, %c8_i32 : i32
    %12 = arith.extui %11 : i1 to i32
    %c0_i32_10 = arith.constant 0 : i32
    %13 = arith.cmpi ne, %12, %c0_i32_10 : i32
    scf.if %13 {
      %c0_11 = arith.constant 0 : index
      %c0_12 = arith.constant 0 : index
      %14 = vector.load %arg9[%c0_11, %c0_12] : memref<32x128xf32, #tpu.memory_space<vmem>>, vector<32x128xf32>
      %c0_13 = arith.constant 0 : index
      %c0_14 = arith.constant 0 : index
      %15 = vector.load %arg5[%c0_13, %c0_14] : memref<1x128xf32, #tpu.memory_space<vmem>>, vector<1x128xf32>
      %16 = vector.broadcast %15 : vector<1x128xf32> to vector<32x128xf32>
      %17 = arith.mulf %14, %16 : vector<32x128xf32>
      %c0_15 = arith.constant 0 : index
      %c0_16 = arith.constant 0 : index
      %18 = vector.load %arg6[%c0_15, %c0_16] : memref<1x128xf32, #tpu.memory_space<vmem>>, vector<1x128xf32>
      %19 = vector.broadcast %18 : vector<1x128xf32> to vector<32x128xf32>
      %20 = arith.addf %17, %19 : vector<32x128xf32>
      %c0_17 = arith.constant 0 : index
      %c0_18 = arith.constant 0 : index
      %21 = vector.load %arg7[%c0_17, %c0_18] : memref<32x128xbf16, #tpu.memory_space<vmem>>, vector<32x128xbf16>
      %22 = arith.extf %21 : vector<32x128xbf16> to vector<32x128xf32>
      %23 = arith.addf %20, %22 : vector<32x128xf32>
      %cst_19 = arith.constant 0.000000e+00 : f32
      %24 = vector.broadcast %cst_19 : f32 to vector<32x128xf32>
      %25 = arith.maximumf %23, %24 : vector<32x128xf32>
      %26 = arith.truncf %25 : vector<32x128xf32> to vector<32x128xbf16>
      %c0_20 = arith.constant 0 : index
      %c0_21 = arith.constant 0 : index
      %27 = vector.load %arg8[%c0_20, %c0_21] : memref<32x128xbf16, #tpu.memory_space<vmem>>, vector<32x128xbf16>
      tpu.vector_store %arg8[%c0_20, %c0_21], %26 {strides = array<i32>} : memref<32x128xbf16, #tpu.memory_space<vmem>>, vector<32x128xbf16>,
    } else {
    }
    return
  }
  func.func @transform_0(%arg0: i32, %arg1: i32, %arg2: i32) -> (i32, i32, i32) {
    %c0_i32 = arith.constant 0 : i32
    %c0_i32_0 = arith.constant 0 : i32
    return %arg2, %arg0, %c0_i32 : i32, i32, i32
  }
  func.func @transform_1(%arg0: i32, %arg1: i32, %arg2: i32) -> (i32, i32, i32) {
    %c0_i32 = arith.constant 0 : i32
    %c0_i32_0 = arith.constant 0 : i32
    return %arg2, %c0_i32, %arg1 : i32, i32, i32
  }
  func.func @transform_2(%arg0: i32, %arg1: i32, %arg2: i32) -> (i32, i32) {
    %c0_i32 = arith.constant 0 : i32
    %c0_i32_0 = arith.constant 0 : i32
    return %c0_i32, %arg1 : i32, i32
  }
  func.func @transform_3(%arg0: i32, %arg1: i32, %arg2: i32) -> (i32, i32) {
    %c0_i32 = arith.constant 0 : i32
    %c0_i32_0 = arith.constant 0 : i32
    return %c0_i32, %arg1 : i32, i32
  }
  func.func @transform_4(%arg0: i32, %arg1: i32, %arg2: i32) -> (i32, i32) {
    %c0_i32 = arith.constant 0 : i32
    return %arg0, %arg1 : i32, i32
  }
  func.func @transform_5(%arg0: i32, %arg1: i32, %arg2: i32) -> (i32, i32) {
    %c0_i32 = arith.constant 0 : i32
    return %arg0, %arg1 : i32, i32
  }
}

module attributes {stable_mosaic.version = 11 : i64} {
  func.func @_fused_mm_kernel(%arg0: i32, %arg1: i32, %arg2: i32, %arg3: memref<1x32x128xbf16, #tpu.memory_space<vmem>>, %arg4: memref<1x128x128xbf16, #tpu.memory_space<vmem>>, %arg5: memref<1x128xf32, #tpu.memory_space<vmem>>, %arg6: memref<1x128xf32, #tpu.memory_space<vmem>>, %arg7: memref<32x128xbf16, #tpu.memory_space<vmem>>, %arg8: memref<32x128xf32, #tpu.memory_space<vmem>>) attributes {dimension_semantics = [#tpu.dimension_semantics<parallel>, #tpu.dimension_semantics<parallel>, #tpu.dimension_semantics<arbitrary>], iteration_bounds = array<i64: 1, 1, 9>, scalar_prefetch = 0 : i64, scratch_operands = 1 : i64, tpu.core_type = #tpu.core_type<tc>, window_params = [{transform_indices = @transform_0, window_bounds = array<i64: 1, 32, 128>}, {transform_indices = @transform_1, window_bounds = array<i64: 1, 128, 128>}, {transform_indices = @transform_2, window_bounds = array<i64: 1, 128>}, {transform_indices = @transform_3, window_bounds = array<i64: 1, 128>}, {transform_indices = @transform_4, window_bounds = array<i64: 32, 128>}]} {
    %c0_i32 = arith.constant 0 : i32
    %0 = arith.cmpi eq, %arg2, %c0_i32 : i32
    %1 = arith.extui %0 : i1 to i32
    %c0_i32_0 = arith.constant 0 : i32
    %2 = arith.cmpi ne, %1, %c0_i32_0 : i32
    scf.if %2 {
      %cst_11 = arith.constant 0.000000e+00 : f32
      %14 = vector.broadcast %cst_11 : f32 to vector<32x128xf32>
      %c0_12 = arith.constant 0 : index
      %c0_13 = arith.constant 0 : index
      %15 = vector.load %arg8[%c0_12, %c0_13] : memref<32x128xf32, #tpu.memory_space<vmem>>, vector<32x128xf32>
      tpu.vector_store %arg8[%c0_12, %c0_13], %14 {strides = array<i32>} : memref<32x128xf32, #tpu.memory_space<vmem>>, vector<32x128xf32>,
    } else {
    }
    %c0 = arith.constant 0 : index
    %c0_1 = arith.constant 0 : index
    %3 = vector.load %arg8[%c0, %c0_1] : memref<32x128xf32, #tpu.memory_space<vmem>>, vector<32x128xf32>
    %c0_2 = arith.constant 0 : index
    %c0_3 = arith.constant 0 : index
    %c0_4 = arith.constant 0 : index
    %4 = vector.load %arg3[%c0_2, %c0_3, %c0_4] : memref<1x32x128xbf16, #tpu.memory_space<vmem>>, vector<1x32x128xbf16>
    %5 = vector.shape_cast %4 : vector<1x32x128xbf16> to vector<32x128xbf16>
    %c0_5 = arith.constant 0 : index
    %c0_6 = arith.constant 0 : index
    %c0_7 = arith.constant 0 : index
    %6 = vector.load %arg4[%c0_5, %c0_6, %c0_7] : memref<1x128x128xbf16, #tpu.memory_space<vmem>>, vector<1x128x128xbf16>
    %7 = vector.shape_cast %6 : vector<1x128x128xbf16> to vector<128x128xbf16>
    %cst = arith.constant dense<0.000000e+00> : vector<32x128xf32>
    %8 = tpu.matmul %5, %7, %cst {dimension_numbers = #tpu.dot_dimension_numbers<[1], [0], [0], [1], [0, 0, 1, 1], [], []>} : vector<32x128xbf16>, vector<128x128xbf16>, vector<32x128xf32> -> vector<32x128xf32>
    %9 = arith.addf %3, %8 : vector<32x128xf32>
    %c0_8 = arith.constant 0 : index
    %c0_9 = arith.constant 0 : index
    %10 = vector.load %arg8[%c0_8, %c0_9] : memref<32x128xf32, #tpu.memory_space<vmem>>, vector<32x128xf32>
    tpu.vector_store %arg8[%c0_8, %c0_9], %9 {strides = array<i32>} : memref<32x128xf32, #tpu.memory_space<vmem>>, vector<32x128xf32>,
    %c8_i32 = arith.constant 8 : i32
    %11 = arith.cmpi eq, %arg2, %c8_i32 : i32
    %12 = arith.extui %11 : i1 to i32
    %c0_i32_10 = arith.constant 0 : i32
    %13 = arith.cmpi ne, %12, %c0_i32_10 : i32
    scf.if %13 {
      %c0_11 = arith.constant 0 : index
      %c0_12 = arith.constant 0 : index
      %14 = vector.load %arg8[%c0_11, %c0_12] : memref<32x128xf32, #tpu.memory_space<vmem>>, vector<32x128xf32>
      %c0_13 = arith.constant 0 : index
      %c0_14 = arith.constant 0 : index
      %15 = vector.load %arg5[%c0_13, %c0_14] : memref<1x128xf32, #tpu.memory_space<vmem>>, vector<1x128xf32>
      %16 = vector.broadcast %15 : vector<1x128xf32> to vector<32x128xf32>
      %17 = arith.mulf %14, %16 : vector<32x128xf32>
      %c0_15 = arith.constant 0 : index
      %c0_16 = arith.constant 0 : index
      %18 = vector.load %arg6[%c0_15, %c0_16] : memref<1x128xf32, #tpu.memory_space<vmem>>, vector<1x128xf32>
      %19 = vector.broadcast %18 : vector<1x128xf32> to vector<32x128xf32>
      %20 = arith.addf %17, %19 : vector<32x128xf32>
      %cst_17 = arith.constant 0.000000e+00 : f32
      %21 = vector.broadcast %cst_17 : f32 to vector<32x128xf32>
      %22 = arith.maximumf %20, %21 : vector<32x128xf32>
      %23 = arith.truncf %22 : vector<32x128xf32> to vector<32x128xbf16>
      %c0_18 = arith.constant 0 : index
      %c0_19 = arith.constant 0 : index
      %24 = vector.load %arg7[%c0_18, %c0_19] : memref<32x128xbf16, #tpu.memory_space<vmem>>, vector<32x128xbf16>
      tpu.vector_store %arg7[%c0_18, %c0_19], %23 {strides = array<i32>} : memref<32x128xbf16, #tpu.memory_space<vmem>>, vector<32x128xbf16>,
    } else {
    }
    return
  }
  func.func @transform_0(%arg0: i32, %arg1: i32, %arg2: i32) -> (i32, i32, i32) {
    %c0_i32 = arith.constant 0 : i32
    %c0_i32_0 = arith.constant 0 : i32
    return %arg2, %arg0, %c0_i32 : i32, i32, i32
  }
  func.func @transform_1(%arg0: i32, %arg1: i32, %arg2: i32) -> (i32, i32, i32) {
    %c0_i32 = arith.constant 0 : i32
    %c0_i32_0 = arith.constant 0 : i32
    return %arg2, %c0_i32, %arg1 : i32, i32, i32
  }
  func.func @transform_2(%arg0: i32, %arg1: i32, %arg2: i32) -> (i32, i32) {
    %c0_i32 = arith.constant 0 : i32
    %c0_i32_0 = arith.constant 0 : i32
    return %c0_i32, %arg1 : i32, i32
  }
  func.func @transform_3(%arg0: i32, %arg1: i32, %arg2: i32) -> (i32, i32) {
    %c0_i32 = arith.constant 0 : i32
    %c0_i32_0 = arith.constant 0 : i32
    return %c0_i32, %arg1 : i32, i32
  }
  func.func @transform_4(%arg0: i32, %arg1: i32, %arg2: i32) -> (i32, i32) {
    %c0_i32 = arith.constant 0 : i32
    return %arg0, %arg1 : i32, i32
  }
}

module attributes {stable_mosaic.version = 11 : i64} {
  func.func @_fused_mm_kernel(%arg0: i32, %arg1: i32, %arg2: i32, %arg3: memref<1x32x64xbf16, #tpu.memory_space<vmem>>, %arg4: memref<1x64x128xbf16, #tpu.memory_space<vmem>>, %arg5: memref<1x128xf32, #tpu.memory_space<vmem>>, %arg6: memref<1x128xf32, #tpu.memory_space<vmem>>, %arg7: memref<32x128xbf16, #tpu.memory_space<vmem>>, %arg8: memref<32x128xf32, #tpu.memory_space<vmem>>) attributes {dimension_semantics = [#tpu.dimension_semantics<parallel>, #tpu.dimension_semantics<parallel>, #tpu.dimension_semantics<arbitrary>], iteration_bounds = array<i64: 1, 1, 1>, scalar_prefetch = 0 : i64, scratch_operands = 1 : i64, tpu.core_type = #tpu.core_type<tc>, window_params = [{transform_indices = @transform_0, window_bounds = array<i64: 1, 32, 64>}, {transform_indices = @transform_1, window_bounds = array<i64: 1, 64, 128>}, {transform_indices = @transform_2, window_bounds = array<i64: 1, 128>}, {transform_indices = @transform_3, window_bounds = array<i64: 1, 128>}, {transform_indices = @transform_4, window_bounds = array<i64: 32, 128>}]} {
    %c0_i32 = arith.constant 0 : i32
    %0 = arith.cmpi eq, %arg2, %c0_i32 : i32
    %1 = arith.extui %0 : i1 to i32
    %c0_i32_0 = arith.constant 0 : i32
    %2 = arith.cmpi ne, %1, %c0_i32_0 : i32
    scf.if %2 {
      %cst_12 = arith.constant 0.000000e+00 : f32
      %14 = vector.broadcast %cst_12 : f32 to vector<32x128xf32>
      %c0_13 = arith.constant 0 : index
      %c0_14 = arith.constant 0 : index
      %15 = vector.load %arg8[%c0_13, %c0_14] : memref<32x128xf32, #tpu.memory_space<vmem>>, vector<32x128xf32>
      tpu.vector_store %arg8[%c0_13, %c0_14], %14 {strides = array<i32>} : memref<32x128xf32, #tpu.memory_space<vmem>>, vector<32x128xf32>,
    } else {
    }
    %c0 = arith.constant 0 : index
    %c0_1 = arith.constant 0 : index
    %3 = vector.load %arg8[%c0, %c0_1] : memref<32x128xf32, #tpu.memory_space<vmem>>, vector<32x128xf32>
    %c0_2 = arith.constant 0 : index
    %c0_3 = arith.constant 0 : index
    %c0_4 = arith.constant 0 : index
    %4 = vector.load %arg3[%c0_2, %c0_3, %c0_4] : memref<1x32x64xbf16, #tpu.memory_space<vmem>>, vector<1x32x64xbf16>
    %5 = vector.shape_cast %4 : vector<1x32x64xbf16> to vector<32x64xbf16>
    %c0_5 = arith.constant 0 : index
    %c0_6 = arith.constant 0 : index
    %c0_7 = arith.constant 0 : index
    %6 = vector.load %arg4[%c0_5, %c0_6, %c0_7] : memref<1x64x128xbf16, #tpu.memory_space<vmem>>, vector<1x64x128xbf16>
    %7 = vector.shape_cast %6 : vector<1x64x128xbf16> to vector<64x128xbf16>
    %cst = arith.constant dense<0.000000e+00> : vector<32x128xf32>
    %8 = tpu.matmul %5, %7, %cst {dimension_numbers = #tpu.dot_dimension_numbers<[1], [0], [0], [1], [0, 0, 1, 1], [], []>} : vector<32x64xbf16>, vector<64x128xbf16>, vector<32x128xf32> -> vector<32x128xf32>
    %9 = arith.addf %3, %8 : vector<32x128xf32>
    %c0_8 = arith.constant 0 : index
    %c0_9 = arith.constant 0 : index
    %10 = vector.load %arg8[%c0_8, %c0_9] : memref<32x128xf32, #tpu.memory_space<vmem>>, vector<32x128xf32>
    tpu.vector_store %arg8[%c0_8, %c0_9], %9 {strides = array<i32>} : memref<32x128xf32, #tpu.memory_space<vmem>>, vector<32x128xf32>,
    %c0_i32_10 = arith.constant 0 : i32
    %11 = arith.cmpi eq, %arg2, %c0_i32_10 : i32
    %12 = arith.extui %11 : i1 to i32
    %c0_i32_11 = arith.constant 0 : i32
    %13 = arith.cmpi ne, %12, %c0_i32_11 : i32
    scf.if %13 {
      %c0_12 = arith.constant 0 : index
      %c0_13 = arith.constant 0 : index
      %14 = vector.load %arg8[%c0_12, %c0_13] : memref<32x128xf32, #tpu.memory_space<vmem>>, vector<32x128xf32>
      %c0_14 = arith.constant 0 : index
      %c0_15 = arith.constant 0 : index
      %15 = vector.load %arg5[%c0_14, %c0_15] : memref<1x128xf32, #tpu.memory_space<vmem>>, vector<1x128xf32>
      %16 = vector.broadcast %15 : vector<1x128xf32> to vector<32x128xf32>
      %17 = arith.mulf %14, %16 : vector<32x128xf32>
      %c0_16 = arith.constant 0 : index
      %c0_17 = arith.constant 0 : index
      %18 = vector.load %arg6[%c0_16, %c0_17] : memref<1x128xf32, #tpu.memory_space<vmem>>, vector<1x128xf32>
      %19 = vector.broadcast %18 : vector<1x128xf32> to vector<32x128xf32>
      %20 = arith.addf %17, %19 : vector<32x128xf32>
      %21 = arith.truncf %20 : vector<32x128xf32> to vector<32x128xbf16>
      %c0_18 = arith.constant 0 : index
      %c0_19 = arith.constant 0 : index
      %22 = vector.load %arg7[%c0_18, %c0_19] : memref<32x128xbf16, #tpu.memory_space<vmem>>, vector<32x128xbf16>
      tpu.vector_store %arg7[%c0_18, %c0_19], %21 {strides = array<i32>} : memref<32x128xbf16, #tpu.memory_space<vmem>>, vector<32x128xbf16>,
    } else {
    }
    return
  }
  func.func @transform_0(%arg0: i32, %arg1: i32, %arg2: i32) -> (i32, i32, i32) {
    %c0_i32 = arith.constant 0 : i32
    %c0_i32_0 = arith.constant 0 : i32
    return %arg2, %arg0, %c0_i32 : i32, i32, i32
  }
  func.func @transform_1(%arg0: i32, %arg1: i32, %arg2: i32) -> (i32, i32, i32) {
    %c0_i32 = arith.constant 0 : i32
    %c0_i32_0 = arith.constant 0 : i32
    return %arg2, %c0_i32, %arg1 : i32, i32, i32
  }
  func.func @transform_2(%arg0: i32, %arg1: i32, %arg2: i32) -> (i32, i32) {
    %c0_i32 = arith.constant 0 : i32
    %c0_i32_0 = arith.constant 0 : i32
    return %c0_i32, %arg1 : i32, i32
  }
  func.func @transform_3(%arg0: i32, %arg1: i32, %arg2: i32) -> (i32, i32) {
    %c0_i32 = arith.constant 0 : i32
    %c0_i32_0 = arith.constant 0 : i32
    return %c0_i32, %arg1 : i32, i32
  }
  func.func @transform_4(%arg0: i32, %arg1: i32, %arg2: i32) -> (i32, i32) {
    %c0_i32 = arith.constant 0 : i32
    return %arg0, %arg1 : i32, i32
  }
}

module attributes {stable_mosaic.version = 11 : i64} {
  func.func @_fused_mm_kernel(%arg0: i32, %arg1: i32, %arg2: i32, %arg3: memref<1x8x128xbf16, #tpu.memory_space<vmem>>, %arg4: memref<1x128x256xbf16, #tpu.memory_space<vmem>>, %arg5: memref<1x256xf32, #tpu.memory_space<vmem>>, %arg6: memref<1x256xf32, #tpu.memory_space<vmem>>, %arg7: memref<8x256xbf16, #tpu.memory_space<vmem>>, %arg8: memref<8x256xf32, #tpu.memory_space<vmem>>) attributes {dimension_semantics = [#tpu.dimension_semantics<parallel>, #tpu.dimension_semantics<parallel>, #tpu.dimension_semantics<arbitrary>], iteration_bounds = array<i64: 1, 1, 1>, scalar_prefetch = 0 : i64, scratch_operands = 1 : i64, tpu.core_type = #tpu.core_type<tc>, window_params = [{transform_indices = @transform_0, window_bounds = array<i64: 1, 8, 128>}, {transform_indices = @transform_1, window_bounds = array<i64: 1, 128, 256>}, {transform_indices = @transform_2, window_bounds = array<i64: 1, 256>}, {transform_indices = @transform_3, window_bounds = array<i64: 1, 256>}, {transform_indices = @transform_4, window_bounds = array<i64: 8, 256>}]} {
    %c0_i32 = arith.constant 0 : i32
    %0 = arith.cmpi eq, %arg2, %c0_i32 : i32
    %1 = arith.extui %0 : i1 to i32
    %c0_i32_0 = arith.constant 0 : i32
    %2 = arith.cmpi ne, %1, %c0_i32_0 : i32
    scf.if %2 {
      %cst_12 = arith.constant 0.000000e+00 : f32
      %14 = vector.broadcast %cst_12 : f32 to vector<8x256xf32>
      %c0_13 = arith.constant 0 : index
      %c0_14 = arith.constant 0 : index
      %15 = vector.load %arg8[%c0_13, %c0_14] : memref<8x256xf32, #tpu.memory_space<vmem>>, vector<8x256xf32>
      tpu.vector_store %arg8[%c0_13, %c0_14], %14 {strides = array<i32>} : memref<8x256xf32, #tpu.memory_space<vmem>>, vector<8x256xf32>,
    } else {
    }
    %c0 = arith.constant 0 : index
    %c0_1 = arith.constant 0 : index
    %3 = vector.load %arg8[%c0, %c0_1] : memref<8x256xf32, #tpu.memory_space<vmem>>, vector<8x256xf32>
    %c0_2 = arith.constant 0 : index
    %c0_3 = arith.constant 0 : index
    %c0_4 = arith.constant 0 : index
    %4 = vector.load %arg3[%c0_2, %c0_3, %c0_4] : memref<1x8x128xbf16, #tpu.memory_space<vmem>>, vector<1x8x128xbf16>
    %5 = vector.shape_cast %4 : vector<1x8x128xbf16> to vector<8x128xbf16>
    %c0_5 = arith.constant 0 : index
    %c0_6 = arith.constant 0 : index
    %c0_7 = arith.constant 0 : index
    %6 = vector.load %arg4[%c0_5, %c0_6, %c0_7] : memref<1x128x256xbf16, #tpu.memory_space<vmem>>, vector<1x128x256xbf16>
    %7 = vector.shape_cast %6 : vector<1x128x256xbf16> to vector<128x256xbf16>
    %cst = arith.constant dense<0.000000e+00> : vector<8x256xf32>
    %8 = tpu.matmul %5, %7, %cst {dimension_numbers = #tpu.dot_dimension_numbers<[1], [0], [0], [1], [0, 0, 1, 1], [], []>} : vector<8x128xbf16>, vector<128x256xbf16>, vector<8x256xf32> -> vector<8x256xf32>
    %9 = arith.addf %3, %8 : vector<8x256xf32>
    %c0_8 = arith.constant 0 : index
    %c0_9 = arith.constant 0 : index
    %10 = vector.load %arg8[%c0_8, %c0_9] : memref<8x256xf32, #tpu.memory_space<vmem>>, vector<8x256xf32>
    tpu.vector_store %arg8[%c0_8, %c0_9], %9 {strides = array<i32>} : memref<8x256xf32, #tpu.memory_space<vmem>>, vector<8x256xf32>,
    %c0_i32_10 = arith.constant 0 : i32
    %11 = arith.cmpi eq, %arg2, %c0_i32_10 : i32
    %12 = arith.extui %11 : i1 to i32
    %c0_i32_11 = arith.constant 0 : i32
    %13 = arith.cmpi ne, %12, %c0_i32_11 : i32
    scf.if %13 {
      %c0_12 = arith.constant 0 : index
      %c0_13 = arith.constant 0 : index
      %14 = vector.load %arg8[%c0_12, %c0_13] : memref<8x256xf32, #tpu.memory_space<vmem>>, vector<8x256xf32>
      %c0_14 = arith.constant 0 : index
      %c0_15 = arith.constant 0 : index
      %15 = vector.load %arg5[%c0_14, %c0_15] : memref<1x256xf32, #tpu.memory_space<vmem>>, vector<1x256xf32>
      %16 = vector.broadcast %15 : vector<1x256xf32> to vector<8x256xf32>
      %17 = arith.mulf %14, %16 : vector<8x256xf32>
      %c0_16 = arith.constant 0 : index
      %c0_17 = arith.constant 0 : index
      %18 = vector.load %arg6[%c0_16, %c0_17] : memref<1x256xf32, #tpu.memory_space<vmem>>, vector<1x256xf32>
      %19 = vector.broadcast %18 : vector<1x256xf32> to vector<8x256xf32>
      %20 = arith.addf %17, %19 : vector<8x256xf32>
      %21 = arith.truncf %20 : vector<8x256xf32> to vector<8x256xbf16>
      %c0_18 = arith.constant 0 : index
      %c0_19 = arith.constant 0 : index
      %22 = vector.load %arg7[%c0_18, %c0_19] : memref<8x256xbf16, #tpu.memory_space<vmem>>, vector<8x256xbf16>
      tpu.vector_store %arg7[%c0_18, %c0_19], %21 {strides = array<i32>} : memref<8x256xbf16, #tpu.memory_space<vmem>>, vector<8x256xbf16>,
    } else {
    }
    return
  }
  func.func @transform_0(%arg0: i32, %arg1: i32, %arg2: i32) -> (i32, i32, i32) {
    %c0_i32 = arith.constant 0 : i32
    %c0_i32_0 = arith.constant 0 : i32
    return %arg2, %arg0, %c0_i32 : i32, i32, i32
  }
  func.func @transform_1(%arg0: i32, %arg1: i32, %arg2: i32) -> (i32, i32, i32) {
    %c0_i32 = arith.constant 0 : i32
    %c0_i32_0 = arith.constant 0 : i32
    return %arg2, %c0_i32, %arg1 : i32, i32, i32
  }
  func.func @transform_2(%arg0: i32, %arg1: i32, %arg2: i32) -> (i32, i32) {
    %c0_i32 = arith.constant 0 : i32
    %c0_i32_0 = arith.constant 0 : i32
    return %c0_i32, %arg1 : i32, i32
  }
  func.func @transform_3(%arg0: i32, %arg1: i32, %arg2: i32) -> (i32, i32) {
    %c0_i32 = arith.constant 0 : i32
    %c0_i32_0 = arith.constant 0 : i32
    return %c0_i32, %arg1 : i32, i32
  }
  func.func @transform_4(%arg0: i32, %arg1: i32, %arg2: i32) -> (i32, i32) {
    %c0_i32 = arith.constant 0 : i32
    return %arg0, %arg1 : i32, i32
  }
}

module attributes {stable_mosaic.version = 11 : i64} {
  func.func @_fused_mm_kernel(%arg0: i32, %arg1: i32, %arg2: i32, %arg3: memref<1x8x256xbf16, #tpu.memory_space<vmem>>, %arg4: memref<1x256x256xbf16, #tpu.memory_space<vmem>>, %arg5: memref<1x256xf32, #tpu.memory_space<vmem>>, %arg6: memref<1x256xf32, #tpu.memory_space<vmem>>, %arg7: memref<8x256xbf16, #tpu.memory_space<vmem>>, %arg8: memref<8x256xf32, #tpu.memory_space<vmem>>) attributes {dimension_semantics = [#tpu.dimension_semantics<parallel>, #tpu.dimension_semantics<parallel>, #tpu.dimension_semantics<arbitrary>], iteration_bounds = array<i64: 1, 1, 9>, scalar_prefetch = 0 : i64, scratch_operands = 1 : i64, tpu.core_type = #tpu.core_type<tc>, window_params = [{transform_indices = @transform_0, window_bounds = array<i64: 1, 8, 256>}, {transform_indices = @transform_1, window_bounds = array<i64: 1, 256, 256>}, {transform_indices = @transform_2, window_bounds = array<i64: 1, 256>}, {transform_indices = @transform_3, window_bounds = array<i64: 1, 256>}, {transform_indices = @transform_4, window_bounds = array<i64: 8, 256>}]} {
    %c0_i32 = arith.constant 0 : i32
    %0 = arith.cmpi eq, %arg2, %c0_i32 : i32
    %1 = arith.extui %0 : i1 to i32
    %c0_i32_0 = arith.constant 0 : i32
    %2 = arith.cmpi ne, %1, %c0_i32_0 : i32
    scf.if %2 {
      %cst_11 = arith.constant 0.000000e+00 : f32
      %14 = vector.broadcast %cst_11 : f32 to vector<8x256xf32>
      %c0_12 = arith.constant 0 : index
      %c0_13 = arith.constant 0 : index
      %15 = vector.load %arg8[%c0_12, %c0_13] : memref<8x256xf32, #tpu.memory_space<vmem>>, vector<8x256xf32>
      tpu.vector_store %arg8[%c0_12, %c0_13], %14 {strides = array<i32>} : memref<8x256xf32, #tpu.memory_space<vmem>>, vector<8x256xf32>,
    } else {
    }
    %c0 = arith.constant 0 : index
    %c0_1 = arith.constant 0 : index
    %3 = vector.load %arg8[%c0, %c0_1] : memref<8x256xf32, #tpu.memory_space<vmem>>, vector<8x256xf32>
    %c0_2 = arith.constant 0 : index
    %c0_3 = arith.constant 0 : index
    %c0_4 = arith.constant 0 : index
    %4 = vector.load %arg3[%c0_2, %c0_3, %c0_4] : memref<1x8x256xbf16, #tpu.memory_space<vmem>>, vector<1x8x256xbf16>
    %5 = vector.shape_cast %4 : vector<1x8x256xbf16> to vector<8x256xbf16>
    %c0_5 = arith.constant 0 : index
    %c0_6 = arith.constant 0 : index
    %c0_7 = arith.constant 0 : index
    %6 = vector.load %arg4[%c0_5, %c0_6, %c0_7] : memref<1x256x256xbf16, #tpu.memory_space<vmem>>, vector<1x256x256xbf16>
    %7 = vector.shape_cast %6 : vector<1x256x256xbf16> to vector<256x256xbf16>
    %cst = arith.constant dense<0.000000e+00> : vector<8x256xf32>
    %8 = tpu.matmul %5, %7, %cst {dimension_numbers = #tpu.dot_dimension_numbers<[1], [0], [0], [1], [0, 0, 1, 1], [], []>} : vector<8x256xbf16>, vector<256x256xbf16>, vector<8x256xf32> -> vector<8x256xf32>
    %9 = arith.addf %3, %8 : vector<8x256xf32>
    %c0_8 = arith.constant 0 : index
    %c0_9 = arith.constant 0 : index
    %10 = vector.load %arg8[%c0_8, %c0_9] : memref<8x256xf32, #tpu.memory_space<vmem>>, vector<8x256xf32>
    tpu.vector_store %arg8[%c0_8, %c0_9], %9 {strides = array<i32>} : memref<8x256xf32, #tpu.memory_space<vmem>>, vector<8x256xf32>,
    %c8_i32 = arith.constant 8 : i32
    %11 = arith.cmpi eq, %arg2, %c8_i32 : i32
    %12 = arith.extui %11 : i1 to i32
    %c0_i32_10 = arith.constant 0 : i32
    %13 = arith.cmpi ne, %12, %c0_i32_10 : i32
    scf.if %13 {
      %c0_11 = arith.constant 0 : index
      %c0_12 = arith.constant 0 : index
      %14 = vector.load %arg8[%c0_11, %c0_12] : memref<8x256xf32, #tpu.memory_space<vmem>>, vector<8x256xf32>
      %c0_13 = arith.constant 0 : index
      %c0_14 = arith.constant 0 : index
      %15 = vector.load %arg5[%c0_13, %c0_14] : memref<1x256xf32, #tpu.memory_space<vmem>>, vector<1x256xf32>
      %16 = vector.broadcast %15 : vector<1x256xf32> to vector<8x256xf32>
      %17 = arith.mulf %14, %16 : vector<8x256xf32>
      %c0_15 = arith.constant 0 : index
      %c0_16 = arith.constant 0 : index
      %18 = vector.load %arg6[%c0_15, %c0_16] : memref<1x256xf32, #tpu.memory_space<vmem>>, vector<1x256xf32>
      %19 = vector.broadcast %18 : vector<1x256xf32> to vector<8x256xf32>
      %20 = arith.addf %17, %19 : vector<8x256xf32>
      %cst_17 = arith.constant 0.000000e+00 : f32
      %21 = vector.broadcast %cst_17 : f32 to vector<8x256xf32>
      %22 = arith.maximumf %20, %21 : vector<8x256xf32>
      %23 = arith.truncf %22 : vector<8x256xf32> to vector<8x256xbf16>
      %c0_18 = arith.constant 0 : index
      %c0_19 = arith.constant 0 : index
      %24 = vector.load %arg7[%c0_18, %c0_19] : memref<8x256xbf16, #tpu.memory_space<vmem>>, vector<8x256xbf16>
      tpu.vector_store %arg7[%c0_18, %c0_19], %23 {strides = array<i32>} : memref<8x256xbf16, #tpu.memory_space<vmem>>, vector<8x256xbf16>,
    } else {
    }
    return
  }
  func.func @transform_0(%arg0: i32, %arg1: i32, %arg2: i32) -> (i32, i32, i32) {
    %c0_i32 = arith.constant 0 : i32
    %c0_i32_0 = arith.constant 0 : i32
    return %arg2, %arg0, %c0_i32 : i32, i32, i32
  }
  func.func @transform_1(%arg0: i32, %arg1: i32, %arg2: i32) -> (i32, i32, i32) {
    %c0_i32 = arith.constant 0 : i32
    %c0_i32_0 = arith.constant 0 : i32
    return %arg2, %c0_i32, %arg1 : i32, i32, i32
  }
  func.func @transform_2(%arg0: i32, %arg1: i32, %arg2: i32) -> (i32, i32) {
    %c0_i32 = arith.constant 0 : i32
    %c0_i32_0 = arith.constant 0 : i32
    return %c0_i32, %arg1 : i32, i32
  }
  func.func @transform_3(%arg0: i32, %arg1: i32, %arg2: i32) -> (i32, i32) {
    %c0_i32 = arith.constant 0 : i32
    %c0_i32_0 = arith.constant 0 : i32
    return %c0_i32, %arg1 : i32, i32
  }
  func.func @transform_4(%arg0: i32, %arg1: i32, %arg2: i32) -> (i32, i32) {
    %c0_i32 = arith.constant 0 : i32
    return %arg0, %arg1 : i32, i32
  }
}

module attributes {stable_mosaic.version = 11 : i64} {
  func.func @_fused_mm_kernel(%arg0: i32, %arg1: i32, %arg2: i32, %arg3: memref<1x8x128xbf16, #tpu.memory_space<vmem>>, %arg4: memref<1x128x256xbf16, #tpu.memory_space<vmem>>, %arg5: memref<1x256xf32, #tpu.memory_space<vmem>>, %arg6: memref<1x256xf32, #tpu.memory_space<vmem>>, %arg7: memref<8x256xbf16, #tpu.memory_space<vmem>>, %arg8: memref<8x256xf32, #tpu.memory_space<vmem>>) attributes {dimension_semantics = [#tpu.dimension_semantics<parallel>, #tpu.dimension_semantics<parallel>, #tpu.dimension_semantics<arbitrary>], iteration_bounds = array<i64: 1, 1, 9>, scalar_prefetch = 0 : i64, scratch_operands = 1 : i64, tpu.core_type = #tpu.core_type<tc>, window_params = [{transform_indices = @transform_0, window_bounds = array<i64: 1, 8, 128>}, {transform_indices = @transform_1, window_bounds = array<i64: 1, 128, 256>}, {transform_indices = @transform_2, window_bounds = array<i64: 1, 256>}, {transform_indices = @transform_3, window_bounds = array<i64: 1, 256>}, {transform_indices = @transform_4, window_bounds = array<i64: 8, 256>}]} {
    %c0_i32 = arith.constant 0 : i32
    %0 = arith.cmpi eq, %arg2, %c0_i32 : i32
    %1 = arith.extui %0 : i1 to i32
    %c0_i32_0 = arith.constant 0 : i32
    %2 = arith.cmpi ne, %1, %c0_i32_0 : i32
    scf.if %2 {
      %cst_11 = arith.constant 0.000000e+00 : f32
      %14 = vector.broadcast %cst_11 : f32 to vector<8x256xf32>
      %c0_12 = arith.constant 0 : index
      %c0_13 = arith.constant 0 : index
      %15 = vector.load %arg8[%c0_12, %c0_13] : memref<8x256xf32, #tpu.memory_space<vmem>>, vector<8x256xf32>
      tpu.vector_store %arg8[%c0_12, %c0_13], %14 {strides = array<i32>} : memref<8x256xf32, #tpu.memory_space<vmem>>, vector<8x256xf32>,
    } else {
    }
    %c0 = arith.constant 0 : index
    %c0_1 = arith.constant 0 : index
    %3 = vector.load %arg8[%c0, %c0_1] : memref<8x256xf32, #tpu.memory_space<vmem>>, vector<8x256xf32>
    %c0_2 = arith.constant 0 : index
    %c0_3 = arith.constant 0 : index
    %c0_4 = arith.constant 0 : index
    %4 = vector.load %arg3[%c0_2, %c0_3, %c0_4] : memref<1x8x128xbf16, #tpu.memory_space<vmem>>, vector<1x8x128xbf16>
    %5 = vector.shape_cast %4 : vector<1x8x128xbf16> to vector<8x128xbf16>
    %c0_5 = arith.constant 0 : index
    %c0_6 = arith.constant 0 : index
    %c0_7 = arith.constant 0 : index
    %6 = vector.load %arg4[%c0_5, %c0_6, %c0_7] : memref<1x128x256xbf16, #tpu.memory_space<vmem>>, vector<1x128x256xbf16>
    %7 = vector.shape_cast %6 : vector<1x128x256xbf16> to vector<128x256xbf16>
    %cst = arith.constant dense<0.000000e+00> : vector<8x256xf32>
    %8 = tpu.matmul %5, %7, %cst {dimension_numbers = #tpu.dot_dimension_numbers<[1], [0], [0], [1], [0, 0, 1, 1], [], []>} : vector<8x128xbf16>, vector<128x256xbf16>, vector<8x256xf32> -> vector<8x256xf32>
    %9 = arith.addf %3, %8 : vector<8x256xf32>
    %c0_8 = arith.constant 0 : index
    %c0_9 = arith.constant 0 : index
    %10 = vector.load %arg8[%c0_8, %c0_9] : memref<8x256xf32, #tpu.memory_space<vmem>>, vector<8x256xf32>
    tpu.vector_store %arg8[%c0_8, %c0_9], %9 {strides = array<i32>} : memref<8x256xf32, #tpu.memory_space<vmem>>, vector<8x256xf32>,
    %c8_i32 = arith.constant 8 : i32
    %11 = arith.cmpi eq, %arg2, %c8_i32 : i32
    %12 = arith.extui %11 : i1 to i32
    %c0_i32_10 = arith.constant 0 : i32
    %13 = arith.cmpi ne, %12, %c0_i32_10 : i32
    scf.if %13 {
      %c0_11 = arith.constant 0 : index
      %c0_12 = arith.constant 0 : index
      %14 = vector.load %arg8[%c0_11, %c0_12] : memref<8x256xf32, #tpu.memory_space<vmem>>, vector<8x256xf32>
      %c0_13 = arith.constant 0 : index
      %c0_14 = arith.constant 0 : index
      %15 = vector.load %arg5[%c0_13, %c0_14] : memref<1x256xf32, #tpu.memory_space<vmem>>, vector<1x256xf32>
      %16 = vector.broadcast %15 : vector<1x256xf32> to vector<8x256xf32>
      %17 = arith.mulf %14, %16 : vector<8x256xf32>
      %c0_15 = arith.constant 0 : index
      %c0_16 = arith.constant 0 : index
      %18 = vector.load %arg6[%c0_15, %c0_16] : memref<1x256xf32, #tpu.memory_space<vmem>>, vector<1x256xf32>
      %19 = vector.broadcast %18 : vector<1x256xf32> to vector<8x256xf32>
      %20 = arith.addf %17, %19 : vector<8x256xf32>
      %cst_17 = arith.constant 0.000000e+00 : f32
      %21 = vector.broadcast %cst_17 : f32 to vector<8x256xf32>
      %22 = arith.maximumf %20, %21 : vector<8x256xf32>
      %23 = arith.truncf %22 : vector<8x256xf32> to vector<8x256xbf16>
      %c0_18 = arith.constant 0 : index
      %c0_19 = arith.constant 0 : index
      %24 = vector.load %arg7[%c0_18, %c0_19] : memref<8x256xbf16, #tpu.memory_space<vmem>>, vector<8x256xbf16>
      tpu.vector_store %arg7[%c0_18, %c0_19], %23 {strides = array<i32>} : memref<8x256xbf16, #tpu.memory_space<vmem>>, vector<8x256xbf16>,
    } else {
    }
    return
  }
  func.func @transform_0(%arg0: i32, %arg1: i32, %arg2: i32) -> (i32, i32, i32) {
    %c0_i32 = arith.constant 0 : i32
    %c0_i32_0 = arith.constant 0 : i32
    return %arg2, %arg0, %c0_i32 : i32, i32, i32
  }
  func.func @transform_1(%arg0: i32, %arg1: i32, %arg2: i32) -> (i32, i32, i32) {
    %c0_i32 = arith.constant 0 : i32
    %c0_i32_0 = arith.constant 0 : i32
    return %arg2, %c0_i32, %arg1 : i32, i32, i32
  }
  func.func @transform_2(%arg0: i32, %arg1: i32, %arg2: i32) -> (i32, i32) {
    %c0_i32 = arith.constant 0 : i32
    %c0_i32_0 = arith.constant 0 : i32
    return %c0_i32, %arg1 : i32, i32
  }
  func.func @transform_3(%arg0: i32, %arg1: i32, %arg2: i32) -> (i32, i32) {
    %c0_i32 = arith.constant 0 : i32
    %c0_i32_0 = arith.constant 0 : i32
    return %c0_i32, %arg1 : i32, i32
  }
  func.func @transform_4(%arg0: i32, %arg1: i32, %arg2: i32) -> (i32, i32) {
    %c0_i32 = arith.constant 0 : i32
    return %arg0, %arg1 : i32, i32
  }
}

module attributes {stable_mosaic.version = 11 : i64} {
  func.func @_fused_mm_kernel(%arg0: i32, %arg1: i32, %arg2: i32, %arg3: memref<1x8x256xbf16, #tpu.memory_space<vmem>>, %arg4: memref<1x256x256xbf16, #tpu.memory_space<vmem>>, %arg5: memref<1x256xf32, #tpu.memory_space<vmem>>, %arg6: memref<1x256xf32, #tpu.memory_space<vmem>>, %arg7: memref<8x256xbf16, #tpu.memory_space<vmem>>, %arg8: memref<8x256xbf16, #tpu.memory_space<vmem>>, %arg9: memref<8x256xf32, #tpu.memory_space<vmem>>) attributes {dimension_semantics = [#tpu.dimension_semantics<parallel>, #tpu.dimension_semantics<parallel>, #tpu.dimension_semantics<arbitrary>], iteration_bounds = array<i64: 1, 1, 9>, scalar_prefetch = 0 : i64, scratch_operands = 1 : i64, tpu.core_type = #tpu.core_type<tc>, window_params = [{transform_indices = @transform_0, window_bounds = array<i64: 1, 8, 256>}, {transform_indices = @transform_1, window_bounds = array<i64: 1, 256, 256>}, {transform_indices = @transform_2, window_bounds = array<i64: 1, 256>}, {transform_indices = @transform_3, window_bounds = array<i64: 1, 256>}, {transform_indices = @transform_4, window_bounds = array<i64: 8, 256>}, {transform_indices = @transform_5, window_bounds = array<i64: 8, 256>}]} {
    %c0_i32 = arith.constant 0 : i32
    %0 = arith.cmpi eq, %arg2, %c0_i32 : i32
    %1 = arith.extui %0 : i1 to i32
    %c0_i32_0 = arith.constant 0 : i32
    %2 = arith.cmpi ne, %1, %c0_i32_0 : i32
    scf.if %2 {
      %cst_11 = arith.constant 0.000000e+00 : f32
      %14 = vector.broadcast %cst_11 : f32 to vector<8x256xf32>
      %c0_12 = arith.constant 0 : index
      %c0_13 = arith.constant 0 : index
      %15 = vector.load %arg9[%c0_12, %c0_13] : memref<8x256xf32, #tpu.memory_space<vmem>>, vector<8x256xf32>
      tpu.vector_store %arg9[%c0_12, %c0_13], %14 {strides = array<i32>} : memref<8x256xf32, #tpu.memory_space<vmem>>, vector<8x256xf32>,
    } else {
    }
    %c0 = arith.constant 0 : index
    %c0_1 = arith.constant 0 : index
    %3 = vector.load %arg9[%c0, %c0_1] : memref<8x256xf32, #tpu.memory_space<vmem>>, vector<8x256xf32>
    %c0_2 = arith.constant 0 : index
    %c0_3 = arith.constant 0 : index
    %c0_4 = arith.constant 0 : index
    %4 = vector.load %arg3[%c0_2, %c0_3, %c0_4] : memref<1x8x256xbf16, #tpu.memory_space<vmem>>, vector<1x8x256xbf16>
    %5 = vector.shape_cast %4 : vector<1x8x256xbf16> to vector<8x256xbf16>
    %c0_5 = arith.constant 0 : index
    %c0_6 = arith.constant 0 : index
    %c0_7 = arith.constant 0 : index
    %6 = vector.load %arg4[%c0_5, %c0_6, %c0_7] : memref<1x256x256xbf16, #tpu.memory_space<vmem>>, vector<1x256x256xbf16>
    %7 = vector.shape_cast %6 : vector<1x256x256xbf16> to vector<256x256xbf16>
    %cst = arith.constant dense<0.000000e+00> : vector<8x256xf32>
    %8 = tpu.matmul %5, %7, %cst {dimension_numbers = #tpu.dot_dimension_numbers<[1], [0], [0], [1], [0, 0, 1, 1], [], []>} : vector<8x256xbf16>, vector<256x256xbf16>, vector<8x256xf32> -> vector<8x256xf32>
    %9 = arith.addf %3, %8 : vector<8x256xf32>
    %c0_8 = arith.constant 0 : index
    %c0_9 = arith.constant 0 : index
    %10 = vector.load %arg9[%c0_8, %c0_9] : memref<8x256xf32, #tpu.memory_space<vmem>>, vector<8x256xf32>
    tpu.vector_store %arg9[%c0_8, %c0_9], %9 {strides = array<i32>} : memref<8x256xf32, #tpu.memory_space<vmem>>, vector<8x256xf32>,
    %c8_i32 = arith.constant 8 : i32
    %11 = arith.cmpi eq, %arg2, %c8_i32 : i32
    %12 = arith.extui %11 : i1 to i32
    %c0_i32_10 = arith.constant 0 : i32
    %13 = arith.cmpi ne, %12, %c0_i32_10 : i32
    scf.if %13 {
      %c0_11 = arith.constant 0 : index
      %c0_12 = arith.constant 0 : index
      %14 = vector.load %arg9[%c0_11, %c0_12] : memref<8x256xf32, #tpu.memory_space<vmem>>, vector<8x256xf32>
      %c0_13 = arith.constant 0 : index
      %c0_14 = arith.constant 0 : index
      %15 = vector.load %arg5[%c0_13, %c0_14] : memref<1x256xf32, #tpu.memory_space<vmem>>, vector<1x256xf32>
      %16 = vector.broadcast %15 : vector<1x256xf32> to vector<8x256xf32>
      %17 = arith.mulf %14, %16 : vector<8x256xf32>
      %c0_15 = arith.constant 0 : index
      %c0_16 = arith.constant 0 : index
      %18 = vector.load %arg6[%c0_15, %c0_16] : memref<1x256xf32, #tpu.memory_space<vmem>>, vector<1x256xf32>
      %19 = vector.broadcast %18 : vector<1x256xf32> to vector<8x256xf32>
      %20 = arith.addf %17, %19 : vector<8x256xf32>
      %c0_17 = arith.constant 0 : index
      %c0_18 = arith.constant 0 : index
      %21 = vector.load %arg7[%c0_17, %c0_18] : memref<8x256xbf16, #tpu.memory_space<vmem>>, vector<8x256xbf16>
      %22 = arith.extf %21 : vector<8x256xbf16> to vector<8x256xf32>
      %23 = arith.addf %20, %22 : vector<8x256xf32>
      %cst_19 = arith.constant 0.000000e+00 : f32
      %24 = vector.broadcast %cst_19 : f32 to vector<8x256xf32>
      %25 = arith.maximumf %23, %24 : vector<8x256xf32>
      %26 = arith.truncf %25 : vector<8x256xf32> to vector<8x256xbf16>
      %c0_20 = arith.constant 0 : index
      %c0_21 = arith.constant 0 : index
      %27 = vector.load %arg8[%c0_20, %c0_21] : memref<8x256xbf16, #tpu.memory_space<vmem>>, vector<8x256xbf16>
      tpu.vector_store %arg8[%c0_20, %c0_21], %26 {strides = array<i32>} : memref<8x256xbf16, #tpu.memory_space<vmem>>, vector<8x256xbf16>,
    } else {
    }
    return
  }
  func.func @transform_0(%arg0: i32, %arg1: i32, %arg2: i32) -> (i32, i32, i32) {
    %c0_i32 = arith.constant 0 : i32
    %c0_i32_0 = arith.constant 0 : i32
    return %arg2, %arg0, %c0_i32 : i32, i32, i32
  }
  func.func @transform_1(%arg0: i32, %arg1: i32, %arg2: i32) -> (i32, i32, i32) {
    %c0_i32 = arith.constant 0 : i32
    %c0_i32_0 = arith.constant 0 : i32
    return %arg2, %c0_i32, %arg1 : i32, i32, i32
  }
  func.func @transform_2(%arg0: i32, %arg1: i32, %arg2: i32) -> (i32, i32) {
    %c0_i32 = arith.constant 0 : i32
    %c0_i32_0 = arith.constant 0 : i32
    return %c0_i32, %arg1 : i32, i32
  }
  func.func @transform_3(%arg0: i32, %arg1: i32, %arg2: i32) -> (i32, i32) {
    %c0_i32 = arith.constant 0 : i32
    %c0_i32_0 = arith.constant 0 : i32
    return %c0_i32, %arg1 : i32, i32
  }
  func.func @transform_4(%arg0: i32, %arg1: i32, %arg2: i32) -> (i32, i32) {
    %c0_i32 = arith.constant 0 : i32
    return %arg0, %arg1 : i32, i32
  }
  func.func @transform_5(%arg0: i32, %arg1: i32, %arg2: i32) -> (i32, i32) {
    %c0_i32 = arith.constant 0 : i32
    return %arg0, %arg1 : i32, i32
  }
}

module attributes {stable_mosaic.version = 11 : i64} {
  func.func @_fused_mm_kernel(%arg0: i32, %arg1: i32, %arg2: i32, %arg3: memref<1x8x256xbf16, #tpu.memory_space<vmem>>, %arg4: memref<1x256x256xbf16, #tpu.memory_space<vmem>>, %arg5: memref<1x256xf32, #tpu.memory_space<vmem>>, %arg6: memref<1x256xf32, #tpu.memory_space<vmem>>, %arg7: memref<8x256xbf16, #tpu.memory_space<vmem>>, %arg8: memref<8x256xf32, #tpu.memory_space<vmem>>) attributes {dimension_semantics = [#tpu.dimension_semantics<parallel>, #tpu.dimension_semantics<parallel>, #tpu.dimension_semantics<arbitrary>], iteration_bounds = array<i64: 1, 2, 9>, scalar_prefetch = 0 : i64, scratch_operands = 1 : i64, tpu.core_type = #tpu.core_type<tc>, window_params = [{transform_indices = @transform_0, window_bounds = array<i64: 1, 8, 256>}, {transform_indices = @transform_1, window_bounds = array<i64: 1, 256, 256>}, {transform_indices = @transform_2, window_bounds = array<i64: 1, 256>}, {transform_indices = @transform_3, window_bounds = array<i64: 1, 256>}, {transform_indices = @transform_4, window_bounds = array<i64: 8, 256>}]} {
    %c0_i32 = arith.constant 0 : i32
    %0 = arith.cmpi eq, %arg2, %c0_i32 : i32
    %1 = arith.extui %0 : i1 to i32
    %c0_i32_0 = arith.constant 0 : i32
    %2 = arith.cmpi ne, %1, %c0_i32_0 : i32
    scf.if %2 {
      %cst_11 = arith.constant 0.000000e+00 : f32
      %14 = vector.broadcast %cst_11 : f32 to vector<8x256xf32>
      %c0_12 = arith.constant 0 : index
      %c0_13 = arith.constant 0 : index
      %15 = vector.load %arg8[%c0_12, %c0_13] : memref<8x256xf32, #tpu.memory_space<vmem>>, vector<8x256xf32>
      tpu.vector_store %arg8[%c0_12, %c0_13], %14 {strides = array<i32>} : memref<8x256xf32, #tpu.memory_space<vmem>>, vector<8x256xf32>,
    } else {
    }
    %c0 = arith.constant 0 : index
    %c0_1 = arith.constant 0 : index
    %3 = vector.load %arg8[%c0, %c0_1] : memref<8x256xf32, #tpu.memory_space<vmem>>, vector<8x256xf32>
    %c0_2 = arith.constant 0 : index
    %c0_3 = arith.constant 0 : index
    %c0_4 = arith.constant 0 : index
    %4 = vector.load %arg3[%c0_2, %c0_3, %c0_4] : memref<1x8x256xbf16, #tpu.memory_space<vmem>>, vector<1x8x256xbf16>
    %5 = vector.shape_cast %4 : vector<1x8x256xbf16> to vector<8x256xbf16>
    %c0_5 = arith.constant 0 : index
    %c0_6 = arith.constant 0 : index
    %c0_7 = arith.constant 0 : index
    %6 = vector.load %arg4[%c0_5, %c0_6, %c0_7] : memref<1x256x256xbf16, #tpu.memory_space<vmem>>, vector<1x256x256xbf16>
    %7 = vector.shape_cast %6 : vector<1x256x256xbf16> to vector<256x256xbf16>
    %cst = arith.constant dense<0.000000e+00> : vector<8x256xf32>
    %8 = tpu.matmul %5, %7, %cst {dimension_numbers = #tpu.dot_dimension_numbers<[1], [0], [0], [1], [0, 0, 1, 1], [], []>} : vector<8x256xbf16>, vector<256x256xbf16>, vector<8x256xf32> -> vector<8x256xf32>
    %9 = arith.addf %3, %8 : vector<8x256xf32>
    %c0_8 = arith.constant 0 : index
    %c0_9 = arith.constant 0 : index
    %10 = vector.load %arg8[%c0_8, %c0_9] : memref<8x256xf32, #tpu.memory_space<vmem>>, vector<8x256xf32>
    tpu.vector_store %arg8[%c0_8, %c0_9], %9 {strides = array<i32>} : memref<8x256xf32, #tpu.memory_space<vmem>>, vector<8x256xf32>,
    %c8_i32 = arith.constant 8 : i32
    %11 = arith.cmpi eq, %arg2, %c8_i32 : i32
    %12 = arith.extui %11 : i1 to i32
    %c0_i32_10 = arith.constant 0 : i32
    %13 = arith.cmpi ne, %12, %c0_i32_10 : i32
    scf.if %13 {
      %c0_11 = arith.constant 0 : index
      %c0_12 = arith.constant 0 : index
      %14 = vector.load %arg8[%c0_11, %c0_12] : memref<8x256xf32, #tpu.memory_space<vmem>>, vector<8x256xf32>
      %c0_13 = arith.constant 0 : index
      %c0_14 = arith.constant 0 : index
      %15 = vector.load %arg5[%c0_13, %c0_14] : memref<1x256xf32, #tpu.memory_space<vmem>>, vector<1x256xf32>
      %16 = vector.broadcast %15 : vector<1x256xf32> to vector<8x256xf32>
      %17 = arith.mulf %14, %16 : vector<8x256xf32>
      %c0_15 = arith.constant 0 : index
      %c0_16 = arith.constant 0 : index
      %18 = vector.load %arg6[%c0_15, %c0_16] : memref<1x256xf32, #tpu.memory_space<vmem>>, vector<1x256xf32>
      %19 = vector.broadcast %18 : vector<1x256xf32> to vector<8x256xf32>
      %20 = arith.addf %17, %19 : vector<8x256xf32>
      %cst_17 = arith.constant 0.000000e+00 : f32
      %21 = vector.broadcast %cst_17 : f32 to vector<8x256xf32>
      %22 = arith.maximumf %20, %21 : vector<8x256xf32>
      %23 = arith.truncf %22 : vector<8x256xf32> to vector<8x256xbf16>
      %c0_18 = arith.constant 0 : index
      %c0_19 = arith.constant 0 : index
      %24 = vector.load %arg7[%c0_18, %c0_19] : memref<8x256xbf16, #tpu.memory_space<vmem>>, vector<8x256xbf16>
      tpu.vector_store %arg7[%c0_18, %c0_19], %23 {strides = array<i32>} : memref<8x256xbf16, #tpu.memory_space<vmem>>, vector<8x256xbf16>,
    } else {
    }
    return
  }
  func.func @transform_0(%arg0: i32, %arg1: i32, %arg2: i32) -> (i32, i32, i32) {
    %c0_i32 = arith.constant 0 : i32
    %c0_i32_0 = arith.constant 0 : i32
    return %arg2, %arg0, %c0_i32 : i32, i32, i32
  }
  func.func @transform_1(%arg0: i32, %arg1: i32, %arg2: i32) -> (i32, i32, i32) {
    %c0_i32 = arith.constant 0 : i32
    %c0_i32_0 = arith.constant 0 : i32
    return %arg2, %c0_i32, %arg1 : i32, i32, i32
  }
  func.func @transform_2(%arg0: i32, %arg1: i32, %arg2: i32) -> (i32, i32) {
    %c0_i32 = arith.constant 0 : i32
    %c0_i32_0 = arith.constant 0 : i32
    return %c0_i32, %arg1 : i32, i32
  }
  func.func @transform_3(%arg0: i32, %arg1: i32, %arg2: i32) -> (i32, i32) {
    %c0_i32 = arith.constant 0 : i32
    %c0_i32_0 = arith.constant 0 : i32
    return %c0_i32, %arg1 : i32, i32
  }
  func.func @transform_4(%arg0: i32, %arg1: i32, %arg2: i32) -> (i32, i32) {
    %c0_i32 = arith.constant 0 : i32
    return %arg0, %arg1 : i32, i32
  }
}

module attributes {stable_mosaic.version = 11 : i64} {
  func.func @_fused_mm_kernel(%arg0: i32, %arg1: i32, %arg2: i32, %arg3: memref<1x8x512xbf16, #tpu.memory_space<vmem>>, %arg4: memref<1x512x256xbf16, #tpu.memory_space<vmem>>, %arg5: memref<1x256xf32, #tpu.memory_space<vmem>>, %arg6: memref<1x256xf32, #tpu.memory_space<vmem>>, %arg7: memref<8x256xbf16, #tpu.memory_space<vmem>>, %arg8: memref<8x256xf32, #tpu.memory_space<vmem>>) attributes {dimension_semantics = [#tpu.dimension_semantics<parallel>, #tpu.dimension_semantics<parallel>, #tpu.dimension_semantics<arbitrary>], iteration_bounds = array<i64: 1, 2, 9>, scalar_prefetch = 0 : i64, scratch_operands = 1 : i64, tpu.core_type = #tpu.core_type<tc>, window_params = [{transform_indices = @transform_0, window_bounds = array<i64: 1, 8, 512>}, {transform_indices = @transform_1, window_bounds = array<i64: 1, 512, 256>}, {transform_indices = @transform_2, window_bounds = array<i64: 1, 256>}, {transform_indices = @transform_3, window_bounds = array<i64: 1, 256>}, {transform_indices = @transform_4, window_bounds = array<i64: 8, 256>}]} {
    %c0_i32 = arith.constant 0 : i32
    %0 = arith.cmpi eq, %arg2, %c0_i32 : i32
    %1 = arith.extui %0 : i1 to i32
    %c0_i32_0 = arith.constant 0 : i32
    %2 = arith.cmpi ne, %1, %c0_i32_0 : i32
    scf.if %2 {
      %cst_11 = arith.constant 0.000000e+00 : f32
      %14 = vector.broadcast %cst_11 : f32 to vector<8x256xf32>
      %c0_12 = arith.constant 0 : index
      %c0_13 = arith.constant 0 : index
      %15 = vector.load %arg8[%c0_12, %c0_13] : memref<8x256xf32, #tpu.memory_space<vmem>>, vector<8x256xf32>
      tpu.vector_store %arg8[%c0_12, %c0_13], %14 {strides = array<i32>} : memref<8x256xf32, #tpu.memory_space<vmem>>, vector<8x256xf32>,
    } else {
    }
    %c0 = arith.constant 0 : index
    %c0_1 = arith.constant 0 : index
    %3 = vector.load %arg8[%c0, %c0_1] : memref<8x256xf32, #tpu.memory_space<vmem>>, vector<8x256xf32>
    %c0_2 = arith.constant 0 : index
    %c0_3 = arith.constant 0 : index
    %c0_4 = arith.constant 0 : index
    %4 = vector.load %arg3[%c0_2, %c0_3, %c0_4] : memref<1x8x512xbf16, #tpu.memory_space<vmem>>, vector<1x8x512xbf16>
    %5 = vector.shape_cast %4 : vector<1x8x512xbf16> to vector<8x512xbf16>
    %c0_5 = arith.constant 0 : index
    %c0_6 = arith.constant 0 : index
    %c0_7 = arith.constant 0 : index
    %6 = vector.load %arg4[%c0_5, %c0_6, %c0_7] : memref<1x512x256xbf16, #tpu.memory_space<vmem>>, vector<1x512x256xbf16>
    %7 = vector.shape_cast %6 : vector<1x512x256xbf16> to vector<512x256xbf16>
    %cst = arith.constant dense<0.000000e+00> : vector<8x256xf32>
    %8 = tpu.matmul %5, %7, %cst {dimension_numbers = #tpu.dot_dimension_numbers<[1], [0], [0], [1], [0, 0, 1, 1], [], []>} : vector<8x512xbf16>, vector<512x256xbf16>, vector<8x256xf32> -> vector<8x256xf32>
    %9 = arith.addf %3, %8 : vector<8x256xf32>
    %c0_8 = arith.constant 0 : index
    %c0_9 = arith.constant 0 : index
    %10 = vector.load %arg8[%c0_8, %c0_9] : memref<8x256xf32, #tpu.memory_space<vmem>>, vector<8x256xf32>
    tpu.vector_store %arg8[%c0_8, %c0_9], %9 {strides = array<i32>} : memref<8x256xf32, #tpu.memory_space<vmem>>, vector<8x256xf32>,
    %c8_i32 = arith.constant 8 : i32
    %11 = arith.cmpi eq, %arg2, %c8_i32 : i32
    %12 = arith.extui %11 : i1 to i32
    %c0_i32_10 = arith.constant 0 : i32
    %13 = arith.cmpi ne, %12, %c0_i32_10 : i32
    scf.if %13 {
      %c0_11 = arith.constant 0 : index
      %c0_12 = arith.constant 0 : index
      %14 = vector.load %arg8[%c0_11, %c0_12] : memref<8x256xf32, #tpu.memory_space<vmem>>, vector<8x256xf32>
      %c0_13 = arith.constant 0 : index
      %c0_14 = arith.constant 0 : index
      %15 = vector.load %arg5[%c0_13, %c0_14] : memref<1x256xf32, #tpu.memory_space<vmem>>, vector<1x256xf32>
      %16 = vector.broadcast %15 : vector<1x256xf32> to vector<8x256xf32>
      %17 = arith.mulf %14, %16 : vector<8x256xf32>
      %c0_15 = arith.constant 0 : index
      %c0_16 = arith.constant 0 : index
      %18 = vector.load %arg6[%c0_15, %c0_16] : memref<1x256xf32, #tpu.memory_space<vmem>>, vector<1x256xf32>
      %19 = vector.broadcast %18 : vector<1x256xf32> to vector<8x256xf32>
      %20 = arith.addf %17, %19 : vector<8x256xf32>
      %cst_17 = arith.constant 0.000000e+00 : f32
      %21 = vector.broadcast %cst_17 : f32 to vector<8x256xf32>
      %22 = arith.maximumf %20, %21 : vector<8x256xf32>
      %23 = arith.truncf %22 : vector<8x256xf32> to vector<8x256xbf16>
      %c0_18 = arith.constant 0 : index
      %c0_19 = arith.constant 0 : index
      %24 = vector.load %arg7[%c0_18, %c0_19] : memref<8x256xbf16, #tpu.memory_space<vmem>>, vector<8x256xbf16>
      tpu.vector_store %arg7[%c0_18, %c0_19], %23 {strides = array<i32>} : memref<8x256xbf16, #tpu.memory_space<vmem>>, vector<8x256xbf16>,
    } else {
    }
    return
  }
  func.func @transform_0(%arg0: i32, %arg1: i32, %arg2: i32) -> (i32, i32, i32) {
    %c0_i32 = arith.constant 0 : i32
    %c0_i32_0 = arith.constant 0 : i32
    return %arg2, %arg0, %c0_i32 : i32, i32, i32
  }
  func.func @transform_1(%arg0: i32, %arg1: i32, %arg2: i32) -> (i32, i32, i32) {
    %c0_i32 = arith.constant 0 : i32
    %c0_i32_0 = arith.constant 0 : i32
    return %arg2, %c0_i32, %arg1 : i32, i32, i32
  }
  func.func @transform_2(%arg0: i32, %arg1: i32, %arg2: i32) -> (i32, i32) {
    %c0_i32 = arith.constant 0 : i32
    %c0_i32_0 = arith.constant 0 : i32
    return %c0_i32, %arg1 : i32, i32
  }
  func.func @transform_3(%arg0: i32, %arg1: i32, %arg2: i32) -> (i32, i32) {
    %c0_i32 = arith.constant 0 : i32
    %c0_i32_0 = arith.constant 0 : i32
    return %c0_i32, %arg1 : i32, i32
  }
  func.func @transform_4(%arg0: i32, %arg1: i32, %arg2: i32) -> (i32, i32) {
    %c0_i32 = arith.constant 0 : i32
    return %arg0, %arg1 : i32, i32
  }
}

module attributes {stable_mosaic.version = 11 : i64} {
  func.func @_fused_mm_kernel(%arg0: i32, %arg1: i32, %arg2: i32, %arg3: memref<1x8x512xbf16, #tpu.memory_space<vmem>>, %arg4: memref<1x512x256xbf16, #tpu.memory_space<vmem>>, %arg5: memref<1x256xf32, #tpu.memory_space<vmem>>, %arg6: memref<1x256xf32, #tpu.memory_space<vmem>>, %arg7: memref<8x256xbf16, #tpu.memory_space<vmem>>, %arg8: memref<8x256xbf16, #tpu.memory_space<vmem>>, %arg9: memref<8x256xf32, #tpu.memory_space<vmem>>) attributes {dimension_semantics = [#tpu.dimension_semantics<parallel>, #tpu.dimension_semantics<parallel>, #tpu.dimension_semantics<arbitrary>], iteration_bounds = array<i64: 1, 2, 9>, scalar_prefetch = 0 : i64, scratch_operands = 1 : i64, tpu.core_type = #tpu.core_type<tc>, window_params = [{transform_indices = @transform_0, window_bounds = array<i64: 1, 8, 512>}, {transform_indices = @transform_1, window_bounds = array<i64: 1, 512, 256>}, {transform_indices = @transform_2, window_bounds = array<i64: 1, 256>}, {transform_indices = @transform_3, window_bounds = array<i64: 1, 256>}, {transform_indices = @transform_4, window_bounds = array<i64: 8, 256>}, {transform_indices = @transform_5, window_bounds = array<i64: 8, 256>}]} {
    %c0_i32 = arith.constant 0 : i32
    %0 = arith.cmpi eq, %arg2, %c0_i32 : i32
    %1 = arith.extui %0 : i1 to i32
    %c0_i32_0 = arith.constant 0 : i32
    %2 = arith.cmpi ne, %1, %c0_i32_0 : i32
    scf.if %2 {
      %cst_11 = arith.constant 0.000000e+00 : f32
      %14 = vector.broadcast %cst_11 : f32 to vector<8x256xf32>
      %c0_12 = arith.constant 0 : index
      %c0_13 = arith.constant 0 : index
      %15 = vector.load %arg9[%c0_12, %c0_13] : memref<8x256xf32, #tpu.memory_space<vmem>>, vector<8x256xf32>
      tpu.vector_store %arg9[%c0_12, %c0_13], %14 {strides = array<i32>} : memref<8x256xf32, #tpu.memory_space<vmem>>, vector<8x256xf32>,
    } else {
    }
    %c0 = arith.constant 0 : index
    %c0_1 = arith.constant 0 : index
    %3 = vector.load %arg9[%c0, %c0_1] : memref<8x256xf32, #tpu.memory_space<vmem>>, vector<8x256xf32>
    %c0_2 = arith.constant 0 : index
    %c0_3 = arith.constant 0 : index
    %c0_4 = arith.constant 0 : index
    %4 = vector.load %arg3[%c0_2, %c0_3, %c0_4] : memref<1x8x512xbf16, #tpu.memory_space<vmem>>, vector<1x8x512xbf16>
    %5 = vector.shape_cast %4 : vector<1x8x512xbf16> to vector<8x512xbf16>
    %c0_5 = arith.constant 0 : index
    %c0_6 = arith.constant 0 : index
    %c0_7 = arith.constant 0 : index
    %6 = vector.load %arg4[%c0_5, %c0_6, %c0_7] : memref<1x512x256xbf16, #tpu.memory_space<vmem>>, vector<1x512x256xbf16>
    %7 = vector.shape_cast %6 : vector<1x512x256xbf16> to vector<512x256xbf16>
    %cst = arith.constant dense<0.000000e+00> : vector<8x256xf32>
    %8 = tpu.matmul %5, %7, %cst {dimension_numbers = #tpu.dot_dimension_numbers<[1], [0], [0], [1], [0, 0, 1, 1], [], []>} : vector<8x512xbf16>, vector<512x256xbf16>, vector<8x256xf32> -> vector<8x256xf32>
    %9 = arith.addf %3, %8 : vector<8x256xf32>
    %c0_8 = arith.constant 0 : index
    %c0_9 = arith.constant 0 : index
    %10 = vector.load %arg9[%c0_8, %c0_9] : memref<8x256xf32, #tpu.memory_space<vmem>>, vector<8x256xf32>
    tpu.vector_store %arg9[%c0_8, %c0_9], %9 {strides = array<i32>} : memref<8x256xf32, #tpu.memory_space<vmem>>, vector<8x256xf32>,
    %c8_i32 = arith.constant 8 : i32
    %11 = arith.cmpi eq, %arg2, %c8_i32 : i32
    %12 = arith.extui %11 : i1 to i32
    %c0_i32_10 = arith.constant 0 : i32
    %13 = arith.cmpi ne, %12, %c0_i32_10 : i32
    scf.if %13 {
      %c0_11 = arith.constant 0 : index
      %c0_12 = arith.constant 0 : index
      %14 = vector.load %arg9[%c0_11, %c0_12] : memref<8x256xf32, #tpu.memory_space<vmem>>, vector<8x256xf32>
      %c0_13 = arith.constant 0 : index
      %c0_14 = arith.constant 0 : index
      %15 = vector.load %arg5[%c0_13, %c0_14] : memref<1x256xf32, #tpu.memory_space<vmem>>, vector<1x256xf32>
      %16 = vector.broadcast %15 : vector<1x256xf32> to vector<8x256xf32>
      %17 = arith.mulf %14, %16 : vector<8x256xf32>
      %c0_15 = arith.constant 0 : index
      %c0_16 = arith.constant 0 : index
      %18 = vector.load %arg6[%c0_15, %c0_16] : memref<1x256xf32, #tpu.memory_space<vmem>>, vector<1x256xf32>
      %19 = vector.broadcast %18 : vector<1x256xf32> to vector<8x256xf32>
      %20 = arith.addf %17, %19 : vector<8x256xf32>
      %c0_17 = arith.constant 0 : index
      %c0_18 = arith.constant 0 : index
      %21 = vector.load %arg7[%c0_17, %c0_18] : memref<8x256xbf16, #tpu.memory_space<vmem>>, vector<8x256xbf16>
      %22 = arith.extf %21 : vector<8x256xbf16> to vector<8x256xf32>
      %23 = arith.addf %20, %22 : vector<8x256xf32>
      %cst_19 = arith.constant 0.000000e+00 : f32
      %24 = vector.broadcast %cst_19 : f32 to vector<8x256xf32>
      %25 = arith.maximumf %23, %24 : vector<8x256xf32>
      %26 = arith.truncf %25 : vector<8x256xf32> to vector<8x256xbf16>
      %c0_20 = arith.constant 0 : index
      %c0_21 = arith.constant 0 : index
      %27 = vector.load %arg8[%c0_20, %c0_21] : memref<8x256xbf16, #tpu.memory_space<vmem>>, vector<8x256xbf16>
      tpu.vector_store %arg8[%c0_20, %c0_21], %26 {strides = array<i32>} : memref<8x256xbf16, #tpu.memory_space<vmem>>, vector<8x256xbf16>,
    } else {
    }
    return
  }
  func.func @transform_0(%arg0: i32, %arg1: i32, %arg2: i32) -> (i32, i32, i32) {
    %c0_i32 = arith.constant 0 : i32
    %c0_i32_0 = arith.constant 0 : i32
    return %arg2, %arg0, %c0_i32 : i32, i32, i32
  }
  func.func @transform_1(%arg0: i32, %arg1: i32, %arg2: i32) -> (i32, i32, i32) {
    %c0_i32 = arith.constant 0 : i32
    %c0_i32_0 = arith.constant 0 : i32
    return %arg2, %c0_i32, %arg1 : i32, i32, i32
  }
  func.func @transform_2(%arg0: i32, %arg1: i32, %arg2: i32) -> (i32, i32) {
    %c0_i32 = arith.constant 0 : i32
    %c0_i32_0 = arith.constant 0 : i32
    return %c0_i32, %arg1 : i32, i32
  }
  func.func @transform_3(%arg0: i32, %arg1: i32, %arg2: i32) -> (i32, i32) {
    %c0_i32 = arith.constant 0 : i32
    %c0_i32_0 = arith.constant 0 : i32
    return %c0_i32, %arg1 : i32, i32
  }
  func.func @transform_4(%arg0: i32, %arg1: i32, %arg2: i32) -> (i32, i32) {
    %c0_i32 = arith.constant 0 : i32
    return %arg0, %arg1 : i32, i32
  }
  func.func @transform_5(%arg0: i32, %arg1: i32, %arg2: i32) -> (i32, i32) {
    %c0_i32 = arith.constant 0 : i32
    return %arg0, %arg1 : i32, i32
  }
}

module attributes {stable_mosaic.version = 11 : i64} {
  func.func @_fused_mm_kernel(%arg0: i32, %arg1: i32, %arg2: i32, %arg3: memref<1x8x256xbf16, #tpu.memory_space<vmem>>, %arg4: memref<1x256x256xbf16, #tpu.memory_space<vmem>>, %arg5: memref<1x256xf32, #tpu.memory_space<vmem>>, %arg6: memref<1x256xf32, #tpu.memory_space<vmem>>, %arg7: memref<8x256xbf16, #tpu.memory_space<vmem>>, %arg8: memref<8x256xf32, #tpu.memory_space<vmem>>) attributes {dimension_semantics = [#tpu.dimension_semantics<parallel>, #tpu.dimension_semantics<parallel>, #tpu.dimension_semantics<arbitrary>], iteration_bounds = array<i64: 1, 2, 1>, scalar_prefetch = 0 : i64, scratch_operands = 1 : i64, tpu.core_type = #tpu.core_type<tc>, window_params = [{transform_indices = @transform_0, window_bounds = array<i64: 1, 8, 256>}, {transform_indices = @transform_1, window_bounds = array<i64: 1, 256, 256>}, {transform_indices = @transform_2, window_bounds = array<i64: 1, 256>}, {transform_indices = @transform_3, window_bounds = array<i64: 1, 256>}, {transform_indices = @transform_4, window_bounds = array<i64: 8, 256>}]} {
    %c0_i32 = arith.constant 0 : i32
    %0 = arith.cmpi eq, %arg2, %c0_i32 : i32
    %1 = arith.extui %0 : i1 to i32
    %c0_i32_0 = arith.constant 0 : i32
    %2 = arith.cmpi ne, %1, %c0_i32_0 : i32
    scf.if %2 {
      %cst_12 = arith.constant 0.000000e+00 : f32
      %14 = vector.broadcast %cst_12 : f32 to vector<8x256xf32>
      %c0_13 = arith.constant 0 : index
      %c0_14 = arith.constant 0 : index
      %15 = vector.load %arg8[%c0_13, %c0_14] : memref<8x256xf32, #tpu.memory_space<vmem>>, vector<8x256xf32>
      tpu.vector_store %arg8[%c0_13, %c0_14], %14 {strides = array<i32>} : memref<8x256xf32, #tpu.memory_space<vmem>>, vector<8x256xf32>,
    } else {
    }
    %c0 = arith.constant 0 : index
    %c0_1 = arith.constant 0 : index
    %3 = vector.load %arg8[%c0, %c0_1] : memref<8x256xf32, #tpu.memory_space<vmem>>, vector<8x256xf32>
    %c0_2 = arith.constant 0 : index
    %c0_3 = arith.constant 0 : index
    %c0_4 = arith.constant 0 : index
    %4 = vector.load %arg3[%c0_2, %c0_3, %c0_4] : memref<1x8x256xbf16, #tpu.memory_space<vmem>>, vector<1x8x256xbf16>
    %5 = vector.shape_cast %4 : vector<1x8x256xbf16> to vector<8x256xbf16>
    %c0_5 = arith.constant 0 : index
    %c0_6 = arith.constant 0 : index
    %c0_7 = arith.constant 0 : index
    %6 = vector.load %arg4[%c0_5, %c0_6, %c0_7] : memref<1x256x256xbf16, #tpu.memory_space<vmem>>, vector<1x256x256xbf16>
    %7 = vector.shape_cast %6 : vector<1x256x256xbf16> to vector<256x256xbf16>
    %cst = arith.constant dense<0.000000e+00> : vector<8x256xf32>
    %8 = tpu.matmul %5, %7, %cst {dimension_numbers = #tpu.dot_dimension_numbers<[1], [0], [0], [1], [0, 0, 1, 1], [], []>} : vector<8x256xbf16>, vector<256x256xbf16>, vector<8x256xf32> -> vector<8x256xf32>
    %9 = arith.addf %3, %8 : vector<8x256xf32>
    %c0_8 = arith.constant 0 : index
    %c0_9 = arith.constant 0 : index
    %10 = vector.load %arg8[%c0_8, %c0_9] : memref<8x256xf32, #tpu.memory_space<vmem>>, vector<8x256xf32>
    tpu.vector_store %arg8[%c0_8, %c0_9], %9 {strides = array<i32>} : memref<8x256xf32, #tpu.memory_space<vmem>>, vector<8x256xf32>,
    %c0_i32_10 = arith.constant 0 : i32
    %11 = arith.cmpi eq, %arg2, %c0_i32_10 : i32
    %12 = arith.extui %11 : i1 to i32
    %c0_i32_11 = arith.constant 0 : i32
    %13 = arith.cmpi ne, %12, %c0_i32_11 : i32
    scf.if %13 {
      %c0_12 = arith.constant 0 : index
      %c0_13 = arith.constant 0 : index
      %14 = vector.load %arg8[%c0_12, %c0_13] : memref<8x256xf32, #tpu.memory_space<vmem>>, vector<8x256xf32>
      %c0_14 = arith.constant 0 : index
      %c0_15 = arith.constant 0 : index
      %15 = vector.load %arg5[%c0_14, %c0_15] : memref<1x256xf32, #tpu.memory_space<vmem>>, vector<1x256xf32>
      %16 = vector.broadcast %15 : vector<1x256xf32> to vector<8x256xf32>
      %17 = arith.mulf %14, %16 : vector<8x256xf32>
      %c0_16 = arith.constant 0 : index
      %c0_17 = arith.constant 0 : index
      %18 = vector.load %arg6[%c0_16, %c0_17] : memref<1x256xf32, #tpu.memory_space<vmem>>, vector<1x256xf32>
      %19 = vector.broadcast %18 : vector<1x256xf32> to vector<8x256xf32>
      %20 = arith.addf %17, %19 : vector<8x256xf32>
      %21 = arith.truncf %20 : vector<8x256xf32> to vector<8x256xbf16>
      %c0_18 = arith.constant 0 : index
      %c0_19 = arith.constant 0 : index
      %22 = vector.load %arg7[%c0_18, %c0_19] : memref<8x256xbf16, #tpu.memory_space<vmem>>, vector<8x256xbf16>
      tpu.vector_store %arg7[%c0_18, %c0_19], %21 {strides = array<i32>} : memref<8x256xbf16, #tpu.memory_space<vmem>>, vector<8x256xbf16>,
    } else {
    }
    return
  }
  func.func @transform_0(%arg0: i32, %arg1: i32, %arg2: i32) -> (i32, i32, i32) {
    %c0_i32 = arith.constant 0 : i32
    %c0_i32_0 = arith.constant 0 : i32
    return %arg2, %arg0, %c0_i32 : i32, i32, i32
  }
  func.func @transform_1(%arg0: i32, %arg1: i32, %arg2: i32) -> (i32, i32, i32) {
    %c0_i32 = arith.constant 0 : i32
    %c0_i32_0 = arith.constant 0 : i32
    return %arg2, %c0_i32, %arg1 : i32, i32, i32
  }
  func.func @transform_2(%arg0: i32, %arg1: i32, %arg2: i32) -> (i32, i32) {
    %c0_i32 = arith.constant 0 : i32
    %c0_i32_0 = arith.constant 0 : i32
    return %c0_i32, %arg1 : i32, i32
  }
  func.func @transform_3(%arg0: i32, %arg1: i32, %arg2: i32) -> (i32, i32) {
    %c0_i32 = arith.constant 0 : i32
    %c0_i32_0 = arith.constant 0 : i32
    return %c0_i32, %arg1 : i32, i32
  }
  func.func @transform_4(%arg0: i32, %arg1: i32, %arg2: i32) -> (i32, i32) {
    %c0_i32 = arith.constant 0 : i32
    return %arg0, %arg1 : i32, i32
  }
}

module attributes {stable_mosaic.version = 11 : i64} {
  func.func @_avgpool_kernel(%arg0: i32, %arg1: memref<1x1x512xbf16, #tpu.memory_space<vmem>>, %arg2: memref<1x1x512xf32, #tpu.memory_space<vmem>>) attributes {dimension_semantics = [#tpu.dimension_semantics<parallel>], iteration_bounds = array<i64: 2>, scalar_prefetch = 0 : i64, scratch_operands = 0 : i64, tpu.core_type = #tpu.core_type<tc>, window_params = [{transform_indices = @transform_0, window_bounds = array<i64: 1, 1, 512>}, {transform_indices = @transform_1, window_bounds = array<i64: 1, 1, 512>}]} {
    %c0 = arith.constant 0 : index
    %c0_0 = arith.constant 0 : index
    %c0_1 = arith.constant 0 : index
    %0 = vector.load %arg1[%c0, %c0_0, %c0_1] : memref<1x1x512xbf16, #tpu.memory_space<vmem>>, vector<1x1x512xbf16>
    %1 = arith.extf %0 : vector<1x1x512xbf16> to vector<1x1x512xf32>
    %cst = arith.constant dense<0.000000e+00> : vector<1x512xf32>
    %2 = vector.multi_reduction <add>, %1, %cst [1] : vector<1x1x512xf32> to vector<1x512xf32>
    %3 = vector.shape_cast %2 : vector<1x512xf32> to vector<1x1x512xf32>
    %cst_2 = arith.constant 1.000000e+00 : f32
    %4 = vector.broadcast %cst_2 : f32 to vector<1x1x512xf32>
    %5 = arith.divf %3, %4 : vector<1x1x512xf32>
    %c0_3 = arith.constant 0 : index
    %c0_4 = arith.constant 0 : index
    %c0_5 = arith.constant 0 : index
    %6 = vector.load %arg2[%c0_3, %c0_4, %c0_5] : memref<1x1x512xf32, #tpu.memory_space<vmem>>, vector<1x1x512xf32>
    tpu.vector_store %arg2[%c0_3, %c0_4, %c0_5], %5 {strides = array<i32>} : memref<1x1x512xf32, #tpu.memory_space<vmem>>, vector<1x1x512xf32>,
    return
  }
  func.func @transform_0(%arg0: i32) -> (i32, i32, i32) {
    %c0_i32 = arith.constant 0 : i32
    %c0_i32_0 = arith.constant 0 : i32
    %c0_i32_1 = arith.constant 0 : i32
    return %arg0, %c0_i32, %c0_i32_0 : i32, i32, i32
  }
  func.func @transform_1(%arg0: i32) -> (i32, i32, i32) {
    %c0_i32 = arith.constant 0 : i32
    %c0_i32_0 = arith.constant 0 : i32
    %c0_i32_1 = arith.constant 0 : i32
    return %arg0, %c0_i32, %c0_i32_0 : i32, i32, i32
  }
}

module attributes {stable_mosaic.version = 11 : i64} {
  func.func @_fused_mm_kernel(%arg0: i32, %arg1: i32, %arg2: i32, %arg3: memref<1x8x512xbf16, #tpu.memory_space<vmem>>, %arg4: memref<1x512x256xbf16, #tpu.memory_space<vmem>>, %arg5: memref<1x256xf32, #tpu.memory_space<vmem>>, %arg6: memref<1x256xf32, #tpu.memory_space<vmem>>, %arg7: memref<8x256xbf16, #tpu.memory_space<vmem>>, %arg8: memref<8x256xf32, #tpu.memory_space<vmem>>) attributes {dimension_semantics = [#tpu.dimension_semantics<parallel>, #tpu.dimension_semantics<parallel>, #tpu.dimension_semantics<arbitrary>], iteration_bounds = array<i64: 1, 2, 1>, scalar_prefetch = 0 : i64, scratch_operands = 1 : i64, tpu.core_type = #tpu.core_type<tc>, window_params = [{transform_indices = @transform_0, window_bounds = array<i64: 1, 8, 512>}, {transform_indices = @transform_1, window_bounds = array<i64: 1, 512, 256>}, {transform_indices = @transform_2, window_bounds = array<i64: 1, 256>}, {transform_indices = @transform_3, window_bounds = array<i64: 1, 256>}, {transform_indices = @transform_4, window_bounds = array<i64: 8, 256>}]} {
    %c0_i32 = arith.constant 0 : i32
    %0 = arith.cmpi eq, %arg2, %c0_i32 : i32
    %1 = arith.extui %0 : i1 to i32
    %c0_i32_0 = arith.constant 0 : i32
    %2 = arith.cmpi ne, %1, %c0_i32_0 : i32
    scf.if %2 {
      %cst_12 = arith.constant 0.000000e+00 : f32
      %14 = vector.broadcast %cst_12 : f32 to vector<8x256xf32>
      %c0_13 = arith.constant 0 : index
      %c0_14 = arith.constant 0 : index
      %15 = vector.load %arg8[%c0_13, %c0_14] : memref<8x256xf32, #tpu.memory_space<vmem>>, vector<8x256xf32>
      tpu.vector_store %arg8[%c0_13, %c0_14], %14 {strides = array<i32>} : memref<8x256xf32, #tpu.memory_space<vmem>>, vector<8x256xf32>,
    } else {
    }
    %c0 = arith.constant 0 : index
    %c0_1 = arith.constant 0 : index
    %3 = vector.load %arg8[%c0, %c0_1] : memref<8x256xf32, #tpu.memory_space<vmem>>, vector<8x256xf32>
    %c0_2 = arith.constant 0 : index
    %c0_3 = arith.constant 0 : index
    %c0_4 = arith.constant 0 : index
    %4 = vector.load %arg3[%c0_2, %c0_3, %c0_4] : memref<1x8x512xbf16, #tpu.memory_space<vmem>>, vector<1x8x512xbf16>
    %5 = vector.shape_cast %4 : vector<1x8x512xbf16> to vector<8x512xbf16>
    %c0_5 = arith.constant 0 : index
    %c0_6 = arith.constant 0 : index
    %c0_7 = arith.constant 0 : index
    %6 = vector.load %arg4[%c0_5, %c0_6, %c0_7] : memref<1x512x256xbf16, #tpu.memory_space<vmem>>, vector<1x512x256xbf16>
    %7 = vector.shape_cast %6 : vector<1x512x256xbf16> to vector<512x256xbf16>
    %cst = arith.constant dense<0.000000e+00> : vector<8x256xf32>
    %8 = tpu.matmul %5, %7, %cst {dimension_numbers = #tpu.dot_dimension_numbers<[1], [0], [0], [1], [0, 0, 1, 1], [], []>} : vector<8x512xbf16>, vector<512x256xbf16>, vector<8x256xf32> -> vector<8x256xf32>
    %9 = arith.addf %3, %8 : vector<8x256xf32>
    %c0_8 = arith.constant 0 : index
    %c0_9 = arith.constant 0 : index
    %10 = vector.load %arg8[%c0_8, %c0_9] : memref<8x256xf32, #tpu.memory_space<vmem>>, vector<8x256xf32>
    tpu.vector_store %arg8[%c0_8, %c0_9], %9 {strides = array<i32>} : memref<8x256xf32, #tpu.memory_space<vmem>>, vector<8x256xf32>,
    %c0_i32_10 = arith.constant 0 : i32
    %11 = arith.cmpi eq, %arg2, %c0_i32_10 : i32
    %12 = arith.extui %11 : i1 to i32
    %c0_i32_11 = arith.constant 0 : i32
    %13 = arith.cmpi ne, %12, %c0_i32_11 : i32
    scf.if %13 {
      %c0_12 = arith.constant 0 : index
      %c0_13 = arith.constant 0 : index
      %14 = vector.load %arg8[%c0_12, %c0_13] : memref<8x256xf32, #tpu.memory_space<vmem>>, vector<8x256xf32>
      %c0_14 = arith.constant 0 : index
      %c0_15 = arith.constant 0 : index
      %15 = vector.load %arg5[%c0_14, %c0_15] : memref<1x256xf32, #tpu.memory_space<vmem>>, vector<1x256xf32>
      %16 = vector.broadcast %15 : vector<1x256xf32> to vector<8x256xf32>
      %17 = arith.mulf %14, %16 : vector<8x256xf32>
      %c0_16 = arith.constant 0 : index
      %c0_17 = arith.constant 0 : index
      %18 = vector.load %arg6[%c0_16, %c0_17] : memref<1x256xf32, #tpu.memory_space<vmem>>, vector<1x256xf32>
      %19 = vector.broadcast %18 : vector<1x256xf32> to vector<8x256xf32>
      %20 = arith.addf %17, %19 : vector<8x256xf32>
      %cst_18 = arith.constant 0.000000e+00 : f32
      %21 = vector.broadcast %cst_18 : f32 to vector<8x256xf32>
      %22 = arith.maximumf %20, %21 : vector<8x256xf32>
      %23 = arith.truncf %22 : vector<8x256xf32> to vector<8x256xbf16>
      %c0_19 = arith.constant 0 : index
      %c0_20 = arith.constant 0 : index
      %24 = vector.load %arg7[%c0_19, %c0_20] : memref<8x256xbf16, #tpu.memory_space<vmem>>, vector<8x256xbf16>
      tpu.vector_store %arg7[%c0_19, %c0_20], %23 {strides = array<i32>} : memref<8x256xbf16, #tpu.memory_space<vmem>>, vector<8x256xbf16>,
    } else {
    }
    return
  }
  func.func @transform_0(%arg0: i32, %arg1: i32, %arg2: i32) -> (i32, i32, i32) {
    %c0_i32 = arith.constant 0 : i32
    %c0_i32_0 = arith.constant 0 : i32
    return %arg2, %arg0, %c0_i32 : i32, i32, i32
  }
  func.func @transform_1(%arg0: i32, %arg1: i32, %arg2: i32) -> (i32, i32, i32) {
    %c0_i32 = arith.constant 0 : i32
    %c0_i32_0 = arith.constant 0 : i32
    return %arg2, %c0_i32, %arg1 : i32, i32, i32
  }
  func.func @transform_2(%arg0: i32, %arg1: i32, %arg2: i32) -> (i32, i32) {
    %c0_i32 = arith.constant 0 : i32
    %c0_i32_0 = arith.constant 0 : i32
    return %c0_i32, %arg1 : i32, i32
  }
  func.func @transform_3(%arg0: i32, %arg1: i32, %arg2: i32) -> (i32, i32) {
    %c0_i32 = arith.constant 0 : i32
    %c0_i32_0 = arith.constant 0 : i32
    return %c0_i32, %arg1 : i32, i32
  }
  func.func @transform_4(%arg0: i32, %arg1: i32, %arg2: i32) -> (i32, i32) {
    %c0_i32 = arith.constant 0 : i32
    return %arg0, %arg1 : i32, i32
  }
}

module attributes {stable_mosaic.version = 11 : i64} {
  func.func @_fused_mm_kernel(%arg0: i32, %arg1: i32, %arg2: i32, %arg3: memref<1x8x512xbf16, #tpu.memory_space<vmem>>, %arg4: memref<1x512x128xbf16, #tpu.memory_space<vmem>>, %arg5: memref<1x128xf32, #tpu.memory_space<vmem>>, %arg6: memref<1x128xf32, #tpu.memory_space<vmem>>, %arg7: memref<8x128xf32, #tpu.memory_space<vmem>>, %arg8: memref<8x128xf32, #tpu.memory_space<vmem>>) attributes {dimension_semantics = [#tpu.dimension_semantics<parallel>, #tpu.dimension_semantics<parallel>, #tpu.dimension_semantics<arbitrary>], iteration_bounds = array<i64: 1, 1, 1>, scalar_prefetch = 0 : i64, scratch_operands = 1 : i64, tpu.core_type = #tpu.core_type<tc>, window_params = [{transform_indices = @transform_0, window_bounds = array<i64: 1, 8, 512>}, {transform_indices = @transform_1, window_bounds = array<i64: 1, 512, 128>}, {transform_indices = @transform_2, window_bounds = array<i64: 1, 128>}, {transform_indices = @transform_3, window_bounds = array<i64: 1, 128>}, {transform_indices = @transform_4, window_bounds = array<i64: 8, 128>}]} {
    %c0_i32 = arith.constant 0 : i32
    %0 = arith.cmpi eq, %arg2, %c0_i32 : i32
    %1 = arith.extui %0 : i1 to i32
    %c0_i32_0 = arith.constant 0 : i32
    %2 = arith.cmpi ne, %1, %c0_i32_0 : i32
    scf.if %2 {
      %cst_12 = arith.constant 0.000000e+00 : f32
      %14 = vector.broadcast %cst_12 : f32 to vector<8x128xf32>
      %c0_13 = arith.constant 0 : index
      %c0_14 = arith.constant 0 : index
      %15 = vector.load %arg8[%c0_13, %c0_14] : memref<8x128xf32, #tpu.memory_space<vmem>>, vector<8x128xf32>
      tpu.vector_store %arg8[%c0_13, %c0_14], %14 {strides = array<i32>} : memref<8x128xf32, #tpu.memory_space<vmem>>, vector<8x128xf32>,
    } else {
    }
    %c0 = arith.constant 0 : index
    %c0_1 = arith.constant 0 : index
    %3 = vector.load %arg8[%c0, %c0_1] : memref<8x128xf32, #tpu.memory_space<vmem>>, vector<8x128xf32>
    %c0_2 = arith.constant 0 : index
    %c0_3 = arith.constant 0 : index
    %c0_4 = arith.constant 0 : index
    %4 = vector.load %arg3[%c0_2, %c0_3, %c0_4] : memref<1x8x512xbf16, #tpu.memory_space<vmem>>, vector<1x8x512xbf16>
    %5 = vector.shape_cast %4 : vector<1x8x512xbf16> to vector<8x512xbf16>
    %c0_5 = arith.constant 0 : index
    %c0_6 = arith.constant 0 : index
    %c0_7 = arith.constant 0 : index
    %6 = vector.load %arg4[%c0_5, %c0_6, %c0_7] : memref<1x512x128xbf16, #tpu.memory_space<vmem>>, vector<1x512x128xbf16>
    %7 = vector.shape_cast %6 : vector<1x512x128xbf16> to vector<512x128xbf16>
    %cst = arith.constant dense<0.000000e+00> : vector<8x128xf32>
    %8 = tpu.matmul %5, %7, %cst {dimension_numbers = #tpu.dot_dimension_numbers<[1], [0], [0], [1], [0, 0, 1, 1], [], []>} : vector<8x512xbf16>, vector<512x128xbf16>, vector<8x128xf32> -> vector<8x128xf32>
    %9 = arith.addf %3, %8 : vector<8x128xf32>
    %c0_8 = arith.constant 0 : index
    %c0_9 = arith.constant 0 : index
    %10 = vector.load %arg8[%c0_8, %c0_9] : memref<8x128xf32, #tpu.memory_space<vmem>>, vector<8x128xf32>
    tpu.vector_store %arg8[%c0_8, %c0_9], %9 {strides = array<i32>} : memref<8x128xf32, #tpu.memory_space<vmem>>, vector<8x128xf32>,
    %c0_i32_10 = arith.constant 0 : i32
    %11 = arith.cmpi eq, %arg2, %c0_i32_10 : i32
    %12 = arith.extui %11 : i1 to i32
    %c0_i32_11 = arith.constant 0 : i32
    %13 = arith.cmpi ne, %12, %c0_i32_11 : i32
    scf.if %13 {
      %c0_12 = arith.constant 0 : index
      %c0_13 = arith.constant 0 : index
      %14 = vector.load %arg8[%c0_12, %c0_13] : memref<8x128xf32, #tpu.memory_space<vmem>>, vector<8x128xf32>
      %c0_14 = arith.constant 0 : index
      %c0_15 = arith.constant 0 : index
      %15 = vector.load %arg5[%c0_14, %c0_15] : memref<1x128xf32, #tpu.memory_space<vmem>>, vector<1x128xf32>
      %16 = vector.broadcast %15 : vector<1x128xf32> to vector<8x128xf32>
      %17 = arith.mulf %14, %16 : vector<8x128xf32>
      %c0_16 = arith.constant 0 : index
      %c0_17 = arith.constant 0 : index
      %18 = vector.load %arg6[%c0_16, %c0_17] : memref<1x128xf32, #tpu.memory_space<vmem>>, vector<1x128xf32>
      %19 = vector.broadcast %18 : vector<1x128xf32> to vector<8x128xf32>
      %20 = arith.addf %17, %19 : vector<8x128xf32>
      %c0_18 = arith.constant 0 : index
      %c0_19 = arith.constant 0 : index
      %21 = vector.load %arg7[%c0_18, %c0_19] : memref<8x128xf32, #tpu.memory_space<vmem>>, vector<8x128xf32>
      tpu.vector_store %arg7[%c0_18, %c0_19], %20 {strides = array<i32>} : memref<8x128xf32, #tpu.memory_space<vmem>>, vector<8x128xf32>,
    } else {
    }
    return
  }
  func.func @transform_0(%arg0: i32, %arg1: i32, %arg2: i32) -> (i32, i32, i32) {
    %c0_i32 = arith.constant 0 : i32
    %c0_i32_0 = arith.constant 0 : i32
    return %arg2, %arg0, %c0_i32 : i32, i32, i32
  }
  func.func @transform_1(%arg0: i32, %arg1: i32, %arg2: i32) -> (i32, i32, i32) {
    %c0_i32 = arith.constant 0 : i32
    %c0_i32_0 = arith.constant 0 : i32
    return %arg2, %c0_i32, %arg1 : i32, i32, i32
  }
  func.func @transform_2(%arg0: i32, %arg1: i32, %arg2: i32) -> (i32, i32) {
    %c0_i32 = arith.constant 0 : i32
    %c0_i32_0 = arith.constant 0 : i32
    return %c0_i32, %arg1 : i32, i32
  }
  func.func @transform_3(%arg0: i32, %arg1: i32, %arg2: i32) -> (i32, i32) {
    %c0_i32 = arith.constant 0 : i32
    %c0_i32_0 = arith.constant 0 : i32
    return %c0_i32, %arg1 : i32, i32
  }
  func.func @transform_4(%arg0: i32, %arg1: i32, %arg2: i32) -> (i32, i32) {
    %c0_i32 = arith.constant 0 : i32
    return %arg0, %arg1 : i32, i32
  }
}

</mosaic_0001>

<bundles_post_ra>
// kernel: forward.27
= control target key start
LH: loop header
LB: loop body
LE: loop exit
PB: predicated region body
PF: predicated region fallthrough
CT: control target
= control target key end

     0   :  { %s1111_s18 = smov 0   ;;  %s1113_s19 = smov 0   ;;  %s1336_s0 = inlined_call_operand.vmem [shape: bf16[9,128,64], index: 0, kind: input, shape index: {}]   ;;  %s1337_s1 = inlined_call_operand.vmem [shape: bf16[9,64,64], index: 1, kind: input, shape index: {}]   ;;  %s1338_s2 = inlined_call_operand.vmem [shape: f32[1,64], index: 2, kind: input, shape index: {}]   ;;  %s1339_s3 = inlined_call_operand.vmem [shape: f32[1,64], index: 3, kind: input, shape index: {}]   ;;  %s1340_s4 = inlined_call_operand.vmem [shape: bf16[128,64], index: 4, kind: input, shape index: {}]   ;;  %s1341_s5 = inlined_call_operand.vmem [shape: bf16[128,64], index: 5, kind: output, shape index: {}]  }
   0x1   :  { %s1115_s20 = smov 0  }
   0x2 LB: > { %s27_s21 = sadd.s32 1, %s1074_s19  ;;  %p897_p0 = scmp.ge.s32.totalorder %s1078_s20, 1  ;;  %s1078_s20 = sphi %s1115_s20, %s15_s20   ;;  %s1074_s19 = sphi %s1113_s19, %s1343_s19   ;;  %s1070_s18 = sphi %s1111_s18, %s1342_s18  }
   0x3   : > { %p28_p1 = scmp.ge.s32.totalorder %s27_s21, 9  ;;  %p262_p2 = scmp.lt.s32.totalorder %s1078_s20, 10 }
   0x5   : > { %s1345_s21 = smov (%p28_p1, %s27_s21), 0  ;;  %p263_p3 = pnand %p897_p0, %p262_p2 }
   0x6   : > { %p320_p4 = scmp.lt.s32.totalorder (!%p263_p3), %s1070_s18, 8  ;;  %p902_p5 = scmp.ne.s32.totalorder (!%p263_p3), %s1070_s18, 0 }
   0x7   : > { %266 = sbr.rel (%p263_p3) target bundleno = 245 (0xf5), region = 40 }
   0xc   : > { %s321_s22 = scalar_select %p320_p4, %s1070_s18, 8 }
   0xd   : > { %365 = sbr.rel (%p902_p5) target bundleno = 35 (0x23), region = 44 }
   0xe   : > { %s964_s23 = sshll.u32 %s321_s22, 6  ;;  %s965_s24 = sshll.u32 %s321_s22, 5 }
   0xf   : > { %s1136_s27 = scalar_lea.vmem %s1336_s0, %s964_s23  ;;  %s1141_s30 = scalar_lea.vmem %s1337_s1, %s965_s24 }
  0x12   : > { %vm366_vm0 = vcmask 523264   ;;  %v1080_v0 = vmov 0.0  }
  0x13   : > { %367 = vst.msk [vmem:[#allocation2] sm:$0xff] %vm366_vm0, %v1080_v0 }
  0x14   : > { %368 = vst.msk [vmem:[#allocation2 + $0x8] sm:$0xff] %vm366_vm0, %v1080_v0 }
  0x15   : > { %369 = vst.msk [vmem:[#allocation2 + $0x10] sm:$0xff] %vm366_vm0, %v1080_v0 }
  0x16   : > { %370 = vst.msk [vmem:[#allocation2 + $0x18] sm:$0xff] %vm366_vm0, %v1080_v0 }
  0x17   : > { %371 = vst.msk [vmem:[#allocation2 + $0x20] sm:$0xff] %vm366_vm0, %v1080_v0 }
  0x18   : > { %372 = vst.msk [vmem:[#allocation2 + $0x28] sm:$0xff] %vm366_vm0, %v1080_v0 }
  0x19   : > { %373 = vst.msk [vmem:[#allocation2 + $0x30] sm:$0xff] %vm366_vm0, %v1080_v0 }
  0x1a   : > { %374 = vst.msk [vmem:[#allocation2 + $0x38] sm:$0xff] %vm366_vm0, %v1080_v0 }
  0x1b   : > { %375 = vst.msk [vmem:[#allocation2 + $0x40] sm:$0xff] %vm366_vm0, %v1080_v0 }
  0x1c   : > { %376 = vst.msk [vmem:[#allocation2 + $0x48] sm:$0xff] %vm366_vm0, %v1080_v0 }
  0x1d   : > { %377 = vst.msk [vmem:[#allocation2 + $0x50] sm:$0xff] %vm366_vm0, %v1080_v0 }
  0x1e   : > { %378 = vst.msk [vmem:[#allocation2 + $0x58] sm:$0xff] %vm366_vm0, %v1080_v0 }
  0x1f   : > { %379 = vst.msk [vmem:[#allocation2 + $0x60] sm:$0xff] %vm366_vm0, %v1080_v0 }
  0x20   : > { %380 = vst.msk [vmem:[#allocation2 + $0x68] sm:$0xff] %vm366_vm0, %v1080_v0 }
  0x21   : > { %381 = vst.msk [vmem:[#allocation2 + $0x70] sm:$0xff] %vm366_vm0, %v1080_v0 }
  0x22   : > { %382 = vst.msk [vmem:[#allocation2 + $0x78] sm:$0xff] %vm366_vm0, %v1080_v0 }
  0x23 PF: > { %v977_v1 = vld [vmem:[%s1141_s30 + $0x18] sm:$0xff]  ;;  %v976_v2 = vld [vmem:[%s1141_s30 + $0x10] sm:$0xff]  ;;  %v975_v3 = vld [vmem:[%s1141_s30 + $0x8] sm:$0xff]  ;;  %vm487_vm1 = vcmask 523264   ;;  %p959_p6 = scmp.ne.s32.totalorder %s1070_s18, 8 }
  0x24   : > { %516 = vmatpush.bf16.msra.mxu0 %v977_v1  ;;  %1017 = vmatpush.bf16.msra.mxu1 %v977_v1  ;;  %v974_v4 = vld [vmem:[%s1141_s30] sm:$0xff]  ;;  %v968_v6 = vld [vmem:[%s1136_s27 + $0x10] sm:$0xff]  ;;  %v967_v9 = vld [vmem:[%s1136_s27 + $0x8] sm:$0xff] }
  0x25   : > { %1018 = vmatpush.bf16.msra.mxu2 %v977_v1  ;;  %1019 = vmatpush.bf16.msra.mxu3 %v977_v1  ;;  %v966_v5 = vld [vmem:[%s1136_s27] sm:$0xff]  ;;  %v972_v8 = vld [vmem:[%s1136_s27 + $0x30] sm:$0xff]  ;;  %v969_v10 = vld [vmem:[%s1136_s27 + $0x18] sm:$0xff] }
  0x26   : > { %v970_v7 = vld [vmem:[%s1136_s27 + $0x20] sm:$0xff]  ;;  %v971_v11 = vld [vmem:[%s1136_s27 + $0x28] sm:$0xff]  ;;  %v973_v12 = vld [vmem:[%s1136_s27 + $0x38] sm:$0xff] }
  0x27   : > { %v383_v13 = vld [vmem:[#allocation2] sm:$0xff]  ;;  %v384_v21 = vld [vmem:[#allocation2 + $0x8] sm:$0xff]  ;;  %v385_v33 = vld [vmem:[#allocation2 + $0x10] sm:$0xff] }
  0x28   : > { %517 = vmatpush.bf16.msra.mxu0 %v976_v2  ;;  %1020 = vmatpush.bf16.msra.mxu1 %v976_v2  ;;  %v387_v14 = vld [vmem:[#allocation2 + $0x20] sm:$0xff]  ;;  %v388_v22 = vld [vmem:[#allocation2 + $0x28] sm:$0xff]  ;;  %v389_v34 = vld [vmem:[#allocation2 + $0x30] sm:$0xff] }
  0x29   : > { %1021 = vmatpush.bf16.msra.mxu2 %v976_v2  ;;  %1022 = vmatpush.bf16.msra.mxu3 %v976_v2  ;;  %v391_v19 = vld [vmem:[#allocation2 + $0x40] sm:$0xff]  ;;  %v392_v31 = vld [vmem:[#allocation2 + $0x48] sm:$0xff]  ;;  %v393_v43 = vld [vmem:[#allocation2 + $0x50] sm:$0xff] }
  0x2a   : > { %v395_v20 = vld [vmem:[#allocation2 + $0x60] sm:$0xff]  ;;  %v396_v32 = vld [vmem:[#allocation2 + $0x68] sm:$0xff]  ;;  %v397_v44 = vld [vmem:[#allocation2 + $0x70] sm:$0xff] }
  0x2b   : > { %v386_v45 = vld [vmem:[#allocation2 + $0x18] sm:$0xff] }
  0x2c   : > { %518 = vmatpush.bf16.msra.mxu0 %v975_v3  ;;  %1023 = vmatpush.bf16.msra.mxu1 %v975_v3  ;;  %v390_v46 = vld [vmem:[#allocation2 + $0x38] sm:$0xff] }
  0x2d   : > { %1024 = vmatpush.bf16.msra.mxu2 %v975_v3  ;;  %1025 = vmatpush.bf16.msra.mxu3 %v975_v3  ;;  %v394_v55 = vld [vmem:[#allocation2 + $0x58] sm:$0xff] }
  0x2e   : > { %v398_v56 = vld [vmem:[#allocation2 + $0x78] sm:$0xff] }
  0x30   : > { %519 = vmatpush.bf16.msra.mxu0 %v974_v4  ;;  %1026 = vmatpush.bf16.msra.mxu1 %v974_v4 }
  0x31   : > { %1027 = vmatpush.bf16.msra.mxu2 %v974_v4  ;;  %1028 = vmatpush.bf16.msra.mxu3 %v974_v4 }
  0x33   : > { %951 = vmatmul.msk.bf16.vlgmr.msra.gmra.mxu0 %vm487_vm1, %v966_v5  ;;  %953 = vmatmul.msk.bf16.vlgmr.msra.gmra.mxu1 %vm487_vm1, %v968_v6 }
  0x34   : > { %955 = vmatmul.msk.bf16.vlgmr.msra.gmra.mxu2 %vm487_vm1, %v970_v7  ;;  %957 = vmatmul.msk.bf16.vlgmr.msra.gmra.mxu3 %vm487_vm1, %v972_v8 }
  0x43   : > { %952 = vmatmul.msk.bf16.gmra.mxu0 %vm487_vm1, %v967_v9  ;;  %954 = vmatmul.msk.bf16.gmra.mxu1 %vm487_vm1, %v969_v10 }
  0x44   : > { %956 = vmatmul.msk.bf16.gmra.mxu2 %vm487_vm1, %v971_v11  ;;  %958 = vmatmul.msk.bf16.gmra.mxu3 %vm487_vm1, %v973_v12 }
  0xb0   : > { %v521_v15 = vpop.f32.mrf.mxu0  ;;  %v531_v16 = vpop.f32.mrf.mxu1 }
  0xb1   : > { %v561_v17 = vadd.f32 %v521_v15, %v383_v13  ;;  %v565_v18 = vadd.f32 %v531_v16, %v387_v14 }
  0xb3   : > { %577 = vst.msk [vmem:[#allocation2] sm:$0xff] %vm487_vm1, %v561_v17 }
  0xb4   : > { %581 = vst.msk [vmem:[#allocation2 + $0x20] sm:$0xff] %vm487_vm1, %v565_v18 }
  0xb7   : > { %v541_v23 = vpop.f32.mrf.mxu2  ;;  %v551_v24 = vpop.f32.mrf.mxu3 }
  0xb8   : > { %v569_v25 = vadd.f32 %v541_v23, %v391_v19  ;;  %v573_v26 = vadd.f32 %v551_v24, %v395_v20  ;;  %v523_v27 = vpop.f32.mrf.mxu0  ;;  %v533_v28 = vpop.f32.mrf.mxu1 }
  0xb9   : > { %v562_v29 = vadd.f32 %v523_v27, %v384_v21  ;;  %v566_v30 = vadd.f32 %v533_v28, %v388_v22 }
  0xba   : > { %585 = vst.msk [vmem:[#allocation2 + $0x40] sm:$0xff] %vm487_vm1, %v569_v25 }
  0xbb   : > { %589 = vst.msk [vmem:[#allocation2 + $0x60] sm:$0xff] %vm487_vm1, %v573_v26 }
  0xbc   : > { %578 = vst.msk [vmem:[#allocation2 + $0x8] sm:$0xff] %vm487_vm1, %v562_v29 }
  0xbd   : > { %582 = vst.msk [vmem:[#allocation2 + $0x28] sm:$0xff] %vm487_vm1, %v566_v30 }
  0xbf   : > { %v543_v35 = vpop.f32.mrf.mxu2  ;;  %v553_v36 = vpop.f32.mrf.mxu3 }
  0xc0   : > { %v570_v37 = vadd.f32 %v543_v35, %v392_v31  ;;  %v574_v38 = vadd.f32 %v553_v36, %v396_v32  ;;  %v526_v39 = vpop.f32.mrf.mxu0  ;;  %v536_v40 = vpop.f32.mrf.mxu1 }
  0xc1   : > { %v563_v41 = vadd.f32 %v526_v39, %v385_v33  ;;  %v567_v42 = vadd.f32 %v536_v40, %v389_v34 }
  0xc2   : > { %586 = vst.msk [vmem:[#allocation2 + $0x48] sm:$0xff] %vm487_vm1, %v570_v37 }
  0xc3   : > { %590 = vst.msk [vmem:[#allocation2 + $0x68] sm:$0xff] %vm487_vm1, %v574_v38 }
  0xc4   : > { %579 = vst.msk [vmem:[#allocation2 + $0x10] sm:$0xff] %vm487_vm1, %v563_v41 }
  0xc5   : > { %583 = vst.msk [vmem:[#allocation2 + $0x30] sm:$0xff] %vm487_vm1, %v567_v42 }
  0xc7   : > { %v546_v47 = vpop.f32.mrf.mxu2  ;;  %v556_v48 = vpop.f32.mrf.mxu3 }
  0xc8   : > { %v571_v49 = vadd.f32 %v546_v47, %v393_v43  ;;  %v575_v50 = vadd.f32 %v556_v48, %v397_v44  ;;  %v528_v51 = vpop.f32.mrf.mxu0  ;;  %v538_v52 = vpop.f32.mrf.mxu1 }
  0xc9   : > { %v564_v53 = vadd.f32 %v528_v51, %v386_v45  ;;  %v568_v54 = vadd.f32 %v538_v52, %v390_v46 }
  0xca   : > { %587 = vst.msk [vmem:[#allocation2 + $0x50] sm:$0xff] %vm487_vm1, %v571_v49 }
  0xcb   : > { %591 = vst.msk [vmem:[#allocation2 + $0x70] sm:$0xff] %vm487_vm1, %v575_v50 }
  0xcc   : > { %580 = vst.msk [vmem:[#allocation2 + $0x18] sm:$0xff] %vm487_vm1, %v564_v53 }
  0xcd   : > { %584 = vst.msk [vmem:[#allocation2 + $0x38] sm:$0xff] %vm487_vm1, %v568_v54 }
  0xcf   : > { %v548_v57 = vpop.f32.mrf.mxu2  ;;  %v558_v58 = vpop.f32.mrf.mxu3  ;;  %596 = sbr.rel (%p959_p6) target bundleno = 245 (0xf5), region = 48 }
  0xd0   : > { %v572_v59 = vadd.f32 %v548_v57, %v394_v55  ;;  %v576_v60 = vadd.f32 %v558_v58, %v398_v56 }
  0xd2   : > { %588 = vst.msk [vmem:[#allocation2 + $0x58] sm:$0xff] %vm487_vm1, %v572_v59 }
  0xd3   : > { %592 = vst.msk [vmem:[#allocation2 + $0x78] sm:$0xff] %vm487_vm1, %v576_v60 }
  0xd4   : > { %v597_v61 = vld [vmem:[#allocation2] sm:$0xff]  ;;  %vm733_vm2 = vcmask 519168   ;;  %v598_v3 = vld [vmem:[#allocation2 + $0x8] sm:$0xff]  ;;  %v599_v5 = vld [vmem:[#allocation2 + $0x10] sm:$0xff] }
  0xd5   : > { %v1200_v62 = vld [vmem:[%s1338_s2] ss:$0 sm:$0xff]  ;;  %v1010_v6 = vld [vmem:[%s1340_s4 + $0x8] sm:$0xff]   ;;  %v600_v10 = vld [vmem:[#allocation2 + $0x18] sm:$0xff] }
  0xd6   : > { %v1205_v63 = vld [vmem:[%s1339_s3] ss:$0 sm:$0xff]  ;;  %v617_v1 = vmul.f32 %v1200_v62, %v597_v61  ;;  %v618_v7 = vmul.f32 %v1200_v62, %v598_v3  ;;  %v619_v8 = vmul.f32 %v1200_v62, %v599_v5  ;;  %v984_v9 = vunpack.c.l.bf16 %v1010_v6  ;;  %v1011_v13 = vld [vmem:[%s1340_s4 + $0x10] sm:$0xff]   ;;  %v602_v18 = vld [vmem:[#allocation2 + $0x28] sm:$0xff] }
  0xd7   : > { %v979_v0 = vld [vmem:[%s1340_s4] sm:$0xff]   ;;  %v985_v11 = vunpack.c.h.bf16 %v1010_v6  ;;  %v620_v15 = vmul.f32 %v1200_v62, %v600_v10  ;;  %v988_v17 = vunpack.c.l.bf16 %v1011_v13  ;;  %v603_v19 = vld [vmem:[#allocation2 + $0x30] sm:$0xff]  ;;  %v1012_v20 = vld [vmem:[%s1340_s4 + $0x18] sm:$0xff]   ;;  %v622_v23 = vmul.f32 %v1200_v62, %v602_v18 }
  0xd8   : > { %v980_v2 = vunpack.c.l.bf16 %v979_v0  ;;  %v981_v4 = vunpack.c.h.bf16 %v979_v0  ;;  %v601_v12 = vld [vmem:[#allocation2 + $0x20] sm:$0xff]  ;;  %v637_v14 = vadd.f32 %v1205_v63, %v617_v1  ;;  %v638_v21 = vadd.f32 %v1205_v63, %v618_v7  ;;  %v604_v29 = vld [vmem:[#allocation2 + $0x38] sm:$0xff]  ;;  %v606_v48 = vld [vmem:[#allocation2 + $0x48] sm:$0xff] }
  0xd9   : > { %v621_v16 = vmul.f32 %v1200_v62, %v601_v12  ;;  %v639_v22 = vadd.f32 %v1205_v63, %v619_v8  ;;  %v989_v24 = vunpack.c.h.bf16 %v1011_v13  ;;  %v640_v26 = vadd.f32 %v1205_v63, %v620_v15  ;;  %v605_v46 = vld [vmem:[#allocation2 + $0x40] sm:$0xff]  ;;  %v607_v53 = vld [vmem:[#allocation2 + $0x50] sm:$0xff]  ;;  %v1014_v58 = vld [vmem:[%s1340_s4 + $0x28] sm:$0xff]  }
  0xda   : > { %v685_v25 = vadd.f32 %v980_v2, %v637_v14  ;;  %v623_v28 = vmul.f32 %v1200_v62, %v603_v19  ;;  %v686_v30 = vadd.f32 %v981_v4, %v638_v21  ;;  %v642_v32 = vadd.f32 %v1205_v63, %v622_v23  ;;  %v1013_v47 = vld [vmem:[%s1340_s4 + $0x20] sm:$0xff]   ;;  %v608_v59 = vld [vmem:[#allocation2 + $0x58] sm:$0xff]  ;;  %v1015_v7 = vld [vmem:[%s1340_s4 + $0x30] sm:$0xff]  }
  0xdb   : > { %v641_v27 = vadd.f32 %v1205_v63, %v621_v16  ;;  %v687_v31 = vadd.f32 %v984_v9, %v639_v22  ;;  %v992_v33 = vunpack.c.l.bf16 %v1012_v20  ;;  %v688_v35 = vadd.f32 %v985_v11, %v640_v26  ;;  %v609_v2 = vld [vmem:[#allocation2 + $0x60] sm:$0xff]  ;;  %v610_v12 = vld [vmem:[#allocation2 + $0x68] sm:$0xff]  ;;  %v611_v21 = vld [vmem:[#allocation2 + $0x70] sm:$0xff] }
  0xdc   : > { %v701_v34 = vmax.f32 %v685_v25, 0.0  ;;  %v643_v37 = vadd.f32 %v1205_v63, %v623_v28  ;;  %v702_v38 = vmax.f32 %v686_v30, 0.0  ;;  %v690_v40 = vadd.f32 %v989_v24, %v642_v32  ;;  %v1016_v26 = vld [vmem:[%s1340_s4 + $0x38] sm:$0xff]  }
  0xdd   : > { %v689_v36 = vadd.f32 %v988_v17, %v641_v27  ;;  %v703_v39 = vmax.f32 %v687_v31, 0.0  ;;  %v624_v41 = vmul.f32 %v1200_v62, %v604_v29  ;;  %v704_v43 = vmax.f32 %v688_v35, 0.0  ;;  %v612_v35 = vld [vmem:[#allocation2 + $0x78] sm:$0xff] }
  0xde   : > { %v717_v42 = vpack.c.bf16 %v701_v34, %v701_v34  ;;  %v691_v45 = vadd.f32 %v992_v33, %v643_v37  ;;  %v718_v49 = vpack.c.bf16 %v702_v38, %v702_v38  ;;  %v706_v51 = vmax.f32 %v690_v40, 0.0 }
  0xdf   : > { %v705_v44 = vmax.f32 %v689_v36, 0.0  ;;  %v719_v50 = vpack.c.bf16 %v703_v39, %v703_v39  ;;  %v644_v52 = vadd.f32 %v1205_v63, %v624_v41  ;;  %v720_v54 = vpack.c.bf16 %v704_v43, %v704_v43 }
  0xe0   : > { %734 = vst.msk [vmem:[%s1341_s5] sm:$0xf] %vm733_vm2, %v717_v42  ;;  %v707_v56 = vmax.f32 %v691_v45, 0.0  ;;  %v993_v57 = vunpack.c.h.bf16 %v1012_v20  ;;  %v722_v60 = vpack.c.bf16 %v706_v51, %v706_v51  ;;  %v625_v61 = vmul.f32 %v1200_v62, %v605_v46 }
  0xe1   : > { %v721_v55 = vpack.c.bf16 %v705_v44, %v705_v44  ;;  %735 = vst.msk [vmem:[%s1341_s5 + $0x4] sm:$0xf] %vm733_vm2, %v718_v49  ;;  %v996_v0 = vunpack.c.l.bf16 %v1013_v47  ;;  %v626_v1 = vmul.f32 %v1200_v62, %v606_v48  ;;  %v997_v5 = vunpack.c.h.bf16 %v1013_v47 }
  0xe2   : > { %736 = vst.msk [vmem:[%s1341_s5 + $0x8] sm:$0xf] %vm733_vm2, %v719_v50  ;;  %v723_v3 = vpack.c.bf16 %v707_v56, %v707_v56  ;;  %v692_v4 = vadd.f32 %v993_v57, %v644_v52  ;;  %v627_v6 = vmul.f32 %v1200_v62, %v607_v53  ;;  %v645_v8 = vadd.f32 %v1205_v63, %v625_v61 }
  0xe3   : > { %737 = vst.msk [vmem:[%s1341_s5 + $0xc] sm:$0xf] %vm733_vm2, %v720_v54  ;;  %v646_v9 = vadd.f32 %v1205_v63, %v626_v1  ;;  %v1000_v10 = vunpack.c.l.bf16 %v1014_v58  ;;  %v628_v11 = vmul.f32 %v1200_v62, %v608_v59  ;;  %v1001_v15 = vunpack.c.h.bf16 %v1014_v58 }
  0xe4   : > { %738 = vst.msk [vmem:[%s1341_s5 + $0x10] sm:$0xf] %vm733_vm2, %v721_v55  ;;  %v708_v13 = vmax.f32 %v692_v4, 0.0  ;;  %v647_v14 = vadd.f32 %v1205_v63, %v627_v6  ;;  %v629_v16 = vmul.f32 %v1200_v62, %v609_v2  ;;  %v693_v17 = vadd.f32 %v996_v0, %v645_v8 }
  0xe5   : > { %739 = vst.msk [vmem:[%s1341_s5 + $0x14] sm:$0xf] %vm733_vm2, %v722_v60  ;;  %v694_v18 = vadd.f32 %v997_v5, %v646_v9  ;;  %v648_v19 = vadd.f32 %v1205_v63, %v628_v11  ;;  %v1004_v20 = vunpack.c.l.bf16 %v1015_v7  ;;  %v630_v25 = vmul.f32 %v1200_v62, %v610_v12 }
  0xe6   : > { %740 = vst.msk [vmem:[%s1341_s5 + $0x18] sm:$0xf] %vm733_vm2, %v723_v3  ;;  %v724_v22 = vpack.c.bf16 %v708_v13, %v708_v13  ;;  %v695_v23 = vadd.f32 %v1000_v10, %v647_v14  ;;  %v649_v24 = vadd.f32 %v1205_v63, %v629_v16  ;;  %v709_v27 = vmax.f32 %v693_v17, 0.0 }
  0xe7   : > { %v710_v28 = vmax.f32 %v694_v18, 0.0  ;;  %v696_v29 = vadd.f32 %v1001_v15, %v648_v19  ;;  %v1005_v30 = vunpack.c.h.bf16 %v1015_v7  ;;  %v650_v33 = vadd.f32 %v1205_v63, %v630_v25 }
  0xe8   : > { %741 = vst.msk [vmem:[%s1341_s5 + $0x1c] sm:$0xf] %vm733_vm2, %v724_v22  ;;  %v711_v31 = vmax.f32 %v695_v23, 0.0  ;;  %v697_v32 = vadd.f32 %v1004_v20, %v649_v24  ;;  %v631_v34 = vmul.f32 %v1200_v62, %v611_v21  ;;  %v725_v36 = vpack.c.bf16 %v709_v27, %v709_v27 }
  0xe9   : > { %v726_v37 = vpack.c.bf16 %v710_v28, %v710_v28  ;;  %v712_v38 = vmax.f32 %v696_v29, 0.0  ;;  %v1008_v39 = vunpack.c.l.bf16 %v1016_v26  ;;  %v698_v42 = vadd.f32 %v1005_v30, %v650_v33 }
  0xea   : > { %v727_v40 = vpack.c.bf16 %v711_v31, %v711_v31  ;;  %v713_v41 = vmax.f32 %v697_v32, 0.0  ;;  %v651_v43 = vadd.f32 %v1205_v63, %v631_v34  ;;  %742 = vst.msk [vmem:[%s1341_s5 + $0x20] sm:$0xf] %vm733_vm2, %v725_v36  ;;  %v632_v45 = vmul.f32 %v1200_v62, %v612_v35 }
  0xeb   : > { %v728_v44 = vpack.c.bf16 %v712_v38, %v712_v38  ;;  %v1009_v46 = vunpack.c.h.bf16 %v1016_v26  ;;  %743 = vst.msk [vmem:[%s1341_s5 + $0x24] sm:$0xf] %vm733_vm2, %v726_v37  ;;  %v714_v48 = vmax.f32 %v698_v42, 0.0 }
  0xec   : > { %v729_v47 = vpack.c.bf16 %v713_v41, %v713_v41  ;;  %v699_v49 = vadd.f32 %v1008_v39, %v651_v43  ;;  %744 = vst.msk [vmem:[%s1341_s5 + $0x28] sm:$0xf] %vm733_vm2, %v727_v40  ;;  %v652_v50 = vadd.f32 %v1205_v63, %v632_v45 }
  0xed   : > { %745 = vst.msk [vmem:[%s1341_s5 + $0x2c] sm:$0xf] %vm733_vm2, %v728_v44  ;;  %v730_v62 = vpack.c.bf16 %v714_v48, %v714_v48 }
  0xee   : > { %v715_v51 = vmax.f32 %v699_v49, 0.0  ;;  %746 = vst.msk [vmem:[%s1341_s5 + $0x30] sm:$0xf] %vm733_vm2, %v729_v47  ;;  %v700_v52 = vadd.f32 %v1009_v46, %v652_v50 }
  0xef   : > { %747 = vst.msk [vmem:[%s1341_s5 + $0x34] sm:$0xf] %vm733_vm2, %v730_v62 }
  0xf0   : > { %v731_v53 = vpack.c.bf16 %v715_v51, %v715_v51  ;;  %v716_v63 = vmax.f32 %v700_v52, 0.0 }
  0xf2   : > { %748 = vst.msk [vmem:[%s1341_s5 + $0x38] sm:$0xf] %vm733_vm2, %v731_v53  ;;  %v732_v54 = vpack.c.bf16 %v716_v63, %v716_v63 }
  0xf4   : > { %749 = vst.msk [vmem:[%s1341_s5 + $0x3c] sm:$0xf] %vm733_vm2, %v732_v54 }
  0xf5 PF: > { %s15_s20 = sadd.s32 1, %s1078_s20   ;;  %s1342_s18 = smov %s1074_s19 }
  0xf6   : > { %p12_p7 = scmp.ge.s32.totalorder %s15_s20, 11   ;;  %s1343_s19 = smov %s1345_s21 }
  0xf8   :  { %14 = sbr.rel (!%p12_p7) target bundleno = 2 (0x2), region = 90 }

// kernel: forward.24
= control target key start
LH: loop header
LB: loop body
LE: loop exit
PB: predicated region body
PF: predicated region fallthrough
CT: control target
= control target key end

     0   :  { %s1621_s15 = smov 0   ;;  %s1623_s16 = smov 0   ;;  %s1979_s0 = inlined_call_operand.vmem [shape: bf16[1,512,256], index: 0, kind: input, shape index: {}]   ;;  %s1980_s1 = inlined_call_operand.vmem [shape: bf16[1,256,64], index: 1, kind: input, shape index: {}]   ;;  %s1981_s2 = inlined_call_operand.vmem [shape: f32[1,64], index: 2, kind: input, shape index: {}]   ;;  %s1982_s3 = inlined_call_operand.vmem [shape: f32[1,64], index: 3, kind: input, shape index: {}]   ;;  %s1983_s4 = inlined_call_operand.vmem [shape: bf16[512,64], index: 4, kind: output, shape index: {}]  }
   0x1   :  { %s1625_s17 = smov 0  }
   0x2 LB: > { %s33_s18 = sadd.s32 1, %s1589_s16  ;;  %p1279_p0 = scmp.ge.s32.totalorder %s1593_s17, 1  ;;  %s1593_s17 = sphi %s1625_s17, %s14_s17   ;;  %s1589_s16 = sphi %s1623_s16, %s1985_s16   ;;  %s1585_s15 = sphi %s1621_s15, %s1984_s15  }
   0x3   : > { %p35_p1 = scmp.ge.s32.totalorder %s33_s18, 2  ;;  %p222_p2 = scmp.lt.s32.totalorder %s1593_s17, 3 }
   0x5   : > { %s1987_s18 = smov (%p35_p1, %s33_s18), 0  ;;  %p223_p3 = pnand %p1279_p0, %p222_p2 }
   0x6   : > { %s1280_s5 = sshll.u32 (!%p223_p3), %s1585_s15, 5 }
   0x7   : > { %226 = sbr.rel (%p223_p3) target bundleno = 319 (0x13f), region = 36  ;;  %p273_p4 = scmp.lt.s32.totalorder (!%p223_p3), %s1280_s5, 63 }
   0xc   : > { %v1519_v0 = vld [vmem:[%s1980_s1 + $0x38] sm:$0xff]  ;;  %v1518_v2 = vld [vmem:[%s1980_s1 + $0x30] sm:$0xff]  ;;  %v1517_v4 = vld [vmem:[%s1980_s1 + $0x28] sm:$0xff]  ;;  %s1989_s5 = smov (!%p273_p4, %s1280_s5), 63  ;;  %vm308_vm0 = vcmask 523264   ;;  %vm1107_vm1 = vcmask 519168  }
   0xd   : > { %v1527_v1 = vld [vmem:[%s1980_s1 + $0x78] sm:$0xff]  ;;  %693 = vmatpush.bf16.msra.mxu0 %v1519_v0  ;;  %1528 = vmatpush.bf16.msra.mxu2 %v1519_v0  ;;  %v1526_v3 = vld [vmem:[%s1980_s1 + $0x70] sm:$0xff]  ;;  %v1525_v5 = vld [vmem:[%s1980_s1 + $0x68] sm:$0xff]  ;;  %s1479_s21 = sshll.u32 %s1989_s5, 3  ;;  %s1284_s12 = sshll.u32 %s1989_s5, 2 }
   0xe   : > { %782 = vmatpush.bf16.msra.mxu1 %v1527_v1  ;;  %1536 = vmatpush.bf16.msra.mxu3 %v1527_v1  ;;  %v1516_v6 = vld [vmem:[%s1980_s1 + $0x20] sm:$0xff]  ;;  %v1515_v8 = vld [vmem:[%s1980_s1 + $0x18] sm:$0xff]  ;;  %v1514_v10 = vld [vmem:[%s1980_s1 + $0x10] sm:$0xff]  ;;  %s1687_s26 = scalar_lea.vmem %s1979_s0, %s1479_s21  ;;  %s1813_s15 = scalar_lea.vmem %s1983_s4, %s1284_s12 }
   0xf   : > { %v1524_v7 = vld [vmem:[%s1980_s1 + $0x60] sm:$0xff]  ;;  %v1523_v9 = vld [vmem:[%s1980_s1 + $0x58] sm:$0xff]  ;;  %v1522_v11 = vld [vmem:[%s1980_s1 + $0x50] sm:$0xff] }
  0x10   : > { %v1513_v12 = vld [vmem:[%s1980_s1 + $0x8] sm:$0xff]  ;;  %v1512_v14 = vld [vmem:[%s1980_s1] sm:$0xff]  ;;  %v1295_v28 = vld [vmem:[%s1687_s26 + $0x10] sm:$0xf] }
  0x11   : > { %694 = vmatpush.bf16.msra.mxu0 %v1518_v2  ;;  %1529 = vmatpush.bf16.msra.mxu2 %v1518_v2  ;;  %v1521_v13 = vld [vmem:[%s1980_s1 + $0x48] sm:$0xff]  ;;  %v1520_v15 = vld [vmem:[%s1980_s1 + $0x40] sm:$0xff]  ;;  %v1483_v29 = vld [vmem:[%s1687_s26 + $0x14] sm:$0xf0] }
  0x12   : > { %783 = vmatpush.bf16.msra.mxu1 %v1526_v3  ;;  %1537 = vmatpush.bf16.msra.mxu3 %v1526_v3  ;;  %v1287_v16 = vld [vmem:[%s1687_s26] sm:$0xf]  ;;  %v1481_v17 = vld [vmem:[%s1687_s26 + $0x4] sm:$0xf0]  ;;  %v1480_v20 = vld [vmem:[%s1687_s26 + $0x4] sm:$0xf]  ;;  %v1296_v36 = vor.u32 %v1483_v29, %v1295_v28 }
  0x13   : > { %v1351_v18 = vld [vmem:[%s1687_s26 + $0x80] sm:$0xf]  ;;  %v1497_v19 = vld [vmem:[%s1687_s26 + $0x84] sm:$0xf0]  ;;  %v1289_v21 = vld [vmem:[%s1687_s26 + $0x8] sm:$0xf0]  ;;  %v1288_v24 = vor.u32 %v1481_v17, %v1287_v16 }
  0x14   : > { %v1496_v22 = vld [vmem:[%s1687_s26 + $0x84] sm:$0xf]  ;;  %v1353_v23 = vld [vmem:[%s1687_s26 + $0x88] sm:$0xf0]  ;;  %v1352_v25 = vor.u32 %v1497_v19, %v1351_v18  ;;  %v1292_v26 = vor.u32 %v1480_v20, %v1289_v21  ;;  %v1359_v30 = vld [vmem:[%s1687_s26 + $0x90] sm:$0xf] }
  0x15   : > { %695 = vmatpush.bf16.msra.mxu0 %v1517_v4  ;;  %1530 = vmatpush.bf16.msra.mxu2 %v1517_v4  ;;  %v1356_v27 = vor.u32 %v1496_v22, %v1353_v23  ;;  %v1499_v31 = vld [vmem:[%s1687_s26 + $0x94] sm:$0xf0]  ;;  %v1482_v32 = vld [vmem:[%s1687_s26 + $0x14] sm:$0xf]  ;;  %v1297_v33 = vld [vmem:[%s1687_s26 + $0x18] sm:$0xf0] }
  0x16   : > { %784 = vmatpush.bf16.msra.mxu1 %v1525_v5  ;;  %1538 = vmatpush.bf16.msra.mxu3 %v1525_v5  ;;  %v1498_v34 = vld [vmem:[%s1687_s26 + $0x94] sm:$0xf]  ;;  %v1361_v35 = vld [vmem:[%s1687_s26 + $0x98] sm:$0xf0]  ;;  %v1360_v37 = vor.u32 %v1499_v31, %v1359_v30  ;;  %v1300_v38 = vor.u32 %v1482_v32, %v1297_v33  ;;  %v1303_v40 = vld [vmem:[%s1687_s26 + $0x20] sm:$0xf] }
  0x17   : > { %v1364_v39 = vor.u32 %v1498_v34, %v1361_v35  ;;  %v1485_v41 = vld [vmem:[%s1687_s26 + $0x24] sm:$0xf0]  ;;  %v1367_v42 = vld [vmem:[%s1687_s26 + $0xa0] sm:$0xf]  ;;  %v1484_v44 = vld [vmem:[%s1687_s26 + $0x24] sm:$0xf] }
  0x18   : > { %v1501_v43 = vld [vmem:[%s1687_s26 + $0xa4] sm:$0xf0]  ;;  %v1305_v45 = vld [vmem:[%s1687_s26 + $0x28] sm:$0xf0]  ;;  %v1500_v46 = vld [vmem:[%s1687_s26 + $0xa4] sm:$0xf]  ;;  %v1304_v48 = vor.u32 %v1485_v41, %v1303_v40 }
  0x19   : > { %696 = vmatpush.bf16.msra.mxu0 %v1516_v6  ;;  %1531 = vmatpush.bf16.msra.mxu2 %v1516_v6  ;;  %v1369_v47 = vld [vmem:[%s1687_s26 + $0xa8] sm:$0xf0]  ;;  %v1368_v49 = vor.u32 %v1501_v43, %v1367_v42  ;;  %v1308_v50 = vor.u32 %v1484_v44, %v1305_v45  ;;  %v1311_v52 = vld [vmem:[%s1687_s26 + $0x30] sm:$0xf]  ;;  %v1487_v53 = vld [vmem:[%s1687_s26 + $0x34] sm:$0xf0] }
  0x1a   : > { %785 = vmatpush.bf16.msra.mxu1 %v1524_v7  ;;  %1539 = vmatpush.bf16.msra.mxu3 %v1524_v7  ;;  %v1372_v51 = vor.u32 %v1500_v46, %v1369_v47  ;;  %v1375_v54 = vld [vmem:[%s1687_s26 + $0xb0] sm:$0xf]  ;;  %v1503_v55 = vld [vmem:[%s1687_s26 + $0xb4] sm:$0xf0]  ;;  %v1486_v56 = vld [vmem:[%s1687_s26 + $0x34] sm:$0xf]  ;;  %v1312_v60 = vor.u32 %v1487_v53, %v1311_v52 }
  0x1b   : > { %v1313_v57 = vld [vmem:[%s1687_s26 + $0x38] sm:$0xf0]  ;;  %v1502_v58 = vld [vmem:[%s1687_s26 + $0xb4] sm:$0xf]  ;;  %v1376_v61 = vor.u32 %v1503_v55, %v1375_v54  ;;  %v1319_v0 = vld [vmem:[%s1687_s26 + $0x40] sm:$0xf] }
  0x1c   : > { %v1377_v59 = vld [vmem:[%s1687_s26 + $0xb8] sm:$0xf0]  ;;  %v1316_v62 = vor.u32 %v1486_v56, %v1313_v57  ;;  %v1489_v1 = vld [vmem:[%s1687_s26 + $0x44] sm:$0xf0]  ;;  %v1383_v2 = vld [vmem:[%s1687_s26 + $0xc0] sm:$0xf] }
  0x1d   : > { %697 = vmatpush.bf16.msra.mxu0 %v1515_v8  ;;  %1532 = vmatpush.bf16.msra.mxu2 %v1515_v8  ;;  %v1380_v63 = vor.u32 %v1502_v58, %v1377_v59  ;;  %v1505_v3 = vld [vmem:[%s1687_s26 + $0xc4] sm:$0xf0]  ;;  %v1488_v4 = vld [vmem:[%s1687_s26 + $0x44] sm:$0xf]  ;;  %v1321_v5 = vld [vmem:[%s1687_s26 + $0x48] sm:$0xf0]  ;;  %v1320_v8 = vor.u32 %v1489_v1, %v1319_v0 }
  0x1e   : > { %786 = vmatpush.bf16.msra.mxu1 %v1523_v9  ;;  %1540 = vmatpush.bf16.msra.mxu3 %v1523_v9  ;;  %v1504_v6 = vld [vmem:[%s1687_s26 + $0xc4] sm:$0xf]  ;;  %v1385_v7 = vld [vmem:[%s1687_s26 + $0xc8] sm:$0xf0]  ;;  %v1384_v9 = vor.u32 %v1505_v3, %v1383_v2  ;;  %v1490_v16 = vld [vmem:[%s1687_s26 + $0x54] sm:$0xf] }
  0x1f   : > { %v1329_v17 = vld [vmem:[%s1687_s26 + $0x58] sm:$0xf0]  ;;  %v1506_v18 = vld [vmem:[%s1687_s26 + $0xd4] sm:$0xf]  ;;  %v1492_v28 = vld [vmem:[%s1687_s26 + $0x64] sm:$0xf] }
  0x20   : > { %v1393_v19 = vld [vmem:[%s1687_s26 + $0xd8] sm:$0xf0]  ;;  %v1332_v22 = vor.u32 %v1490_v16, %v1329_v17  ;;  %v1337_v29 = vld [vmem:[%s1687_s26 + $0x68] sm:$0xf0]  ;;  %v1508_v30 = vld [vmem:[%s1687_s26 + $0xe4] sm:$0xf] }
  0x21   : > { %698 = vmatpush.bf16.msra.mxu0 %v1514_v10  ;;  %1533 = vmatpush.bf16.msra.mxu2 %v1514_v10  ;;  %v1324_v10 = vor.u32 %v1488_v4, %v1321_v5  ;;  %v1396_v23 = vor.u32 %v1506_v18, %v1393_v19  ;;  %v1401_v31 = vld [vmem:[%s1687_s26 + $0xe8] sm:$0xf0]  ;;  %v1340_v34 = vor.u32 %v1492_v28, %v1337_v29  ;;  %v1511_v40 = vld [vmem:[%s1687_s26 + $0xf4] sm:$0xf0]  ;;  %v1494_v41 = vld [vmem:[%s1687_s26 + $0x74] sm:$0xf] }
  0x22   : > { %787 = vmatpush.bf16.msra.mxu1 %v1522_v11  ;;  %1541 = vmatpush.bf16.msra.mxu3 %v1522_v11  ;;  %v1388_v11 = vor.u32 %v1504_v6, %v1385_v7  ;;  %v1404_v35 = vor.u32 %v1508_v30, %v1401_v31  ;;  %v1345_v42 = vld [vmem:[%s1687_s26 + $0x78] sm:$0xf0]  ;;  %v1510_v43 = vld [vmem:[%s1687_s26 + $0xf4] sm:$0xf]  ;;  %v1803_v0 = vld [vmem:[%s1982_s3] ss:$0 sm:$0xff] }
  0x23   : > { %v1409_v44 = vld [vmem:[%s1687_s26 + $0xf8] sm:$0xf0]  ;;  %v1348_v47 = vor.u32 %v1494_v41, %v1345_v42 }
  0x25   : > { %699 = vmatpush.bf16.msra.mxu0 %v1513_v12  ;;  %1534 = vmatpush.bf16.msra.mxu2 %v1513_v12  ;;  %v1327_v12 = vld [vmem:[%s1687_s26 + $0x50] sm:$0xf] }
  0x26   : > { %788 = vmatpush.bf16.msra.mxu1 %v1521_v13  ;;  %1542 = vmatpush.bf16.msra.mxu3 %v1521_v13  ;;  %v1491_v13 = vld [vmem:[%s1687_s26 + $0x54] sm:$0xf0] }
  0x27   : > { %v1328_v20 = vor.u32 %v1491_v13, %v1327_v12 }
  0x29   : > { %700 = vmatpush.bf16.msra.mxu0 %v1512_v14  ;;  %1535 = vmatpush.bf16.msra.mxu2 %v1512_v14  ;;  %v1391_v14 = vld [vmem:[%s1687_s26 + $0xd0] sm:$0xf] }
  0x2a   : > { %789 = vmatpush.bf16.msra.mxu1 %v1520_v15  ;;  %1543 = vmatpush.bf16.msra.mxu3 %v1520_v15  ;;  %v1507_v15 = vld [vmem:[%s1687_s26 + $0xd4] sm:$0xf0] }
  0x2b   : > { %v1392_v21 = vor.u32 %v1507_v15, %v1391_v14 }
  0x2c   : > { %701 = vmatmul.bf16.vlgmr.msra.gmra.mxu0 %v1288_v24  ;;  %741 = vmatmul.bf16.vlgmr.msra.gmra.mxu2 %v1352_v25  ;;  %v1335_v24 = vld [vmem:[%s1687_s26 + $0x60] sm:$0xf]  ;;  %v1493_v25 = vld [vmem:[%s1687_s26 + $0x64] sm:$0xf0] }
  0x2d   : > { %790 = vmatmul.bf16.vlgmr.msra.gmra.mxu1 %v1292_v26  ;;  %830 = vmatmul.bf16.vlgmr.msra.gmra.mxu3 %v1356_v27  ;;  %v1399_v26 = vld [vmem:[%s1687_s26 + $0xe0] sm:$0xf]  ;;  %v1509_v27 = vld [vmem:[%s1687_s26 + $0xe4] sm:$0xf0]  ;;  %v1336_v32 = vor.u32 %v1493_v25, %v1335_v24 }
  0x2e   : > { %v1400_v33 = vor.u32 %v1509_v27, %v1399_v26 }
  0x3c   : > { %706 = vmatmul.bf16.gmra.mxu0 %v1296_v36  ;;  %746 = vmatmul.bf16.gmra.mxu2 %v1360_v37  ;;  %v1595_v36 = vmov 0.0   ;;  %v1343_v37 = vld [vmem:[%s1687_s26 + $0x70] sm:$0xf] }
  0x3d   : > { %795 = vmatmul.bf16.gmra.mxu1 %v1300_v38  ;;  %835 = vmatmul.bf16.gmra.mxu3 %v1364_v39  ;;  %309 = vst.msk [vmem:[#allocation2] sm:$0xff] %vm308_vm0, %v1595_v36  ;;  %v1495_v38 = vld [vmem:[%s1687_s26 + $0x74] sm:$0xf0]  ;;  %v1407_v39 = vld [vmem:[%s1687_s26 + $0xf0] sm:$0xf] }
  0x3e   : > { %310 = vst.msk [vmem:[#allocation2 + $0x8] sm:$0xff] %vm308_vm0, %v1595_v36  ;;  %v1344_v45 = vor.u32 %v1495_v38, %v1343_v37  ;;  %v1408_v46 = vor.u32 %v1511_v40, %v1407_v39 }
  0x3f   : > { %311 = vst.msk [vmem:[#allocation2 + $0x10] sm:$0xff] %vm308_vm0, %v1595_v36 }
  0x40   : > { %312 = vst.msk [vmem:[#allocation2 + $0x18] sm:$0xff] %vm308_vm0, %v1595_v36 }
  0x41   : > { %313 = vst.msk [vmem:[#allocation2 + $0x20] sm:$0xff] %vm308_vm0, %v1595_v36 }
  0x42   : > { %314 = vst.msk [vmem:[#allocation2 + $0x28] sm:$0xff] %vm308_vm0, %v1595_v36 }
  0x43   : > { %315 = vst.msk [vmem:[#allocation2 + $0x30] sm:$0xff] %vm308_vm0, %v1595_v36 }
  0x44   : > { %316 = vst.msk [vmem:[#allocation2 + $0x38] sm:$0xff] %vm308_vm0, %v1595_v36 }
  0x45   : > { %317 = vst.msk [vmem:[#allocation2 + $0x40] sm:$0xff] %vm308_vm0, %v1595_v36  ;;  %v342_v59 = vld [vmem:[#allocation2 + $0x8] sm:$0xff] }
  0x46   : > { %318 = vst.msk [vmem:[#allocation2 + $0x48] sm:$0xff] %vm308_vm0, %v1595_v36 }
  0x47   : > { %319 = vst.msk [vmem:[#allocation2 + $0x50] sm:$0xff] %vm308_vm0, %v1595_v36  ;;  %v344_v29 = vld [vmem:[#allocation2 + $0x18] sm:$0xff] }
  0x48   : > { %320 = vst.msk [vmem:[#allocation2 + $0x58] sm:$0xff] %vm308_vm0, %v1595_v36 }
  0x49   : > { %321 = vst.msk [vmem:[#allocation2 + $0x60] sm:$0xff] %vm308_vm0, %v1595_v36 }
  0x4a   : > { %322 = vst.msk [vmem:[#allocation2 + $0x68] sm:$0xff] %vm308_vm0, %v1595_v36 }
  0x4b   : > { %323 = vst.msk [vmem:[#allocation2 + $0x70] sm:$0xff] %vm308_vm0, %v1595_v36 }
  0x4c   : > { %711 = vmatmul.bf16.gmra.mxu0 %v1304_v48  ;;  %751 = vmatmul.bf16.gmra.mxu2 %v1368_v49  ;;  %v1412_v48 = vor.u32 %v1510_v43, %v1409_v44  ;;  %324 = vst.msk [vmem:[#allocation2 + $0x78] sm:$0xff] %vm308_vm0, %v1595_v36 }
  0x4d   : > { %800 = vmatmul.bf16.gmra.mxu1 %v1308_v50  ;;  %840 = vmatmul.bf16.gmra.mxu3 %v1372_v51  ;;  %325 = vst.msk [vmem:[#allocation2 + $0x80] sm:$0xff] %vm308_vm0, %v1595_v36  ;;  %v341_v50 = vld [vmem:[#allocation2] sm:$0xff] }
  0x4e   : > { %326 = vst.msk [vmem:[#allocation2 + $0x88] sm:$0xff] %vm308_vm0, %v1595_v36 }
  0x4f   : > { %327 = vst.msk [vmem:[#allocation2 + $0x90] sm:$0xff] %vm308_vm0, %v1595_v36 }
  0x50   : > { %328 = vst.msk [vmem:[#allocation2 + $0x98] sm:$0xff] %vm308_vm0, %v1595_v36 }
  0x51   : > { %329 = vst.msk [vmem:[#allocation2 + $0xa0] sm:$0xff] %vm308_vm0, %v1595_v36 }
  0x52   : > { %330 = vst.msk [vmem:[#allocation2 + $0xa8] sm:$0xff] %vm308_vm0, %v1595_v36 }
  0x53   : > { %331 = vst.msk [vmem:[#allocation2 + $0xb0] sm:$0xff] %vm308_vm0, %v1595_v36 }
  0x54   : > { %332 = vst.msk [vmem:[#allocation2 + $0xb8] sm:$0xff] %vm308_vm0, %v1595_v36  ;;  %v357_v55 = vld [vmem:[#allocation2 + $0x80] sm:$0xff] }
  0x55   : > { %333 = vst.msk [vmem:[#allocation2 + $0xc0] sm:$0xff] %vm308_vm0, %v1595_v36  ;;  %v358_v5 = vld [vmem:[#allocation2 + $0x88] sm:$0xff] }
  0x56   : > { %334 = vst.msk [vmem:[#allocation2 + $0xc8] sm:$0xff] %vm308_vm0, %v1595_v36 }
  0x57   : > { %335 = vst.msk [vmem:[#allocation2 + $0xd0] sm:$0xff] %vm308_vm0, %v1595_v36  ;;  %v360_v43 = vld [vmem:[#allocation2 + $0x98] sm:$0xff] }
  0x58   : > { %336 = vst.msk [vmem:[#allocation2 + $0xd8] sm:$0xff] %vm308_vm0, %v1595_v36 }
  0x59   : > { %337 = vst.msk [vmem:[#allocation2 + $0xe0] sm:$0xff] %vm308_vm0, %v1595_v36 }
  0x5a   : > { %338 = vst.msk [vmem:[#allocation2 + $0xe8] sm:$0xff] %vm308_vm0, %v1595_v36 }
  0x5b   : > { %339 = vst.msk [vmem:[#allocation2 + $0xf0] sm:$0xff] %vm308_vm0, %v1595_v36 }
  0x5c   : > { %716 = vmatmul.bf16.gmra.mxu0 %v1312_v60  ;;  %756 = vmatmul.bf16.gmra.mxu2 %v1376_v61  ;;  %340 = vst.msk [vmem:[#allocation2 + $0xf8] sm:$0xff] %vm308_vm0, %v1595_v36  ;;  %v1798_v61 = vld [vmem:[%s1981_s2] ss:$0 sm:$0xff] }
  0x5d   : > { %805 = vmatmul.bf16.gmra.mxu1 %v1316_v62  ;;  %845 = vmatmul.bf16.gmra.mxu3 %v1380_v63 }
  0x6c   : > { %721 = vmatmul.bf16.gmra.mxu0 %v1320_v8  ;;  %761 = vmatmul.bf16.gmra.mxu2 %v1384_v9 }
  0x6d   : > { %810 = vmatmul.bf16.gmra.mxu1 %v1324_v10  ;;  %850 = vmatmul.bf16.gmra.mxu3 %v1388_v11  ;;  %v343_v10 = vld [vmem:[#allocation2 + $0x10] sm:$0xff] }
  0x7c   : > { %726 = vmatmul.bf16.gmra.mxu0 %v1328_v20  ;;  %766 = vmatmul.bf16.gmra.mxu2 %v1392_v21 }
  0x7d   : > { %815 = vmatmul.bf16.gmra.mxu1 %v1332_v22  ;;  %855 = vmatmul.bf16.gmra.mxu3 %v1396_v23  ;;  %v359_v23 = vld [vmem:[#allocation2 + $0x90] sm:$0xff] }
  0x8c   : > { %731 = vmatmul.bf16.gmra.mxu0 %v1336_v32  ;;  %771 = vmatmul.bf16.gmra.mxu2 %v1400_v33 }
  0x8d   : > { %820 = vmatmul.bf16.gmra.mxu1 %v1340_v34  ;;  %860 = vmatmul.bf16.gmra.mxu3 %v1404_v35 }
  0x9c   : > { %736 = vmatmul.bf16.gmra.mxu0 %v1344_v45  ;;  %776 = vmatmul.bf16.gmra.mxu2 %v1408_v46 }
  0x9d   : > { %825 = vmatmul.bf16.gmra.mxu1 %v1348_v47  ;;  %865 = vmatmul.bf16.gmra.mxu3 %v1412_v48 }
  0xa9   : > { %v702_v49 = vpop.f32.mrf.mxu0 }
  0xaa   : > { %v791_v51 = vpop.f32.mrf.mxu1 }
  0xab   : > { %v792_v52 = vadd.f32 %v791_v51, %v702_v49  ;;  %v345_v49 = vld [vmem:[#allocation2 + $0x20] sm:$0xff] }
  0xad   : > { %v871_v53 = vadd.f32 %v792_v52, %v341_v50 }
  0xaf   : > { %904 = vst.msk [vmem:[#allocation2] sm:$0xff] %vm308_vm0, %v871_v53  ;;  %v742_v54 = vpop.f32.mrf.mxu2 }
  0xb0   : > { %v831_v56 = vpop.f32.mrf.mxu3 }
  0xb1   : > { %v832_v57 = vadd.f32 %v831_v56, %v742_v54  ;;  %v704_v58 = vpop.f32.mrf.mxu0 }
  0xb2   : > { %v793_v60 = vpop.f32.mrf.mxu1 }
  0xb3   : > { %v887_v62 = vadd.f32 %v832_v57, %v357_v55  ;;  %v794_v63 = vadd.f32 %v793_v60, %v704_v58 }
  0xb5   : > { %920 = vst.msk [vmem:[#allocation2 + $0x80] sm:$0xff] %vm308_vm0, %v887_v62  ;;  %v872_v1 = vadd.f32 %v794_v63, %v342_v59 }
  0xb6   : > { %v939_v2 = vld [vmem:[#allocation2] sm:$0xff] }
  0xb7   : > { %v975_v3 = vmul.f32 %v1798_v61, %v939_v2  ;;  %905 = vst.msk [vmem:[#allocation2 + $0x8] sm:$0xff] %vm308_vm0, %v872_v1  ;;  %v744_v4 = vpop.f32.mrf.mxu2  ;;  %v361_v1 = vld [vmem:[#allocation2 + $0xa0] sm:$0xff] }
  0xb8   : > { %v833_v6 = vpop.f32.mrf.mxu3 }
  0xb9   : > { %v1011_v7 = vadd.f32 %v1803_v0, %v975_v3  ;;  %v834_v8 = vadd.f32 %v833_v6, %v744_v4  ;;  %v707_v9 = vpop.f32.mrf.mxu0 }
  0xba   : > { %v796_v11 = vpop.f32.mrf.mxu1 }
  0xbb   : > { %v1043_v12 = vmax.f32 %v1011_v7, 0.0  ;;  %v888_v13 = vadd.f32 %v834_v8, %v358_v5  ;;  %v797_v14 = vadd.f32 %v796_v11, %v707_v9  ;;  %v346_v7 = vld [vmem:[#allocation2 + $0x28] sm:$0xff] }
  0xbc   : > { %v955_v15 = vld [vmem:[#allocation2 + $0x80] sm:$0xff] }
  0xbd   : > { %v1075_v16 = vpack.c.bf16 %v1043_v12, %v1043_v12  ;;  %v991_v17 = vmul.f32 %v1798_v61, %v955_v15  ;;  %921 = vst.msk [vmem:[#allocation2 + $0x88] sm:$0xff] %vm308_vm0, %v888_v13  ;;  %v873_v18 = vadd.f32 %v797_v14, %v343_v10 }
  0xbe   : > { %v940_v19 = vld [vmem:[#allocation2 + $0x8] sm:$0xff] }
  0xbf   : > { %1108 = vst.msk [vmem:[%s1813_s15] sm:$0xf] %vm1107_vm1, %v1075_v16  ;;  %v1027_v20 = vadd.f32 %v1803_v0, %v991_v17  ;;  %v976_v21 = vmul.f32 %v1798_v61, %v940_v19  ;;  %v747_v22 = vpop.f32.mrf.mxu2 }
  0xc0   : > { %906 = vst.msk [vmem:[#allocation2 + $0x10] sm:$0xff] %vm308_vm0, %v873_v18  ;;  %v836_v24 = vpop.f32.mrf.mxu3 }
  0xc1   : > { %v1059_v25 = vmax.f32 %v1027_v20, 0.0  ;;  %v1012_v26 = vadd.f32 %v1803_v0, %v976_v21  ;;  %v837_v27 = vadd.f32 %v836_v24, %v747_v22  ;;  %v709_v28 = vpop.f32.mrf.mxu0  ;;  %v362_v21 = vld [vmem:[#allocation2 + $0xa8] sm:$0xff] }
  0xc2   : > { %v798_v30 = vpop.f32.mrf.mxu1 }
  0xc3   : > { %v1091_v31 = vpack.c.bf16 %v1059_v25, %v1059_v25  ;;  %v1044_v32 = vmax.f32 %v1012_v26, 0.0  ;;  %v889_v33 = vadd.f32 %v837_v27, %v359_v23  ;;  %v799_v34 = vadd.f32 %v798_v30, %v709_v28  ;;  %v347_v27 = vld [vmem:[#allocation2 + $0x30] sm:$0xff] }
  0xc4   : > { %v956_v35 = vld [vmem:[#allocation2 + $0x88] sm:$0xff] }
  0xc5   : > { %1124 = vst.msk [vmem:[%s1813_s15 + $0x40] sm:$0xf] %vm1107_vm1, %v1091_v31  ;;  %v1076_v36 = vpack.c.bf16 %v1044_v32, %v1044_v32  ;;  %v992_v37 = vmul.f32 %v1798_v61, %v956_v35  ;;  %v874_v38 = vadd.f32 %v799_v34, %v344_v29 }
  0xc6   : > { %922 = vst.msk [vmem:[#allocation2 + $0x90] sm:$0xff] %vm308_vm0, %v889_v33 }
  0xc7   : > { %1109 = vst.msk [vmem:[%s1813_s15 + $0x4] sm:$0xf] %vm1107_vm1, %v1076_v36  ;;  %v1028_v39 = vadd.f32 %v1803_v0, %v992_v37  ;;  %v941_v40 = vld [vmem:[#allocation2 + $0x10] sm:$0xff]  ;;  %v749_v41 = vpop.f32.mrf.mxu2 }
  0xc8   : > { %v977_v42 = vmul.f32 %v1798_v61, %v941_v40  ;;  %907 = vst.msk [vmem:[#allocation2 + $0x18] sm:$0xff] %vm308_vm0, %v874_v38  ;;  %v838_v44 = vpop.f32.mrf.mxu3 }
  0xc9   : > { %v1060_v45 = vmax.f32 %v1028_v39, 0.0  ;;  %v839_v46 = vadd.f32 %v838_v44, %v749_v41  ;;  %v712_v47 = vpop.f32.mrf.mxu0  ;;  %v363_v41 = vld [vmem:[#allocation2 + $0xb0] sm:$0xff] }
  0xca   : > { %v1013_v48 = vadd.f32 %v1803_v0, %v977_v42  ;;  %v801_v50 = vpop.f32.mrf.mxu1 }
  0xcb   : > { %v1092_v51 = vpack.c.bf16 %v1060_v45, %v1060_v45  ;;  %v890_v52 = vadd.f32 %v839_v46, %v360_v43  ;;  %v802_v53 = vadd.f32 %v801_v50, %v712_v47  ;;  %v348_v47 = vld [vmem:[#allocation2 + $0x38] sm:$0xff] }
  0xcc   : > { %v1045_v54 = vmax.f32 %v1013_v48, 0.0 }
  0xcd   : > { %1125 = vst.msk [vmem:[%s1813_s15 + $0x44] sm:$0xf] %vm1107_vm1, %v1092_v51  ;;  %v957_v55 = vld [vmem:[#allocation2 + $0x90] sm:$0xff]  ;;  %v875_v56 = vadd.f32 %v802_v53, %v345_v49 }
  0xce   : > { %v1077_v57 = vpack.c.bf16 %v1045_v54, %v1045_v54  ;;  %v993_v58 = vmul.f32 %v1798_v61, %v957_v55  ;;  %923 = vst.msk [vmem:[#allocation2 + $0x98] sm:$0xff] %vm308_vm0, %v890_v52 }
  0xcf   : > { %v942_v59 = vld [vmem:[#allocation2 + $0x18] sm:$0xff]  ;;  %908 = vst.msk [vmem:[#allocation2 + $0x20] sm:$0xff] %vm308_vm0, %v875_v56  ;;  %v752_v60 = vpop.f32.mrf.mxu2 }
  0xd0   : > { %1110 = vst.msk [vmem:[%s1813_s15 + $0x8] sm:$0xf] %vm1107_vm1, %v1077_v57  ;;  %v1029_v62 = vadd.f32 %v1803_v0, %v993_v58  ;;  %v978_v63 = vmul.f32 %v1798_v61, %v942_v59  ;;  %v841_v2 = vpop.f32.mrf.mxu3 }
  0xd1   : > { %v842_v3 = vadd.f32 %v841_v2, %v752_v60  ;;  %v714_v4 = vpop.f32.mrf.mxu0 }
  0xd2   : > { %v1061_v5 = vmax.f32 %v1029_v62, 0.0  ;;  %v1014_v6 = vadd.f32 %v1803_v0, %v978_v63  ;;  %v803_v8 = vpop.f32.mrf.mxu1  ;;  %v364_v62 = vld [vmem:[#allocation2 + $0xb8] sm:$0xff] }
  0xd3   : > { %v891_v9 = vadd.f32 %v842_v3, %v361_v1  ;;  %v804_v10 = vadd.f32 %v803_v8, %v714_v4 }
  0xd4   : > { %v1093_v11 = vpack.c.bf16 %v1061_v5, %v1061_v5  ;;  %v1046_v12 = vmax.f32 %v1014_v6, 0.0  ;;  %v349_v5 = vld [vmem:[#allocation2 + $0x40] sm:$0xff] }
  0xd5   : > { %v958_v13 = vld [vmem:[#allocation2 + $0x98] sm:$0xff]  ;;  %924 = vst.msk [vmem:[#allocation2 + $0xa0] sm:$0xff] %vm308_vm0, %v891_v9  ;;  %v876_v14 = vadd.f32 %v804_v10, %v346_v7 }
  0xd6   : > { %1126 = vst.msk [vmem:[%s1813_s15 + $0x48] sm:$0xf] %vm1107_vm1, %v1093_v11  ;;  %v1078_v15 = vpack.c.bf16 %v1046_v12, %v1046_v12  ;;  %v994_v16 = vmul.f32 %v1798_v61, %v958_v13  ;;  %v943_v17 = vld [vmem:[#allocation2 + $0x20] sm:$0xff] }
  0xd7   : > { %v979_v18 = vmul.f32 %v1798_v61, %v943_v17  ;;  %909 = vst.msk [vmem:[#allocation2 + $0x28] sm:$0xff] %vm308_vm0, %v876_v14  ;;  %v754_v19 = vpop.f32.mrf.mxu2 }
  0xd8   : > { %1111 = vst.msk [vmem:[%s1813_s15 + $0xc] sm:$0xf] %vm1107_vm1, %v1078_v15  ;;  %v1030_v20 = vadd.f32 %v1803_v0, %v994_v16  ;;  %v843_v22 = vpop.f32.mrf.mxu3 }
  0xd9   : > { %v1015_v23 = vadd.f32 %v1803_v0, %v979_v18  ;;  %v844_v24 = vadd.f32 %v843_v22, %v754_v19  ;;  %v717_v25 = vpop.f32.mrf.mxu0  ;;  %v365_v19 = vld [vmem:[#allocation2 + $0xc0] sm:$0xff] }
  0xda   : > { %v1062_v26 = vmax.f32 %v1030_v20, 0.0  ;;  %v806_v28 = vpop.f32.mrf.mxu1 }
  0xdb   : > { %v1047_v29 = vmax.f32 %v1015_v23, 0.0  ;;  %v892_v30 = vadd.f32 %v844_v24, %v362_v21  ;;  %v807_v31 = vadd.f32 %v806_v28, %v717_v25  ;;  %v350_v25 = vld [vmem:[#allocation2 + $0x48] sm:$0xff] }
  0xdc   : > { %v1094_v32 = vpack.c.bf16 %v1062_v26, %v1062_v26  ;;  %v959_v33 = vld [vmem:[#allocation2 + $0xa0] sm:$0xff] }
  0xdd   : > { %v1079_v34 = vpack.c.bf16 %v1047_v29, %v1047_v29  ;;  %v995_v35 = vmul.f32 %v1798_v61, %v959_v33  ;;  %925 = vst.msk [vmem:[#allocation2 + $0xa8] sm:$0xff] %vm308_vm0, %v892_v30  ;;  %v877_v36 = vadd.f32 %v807_v31, %v347_v27 }
  0xde   : > { %1127 = vst.msk [vmem:[%s1813_s15 + $0x4c] sm:$0xf] %vm1107_vm1, %v1094_v32  ;;  %v944_v37 = vld [vmem:[#allocation2 + $0x28] sm:$0xff] }
  0xdf   : > { %1112 = vst.msk [vmem:[%s1813_s15 + $0x10] sm:$0xf] %vm1107_vm1, %v1079_v34  ;;  %v1031_v38 = vadd.f32 %v1803_v0, %v995_v35  ;;  %v980_v39 = vmul.f32 %v1798_v61, %v944_v37  ;;  %v757_v40 = vpop.f32.mrf.mxu2 }
  0xe0   : > { %910 = vst.msk [vmem:[#allocation2 + $0x30] sm:$0xff] %vm308_vm0, %v877_v36  ;;  %v846_v42 = vpop.f32.mrf.mxu3 }
  0xe1   : > { %v1063_v43 = vmax.f32 %v1031_v38, 0.0  ;;  %v1016_v44 = vadd.f32 %v1803_v0, %v980_v39  ;;  %v847_v45 = vadd.f32 %v846_v42, %v757_v40  ;;  %v719_v46 = vpop.f32.mrf.mxu0  ;;  %v366_v39 = vld [vmem:[#allocation2 + $0xc8] sm:$0xff] }
  0xe2   : > { %v808_v48 = vpop.f32.mrf.mxu1 }
  0xe3   : > { %v1095_v49 = vpack.c.bf16 %v1063_v43, %v1063_v43  ;;  %v1048_v50 = vmax.f32 %v1016_v44, 0.0  ;;  %v893_v51 = vadd.f32 %v847_v45, %v363_v41  ;;  %v809_v52 = vadd.f32 %v808_v48, %v719_v46  ;;  %v351_v45 = vld [vmem:[#allocation2 + $0x50] sm:$0xff] }
  0xe4   : > { %v960_v53 = vld [vmem:[#allocation2 + $0xa8] sm:$0xff] }
  0xe5   : > { %1128 = vst.msk [vmem:[%s1813_s15 + $0x50] sm:$0xf] %vm1107_vm1, %v1095_v49  ;;  %v1080_v54 = vpack.c.bf16 %v1048_v50, %v1048_v50  ;;  %v996_v55 = vmul.f32 %v1798_v61, %v960_v53  ;;  %v878_v56 = vadd.f32 %v809_v52, %v348_v47 }
  0xe6   : > { %926 = vst.msk [vmem:[#allocation2 + $0xb0] sm:$0xff] %vm308_vm0, %v893_v51 }
  0xe7   : > { %1113 = vst.msk [vmem:[%s1813_s15 + $0x14] sm:$0xf] %vm1107_vm1, %v1080_v54  ;;  %v1032_v57 = vadd.f32 %v1803_v0, %v996_v55  ;;  %v945_v58 = vld [vmem:[#allocation2 + $0x30] sm:$0xff]  ;;  %v759_v59 = vpop.f32.mrf.mxu2 }
  0xe8   : > { %v981_v60 = vmul.f32 %v1798_v61, %v945_v58  ;;  %911 = vst.msk [vmem:[#allocation2 + $0x38] sm:$0xff] %vm308_vm0, %v878_v56  ;;  %v848_v63 = vpop.f32.mrf.mxu3 }
  0xe9   : > { %v1064_v1 = vmax.f32 %v1032_v57, 0.0  ;;  %v849_v2 = vadd.f32 %v848_v63, %v759_v59  ;;  %v722_v3 = vpop.f32.mrf.mxu0  ;;  %v367_v59 = vld [vmem:[#allocation2 + $0xd0] sm:$0xff] }
  0xea   : > { %v1017_v4 = vadd.f32 %v1803_v0, %v981_v60  ;;  %v811_v6 = vpop.f32.mrf.mxu1 }
  0xeb   : > { %v1096_v7 = vpack.c.bf16 %v1064_v1, %v1064_v1  ;;  %v894_v8 = vadd.f32 %v849_v2, %v364_v62  ;;  %v812_v9 = vadd.f32 %v811_v6, %v722_v3  ;;  %v352_v3 = vld [vmem:[#allocation2 + $0x58] sm:$0xff] }
  0xec   : > { %v1049_v10 = vmax.f32 %v1017_v4, 0.0 }
  0xed   : > { %1129 = vst.msk [vmem:[%s1813_s15 + $0x54] sm:$0xf] %vm1107_vm1, %v1096_v7  ;;  %v961_v11 = vld [vmem:[#allocation2 + $0xb0] sm:$0xff]  ;;  %v879_v12 = vadd.f32 %v812_v9, %v349_v5 }
  0xee   : > { %v1081_v13 = vpack.c.bf16 %v1049_v10, %v1049_v10  ;;  %v997_v14 = vmul.f32 %v1798_v61, %v961_v11  ;;  %927 = vst.msk [vmem:[#allocation2 + $0xb8] sm:$0xff] %vm308_vm0, %v894_v8 }
  0xef   : > { %v946_v15 = vld [vmem:[#allocation2 + $0x38] sm:$0xff]  ;;  %912 = vst.msk [vmem:[#allocation2 + $0x40] sm:$0xff] %vm308_vm0, %v879_v12  ;;  %v762_v16 = vpop.f32.mrf.mxu2 }
  0xf0   : > { %1114 = vst.msk [vmem:[%s1813_s15 + $0x18] sm:$0xf] %vm1107_vm1, %v1081_v13  ;;  %v1033_v17 = vadd.f32 %v1803_v0, %v997_v14  ;;  %v982_v18 = vmul.f32 %v1798_v61, %v946_v15  ;;  %v851_v20 = vpop.f32.mrf.mxu3 }
  0xf1   : > { %v852_v21 = vadd.f32 %v851_v20, %v762_v16  ;;  %v724_v22 = vpop.f32.mrf.mxu0 }
  0xf2   : > { %v1065_v23 = vmax.f32 %v1033_v17, 0.0  ;;  %v1018_v24 = vadd.f32 %v1803_v0, %v982_v18  ;;  %v813_v26 = vpop.f32.mrf.mxu1  ;;  %v368_v17 = vld [vmem:[#allocation2 + $0xd8] sm:$0xff] }
  0xf3   : > { %v895_v27 = vadd.f32 %v852_v21, %v365_v19  ;;  %v814_v28 = vadd.f32 %v813_v26, %v724_v22 }
  0xf4   : > { %v1097_v29 = vpack.c.bf16 %v1065_v23, %v1065_v23  ;;  %v1050_v30 = vmax.f32 %v1018_v24, 0.0  ;;  %v353_v23 = vld [vmem:[#allocation2 + $0x60] sm:$0xff] }
  0xf5   : > { %v962_v31 = vld [vmem:[#allocation2 + $0xb8] sm:$0xff]  ;;  %928 = vst.msk [vmem:[#allocation2 + $0xc0] sm:$0xff] %vm308_vm0, %v895_v27  ;;  %v880_v32 = vadd.f32 %v814_v28, %v350_v25 }
  0xf6   : > { %1130 = vst.msk [vmem:[%s1813_s15 + $0x58] sm:$0xf] %vm1107_vm1, %v1097_v29  ;;  %v1082_v33 = vpack.c.bf16 %v1050_v30, %v1050_v30  ;;  %v998_v34 = vmul.f32 %v1798_v61, %v962_v31  ;;  %v947_v35 = vld [vmem:[#allocation2 + $0x40] sm:$0xff] }
  0xf7   : > { %v983_v36 = vmul.f32 %v1798_v61, %v947_v35  ;;  %913 = vst.msk [vmem:[#allocation2 + $0x48] sm:$0xff] %vm308_vm0, %v880_v32  ;;  %v764_v37 = vpop.f32.mrf.mxu2 }
  0xf8   : > { %1115 = vst.msk [vmem:[%s1813_s15 + $0x1c] sm:$0xf] %vm1107_vm1, %v1082_v33  ;;  %v1034_v38 = vadd.f32 %v1803_v0, %v998_v34  ;;  %v853_v40 = vpop.f32.mrf.mxu3 }
  0xf9   : > { %v1019_v41 = vadd.f32 %v1803_v0, %v983_v36  ;;  %v854_v42 = vadd.f32 %v853_v40, %v764_v37  ;;  %v727_v43 = vpop.f32.mrf.mxu0  ;;  %v369_v37 = vld [vmem:[#allocation2 + $0xe0] sm:$0xff] }
  0xfa   : > { %v1066_v44 = vmax.f32 %v1034_v38, 0.0  ;;  %v816_v46 = vpop.f32.mrf.mxu1 }
  0xfb   : > { %v1051_v47 = vmax.f32 %v1019_v41, 0.0  ;;  %v896_v48 = vadd.f32 %v854_v42, %v366_v39  ;;  %v817_v49 = vadd.f32 %v816_v46, %v727_v43  ;;  %v354_v43 = vld [vmem:[#allocation2 + $0x68] sm:$0xff] }
  0xfc   : > { %v1098_v50 = vpack.c.bf16 %v1066_v44, %v1066_v44  ;;  %v963_v51 = vld [vmem:[#allocation2 + $0xc0] sm:$0xff] }
  0xfd   : > { %v1083_v52 = vpack.c.bf16 %v1051_v47, %v1051_v47  ;;  %v999_v53 = vmul.f32 %v1798_v61, %v963_v51  ;;  %929 = vst.msk [vmem:[#allocation2 + $0xc8] sm:$0xff] %vm308_vm0, %v896_v48  ;;  %v881_v54 = vadd.f32 %v817_v49, %v351_v45 }
  0xfe   : > { %1131 = vst.msk [vmem:[%s1813_s15 + $0x5c] sm:$0xf] %vm1107_vm1, %v1098_v50  ;;  %v948_v55 = vld [vmem:[#allocation2 + $0x48] sm:$0xff] }
  0xff   : > { %1116 = vst.msk [vmem:[%s1813_s15 + $0x20] sm:$0xf] %vm1107_vm1, %v1083_v52  ;;  %v1035_v56 = vadd.f32 %v1803_v0, %v999_v53  ;;  %v984_v57 = vmul.f32 %v1798_v61, %v948_v55  ;;  %v767_v58 = vpop.f32.mrf.mxu2 }
 0x100   : > { %914 = vst.msk [vmem:[#allocation2 + $0x50] sm:$0xff] %vm308_vm0, %v881_v54  ;;  %v856_v60 = vpop.f32.mrf.mxu3 }
 0x101   : > { %v1067_v62 = vmax.f32 %v1035_v56, 0.0  ;;  %v1020_v63 = vadd.f32 %v1803_v0, %v984_v57  ;;  %v857_v1 = vadd.f32 %v856_v60, %v767_v58  ;;  %v729_v2 = vpop.f32.mrf.mxu0  ;;  %v370_v57 = vld [vmem:[#allocation2 + $0xe8] sm:$0xff] }
 0x102   : > { %v818_v4 = vpop.f32.mrf.mxu1 }
 0x103   : > { %v1099_v5 = vpack.c.bf16 %v1067_v62, %v1067_v62  ;;  %v1052_v6 = vmax.f32 %v1020_v63, 0.0  ;;  %v897_v7 = vadd.f32 %v857_v1, %v367_v59  ;;  %v819_v8 = vadd.f32 %v818_v4, %v729_v2  ;;  %v355_v1 = vld [vmem:[#allocation2 + $0x70] sm:$0xff] }
 0x104   : > { %v964_v9 = vld [vmem:[#allocation2 + $0xc8] sm:$0xff] }
 0x105   : > { %1132 = vst.msk [vmem:[%s1813_s15 + $0x60] sm:$0xf] %vm1107_vm1, %v1099_v5  ;;  %v1084_v10 = vpack.c.bf16 %v1052_v6, %v1052_v6  ;;  %v1000_v11 = vmul.f32 %v1798_v61, %v964_v9  ;;  %v882_v12 = vadd.f32 %v819_v8, %v352_v3 }
 0x106   : > { %930 = vst.msk [vmem:[#allocation2 + $0xd0] sm:$0xff] %vm308_vm0, %v897_v7 }
 0x107   : > { %1117 = vst.msk [vmem:[%s1813_s15 + $0x24] sm:$0xf] %vm1107_vm1, %v1084_v10  ;;  %v1036_v13 = vadd.f32 %v1803_v0, %v1000_v11  ;;  %v949_v14 = vld [vmem:[#allocation2 + $0x50] sm:$0xff]  ;;  %v769_v15 = vpop.f32.mrf.mxu2 }
 0x108   : > { %v985_v16 = vmul.f32 %v1798_v61, %v949_v14  ;;  %915 = vst.msk [vmem:[#allocation2 + $0x58] sm:$0xff] %vm308_vm0, %v882_v12  ;;  %v858_v18 = vpop.f32.mrf.mxu3 }
 0x109   : > { %v1068_v19 = vmax.f32 %v1036_v13, 0.0  ;;  %v859_v20 = vadd.f32 %v858_v18, %v769_v15  ;;  %v732_v21 = vpop.f32.mrf.mxu0  ;;  %v371_v15 = vld [vmem:[#allocation2 + $0xf0] sm:$0xff] }
 0x10a   : > { %v1021_v22 = vadd.f32 %v1803_v0, %v985_v16  ;;  %v821_v24 = vpop.f32.mrf.mxu1 }
 0x10b   : > { %v1100_v25 = vpack.c.bf16 %v1068_v19, %v1068_v19  ;;  %v898_v26 = vadd.f32 %v859_v20, %v368_v17  ;;  %v822_v27 = vadd.f32 %v821_v24, %v732_v21  ;;  %v356_v21 = vld [vmem:[#allocation2 + $0x78] sm:$0xff] }
 0x10c   : > { %v1053_v28 = vmax.f32 %v1021_v22, 0.0 }
 0x10d   : > { %1133 = vst.msk [vmem:[%s1813_s15 + $0x64] sm:$0xf] %vm1107_vm1, %v1100_v25  ;;  %v965_v29 = vld [vmem:[#allocation2 + $0xd0] sm:$0xff]  ;;  %v883_v30 = vadd.f32 %v822_v27, %v353_v23 }
 0x10e   : > { %v1085_v31 = vpack.c.bf16 %v1053_v28, %v1053_v28  ;;  %v1001_v32 = vmul.f32 %v1798_v61, %v965_v29  ;;  %931 = vst.msk [vmem:[#allocation2 + $0xd8] sm:$0xff] %vm308_vm0, %v898_v26 }
 0x10f   : > { %v950_v33 = vld [vmem:[#allocation2 + $0x58] sm:$0xff]  ;;  %916 = vst.msk [vmem:[#allocation2 + $0x60] sm:$0xff] %vm308_vm0, %v883_v30  ;;  %v772_v34 = vpop.f32.mrf.mxu2 }
 0x110   : > { %1118 = vst.msk [vmem:[%s1813_s15 + $0x28] sm:$0xf] %vm1107_vm1, %v1085_v31  ;;  %v1037_v35 = vadd.f32 %v1803_v0, %v1001_v32  ;;  %v986_v36 = vmul.f32 %v1798_v61, %v950_v33  ;;  %v861_v38 = vpop.f32.mrf.mxu3 }
 0x111   : > { %v862_v39 = vadd.f32 %v861_v38, %v772_v34  ;;  %v734_v40 = vpop.f32.mrf.mxu0 }
 0x112   : > { %v1069_v41 = vmax.f32 %v1037_v35, 0.0  ;;  %v1022_v42 = vadd.f32 %v1803_v0, %v986_v36  ;;  %v823_v44 = vpop.f32.mrf.mxu1  ;;  %v372_v35 = vld [vmem:[#allocation2 + $0xf8] sm:$0xff] }
 0x113   : > { %v899_v45 = vadd.f32 %v862_v39, %v369_v37  ;;  %v824_v46 = vadd.f32 %v823_v44, %v734_v40 }
 0x114   : > { %v1101_v47 = vpack.c.bf16 %v1069_v41, %v1069_v41  ;;  %v1054_v48 = vmax.f32 %v1022_v42, 0.0 }
 0x115   : > { %v966_v49 = vld [vmem:[#allocation2 + $0xd8] sm:$0xff]  ;;  %932 = vst.msk [vmem:[#allocation2 + $0xe0] sm:$0xff] %vm308_vm0, %v899_v45  ;;  %v884_v50 = vadd.f32 %v824_v46, %v354_v43 }
 0x116   : > { %1134 = vst.msk [vmem:[%s1813_s15 + $0x68] sm:$0xf] %vm1107_vm1, %v1101_v47  ;;  %v1086_v51 = vpack.c.bf16 %v1054_v48, %v1054_v48  ;;  %v1002_v52 = vmul.f32 %v1798_v61, %v966_v49  ;;  %v951_v53 = vld [vmem:[#allocation2 + $0x60] sm:$0xff] }
 0x117   : > { %v987_v54 = vmul.f32 %v1798_v61, %v951_v53  ;;  %917 = vst.msk [vmem:[#allocation2 + $0x68] sm:$0xff] %vm308_vm0, %v884_v50  ;;  %v774_v55 = vpop.f32.mrf.mxu2 }
 0x118   : > { %1119 = vst.msk [vmem:[%s1813_s15 + $0x2c] sm:$0xf] %vm1107_vm1, %v1086_v51  ;;  %v1038_v56 = vadd.f32 %v1803_v0, %v1002_v52  ;;  %v863_v58 = vpop.f32.mrf.mxu3 }
 0x119   : > { %v1023_v59 = vadd.f32 %v1803_v0, %v987_v54  ;;  %v864_v60 = vadd.f32 %v863_v58, %v774_v55  ;;  %v737_v62 = vpop.f32.mrf.mxu0 }
 0x11a   : > { %v1070_v63 = vmax.f32 %v1038_v56, 0.0  ;;  %v826_v2 = vpop.f32.mrf.mxu1 }
 0x11b   : > { %v1055_v3 = vmax.f32 %v1023_v59, 0.0  ;;  %v900_v4 = vadd.f32 %v864_v60, %v370_v57  ;;  %v827_v5 = vadd.f32 %v826_v2, %v737_v62 }
 0x11c   : > { %v1102_v6 = vpack.c.bf16 %v1070_v63, %v1070_v63  ;;  %v967_v7 = vld [vmem:[#allocation2 + $0xe0] sm:$0xff] }
 0x11d   : > { %v1087_v8 = vpack.c.bf16 %v1055_v3, %v1055_v3  ;;  %v1003_v9 = vmul.f32 %v1798_v61, %v967_v7  ;;  %933 = vst.msk [vmem:[#allocation2 + $0xe8] sm:$0xff] %vm308_vm0, %v900_v4  ;;  %v885_v10 = vadd.f32 %v827_v5, %v355_v1 }
 0x11e   : > { %1135 = vst.msk [vmem:[%s1813_s15 + $0x6c] sm:$0xf] %vm1107_vm1, %v1102_v6  ;;  %v952_v11 = vld [vmem:[#allocation2 + $0x68] sm:$0xff] }
 0x11f   : > { %1120 = vst.msk [vmem:[%s1813_s15 + $0x30] sm:$0xf] %vm1107_vm1, %v1087_v8  ;;  %v1039_v12 = vadd.f32 %v1803_v0, %v1003_v9  ;;  %v988_v13 = vmul.f32 %v1798_v61, %v952_v11  ;;  %v777_v14 = vpop.f32.mrf.mxu2 }
 0x120   : > { %918 = vst.msk [vmem:[#allocation2 + $0x70] sm:$0xff] %vm308_vm0, %v885_v10  ;;  %v866_v16 = vpop.f32.mrf.mxu3 }
 0x121   : > { %v1071_v17 = vmax.f32 %v1039_v12, 0.0  ;;  %v1024_v18 = vadd.f32 %v1803_v0, %v988_v13  ;;  %v867_v19 = vadd.f32 %v866_v16, %v777_v14  ;;  %v739_v20 = vpop.f32.mrf.mxu0 }
 0x122   : > { %v828_v22 = vpop.f32.mrf.mxu1 }
 0x123   : > { %v1103_v23 = vpack.c.bf16 %v1071_v17, %v1071_v17  ;;  %v1056_v24 = vmax.f32 %v1024_v18, 0.0  ;;  %v901_v25 = vadd.f32 %v867_v19, %v371_v15  ;;  %v829_v26 = vadd.f32 %v828_v22, %v739_v20 }
 0x124   : > { %v968_v27 = vld [vmem:[#allocation2 + $0xe8] sm:$0xff] }
 0x125   : > { %1136 = vst.msk [vmem:[%s1813_s15 + $0x70] sm:$0xf] %vm1107_vm1, %v1103_v23  ;;  %v1088_v28 = vpack.c.bf16 %v1056_v24, %v1056_v24  ;;  %v1004_v29 = vmul.f32 %v1798_v61, %v968_v27  ;;  %v886_v30 = vadd.f32 %v829_v26, %v356_v21 }
 0x126   : > { %934 = vst.msk [vmem:[#allocation2 + $0xf0] sm:$0xff] %vm308_vm0, %v901_v25 }
 0x127   : > { %1121 = vst.msk [vmem:[%s1813_s15 + $0x34] sm:$0xf] %vm1107_vm1, %v1088_v28  ;;  %v1040_v31 = vadd.f32 %v1803_v0, %v1004_v29  ;;  %v953_v32 = vld [vmem:[#allocation2 + $0x70] sm:$0xff]  ;;  %v779_v33 = vpop.f32.mrf.mxu2 }
 0x128   : > { %v989_v34 = vmul.f32 %v1798_v61, %v953_v32  ;;  %919 = vst.msk [vmem:[#allocation2 + $0x78] sm:$0xff] %vm308_vm0, %v886_v30  ;;  %v868_v36 = vpop.f32.mrf.mxu3 }
 0x129   : > { %v1072_v37 = vmax.f32 %v1040_v31, 0.0  ;;  %v869_v38 = vadd.f32 %v868_v36, %v779_v33 }
 0x12a   : > { %v1025_v39 = vadd.f32 %v1803_v0, %v989_v34 }
 0x12b   : > { %v1104_v40 = vpack.c.bf16 %v1072_v37, %v1072_v37  ;;  %v902_v41 = vadd.f32 %v869_v38, %v372_v35 }
 0x12c   : > { %v1057_v42 = vmax.f32 %v1025_v39, 0.0 }
 0x12d   : > { %1137 = vst.msk [vmem:[%s1813_s15 + $0x74] sm:$0xf] %vm1107_vm1, %v1104_v40  ;;  %v969_v43 = vld [vmem:[#allocation2 + $0xf0] sm:$0xff] }
 0x12e   : > { %v1089_v44 = vpack.c.bf16 %v1057_v42, %v1057_v42  ;;  %v1005_v45 = vmul.f32 %v1798_v61, %v969_v43  ;;  %935 = vst.msk [vmem:[#allocation2 + $0xf8] sm:$0xff] %vm308_vm0, %v902_v41 }
 0x12f   : > { %v954_v46 = vld [vmem:[#allocation2 + $0x78] sm:$0xff] }
 0x130   : > { %1122 = vst.msk [vmem:[%s1813_s15 + $0x38] sm:$0xf] %vm1107_vm1, %v1089_v44  ;;  %v1041_v47 = vadd.f32 %v1803_v0, %v1005_v45  ;;  %v990_v48 = vmul.f32 %v1798_v61, %v954_v46 }
 0x132   : > { %v1073_v49 = vmax.f32 %v1041_v47, 0.0  ;;  %v1026_v50 = vadd.f32 %v1803_v0, %v990_v48 }
 0x134   : > { %v1105_v51 = vpack.c.bf16 %v1073_v49, %v1073_v49  ;;  %v1058_v52 = vmax.f32 %v1026_v50, 0.0 }
 0x135   : > { %v970_v53 = vld [vmem:[#allocation2 + $0xf8] sm:$0xff] }
 0x136   : > { %1138 = vst.msk [vmem:[%s1813_s15 + $0x78] sm:$0xf] %vm1107_vm1, %v1105_v51  ;;  %v1090_v54 = vpack.c.bf16 %v1058_v52, %v1058_v52  ;;  %v1006_v55 = vmul.f32 %v1798_v61, %v970_v53 }
 0x138   : > { %1123 = vst.msk [vmem:[%s1813_s15 + $0x3c] sm:$0xf] %vm1107_vm1, %v1090_v54  ;;  %v1042_v56 = vadd.f32 %v1803_v0, %v1006_v55 }
 0x13a   : > { %v1074_v57 = vmax.f32 %v1042_v56, 0.0 }
 0x13c   : > { %v1106_v58 = vpack.c.bf16 %v1074_v57, %v1074_v57 }
 0x13e   : > { %1139 = vst.msk [vmem:[%s1813_s15 + $0x7c] sm:$0xf] %vm1107_vm1, %v1106_v58 }
 0x13f PF: > { %s14_s17 = sadd.s32 1, %s1593_s17   ;;  %s1984_s15 = smov %s1589_s16 }
 0x140   : > { %p11_p5 = scmp.ge.s32.totalorder %s14_s17, 4   ;;  %s1985_s16 = smov %s1987_s18 }
 0x142   :  { %13 = sbr.rel (!%p11_p5) target bundleno = 2 (0x2), region = 83 }

// kernel: forward.25
= control target key start
LH: loop header
LB: loop body
LE: loop exit
PB: predicated region body
PF: predicated region fallthrough
CT: control target
= control target key end

     0   :  { %vm296_vm0 = vcmask 523264   ;;  %vm585_vm1 = vcmask 519168   ;;  %s1539_s0 = inlined_call_operand.vmem [shape: bf16[9,128,64], index: 0, kind: input, shape index: {}]   ;;  %s1540_s1 = inlined_call_operand.vmem [shape: bf16[128,64], index: 1, kind: output, shape index: {}]  }
   0x1   :  { %v607_v0 = vld [vmem:[%s1539_s0] sm:$0xff]   ;;  %v1018_v35 = vld [vmem:[%s1539_s0 + $0x8] sm:$0xff]  }
   0x2   :  { %v901_v1 = vld [vmem:[%s1539_s0 + $0x40] sm:$0xff]   ;;  %v608_v3 = vunpack.c.l.bf16 %v607_v0  ;;  %v609_v19 = vunpack.c.h.bf16 %v607_v0  ;;  %v1023_v36 = vld [vmem:[%s1539_s0 + $0x48] sm:$0xff]   ;;  %v612_v49 = vunpack.c.l.bf16 %v1018_v35 }
   0x3   :  { %v909_v2 = vld [vmem:[%s1539_s0 + $0x80] sm:$0xff]   ;;  %v640_v4 = vunpack.c.l.bf16 %v901_v1  ;;  %v641_v20 = vunpack.c.h.bf16 %v901_v1  ;;  %v910_v41 = vld [vmem:[%s1539_s0 + $0x88] sm:$0xff]   ;;  %v644_v50 = vunpack.c.l.bf16 %v1023_v36 }
   0x4   :  { %v672_v5 = vunpack.c.l.bf16 %v909_v2  ;;  %v917_v6 = vld [vmem:[%s1539_s0 + $0xc0] sm:$0xff]   ;;  %v297_v16 = vsel %vm296_vm0, %v608_v3, -inf  ;;  %v673_v25 = vunpack.c.h.bf16 %v909_v2  ;;  %v314_v32 = vsel %vm296_vm0, %v609_v19, -inf  ;;  %v1031_v42 = vld [vmem:[%s1539_s0 + $0xc8] sm:$0xff]  }
   0x5   :  { %v925_v7 = vld [vmem:[%s1539_s0 + $0x100] sm:$0xff]   ;;  %v704_v9 = vunpack.c.l.bf16 %v917_v6  ;;  %v298_v17 = vsel %vm296_vm0, %v640_v4, -inf  ;;  %v705_v26 = vunpack.c.h.bf16 %v917_v6  ;;  %v315_v33 = vsel %vm296_vm0, %v641_v20, -inf  ;;  %v1041_v51 = vld [vmem:[%s1539_s0 + $0x108] sm:$0xff]  }
   0x6   :  { %v933_v8 = vld [vmem:[%s1539_s0 + $0x140] sm:$0xff]   ;;  %v736_v12 = vunpack.c.l.bf16 %v925_v7  ;;  %v300_v18 = vsel %vm296_vm0, %v672_v5, -inf  ;;  %v299_v22 = vmax.f32 %v297_v16, %v298_v17  ;;  %v737_v31 = vunpack.c.h.bf16 %v925_v7  ;;  %v1051_v60 = vld [vmem:[%s1539_s0 + $0x148] sm:$0xff]  }
   0x7   :  { %v941_v10 = vld [vmem:[%s1539_s0 + $0x180] sm:$0xff]   ;;  %v768_v13 = vunpack.c.l.bf16 %v933_v8  ;;  %v302_v24 = vsel %vm296_vm0, %v704_v9, -inf  ;;  %v317_v34 = vsel %vm296_vm0, %v673_v25, -inf  ;;  %v769_v38 = vunpack.c.h.bf16 %v933_v8  ;;  %v1056_v61 = vld [vmem:[%s1539_s0 + $0x188] sm:$0xff]  }
   0x8   :  { %v949_v11 = vld [vmem:[%s1539_s0 + $0x1c0] sm:$0xff]   ;;  %v800_v14 = vunpack.c.l.bf16 %v941_v10  ;;  %v301_v27 = vmax.f32 %v299_v22, %v300_v18  ;;  %v304_v28 = vsel %vm296_vm0, %v736_v12, -inf  ;;  %v801_v39 = vunpack.c.h.bf16 %v941_v10  ;;  %v1061_v62 = vld [vmem:[%s1539_s0 + $0x1c8] sm:$0xff]  }
   0x9   :  { %v1002_v15 = vld [vmem:[%s1539_s0 + $0x200] sm:$0xff]   ;;  %v832_v21 = vunpack.c.l.bf16 %v949_v11  ;;  %v306_v29 = vsel %vm296_vm0, %v768_v13, -inf  ;;  %v316_v40 = vmax.f32 %v314_v32, %v315_v33  ;;  %v833_v45 = vunpack.c.h.bf16 %v949_v11  ;;  %v1074_v10 = vld [vmem:[%s1539_s0 + $0x208] sm:$0xff]   ;;  %v1090_v32 = vld [vmem:[%s1539_s0 + $0x10] sm:$0xff]  }
   0xa   :  { %v864_v23 = vunpack.c.l.bf16 %v1002_v15  ;;  %v308_v30 = vsel %vm296_vm0, %v800_v14, -inf  ;;  %v303_v37 = vmax.f32 %v301_v27, %v302_v24  ;;  %v319_v46 = vsel %vm296_vm0, %v705_v26, -inf }
   0xb   :  { %v310_v43 = vsel %vm296_vm0, %v832_v21, -inf  ;;  %v318_v48 = vmax.f32 %v316_v40, %v317_v34  ;;  %v865_v52 = vunpack.c.h.bf16 %v1002_v15  ;;  %v321_v53 = vsel %vm296_vm0, %v737_v31, -inf }
   0xc   :  { %v312_v44 = vsel %vm296_vm0, %v864_v23, -inf  ;;  %v305_v47 = vmax.f32 %v303_v37, %v304_v28  ;;  %v676_v54 = vunpack.c.l.bf16 %v910_v41  ;;  %v708_v55 = vunpack.c.l.bf16 %v1031_v42  ;;  %v903_v37 = vld [vmem:[%s1539_s0 + $0x50] sm:$0xff]  }
   0xd   :  { %v320_v57 = vmax.f32 %v318_v48, %v319_v46  ;;  %v323_v58 = vsel %vm296_vm0, %v769_v38, -inf  ;;  %v325_v59 = vsel %vm296_vm0, %v801_v39, -inf  ;;  %v740_v63 = vunpack.c.l.bf16 %v1041_v51 }
   0xe   :  { %v307_v56 = vmax.f32 %v305_v47, %v306_v29  ;;  %v331_v0 = vsel %vm296_vm0, %v612_v49, -inf  ;;  %v332_v1 = vsel %vm296_vm0, %v644_v50, -inf  ;;  %v334_v2 = vsel %vm296_vm0, %v676_v54, -inf }
   0xf   :  { %v322_v4 = vmax.f32 %v320_v57, %v321_v53  ;;  %v327_v5 = vsel %vm296_vm0, %v833_v45, -inf  ;;  %v333_v6 = vmax.f32 %v331_v0, %v332_v1  ;;  %v772_v7 = vunpack.c.l.bf16 %v1051_v60  ;;  %v1142_v0 = vld [vmem:[%s1539_s0 + $0x1d0] sm:$0xff]  }
  0x10   :  { %v309_v3 = vmax.f32 %v307_v56, %v308_v30  ;;  %v804_v8 = vunpack.c.l.bf16 %v1056_v61  ;;  %v836_v9 = vunpack.c.l.bf16 %v1061_v62  ;;  %v336_v11 = vsel %vm296_vm0, %v708_v55, -inf }
  0x11   :  { %v324_v13 = vmax.f32 %v322_v4, %v323_v58  ;;  %v329_v14 = vsel %vm296_vm0, %v865_v52, -inf  ;;  %v335_v15 = vmax.f32 %v333_v6, %v334_v2  ;;  %v338_v16 = vsel %vm296_vm0, %v740_v63, -inf  ;;  %v1119_v52 = vld [vmem:[%s1539_s0 + $0x110] sm:$0xff]  }
  0x12   :  { %v311_v12 = vmax.f32 %v309_v3, %v310_v43  ;;  %v613_v17 = vunpack.c.h.bf16 %v1018_v35  ;;  %v645_v18 = vunpack.c.h.bf16 %v1023_v36  ;;  %v677_v19 = vunpack.c.h.bf16 %v910_v41  ;;  %v1110_v43 = vld [vmem:[%s1539_s0 + $0xd0] sm:$0xff]  }
  0x13   :  { %v326_v21 = vmax.f32 %v324_v13, %v325_v59  ;;  %v868_v22 = vunpack.c.l.bf16 %v1074_v10  ;;  %v337_v23 = vmax.f32 %v335_v15, %v336_v11  ;;  %v340_v24 = vsel %vm296_vm0, %v772_v7, -inf  ;;  %v959_v11 = vld [vmem:[%s1539_s0 + $0x210] sm:$0xff]  }
  0x14   :  { %v313_v20 = vmax.f32 %v311_v12, %v312_v44  ;;  %v342_v25 = vsel %vm296_vm0, %v804_v8, -inf  ;;  %v344_v26 = vsel %vm296_vm0, %v836_v9, -inf  ;;  %v709_v27 = vunpack.c.h.bf16 %v1031_v42  ;;  %v911_v42 = vld [vmem:[%s1539_s0 + $0x90] sm:$0xff]  }
  0x15   :  { %v328_v29 = vmax.f32 %v326_v21, %v327_v5  ;;  %v339_v30 = vmax.f32 %v337_v23, %v338_v16  ;;  %v348_v31 = vsel %vm296_vm0, %v613_v17, -inf  ;;  %v741_v33 = vunpack.c.h.bf16 %v1041_v51 }
  0x16   :  { %v569_v28 = vpack.c.bf16 %v313_v20, %v313_v20  ;;  %v773_v34 = vunpack.c.h.bf16 %v1051_v60  ;;  %v349_v35 = vsel %vm296_vm0, %v645_v18, -inf  ;;  %v351_v36 = vsel %vm296_vm0, %v677_v19, -inf }
  0x17   :  { %v330_v38 = vmax.f32 %v328_v29, %v329_v14  ;;  %v341_v39 = vmax.f32 %v339_v30, %v340_v24  ;;  %v805_v40 = vunpack.c.h.bf16 %v1056_v61  ;;  %v350_v41 = vmax.f32 %v348_v31, %v349_v35  ;;  %v935_v61 = vld [vmem:[%s1539_s0 + $0x150] sm:$0xff]  }
  0x18   :  { %586 = vst.msk [vmem:[%s1540_s1] sm:$0xf] %vm585_vm1, %v569_v28  ;;  %v346_v44 = vsel %vm296_vm0, %v868_v22, -inf  ;;  %v837_v45 = vunpack.c.h.bf16 %v1061_v62  ;;  %v353_v46 = vsel %vm296_vm0, %v709_v27, -inf  ;;  %v616_v47 = vunpack.c.l.bf16 %v1090_v32  ;;  %v1136_v62 = vld [vmem:[%s1539_s0 + $0x190] sm:$0xff]  }
  0x19   :  { %v570_v48 = vpack.c.bf16 %v330_v38, %v330_v38  ;;  %v343_v49 = vmax.f32 %v341_v39, %v342_v25  ;;  %v352_v50 = vmax.f32 %v350_v41, %v351_v36  ;;  %v648_v51 = vunpack.c.l.bf16 %v903_v37  ;;  %v912_v39 = vld [vmem:[%s1539_s0 + $0x98] sm:$0xff]  }
  0x1a   :  { %v869_v53 = vunpack.c.h.bf16 %v1074_v10  ;;  %v355_v54 = vsel %vm296_vm0, %v741_v33, -inf  ;;  %v680_v55 = vunpack.c.l.bf16 %v911_v42  ;;  %v712_v56 = vunpack.c.l.bf16 %v1110_v43  ;;  %v896_v33 = vld [vmem:[%s1539_s0 + $0x18] sm:$0xff]  }
  0x1b   :  { %587 = vst.msk [vmem:[%s1540_s1 + $0x4] sm:$0xf] %vm585_vm1, %v570_v48  ;;  %v345_v57 = vmax.f32 %v343_v49, %v344_v26  ;;  %v354_v58 = vmax.f32 %v352_v50, %v353_v46  ;;  %v357_v59 = vsel %vm296_vm0, %v773_v34, -inf  ;;  %v359_v60 = vsel %vm296_vm0, %v805_v40, -inf  ;;  %v904_v34 = vld [vmem:[%s1539_s0 + $0x58] sm:$0xff]  }
  0x1c   :  { %v744_v63 = vunpack.c.l.bf16 %v1119_v52  ;;  %v365_v1 = vsel %vm296_vm0, %v616_v47, -inf  ;;  %v366_v2 = vsel %vm296_vm0, %v648_v51, -inf  ;;  %v368_v3 = vsel %vm296_vm0, %v680_v55, -inf }
  0x1d   :  { %v347_v4 = vmax.f32 %v345_v57, %v346_v44  ;;  %v356_v5 = vmax.f32 %v354_v58, %v355_v54  ;;  %v361_v6 = vsel %vm296_vm0, %v837_v45, -inf  ;;  %v367_v7 = vmax.f32 %v365_v1, %v366_v2  ;;  %v1184_v44 = vld [vmem:[%s1539_s0 + $0xd8] sm:$0xff]  }
  0x1e   :  { %v363_v8 = vsel %vm296_vm0, %v869_v53, -inf  ;;  %v776_v9 = vunpack.c.l.bf16 %v935_v61  ;;  %v808_v10 = vunpack.c.l.bf16 %v1136_v62  ;;  %v370_v12 = vsel %vm296_vm0, %v712_v56, -inf  ;;  %v928_v53 = vld [vmem:[%s1539_s0 + $0x118] sm:$0xff]  }
  0x1f   :  { %v571_v13 = vpack.c.bf16 %v347_v4, %v347_v4  ;;  %v358_v14 = vmax.f32 %v356_v5, %v357_v59  ;;  %v840_v15 = vunpack.c.l.bf16 %v1142_v0  ;;  %v369_v16 = vmax.f32 %v367_v7, %v368_v3  ;;  %v1196_v58 = vld [vmem:[%s1539_s0 + $0x158] sm:$0xff]  }
  0x20   :  { %v372_v17 = vsel %vm296_vm0, %v744_v63, -inf  ;;  %v617_v18 = vunpack.c.h.bf16 %v1090_v32  ;;  %v649_v19 = vunpack.c.h.bf16 %v903_v37  ;;  %v681_v20 = vunpack.c.h.bf16 %v911_v42  ;;  %v1201_v59 = vld [vmem:[%s1539_s0 + $0x198] sm:$0xff]  }
  0x21   :  { %588 = vst.msk [vmem:[%s1540_s1 + $0x8] sm:$0xf] %vm585_vm1, %v571_v13  ;;  %v360_v21 = vmax.f32 %v358_v14, %v359_v60  ;;  %v872_v22 = vunpack.c.l.bf16 %v959_v11  ;;  %v371_v23 = vmax.f32 %v369_v16, %v370_v12  ;;  %v713_v24 = vunpack.c.h.bf16 %v1110_v43  ;;  %v1212_v63 = vld [vmem:[%s1539_s0 + $0x1d8] sm:$0xff]  }
  0x22   :  { %v374_v25 = vsel %vm296_vm0, %v776_v9, -inf  ;;  %v376_v26 = vsel %vm296_vm0, %v808_v10, -inf  ;;  %v745_v27 = vunpack.c.h.bf16 %v1119_v52  ;;  %v382_v28 = vsel %vm296_vm0, %v617_v18, -inf  ;;  %v1224_v12 = vld [vmem:[%s1539_s0 + $0x218] sm:$0xff]  }
  0x23   :  { %v362_v29 = vmax.f32 %v360_v21, %v361_v6  ;;  %v373_v30 = vmax.f32 %v371_v23, %v372_v17  ;;  %v383_v31 = vsel %vm296_vm0, %v649_v19, -inf  ;;  %v385_v32 = vsel %vm296_vm0, %v681_v20, -inf }
  0x24   :  { %v378_v35 = vsel %vm296_vm0, %v840_v15, -inf  ;;  %v777_v36 = vunpack.c.h.bf16 %v935_v61  ;;  %v809_v37 = vunpack.c.h.bf16 %v1136_v62  ;;  %v384_v38 = vmax.f32 %v382_v28, %v383_v31 }
  0x25   :  { %v364_v40 = vmax.f32 %v362_v29, %v363_v8  ;;  %v375_v41 = vmax.f32 %v373_v30, %v374_v25  ;;  %v841_v42 = vunpack.c.h.bf16 %v1142_v0  ;;  %v387_v43 = vsel %vm296_vm0, %v713_v24, -inf }
  0x26   :  { %v873_v45 = vunpack.c.h.bf16 %v959_v11  ;;  %v386_v46 = vmax.f32 %v384_v38, %v385_v32  ;;  %v620_v47 = vunpack.c.l.bf16 %v896_v33  ;;  %v652_v48 = vunpack.c.l.bf16 %v904_v34 }
  0x27   :  { %v572_v49 = vpack.c.bf16 %v364_v40, %v364_v40  ;;  %v377_v50 = vmax.f32 %v375_v41, %v376_v26  ;;  %v389_v51 = vsel %vm296_vm0, %v745_v27, -inf  ;;  %v684_v52 = vunpack.c.l.bf16 %v912_v39  ;;  %v1255_v41 = vld [vmem:[%s1539_s0 + $0xe0] sm:$0xff]  }
  0x28   :  { %v380_v54 = vsel %vm296_vm0, %v872_v22, -inf  ;;  %v388_v55 = vmax.f32 %v386_v46, %v387_v43  ;;  %v391_v56 = vsel %vm296_vm0, %v777_v36, -inf  ;;  %v716_v57 = vunpack.c.l.bf16 %v1184_v44  ;;  %v913_v36 = vld [vmem:[%s1539_s0 + $0xa0] sm:$0xff]  }
  0x29   :  { %589 = vst.msk [vmem:[%s1540_s1 + $0xc] sm:$0xf] %vm585_vm1, %v572_v49  ;;  %v379_v60 = vmax.f32 %v377_v50, %v378_v35  ;;  %v393_v61 = vsel %vm296_vm0, %v809_v37, -inf  ;;  %v395_v62 = vsel %vm296_vm0, %v841_v42, -inf  ;;  %v399_v0 = vsel %vm296_vm0, %v620_v47, -inf  ;;  %v905_v35 = vld [vmem:[%s1539_s0 + $0x60] sm:$0xff]  }
  0x2a   :  { %v390_v1 = vmax.f32 %v388_v55, %v389_v51  ;;  %v748_v2 = vunpack.c.l.bf16 %v928_v53  ;;  %v400_v3 = vsel %vm296_vm0, %v652_v48, -inf  ;;  %v402_v4 = vsel %vm296_vm0, %v684_v52, -inf  ;;  %v1262_v46 = vld [vmem:[%s1539_s0 + $0x120] sm:$0xff]  }
  0x2b   :  { %v381_v5 = vmax.f32 %v379_v60, %v380_v54  ;;  %v397_v6 = vsel %vm296_vm0, %v873_v45, -inf  ;;  %v780_v7 = vunpack.c.l.bf16 %v1196_v58  ;;  %v401_v8 = vmax.f32 %v399_v0, %v400_v3  ;;  %v1269_v55 = vld [vmem:[%s1539_s0 + $0x160] sm:$0xff]  }
  0x2c   :  { %v392_v9 = vmax.f32 %v390_v1, %v391_v56  ;;  %v812_v10 = vunpack.c.l.bf16 %v1201_v59  ;;  %v844_v11 = vunpack.c.l.bf16 %v1212_v63  ;;  %v404_v13 = vsel %vm296_vm0, %v716_v57, -inf  ;;  %v1282_v60 = vld [vmem:[%s1539_s0 + $0x1a0] sm:$0xff]  }
  0x2d   :  { %v573_v14 = vpack.c.bf16 %v381_v5, %v381_v5  ;;  %v403_v15 = vmax.f32 %v401_v8, %v402_v4  ;;  %v621_v16 = vunpack.c.h.bf16 %v896_v33  ;;  %v653_v17 = vunpack.c.h.bf16 %v904_v34  ;;  %v897_v34 = vld [vmem:[%s1539_s0 + $0x20] sm:$0xff]  }
  0x2e   :  { %v394_v18 = vmax.f32 %v392_v9, %v393_v61  ;;  %v406_v19 = vsel %vm296_vm0, %v748_v2, -inf  ;;  %v685_v20 = vunpack.c.h.bf16 %v912_v39  ;;  %v717_v21 = vunpack.c.h.bf16 %v1184_v44  ;;  %v961_v9 = vld [vmem:[%s1539_s0 + $0x220] sm:$0xff]  }
  0x2f   :  { %590 = vst.msk [vmem:[%s1540_s1 + $0x10] sm:$0xf] %vm585_vm1, %v573_v14  ;;  %v876_v22 = vunpack.c.l.bf16 %v1224_v12  ;;  %v405_v23 = vmax.f32 %v403_v15, %v404_v13  ;;  %v408_v24 = vsel %vm296_vm0, %v780_v7, -inf  ;;  %v749_v25 = vunpack.c.h.bf16 %v928_v53 }
  0x30   :  { %v396_v26 = vmax.f32 %v394_v18, %v395_v62  ;;  %v410_v27 = vsel %vm296_vm0, %v812_v10, -inf  ;;  %v416_v28 = vsel %vm296_vm0, %v621_v16, -inf  ;;  %v417_v29 = vsel %vm296_vm0, %v653_v17, -inf }
  0x31   :  { %v407_v30 = vmax.f32 %v405_v23, %v406_v19  ;;  %v412_v31 = vsel %vm296_vm0, %v844_v11, -inf  ;;  %v418_v32 = vmax.f32 %v416_v28, %v417_v29  ;;  %v419_v33 = vsel %vm296_vm0, %v685_v20, -inf }
  0x32   :  { %v398_v37 = vmax.f32 %v396_v26, %v397_v6  ;;  %v781_v38 = vunpack.c.h.bf16 %v1196_v58  ;;  %v813_v39 = vunpack.c.h.bf16 %v1201_v59  ;;  %v421_v40 = vsel %vm296_vm0, %v717_v21, -inf }
  0x33   :  { %v409_v42 = vmax.f32 %v407_v30, %v408_v24  ;;  %v845_v43 = vunpack.c.h.bf16 %v1212_v63  ;;  %v420_v44 = vmax.f32 %v418_v32, %v419_v33  ;;  %v423_v45 = vsel %vm296_vm0, %v749_v25, -inf  ;;  %v1287_v63 = vld [vmem:[%s1539_s0 + $0x1e0] sm:$0xff]  }
  0x34   :  { %v574_v47 = vpack.c.bf16 %v398_v37, %v398_v37  ;;  %v624_v48 = vunpack.c.l.bf16 %v897_v34  ;;  %v656_v49 = vunpack.c.l.bf16 %v905_v35  ;;  %v688_v50 = vunpack.c.l.bf16 %v913_v36  ;;  %v914_v37 = vld [vmem:[%s1539_s0 + $0xa8] sm:$0xff]  }
  0x35   :  { %v411_v51 = vmax.f32 %v409_v42, %v410_v27  ;;  %v414_v52 = vsel %vm296_vm0, %v876_v22, -inf  ;;  %v422_v53 = vmax.f32 %v420_v44, %v421_v40  ;;  %v720_v54 = vunpack.c.l.bf16 %v1255_v41  ;;  %v1330_v42 = vld [vmem:[%s1539_s0 + $0xe8] sm:$0xff]  }
  0x36   :  { %591 = vst.msk [vmem:[%s1540_s1 + $0x14] sm:$0xf] %vm585_vm1, %v574_v47  ;;  %v877_v56 = vunpack.c.h.bf16 %v1224_v12  ;;  %v425_v57 = vsel %vm296_vm0, %v781_v38, -inf  ;;  %v427_v58 = vsel %vm296_vm0, %v813_v39, -inf  ;;  %v752_v59 = vunpack.c.l.bf16 %v1262_v46 }
  0x37   :  { %v413_v61 = vmax.f32 %v411_v51, %v412_v31  ;;  %v424_v62 = vmax.f32 %v422_v53, %v423_v45  ;;  %v433_v0 = vsel %vm296_vm0, %v624_v48, -inf  ;;  %v434_v1 = vsel %vm296_vm0, %v656_v49, -inf  ;;  %v898_v31 = vld [vmem:[%s1539_s0 + $0x28] sm:$0xff]  }
  0x38   :  { %v429_v2 = vsel %vm296_vm0, %v845_v43, -inf  ;;  %v784_v3 = vunpack.c.l.bf16 %v1269_v55  ;;  %v435_v4 = vmax.f32 %v433_v0, %v434_v1  ;;  %v436_v5 = vsel %vm296_vm0, %v688_v50, -inf  ;;  %v930_v51 = vld [vmem:[%s1539_s0 + $0x128] sm:$0xff]  }
  0x39   :  { %v415_v6 = vmax.f32 %v413_v61, %v414_v52  ;;  %v426_v7 = vmax.f32 %v424_v62, %v425_v57  ;;  %v816_v8 = vunpack.c.l.bf16 %v1282_v60  ;;  %v438_v10 = vsel %vm296_vm0, %v720_v54, -inf  ;;  %v1358_v61 = vld [vmem:[%s1539_s0 + $0x1e8] sm:$0xff]  }
  0x3a   :  { %v848_v11 = vunpack.c.l.bf16 %v1287_v63  ;;  %v437_v12 = vmax.f32 %v435_v4, %v436_v5  ;;  %v440_v13 = vsel %vm296_vm0, %v752_v59, -inf  ;;  %v625_v14 = vunpack.c.h.bf16 %v897_v34 }
  0x3b   :  { %v575_v15 = vpack.c.bf16 %v415_v6, %v415_v6  ;;  %v428_v16 = vmax.f32 %v426_v7, %v427_v58  ;;  %v657_v17 = vunpack.c.h.bf16 %v905_v35  ;;  %v689_v18 = vunpack.c.h.bf16 %v913_v36  ;;  %v906_v36 = vld [vmem:[%s1539_s0 + $0x68] sm:$0xff]  }
  0x3c   :  { %v431_v19 = vsel %vm296_vm0, %v877_v56, -inf  ;;  %v880_v20 = vunpack.c.l.bf16 %v961_v9  ;;  %v439_v21 = vmax.f32 %v437_v12, %v438_v10  ;;  %v721_v22 = vunpack.c.h.bf16 %v1255_v41  ;;  %v1346_v56 = vld [vmem:[%s1539_s0 + $0x168] sm:$0xff]  }
  0x3d   :  { %592 = vst.msk [vmem:[%s1540_s1 + $0x18] sm:$0xf] %vm585_vm1, %v575_v15  ;;  %v430_v23 = vmax.f32 %v428_v16, %v429_v2  ;;  %v442_v24 = vsel %vm296_vm0, %v784_v3, -inf  ;;  %v444_v25 = vsel %vm296_vm0, %v816_v8, -inf  ;;  %v753_v26 = vunpack.c.h.bf16 %v1262_v46  ;;  %v1370_v10 = vld [vmem:[%s1539_s0 + $0x228] sm:$0xff]  }
  0x3e   :  { %v441_v27 = vmax.f32 %v439_v21, %v440_v13  ;;  %v450_v28 = vsel %vm296_vm0, %v625_v14, -inf  ;;  %v451_v29 = vsel %vm296_vm0, %v657_v17, -inf  ;;  %v453_v30 = vsel %vm296_vm0, %v689_v18, -inf }
  0x3f   :  { %v432_v32 = vmax.f32 %v430_v23, %v431_v19  ;;  %v446_v33 = vsel %vm296_vm0, %v848_v11, -inf  ;;  %v785_v34 = vunpack.c.h.bf16 %v1269_v55  ;;  %v452_v35 = vmax.f32 %v450_v28, %v451_v29 }
  0x40   :  { %v443_v38 = vmax.f32 %v441_v27, %v442_v24  ;;  %v817_v39 = vunpack.c.h.bf16 %v1282_v60  ;;  %v849_v40 = vunpack.c.h.bf16 %v1287_v63  ;;  %v455_v41 = vsel %vm296_vm0, %v721_v22, -inf  ;;  %v1353_v60 = vld [vmem:[%s1539_s0 + $0x1a8] sm:$0xff]  }
  0x41   :  { %v576_v43 = vpack.c.bf16 %v432_v32, %v432_v32  ;;  %v881_v44 = vunpack.c.h.bf16 %v961_v9  ;;  %v454_v45 = vmax.f32 %v452_v35, %v453_v30  ;;  %v628_v46 = vunpack.c.l.bf16 %v898_v31  ;;  %v899_v32 = vld [vmem:[%s1539_s0 + $0x30] sm:$0xff]  }
  0x42   :  { %v445_v47 = vmax.f32 %v443_v38, %v444_v25  ;;  %v457_v48 = vsel %vm296_vm0, %v753_v26, -inf  ;;  %v660_v49 = vunpack.c.l.bf16 %v906_v36  ;;  %v692_v50 = vunpack.c.l.bf16 %v914_v37 }
  0x43   :  { %593 = vst.msk [vmem:[%s1540_s1 + $0x1c] sm:$0xf] %vm585_vm1, %v576_v43  ;;  %v448_v52 = vsel %vm296_vm0, %v880_v20, -inf  ;;  %v456_v53 = vmax.f32 %v454_v45, %v455_v41  ;;  %v459_v54 = vsel %vm296_vm0, %v785_v34, -inf  ;;  %v724_v55 = vunpack.c.l.bf16 %v1330_v42  ;;  %v915_v34 = vld [vmem:[%s1539_s0 + $0xb0] sm:$0xff]  }
  0x44   :  { %v447_v57 = vmax.f32 %v445_v47, %v446_v33  ;;  %v461_v58 = vsel %vm296_vm0, %v817_v39, -inf  ;;  %v463_v59 = vsel %vm296_vm0, %v849_v40, -inf  ;;  %v467_v62 = vsel %vm296_vm0, %v628_v46, -inf  ;;  %v907_v33 = vld [vmem:[%s1539_s0 + $0x70] sm:$0xff]  }
  0x45   :  { %v458_v63 = vmax.f32 %v456_v53, %v457_v48  ;;  %v756_v0 = vunpack.c.l.bf16 %v930_v51  ;;  %v468_v1 = vsel %vm296_vm0, %v660_v49, -inf  ;;  %v470_v2 = vsel %vm296_vm0, %v692_v50, -inf  ;;  %v1401_v39 = vld [vmem:[%s1539_s0 + $0xf0] sm:$0xff]  }
  0x46   :  { %v449_v3 = vmax.f32 %v447_v57, %v448_v52  ;;  %v465_v4 = vsel %vm296_vm0, %v881_v44, -inf  ;;  %v788_v5 = vunpack.c.l.bf16 %v1346_v56  ;;  %v469_v6 = vmax.f32 %v467_v62, %v468_v1  ;;  %v1408_v44 = vld [vmem:[%s1539_s0 + $0x130] sm:$0xff]  }
  0x47   :  { %v460_v7 = vmax.f32 %v458_v63, %v459_v54  ;;  %v820_v8 = vunpack.c.l.bf16 %v1353_v60  ;;  %v852_v9 = vunpack.c.l.bf16 %v1358_v61  ;;  %v472_v11 = vsel %vm296_vm0, %v724_v55, -inf }
  0x48   :  { %v577_v12 = vpack.c.bf16 %v449_v3, %v449_v3  ;;  %v471_v13 = vmax.f32 %v469_v6, %v470_v2  ;;  %v629_v14 = vunpack.c.h.bf16 %v898_v31  ;;  %v661_v15 = vunpack.c.h.bf16 %v906_v36 }
  0x49   :  { %v462_v16 = vmax.f32 %v460_v7, %v461_v58  ;;  %v474_v17 = vsel %vm296_vm0, %v756_v0, -inf  ;;  %v693_v18 = vunpack.c.h.bf16 %v914_v37  ;;  %v725_v19 = vunpack.c.h.bf16 %v1330_v42 }
  0x4a   :  { %594 = vst.msk [vmem:[%s1540_s1 + $0x20] sm:$0xf] %vm585_vm1, %v577_v12  ;;  %v884_v20 = vunpack.c.l.bf16 %v1370_v10  ;;  %v473_v21 = vmax.f32 %v471_v13, %v472_v11  ;;  %v476_v22 = vsel %vm296_vm0, %v788_v5, -inf  ;;  %v757_v23 = vunpack.c.h.bf16 %v930_v51  ;;  %v1438_v5 = vld [vmem:[%s1539_s0 + $0x1f0] sm:$0xff]  }
  0x4b   :  { %v464_v24 = vmax.f32 %v462_v16, %v463_v59  ;;  %v478_v25 = vsel %vm296_vm0, %v820_v8, -inf  ;;  %v484_v26 = vsel %vm296_vm0, %v629_v14, -inf  ;;  %v485_v27 = vsel %vm296_vm0, %v661_v15, -inf  ;;  %v1427_v59 = vld [vmem:[%s1539_s0 + $0x1b0] sm:$0xff]  }
  0x4c   :  { %v475_v28 = vmax.f32 %v473_v21, %v474_v17  ;;  %v480_v29 = vsel %vm296_vm0, %v852_v9, -inf  ;;  %v486_v30 = vmax.f32 %v484_v26, %v485_v27  ;;  %v487_v31 = vsel %vm296_vm0, %v693_v18, -inf  ;;  %v1448_v17 = vld [vmem:[%s1539_s0 + $0x230] sm:$0xff]   ;;  %v900_v27 = vld [vmem:[%s1539_s0 + $0x38] sm:$0xff]  }
  0x4d   :  { %v466_v35 = vmax.f32 %v464_v24, %v465_v4  ;;  %v789_v36 = vunpack.c.h.bf16 %v1346_v56  ;;  %v821_v37 = vunpack.c.h.bf16 %v1353_v60  ;;  %v489_v38 = vsel %vm296_vm0, %v725_v19, -inf  ;;  %v1422_v56 = vld [vmem:[%s1539_s0 + $0x170] sm:$0xff]  }
  0x4e   :  { %v477_v40 = vmax.f32 %v475_v28, %v476_v22  ;;  %v853_v41 = vunpack.c.h.bf16 %v1358_v61  ;;  %v488_v42 = vmax.f32 %v486_v30, %v487_v31  ;;  %v491_v43 = vsel %vm296_vm0, %v757_v23, -inf }
  0x4f   :  { %v578_v45 = vpack.c.bf16 %v466_v35, %v466_v35  ;;  %v632_v46 = vunpack.c.l.bf16 %v899_v32  ;;  %v664_v47 = vunpack.c.l.bf16 %v907_v33  ;;  %v696_v48 = vunpack.c.l.bf16 %v915_v34 }
  0x50   :  { %v479_v49 = vmax.f32 %v477_v40, %v478_v25  ;;  %v490_v50 = vmax.f32 %v488_v42, %v489_v38  ;;  %v728_v51 = vunpack.c.l.bf16 %v1401_v39  ;;  %v482_v52 = vsel %vm296_vm0, %v884_v20, -inf  ;;  %v924_v38 = vld [vmem:[%s1539_s0 + $0xf8] sm:$0xff]  }
  0x51   :  { %595 = vst.msk [vmem:[%s1540_s1 + $0x24] sm:$0xf] %vm585_vm1, %v578_v45  ;;  %v885_v53 = vunpack.c.h.bf16 %v1370_v10  ;;  %v493_v54 = vsel %vm296_vm0, %v789_v36, -inf  ;;  %v760_v55 = vunpack.c.l.bf16 %v1408_v44  ;;  %v501_v60 = vsel %vm296_vm0, %v632_v46, -inf }
  0x52   :  { %v481_v57 = vmax.f32 %v479_v49, %v480_v29  ;;  %v492_v58 = vmax.f32 %v490_v50, %v491_v43  ;;  %v502_v61 = vsel %vm296_vm0, %v664_v47, -inf  ;;  %v495_v62 = vsel %vm296_vm0, %v821_v37, -inf  ;;  %v932_v47 = vld [vmem:[%s1539_s0 + $0x138] sm:$0xff]  }
  0x53   :  { %v497_v63 = vsel %vm296_vm0, %v853_v41, -inf  ;;  %v503_v0 = vmax.f32 %v501_v60, %v502_v61  ;;  %v504_v1 = vsel %vm296_vm0, %v696_v48, -inf  ;;  %v792_v4 = vunpack.c.l.bf16 %v1422_v56 }
  0x54   :  { %v483_v2 = vmax.f32 %v481_v57, %v482_v52  ;;  %v494_v3 = vmax.f32 %v492_v58, %v493_v54  ;;  %v506_v6 = vsel %vm296_vm0, %v728_v51, -inf  ;;  %v824_v7 = vunpack.c.l.bf16 %v1427_v59  ;;  %v940_v52 = vld [vmem:[%s1539_s0 + $0x178] sm:$0xff]  }
  0x55   :  { %v505_v8 = vmax.f32 %v503_v0, %v504_v1  ;;  %v508_v9 = vsel %vm296_vm0, %v760_v55, -inf  ;;  %v633_v10 = vunpack.c.h.bf16 %v899_v32  ;;  %v665_v13 = vunpack.c.h.bf16 %v907_v33  ;;  %v908_v32 = vld [vmem:[%s1539_s0 + $0x78] sm:$0xff]  }
  0x56   :  { %v579_v11 = vpack.c.bf16 %v483_v2, %v483_v2  ;;  %v496_v12 = vmax.f32 %v494_v3, %v495_v62  ;;  %v697_v14 = vunpack.c.h.bf16 %v915_v34  ;;  %v499_v15 = vsel %vm296_vm0, %v885_v53, -inf  ;;  %v916_v33 = vld [vmem:[%s1539_s0 + $0xb8] sm:$0xff]  }
  0x57   :  { %v856_v16 = vunpack.c.l.bf16 %v1438_v5  ;;  %v507_v18 = vmax.f32 %v505_v8, %v506_v6  ;;  %v729_v19 = vunpack.c.h.bf16 %v1401_v39  ;;  %v510_v21 = vsel %vm296_vm0, %v792_v4, -inf }
  0x58   :  { %596 = vst.msk [vmem:[%s1540_s1 + $0x28] sm:$0xf] %vm585_vm1, %v579_v11  ;;  %v498_v20 = vmax.f32 %v496_v12, %v497_v63  ;;  %v761_v22 = vunpack.c.h.bf16 %v1408_v44  ;;  %v518_v24 = vsel %vm296_vm0, %v633_v10, -inf  ;;  %v519_v25 = vsel %vm296_vm0, %v665_v13, -inf  ;;  %v964_v12 = vld [vmem:[%s1539_s0 + $0x238] sm:$0xff]  }
  0x59   :  { %v509_v23 = vmax.f32 %v507_v18, %v508_v9  ;;  %v521_v26 = vsel %vm296_vm0, %v697_v14, -inf  ;;  %v888_v29 = vunpack.c.l.bf16 %v1448_v17  ;;  %v512_v30 = vsel %vm296_vm0, %v824_v7, -inf }
  0x5a   :  { %v500_v28 = vmax.f32 %v498_v20, %v499_v15  ;;  %v520_v31 = vmax.f32 %v518_v24, %v519_v25  ;;  %v514_v35 = vsel %vm296_vm0, %v856_v16, -inf  ;;  %v793_v36 = vunpack.c.h.bf16 %v1422_v56  ;;  %v948_v56 = vld [vmem:[%s1539_s0 + $0x1b8] sm:$0xff]  }
  0x5b   :  { %v511_v34 = vmax.f32 %v509_v23, %v510_v21  ;;  %v523_v37 = vsel %vm296_vm0, %v729_v19, -inf  ;;  %v825_v40 = vunpack.c.h.bf16 %v1427_v59  ;;  %v636_v42 = vunpack.c.l.bf16 %v900_v27 }
  0x5c   :  { %v580_v39 = vpack.c.bf16 %v500_v28, %v500_v28  ;;  %v522_v41 = vmax.f32 %v520_v31, %v521_v26  ;;  %v525_v44 = vsel %vm296_vm0, %v761_v22, -inf  ;;  %v668_v45 = vunpack.c.l.bf16 %v908_v32 }
  0x5d   :  { %v513_v43 = vmax.f32 %v511_v34, %v512_v30  ;;  %v700_v46 = vunpack.c.l.bf16 %v916_v33  ;;  %v516_v48 = vsel %vm296_vm0, %v888_v29, -inf  ;;  %v857_v49 = vunpack.c.h.bf16 %v1438_v5  ;;  %v956_v5 = vld [vmem:[%s1539_s0 + $0x1f8] sm:$0xff]  }
  0x5e   :  { %597 = vst.msk [vmem:[%s1540_s1 + $0x2c] sm:$0xf] %vm585_vm1, %v580_v39  ;;  %v524_v50 = vmax.f32 %v522_v41, %v523_v37  ;;  %v732_v51 = vunpack.c.l.bf16 %v924_v38  ;;  %v889_v54 = vunpack.c.h.bf16 %v1448_v17  ;;  %v527_v55 = vsel %vm296_vm0, %v793_v36, -inf }
  0x5f   :  { %v515_v53 = vmax.f32 %v513_v43, %v514_v35  ;;  %v535_v57 = vsel %vm296_vm0, %v636_v42, -inf  ;;  %v764_v59 = vunpack.c.l.bf16 %v932_v47  ;;  %v536_v60 = vsel %vm296_vm0, %v668_v45, -inf }
  0x60   :  { %v526_v58 = vmax.f32 %v524_v50, %v525_v44  ;;  %v538_v61 = vsel %vm296_vm0, %v700_v46, -inf  ;;  %v529_v63 = vsel %vm296_vm0, %v825_v40, -inf  ;;  %v796_v0 = vunpack.c.l.bf16 %v940_v52 }
  0x61   :  { %v517_v62 = vmax.f32 %v515_v53, %v516_v48  ;;  %v537_v1 = vmax.f32 %v535_v57, %v536_v60  ;;  %v531_v3 = vsel %vm296_vm0, %v857_v49, -inf  ;;  %v828_v4 = vunpack.c.l.bf16 %v948_v56 }
  0x62   :  { %v528_v2 = vmax.f32 %v526_v58, %v527_v55  ;;  %v540_v6 = vsel %vm296_vm0, %v732_v51, -inf  ;;  %v637_v9 = vunpack.c.h.bf16 %v900_v27  ;;  %v669_v10 = vunpack.c.h.bf16 %v908_v32 }
  0x63   :  { %v581_v7 = vpack.c.bf16 %v517_v62, %v517_v62  ;;  %v539_v8 = vmax.f32 %v537_v1, %v538_v61  ;;  %v542_v13 = vsel %vm296_vm0, %v764_v59, -inf  ;;  %v701_v14 = vunpack.c.h.bf16 %v916_v33 }
  0x64   :  { %v530_v11 = vmax.f32 %v528_v2, %v529_v63  ;;  %v733_v15 = vunpack.c.h.bf16 %v924_v38  ;;  %v533_v16 = vsel %vm296_vm0, %v889_v54, -inf  ;;  %v860_v17 = vunpack.c.l.bf16 %v956_v5 }
  0x65   :  { %598 = vst.msk [vmem:[%s1540_s1 + $0x30] sm:$0xf] %vm585_vm1, %v581_v7  ;;  %v541_v18 = vmax.f32 %v539_v8, %v540_v6  ;;  %v544_v19 = vsel %vm296_vm0, %v796_v0, -inf  ;;  %v765_v21 = vunpack.c.h.bf16 %v932_v47  ;;  %v552_v22 = vsel %vm296_vm0, %v637_v9, -inf }
  0x66   :  { %v532_v20 = vmax.f32 %v530_v11, %v531_v3  ;;  %v553_v23 = vsel %vm296_vm0, %v669_v10, -inf  ;;  %v892_v24 = vunpack.c.l.bf16 %v964_v12  ;;  %v555_v27 = vsel %vm296_vm0, %v701_v14, -inf }
  0x67   :  { %v543_v25 = vmax.f32 %v541_v18, %v542_v13  ;;  %v554_v26 = vmax.f32 %v552_v22, %v553_v23  ;;  %v546_v29 = vsel %vm296_vm0, %v828_v4, -inf  ;;  %v797_v30 = vunpack.c.h.bf16 %v940_v52 }
  0x68   :  { %v534_v28 = vmax.f32 %v532_v20, %v533_v16  ;;  %v557_v31 = vsel %vm296_vm0, %v733_v15, -inf  ;;  %v548_v35 = vsel %vm296_vm0, %v860_v17, -inf  ;;  %v829_v36 = vunpack.c.h.bf16 %v948_v56 }
  0x69   :  { %v545_v32 = vmax.f32 %v543_v25, %v544_v19  ;;  %v556_v33 = vmax.f32 %v554_v26, %v555_v27  ;;  %v559_v37 = vsel %vm296_vm0, %v765_v21, -inf  ;;  %v550_v40 = vsel %vm296_vm0, %v892_v24, -inf }
  0x6a   :  { %v582_v34 = vpack.c.bf16 %v534_v28, %v534_v28  ;;  %v861_v41 = vunpack.c.h.bf16 %v956_v5  ;;  %v561_v42 = vsel %vm296_vm0, %v797_v30, -inf  ;;  %v893_v45 = vunpack.c.h.bf16 %v964_v12 }
  0x6b   :  { %v547_v38 = vmax.f32 %v545_v32, %v546_v29  ;;  %v558_v39 = vmax.f32 %v556_v33, %v557_v31  ;;  %v563_v46 = vsel %vm296_vm0, %v829_v36, -inf }
  0x6c   :  { %599 = vst.msk [vmem:[%s1540_s1 + $0x34] sm:$0xf] %vm585_vm1, %v582_v34  ;;  %v565_v49 = vsel %vm296_vm0, %v861_v41, -inf  ;;  %v567_v52 = vsel %vm296_vm0, %v893_v45, -inf }
  0x6d   :  { %v549_v43 = vmax.f32 %v547_v38, %v548_v35  ;;  %v560_v44 = vmax.f32 %v558_v39, %v559_v37 }
  0x6f   :  { %v551_v47 = vmax.f32 %v549_v43, %v550_v40  ;;  %v562_v48 = vmax.f32 %v560_v44, %v561_v42 }
  0x71   :  { %v583_v50 = vpack.c.bf16 %v551_v47, %v551_v47  ;;  %v564_v51 = vmax.f32 %v562_v48, %v563_v46 }
  0x73   :  { %600 = vst.msk [vmem:[%s1540_s1 + $0x38] sm:$0xf] %vm585_vm1, %v583_v50  ;;  %v566_v53 = vmax.f32 %v564_v51, %v565_v49 }
  0x75   :  { %v568_v54 = vmax.f32 %v566_v53, %v567_v52 }
  0x77   :  { %v584_v55 = vpack.c.bf16 %v568_v54, %v568_v54 }
  0x79   :  { %601 = vst.msk [vmem:[%s1540_s1 + $0x3c] sm:$0xf] %vm585_vm1, %v584_v55 }

// kernel: forward.26
= control target key start
LH: loop header
LB: loop body
LE: loop exit
PB: predicated region body
PF: predicated region fallthrough
CT: control target
= control target key end

     0   :  { %s940_s15 = smov 0   ;;  %s942_s16 = smov 0   ;;  %s1141_s0 = inlined_call_operand.vmem [shape: bf16[9,128,64], index: 0, kind: input, shape index: {}]   ;;  %s1142_s1 = inlined_call_operand.vmem [shape: bf16[9,64,64], index: 1, kind: input, shape index: {}]   ;;  %s1143_s2 = inlined_call_operand.vmem [shape: f32[1,64], index: 2, kind: input, shape index: {}]   ;;  %s1144_s3 = inlined_call_operand.vmem [shape: f32[1,64], index: 3, kind: input, shape index: {}]   ;;  %s1145_s4 = inlined_call_operand.vmem [shape: bf16[128,64], index: 4, kind: output, shape index: {}]  }
   0x1   :  { %s944_s17 = smov 0  }
   0x2 LB: > { %s26_s18 = sadd.s32 1, %s908_s16  ;;  %p770_p0 = scmp.ge.s32.totalorder %s912_s17, 1  ;;  %s912_s17 = sphi %s944_s17, %s14_s17   ;;  %s908_s16 = sphi %s942_s16, %s1147_s16   ;;  %s904_s15 = sphi %s940_s15, %s1146_s15  }
   0x3   : > { %p27_p1 = scmp.ge.s32.totalorder %s26_s18, 9  ;;  %p221_p2 = scmp.lt.s32.totalorder %s912_s17, 10 }
   0x5   : > { %s1149_s18 = smov (%p27_p1, %s26_s18), 0  ;;  %p222_p3 = pnand %p770_p0, %p221_p2 }
   0x6   : > { %p269_p4 = scmp.lt.s32.totalorder (!%p222_p3), %s904_s15, 8  ;;  %p775_p5 = scmp.ne.s32.totalorder (!%p222_p3), %s904_s15, 0 }
   0x7   : > { %225 = sbr.rel (%p222_p3) target bundleno = 238 (0xee), region = 36 }
   0xc   : > { %s270_s19 = scalar_select %p269_p4, %s904_s15, 8 }
   0xd   : > { %305 = sbr.rel (%p775_p5) target bundleno = 35 (0x23), region = 40 }
   0xe   : > { %s837_s20 = sshll.u32 %s270_s19, 6  ;;  %s838_s21 = sshll.u32 %s270_s19, 5 }
   0xf   : > { %s965_s24 = scalar_lea.vmem %s1141_s0, %s837_s20  ;;  %s970_s27 = scalar_lea.vmem %s1142_s1, %s838_s21 }
  0x12   : > { %vm306_vm0 = vcmask 523264   ;;  %v914_v0 = vmov 0.0  }
  0x13   : > { %307 = vst.msk [vmem:[#allocation2] sm:$0xff] %vm306_vm0, %v914_v0 }
  0x14   : > { %308 = vst.msk [vmem:[#allocation2 + $0x8] sm:$0xff] %vm306_vm0, %v914_v0 }
  0x15   : > { %309 = vst.msk [vmem:[#allocation2 + $0x10] sm:$0xff] %vm306_vm0, %v914_v0 }
  0x16   : > { %310 = vst.msk [vmem:[#allocation2 + $0x18] sm:$0xff] %vm306_vm0, %v914_v0 }
  0x17   : > { %311 = vst.msk [vmem:[#allocation2 + $0x20] sm:$0xff] %vm306_vm0, %v914_v0 }
  0x18   : > { %312 = vst.msk [vmem:[#allocation2 + $0x28] sm:$0xff] %vm306_vm0, %v914_v0 }
  0x19   : > { %313 = vst.msk [vmem:[#allocation2 + $0x30] sm:$0xff] %vm306_vm0, %v914_v0 }
  0x1a   : > { %314 = vst.msk [vmem:[#allocation2 + $0x38] sm:$0xff] %vm306_vm0, %v914_v0 }
  0x1b   : > { %315 = vst.msk [vmem:[#allocation2 + $0x40] sm:$0xff] %vm306_vm0, %v914_v0 }
  0x1c   : > { %316 = vst.msk [vmem:[#allocation2 + $0x48] sm:$0xff] %vm306_vm0, %v914_v0 }
  0x1d   : > { %317 = vst.msk [vmem:[#allocation2 + $0x50] sm:$0xff] %vm306_vm0, %v914_v0 }
  0x1e   : > { %318 = vst.msk [vmem:[#allocation2 + $0x58] sm:$0xff] %vm306_vm0, %v914_v0 }
  0x1f   : > { %319 = vst.msk [vmem:[#allocation2 + $0x60] sm:$0xff] %vm306_vm0, %v914_v0 }
  0x20   : > { %320 = vst.msk [vmem:[#allocation2 + $0x68] sm:$0xff] %vm306_vm0, %v914_v0 }
  0x21   : > { %321 = vst.msk [vmem:[#allocation2 + $0x70] sm:$0xff] %vm306_vm0, %v914_v0 }
  0x22   : > { %322 = vst.msk [vmem:[#allocation2 + $0x78] sm:$0xff] %vm306_vm0, %v914_v0 }
  0x23 PF: > { %v850_v1 = vld [vmem:[%s970_s27 + $0x18] sm:$0xff]  ;;  %v849_v2 = vld [vmem:[%s970_s27 + $0x10] sm:$0xff]  ;;  %v848_v3 = vld [vmem:[%s970_s27 + $0x8] sm:$0xff]  ;;  %vm427_vm1 = vcmask 523264   ;;  %p832_p6 = scmp.ne.s32.totalorder %s904_s15, 8 }
  0x24   : > { %456 = vmatpush.bf16.msra.mxu0 %v850_v1  ;;  %851 = vmatpush.bf16.msra.mxu1 %v850_v1  ;;  %v847_v4 = vld [vmem:[%s970_s27] sm:$0xff]  ;;  %v841_v6 = vld [vmem:[%s965_s24 + $0x10] sm:$0xff]  ;;  %v840_v9 = vld [vmem:[%s965_s24 + $0x8] sm:$0xff] }
  0x25   : > { %852 = vmatpush.bf16.msra.mxu2 %v850_v1  ;;  %853 = vmatpush.bf16.msra.mxu3 %v850_v1  ;;  %v839_v5 = vld [vmem:[%s965_s24] sm:$0xff]  ;;  %v845_v8 = vld [vmem:[%s965_s24 + $0x30] sm:$0xff]  ;;  %v842_v10 = vld [vmem:[%s965_s24 + $0x18] sm:$0xff] }
  0x26   : > { %v843_v7 = vld [vmem:[%s965_s24 + $0x20] sm:$0xff]  ;;  %v844_v11 = vld [vmem:[%s965_s24 + $0x28] sm:$0xff]  ;;  %v846_v12 = vld [vmem:[%s965_s24 + $0x38] sm:$0xff] }
  0x27   : > { %v323_v13 = vld [vmem:[#allocation2] sm:$0xff]  ;;  %v324_v21 = vld [vmem:[#allocation2 + $0x8] sm:$0xff]  ;;  %v325_v33 = vld [vmem:[#allocation2 + $0x10] sm:$0xff] }
  0x28   : > { %457 = vmatpush.bf16.msra.mxu0 %v849_v2  ;;  %854 = vmatpush.bf16.msra.mxu1 %v849_v2  ;;  %v327_v14 = vld [vmem:[#allocation2 + $0x20] sm:$0xff]  ;;  %v328_v22 = vld [vmem:[#allocation2 + $0x28] sm:$0xff]  ;;  %v329_v34 = vld [vmem:[#allocation2 + $0x30] sm:$0xff] }
  0x29   : > { %855 = vmatpush.bf16.msra.mxu2 %v849_v2  ;;  %856 = vmatpush.bf16.msra.mxu3 %v849_v2  ;;  %v331_v19 = vld [vmem:[#allocation2 + $0x40] sm:$0xff]  ;;  %v332_v31 = vld [vmem:[#allocation2 + $0x48] sm:$0xff]  ;;  %v333_v43 = vld [vmem:[#allocation2 + $0x50] sm:$0xff] }
  0x2a   : > { %v335_v20 = vld [vmem:[#allocation2 + $0x60] sm:$0xff]  ;;  %v336_v32 = vld [vmem:[#allocation2 + $0x68] sm:$0xff]  ;;  %v337_v44 = vld [vmem:[#allocation2 + $0x70] sm:$0xff] }
  0x2b   : > { %v326_v45 = vld [vmem:[#allocation2 + $0x18] sm:$0xff] }
  0x2c   : > { %458 = vmatpush.bf16.msra.mxu0 %v848_v3  ;;  %857 = vmatpush.bf16.msra.mxu1 %v848_v3  ;;  %v330_v46 = vld [vmem:[#allocation2 + $0x38] sm:$0xff] }
  0x2d   : > { %858 = vmatpush.bf16.msra.mxu2 %v848_v3  ;;  %859 = vmatpush.bf16.msra.mxu3 %v848_v3  ;;  %v334_v55 = vld [vmem:[#allocation2 + $0x58] sm:$0xff] }
  0x2e   : > { %v338_v56 = vld [vmem:[#allocation2 + $0x78] sm:$0xff] }
  0x30   : > { %459 = vmatpush.bf16.msra.mxu0 %v847_v4  ;;  %860 = vmatpush.bf16.msra.mxu1 %v847_v4 }
  0x31   : > { %861 = vmatpush.bf16.msra.mxu2 %v847_v4  ;;  %862 = vmatpush.bf16.msra.mxu3 %v847_v4 }
  0x33   : > { %824 = vmatmul.msk.bf16.vlgmr.msra.gmra.mxu0 %vm427_vm1, %v839_v5  ;;  %826 = vmatmul.msk.bf16.vlgmr.msra.gmra.mxu1 %vm427_vm1, %v841_v6 }
  0x34   : > { %828 = vmatmul.msk.bf16.vlgmr.msra.gmra.mxu2 %vm427_vm1, %v843_v7  ;;  %830 = vmatmul.msk.bf16.vlgmr.msra.gmra.mxu3 %vm427_vm1, %v845_v8 }
  0x43   : > { %825 = vmatmul.msk.bf16.gmra.mxu0 %vm427_vm1, %v840_v9  ;;  %827 = vmatmul.msk.bf16.gmra.mxu1 %vm427_vm1, %v842_v10 }
  0x44   : > { %829 = vmatmul.msk.bf16.gmra.mxu2 %vm427_vm1, %v844_v11  ;;  %831 = vmatmul.msk.bf16.gmra.mxu3 %vm427_vm1, %v846_v12 }
  0xb0   : > { %v461_v15 = vpop.f32.mrf.mxu0  ;;  %v471_v16 = vpop.f32.mrf.mxu1 }
  0xb1   : > { %v501_v17 = vadd.f32 %v461_v15, %v323_v13  ;;  %v505_v18 = vadd.f32 %v471_v16, %v327_v14 }
  0xb3   : > { %517 = vst.msk [vmem:[#allocation2] sm:$0xff] %vm427_vm1, %v501_v17 }
  0xb4   : > { %521 = vst.msk [vmem:[#allocation2 + $0x20] sm:$0xff] %vm427_vm1, %v505_v18 }
  0xb7   : > { %v481_v23 = vpop.f32.mrf.mxu2  ;;  %v491_v24 = vpop.f32.mrf.mxu3 }
  0xb8   : > { %v509_v25 = vadd.f32 %v481_v23, %v331_v19  ;;  %v513_v26 = vadd.f32 %v491_v24, %v335_v20  ;;  %v463_v27 = vpop.f32.mrf.mxu0  ;;  %v473_v28 = vpop.f32.mrf.mxu1 }
  0xb9   : > { %v502_v29 = vadd.f32 %v463_v27, %v324_v21  ;;  %v506_v30 = vadd.f32 %v473_v28, %v328_v22 }
  0xba   : > { %525 = vst.msk [vmem:[#allocation2 + $0x40] sm:$0xff] %vm427_vm1, %v509_v25 }
  0xbb   : > { %529 = vst.msk [vmem:[#allocation2 + $0x60] sm:$0xff] %vm427_vm1, %v513_v26 }
  0xbc   : > { %518 = vst.msk [vmem:[#allocation2 + $0x8] sm:$0xff] %vm427_vm1, %v502_v29 }
  0xbd   : > { %522 = vst.msk [vmem:[#allocation2 + $0x28] sm:$0xff] %vm427_vm1, %v506_v30 }
  0xbf   : > { %v483_v35 = vpop.f32.mrf.mxu2  ;;  %v493_v36 = vpop.f32.mrf.mxu3 }
  0xc0   : > { %v510_v37 = vadd.f32 %v483_v35, %v332_v31  ;;  %v514_v38 = vadd.f32 %v493_v36, %v336_v32  ;;  %v466_v39 = vpop.f32.mrf.mxu0  ;;  %v476_v40 = vpop.f32.mrf.mxu1 }
  0xc1   : > { %v503_v41 = vadd.f32 %v466_v39, %v325_v33  ;;  %v507_v42 = vadd.f32 %v476_v40, %v329_v34 }
  0xc2   : > { %526 = vst.msk [vmem:[#allocation2 + $0x48] sm:$0xff] %vm427_vm1, %v510_v37 }
  0xc3   : > { %530 = vst.msk [vmem:[#allocation2 + $0x68] sm:$0xff] %vm427_vm1, %v514_v38 }
  0xc4   : > { %519 = vst.msk [vmem:[#allocation2 + $0x10] sm:$0xff] %vm427_vm1, %v503_v41 }
  0xc5   : > { %523 = vst.msk [vmem:[#allocation2 + $0x30] sm:$0xff] %vm427_vm1, %v507_v42 }
  0xc7   : > { %v486_v47 = vpop.f32.mrf.mxu2  ;;  %v496_v48 = vpop.f32.mrf.mxu3 }
  0xc8   : > { %v511_v49 = vadd.f32 %v486_v47, %v333_v43  ;;  %v515_v50 = vadd.f32 %v496_v48, %v337_v44  ;;  %v468_v51 = vpop.f32.mrf.mxu0  ;;  %v478_v52 = vpop.f32.mrf.mxu1 }
  0xc9   : > { %v504_v53 = vadd.f32 %v468_v51, %v326_v45  ;;  %v508_v54 = vadd.f32 %v478_v52, %v330_v46 }
  0xca   : > { %527 = vst.msk [vmem:[#allocation2 + $0x50] sm:$0xff] %vm427_vm1, %v511_v49 }
  0xcb   : > { %531 = vst.msk [vmem:[#allocation2 + $0x70] sm:$0xff] %vm427_vm1, %v515_v50 }
  0xcc   : > { %520 = vst.msk [vmem:[#allocation2 + $0x18] sm:$0xff] %vm427_vm1, %v504_v53 }
  0xcd   : > { %524 = vst.msk [vmem:[#allocation2 + $0x38] sm:$0xff] %vm427_vm1, %v508_v54 }
  0xcf   : > { %v488_v57 = vpop.f32.mrf.mxu2  ;;  %v498_v58 = vpop.f32.mrf.mxu3  ;;  %536 = sbr.rel (%p832_p6) target bundleno = 238 (0xee), region = 44 }
  0xd0   : > { %v512_v59 = vadd.f32 %v488_v57, %v334_v55  ;;  %v516_v60 = vadd.f32 %v498_v58, %v338_v56 }
  0xd2   : > { %528 = vst.msk [vmem:[#allocation2 + $0x58] sm:$0xff] %vm427_vm1, %v512_v59 }
  0xd3   : > { %532 = vst.msk [vmem:[#allocation2 + $0x78] sm:$0xff] %vm427_vm1, %v516_v60 }
  0xd4   : > { %v537_v61 = vld [vmem:[#allocation2] sm:$0xff]  ;;  %v538_v0 = vld [vmem:[#allocation2 + $0x8] sm:$0xff]  ;;  %v539_v3 = vld [vmem:[#allocation2 + $0x10] sm:$0xff]  ;;  %vm625_vm2 = vcmask 519168  }
  0xd5   : > { %v1029_v62 = vld [vmem:[%s1143_s2] ss:$0 sm:$0xff]  ;;  %v540_v4 = vld [vmem:[#allocation2 + $0x18] sm:$0xff]  ;;  %v542_v9 = vld [vmem:[#allocation2 + $0x28] sm:$0xff] }
  0xd6   : > { %v1034_v63 = vld [vmem:[%s1144_s3] ss:$0 sm:$0xff]  ;;  %v557_v1 = vmul.f32 %v1029_v62, %v537_v61  ;;  %v558_v2 = vmul.f32 %v1029_v62, %v538_v0  ;;  %v559_v6 = vmul.f32 %v1029_v62, %v539_v3  ;;  %v560_v7 = vmul.f32 %v1029_v62, %v540_v4  ;;  %v543_v10 = vld [vmem:[#allocation2 + $0x30] sm:$0xff]  ;;  %v544_v11 = vld [vmem:[#allocation2 + $0x38] sm:$0xff] }
  0xd7   : > { %v541_v5 = vld [vmem:[#allocation2 + $0x20] sm:$0xff]  ;;  %v562_v14 = vmul.f32 %v1029_v62, %v542_v9  ;;  %v563_v15 = vmul.f32 %v1029_v62, %v543_v10  ;;  %v564_v19 = vmul.f32 %v1029_v62, %v544_v11  ;;  %v546_v29 = vld [vmem:[#allocation2 + $0x48] sm:$0xff]  ;;  %v547_v34 = vld [vmem:[#allocation2 + $0x50] sm:$0xff] }
  0xd8   : > { %v561_v8 = vmul.f32 %v1029_v62, %v541_v5  ;;  %v577_v12 = vadd.f32 %v1034_v63, %v557_v1  ;;  %v578_v13 = vadd.f32 %v1034_v63, %v558_v2  ;;  %v579_v16 = vadd.f32 %v1034_v63, %v559_v6  ;;  %v545_v28 = vld [vmem:[#allocation2 + $0x40] sm:$0xff]  ;;  %v550_v41 = vld [vmem:[#allocation2 + $0x68] sm:$0xff]  ;;  %v551_v42 = vld [vmem:[#allocation2 + $0x70] sm:$0xff] }
  0xd9   : > { %v580_v17 = vadd.f32 %v1034_v63, %v560_v7  ;;  %v582_v22 = vadd.f32 %v1034_v63, %v562_v14  ;;  %v583_v23 = vadd.f32 %v1034_v63, %v563_v15  ;;  %v584_v27 = vadd.f32 %v1034_v63, %v564_v19  ;;  %v548_v35 = vld [vmem:[#allocation2 + $0x58] sm:$0xff]  ;;  %v549_v36 = vld [vmem:[#allocation2 + $0x60] sm:$0xff] }
  0xda   : > { %v581_v18 = vadd.f32 %v1034_v63, %v561_v8  ;;  %v593_v20 = vmax.f32 %v577_v12, 0.0  ;;  %v594_v21 = vmax.f32 %v578_v13, 0.0  ;;  %v595_v24 = vmax.f32 %v579_v16, 0.0  ;;  %v552_v47 = vld [vmem:[#allocation2 + $0x78] sm:$0xff] }
  0xdb   : > { %v596_v25 = vmax.f32 %v580_v17, 0.0  ;;  %v598_v32 = vmax.f32 %v582_v22, 0.0  ;;  %v599_v33 = vmax.f32 %v583_v23, 0.0  ;;  %v600_v40 = vmax.f32 %v584_v27, 0.0 }
  0xdc   : > { %v597_v26 = vmax.f32 %v581_v18, 0.0  ;;  %v609_v30 = vpack.c.bf16 %v593_v20, %v593_v20  ;;  %v610_v31 = vpack.c.bf16 %v594_v21, %v594_v21  ;;  %v611_v37 = vpack.c.bf16 %v595_v24, %v595_v24 }
  0xdd   : > { %v612_v38 = vpack.c.bf16 %v596_v25, %v596_v25  ;;  %v614_v43 = vpack.c.bf16 %v598_v32, %v598_v32  ;;  %v615_v44 = vpack.c.bf16 %v599_v33, %v599_v33  ;;  %v565_v45 = vmul.f32 %v1029_v62, %v545_v28 }
  0xde   : > { %v613_v39 = vpack.c.bf16 %v597_v26, %v597_v26  ;;  %626 = vst.msk [vmem:[%s1145_s4] sm:$0xf] %vm625_vm2, %v609_v30  ;;  %v566_v46 = vmul.f32 %v1029_v62, %v546_v29  ;;  %v616_v48 = vpack.c.bf16 %v600_v40, %v600_v40  ;;  %v567_v49 = vmul.f32 %v1029_v62, %v547_v34 }
  0xdf   : > { %627 = vst.msk [vmem:[%s1145_s4 + $0x4] sm:$0xf] %vm625_vm2, %v610_v31  ;;  %v568_v50 = vmul.f32 %v1029_v62, %v548_v35  ;;  %v569_v51 = vmul.f32 %v1029_v62, %v549_v36  ;;  %v585_v52 = vadd.f32 %v1034_v63, %v565_v45  ;;  %v570_v54 = vmul.f32 %v1029_v62, %v550_v41 }
  0xe0   : > { %628 = vst.msk [vmem:[%s1145_s4 + $0x8] sm:$0xf] %vm625_vm2, %v611_v37  ;;  %v586_v53 = vadd.f32 %v1034_v63, %v566_v46  ;;  %v571_v55 = vmul.f32 %v1029_v62, %v551_v42  ;;  %v587_v56 = vadd.f32 %v1034_v63, %v567_v49  ;;  %v572_v59 = vmul.f32 %v1029_v62, %v552_v47 }
  0xe1   : > { %629 = vst.msk [vmem:[%s1145_s4 + $0xc] sm:$0xf] %vm625_vm2, %v612_v38  ;;  %v588_v57 = vadd.f32 %v1034_v63, %v568_v50  ;;  %v589_v58 = vadd.f32 %v1034_v63, %v569_v51  ;;  %v601_v60 = vmax.f32 %v585_v52, 0.0  ;;  %v590_v0 = vadd.f32 %v1034_v63, %v570_v54 }
  0xe2   : > { %630 = vst.msk [vmem:[%s1145_s4 + $0x10] sm:$0xf] %vm625_vm2, %v613_v39  ;;  %v602_v61 = vmax.f32 %v586_v53, 0.0  ;;  %v591_v1 = vadd.f32 %v1034_v63, %v571_v55  ;;  %v603_v2 = vmax.f32 %v587_v56, 0.0  ;;  %v592_v62 = vadd.f32 %v1034_v63, %v572_v59 }
  0xe3   : > { %631 = vst.msk [vmem:[%s1145_s4 + $0x14] sm:$0xf] %vm625_vm2, %v614_v43  ;;  %v604_v3 = vmax.f32 %v588_v57, 0.0  ;;  %v605_v4 = vmax.f32 %v589_v58, 0.0  ;;  %v617_v5 = vpack.c.bf16 %v601_v60, %v601_v60  ;;  %v606_v7 = vmax.f32 %v590_v0, 0.0 }
  0xe4   : > { %632 = vst.msk [vmem:[%s1145_s4 + $0x18] sm:$0xf] %vm625_vm2, %v615_v44  ;;  %v618_v6 = vpack.c.bf16 %v602_v61, %v602_v61  ;;  %v607_v8 = vmax.f32 %v591_v1, 0.0  ;;  %v619_v9 = vpack.c.bf16 %v603_v2, %v603_v2  ;;  %v608_v11 = vmax.f32 %v592_v62, 0.0 }
  0xe5   : > { %633 = vst.msk [vmem:[%s1145_s4 + $0x1c] sm:$0xf] %vm625_vm2, %v616_v48  ;;  %v620_v10 = vpack.c.bf16 %v604_v3, %v604_v3  ;;  %v621_v63 = vpack.c.bf16 %v605_v4, %v605_v4  ;;  %v622_v12 = vpack.c.bf16 %v606_v7, %v606_v7 }
  0xe6   : > { %634 = vst.msk [vmem:[%s1145_s4 + $0x20] sm:$0xf] %vm625_vm2, %v617_v5  ;;  %v623_v13 = vpack.c.bf16 %v607_v8, %v607_v8  ;;  %v624_v14 = vpack.c.bf16 %v608_v11, %v608_v11 }
  0xe7   : > { %635 = vst.msk [vmem:[%s1145_s4 + $0x24] sm:$0xf] %vm625_vm2, %v618_v6 }
  0xe8   : > { %636 = vst.msk [vmem:[%s1145_s4 + $0x28] sm:$0xf] %vm625_vm2, %v619_v9 }
  0xe9   : > { %637 = vst.msk [vmem:[%s1145_s4 + $0x2c] sm:$0xf] %vm625_vm2, %v620_v10 }
  0xea   : > { %638 = vst.msk [vmem:[%s1145_s4 + $0x30] sm:$0xf] %vm625_vm2, %v621_v63 }
  0xeb   : > { %639 = vst.msk [vmem:[%s1145_s4 + $0x34] sm:$0xf] %vm625_vm2, %v622_v12 }
  0xec   : > { %640 = vst.msk [vmem:[%s1145_s4 + $0x38] sm:$0xf] %vm625_vm2, %v623_v13 }
  0xed   : > { %641 = vst.msk [vmem:[%s1145_s4 + $0x3c] sm:$0xf] %vm625_vm2, %v624_v14 }
  0xee PF: > { %s14_s17 = sadd.s32 1, %s912_s17   ;;  %s1146_s15 = smov %s908_s16 }
  0xef   : > { %p11_p7 = scmp.ge.s32.totalorder %s14_s17, 11   ;;  %s1147_s16 = smov %s1149_s18 }
  0xf1   :  { %13 = sbr.rel (!%p11_p7) target bundleno = 2 (0x2), region = 83 }

// kernel: forward.32
= control target key start
LH: loop header
LB: loop body
LE: loop exit
PB: predicated region body
PF: predicated region fallthrough
CT: control target
= control target key end

     0   :  { %s848_s18 = smov 0   ;;  %s850_s19 = smov 0   ;;  %s909_s0 = inlined_call_operand.vmem [shape: bf16[9,32,128], index: 0, kind: input, shape index: {}]   ;;  %s910_s1 = inlined_call_operand.vmem [shape: bf16[9,128,128], index: 1, kind: input, shape index: {}]   ;;  %s911_s2 = inlined_call_operand.vmem [shape: f32[1,128], index: 2, kind: input, shape index: {}]   ;;  %s912_s3 = inlined_call_operand.vmem [shape: f32[1,128], index: 3, kind: input, shape index: {}]   ;;  %s913_s4 = inlined_call_operand.vmem [shape: bf16[32,128], index: 4, kind: input, shape index: {}]   ;;  %s914_s5 = inlined_call_operand.vmem [shape: bf16[32,128], index: 5, kind: output, shape index: {}]  }
   0x1   :  { %s852_s20 = smov 0  }
   0x2 LB: > { %s27_s21 = sadd.s32 1, %s811_s19  ;;  %p675_p0 = scmp.ge.s32.totalorder %s815_s20, 1  ;;  %s815_s20 = sphi %s852_s20, %s15_s20   ;;  %s811_s19 = sphi %s850_s19, %s916_s19   ;;  %s807_s18 = sphi %s848_s18, %s915_s18  }
   0x3   : > { %p28_p1 = scmp.ge.s32.totalorder %s27_s21, 9  ;;  %p262_p2 = scmp.lt.s32.totalorder %s815_s20, 10 }
   0x5   : > { %s918_s21 = smov (%p28_p1, %s27_s21), 0  ;;  %p263_p3 = pnand %p675_p0, %p262_p2 }
   0x6   : > { %p320_p4 = scmp.lt.s32.totalorder (!%p263_p3), %s807_s18, 8  ;;  %p680_p5 = scmp.ne.s32.totalorder (!%p263_p3), %s807_s18, 0 }
   0x7   : > { %266 = sbr.rel (%p263_p3) target bundleno = 211 (0xd3), region = 40 }
   0xc   : > { %s321_s22 = scalar_select %p320_p4, %s807_s18, 8 }
   0xd   : > { %364 = sbr.rel (%p680_p5) target bundleno = 23 (0x17), region = 44 }
   0xe   : > { %s726_s23 = sshll.u32 %s321_s22, 4  ;;  %s727_s24 = sshll.u32 %s321_s22, 6 }
   0xf   : > { %s873_s27 = scalar_lea.vmem %s909_s0, %s726_s23  ;;  %s336_s30 = scalar_lea.vmem %s910_s1, %s727_s24 }
  0x12   : > { %v817_v0 = vmov 0.0  }
  0x13   : > { %365 = vst [vmem:[#allocation2 + $0x10] sm:$0xff] %v817_v0 }
  0x14   : > { %366 = vst [vmem:[#allocation2] sm:$0xff] %v817_v0 }
  0x15   : > { %367 = vst [vmem:[#allocation2 + $0x18] sm:$0xff] %v817_v0 }
  0x16   : > { %368 = vst [vmem:[#allocation2 + $0x8] sm:$0xff] %v817_v0 }
  0x17 PF: > { %v737_v1 = vld [vmem:[%s336_s30 + $0x38] sm:$0xff]  ;;  %v736_v2 = vld [vmem:[%s336_s30 + $0x30] sm:$0xff]  ;;  %v735_v3 = vld [vmem:[%s336_s30 + $0x28] sm:$0xff]  ;;  %p721_p6 = scmp.ne.s32.totalorder %s807_s18, 8 }
  0x18   : > { %453 = vmatpush.bf16.msra.mxu0 %v737_v1  ;;  %758 = vmatpush.bf16.msra.mxu1 %v737_v1  ;;  %v734_v4 = vld [vmem:[%s336_s30 + $0x20] sm:$0xff]  ;;  %v733_v5 = vld [vmem:[%s336_s30 + $0x18] sm:$0xff]  ;;  %v732_v6 = vld [vmem:[%s336_s30 + $0x10] sm:$0xff] }
  0x19   : > { %v731_v7 = vld [vmem:[%s336_s30 + $0x8] sm:$0xff]  ;;  %v730_v8 = vld [vmem:[%s336_s30] sm:$0xff] }
  0x1a   : > { %v728_v9 = vld [vmem:[%s873_s27] sm:$0xff]  ;;  %v729_v10 = vld [vmem:[%s873_s27 + $0x8] sm:$0xff]  ;;  %v369_v11 = vld [vmem:[#allocation2 + $0x10] sm:$0xff] }
  0x1b   : > { %v370_v17 = vld [vmem:[#allocation2] sm:$0xff] }
  0x1c   : > { %454 = vmatpush.bf16.msra.mxu0 %v736_v2  ;;  %759 = vmatpush.bf16.msra.mxu1 %v736_v2  ;;  %v371_v12 = vld [vmem:[#allocation2 + $0x18] sm:$0xff] }
  0x1d   : > { %v372_v18 = vld [vmem:[#allocation2 + $0x8] sm:$0xff] }
  0x20   : > { %455 = vmatpush.bf16.msra.mxu0 %v735_v3  ;;  %760 = vmatpush.bf16.msra.mxu1 %v735_v3 }
  0x24   : > { %456 = vmatpush.bf16.msra.mxu0 %v734_v4  ;;  %761 = vmatpush.bf16.msra.mxu1 %v734_v4 }
  0x28   : > { %457 = vmatpush.bf16.msra.mxu0 %v733_v5  ;;  %762 = vmatpush.bf16.msra.mxu1 %v733_v5 }
  0x2c   : > { %458 = vmatpush.bf16.msra.mxu0 %v732_v6  ;;  %763 = vmatpush.bf16.msra.mxu1 %v732_v6 }
  0x30   : > { %459 = vmatpush.bf16.msra.mxu0 %v731_v7  ;;  %764 = vmatpush.bf16.msra.mxu1 %v731_v7 }
  0x34   : > { %460 = vmatpush.bf16.msra.mxu0 %v730_v8  ;;  %765 = vmatpush.bf16.msra.mxu1 %v730_v8 }
  0x37   : > { %461 = vmatmul.bf16.vlgmr.msra.gmra.mxu0 %v728_v9  ;;  %466 = vmatmul.bf16.vlgmr.msra.gmra.mxu1 %v729_v10 }
  0xb4   : > { %v462_v13 = vpop.f32.mrf.mxu0  ;;  %v467_v14 = vpop.f32.mrf.mxu1 }
  0xb5   : > { %v472_v15 = vadd.f32 %v462_v13, %v369_v11  ;;  %v474_v16 = vadd.f32 %v467_v14, %v371_v12 }
  0xb7   : > { %476 = vst [vmem:[#allocation2 + $0x10] sm:$0xff] %v472_v15 }
  0xb8   : > { %478 = vst [vmem:[#allocation2 + $0x18] sm:$0xff] %v474_v16 }
  0xbc   : > { %v464_v19 = vpop.f32.mrf.mxu0  ;;  %v469_v20 = vpop.f32.mrf.mxu1  ;;  %483 = sbr.rel (%p721_p6) target bundleno = 211 (0xd3), region = 48 }
  0xbd   : > { %v473_v21 = vadd.f32 %v464_v19, %v370_v17  ;;  %v475_v22 = vadd.f32 %v469_v20, %v372_v18 }
  0xbf   : > { %477 = vst [vmem:[#allocation2] sm:$0xff] %v473_v21 }
  0xc0   : > { %479 = vst [vmem:[#allocation2 + $0x8] sm:$0xff] %v475_v22 }
  0xc1   : > { %v484_v23 = vld [vmem:[#allocation2 + $0x10] sm:$0xff]  ;;  %v791_v25 = vld [vmem:[%s911_s2] ss:$0 sm:$0xff]  ;;  %v486_v28 = vld [vmem:[#allocation2 + $0x18] sm:$0xff] }
  0xc2   : > { %v792_v26 = vld [vmem:[%s912_s3] ss:$0 sm:$0xff]  ;;  %v492_v30 = vmul.f32 %v791_v25, %v484_v23  ;;  %v756_v34 = vld [vmem:[%s913_s4 + $0x8] sm:$0xff]   ;;  %v494_v35 = vmul.f32 %v791_v25, %v486_v28 }
  0xc3   : > { %v739_v27 = vld [vmem:[%s913_s4] sm:$0xff]   ;;  %v744_v37 = vunpack.c.l.bf16 %v756_v34  ;;  %v745_v38 = vunpack.c.h.bf16 %v756_v34 }
  0xc4   : > { %v740_v32 = vunpack.c.l.bf16 %v739_v27  ;;  %v741_v33 = vunpack.c.h.bf16 %v739_v27  ;;  %v500_v39 = vadd.f32 %v792_v26, %v492_v30  ;;  %v502_v41 = vadd.f32 %v792_v26, %v494_v35 }
  0xc6   : > { %v485_v24 = vld [vmem:[#allocation2] sm:$0xff]  ;;  %v512_v43 = vadd.f32 %v740_v32, %v500_v39  ;;  %v514_v45 = vadd.f32 %v744_v37, %v502_v41 }
  0xc7   : > { %v487_v29 = vld [vmem:[#allocation2 + $0x8] sm:$0xff]  ;;  %v493_v31 = vmul.f32 %v791_v25, %v485_v24 }
  0xc8   : > { %v495_v36 = vmul.f32 %v791_v25, %v487_v29  ;;  %v516_v47 = vmax.f32 %v512_v43, 0.0  ;;  %v518_v49 = vmax.f32 %v514_v45, 0.0 }
  0xc9   : > { %v501_v40 = vadd.f32 %v792_v26, %v493_v31 }
  0xca   : > { %v503_v42 = vadd.f32 %v792_v26, %v495_v36 }
  0xcb   : > { %v513_v44 = vadd.f32 %v741_v33, %v501_v40 }
  0xcc   : > { %v515_v46 = vadd.f32 %v745_v38, %v503_v42 }
  0xcd   : > { %v517_v48 = vmax.f32 %v513_v44, 0.0 }
  0xce   : > { %v519_v50 = vmax.f32 %v515_v46, 0.0 }
  0xcf   : > { %v749_v51 = vpack.c.bf16 %v517_v48, %v516_v47 }
  0xd0   : > { %v754_v52 = vpack.c.bf16 %v519_v50, %v518_v49 }
  0xd1   : > { %750 = vst [vmem:[%s914_s5] sm:$0xff] %v749_v51  }
  0xd2   : > { %757 = vst [vmem:[%s914_s5 + $0x8] sm:$0xff] %v754_v52  }
  0xd3 PF: > { %s15_s20 = sadd.s32 1, %s815_s20   ;;  %s915_s18 = smov %s811_s19 }
  0xd4   : > { %p12_p7 = scmp.ge.s32.totalorder %s15_s20, 11   ;;  %s916_s19 = smov %s918_s21 }
  0xd6   :  { %14 = sbr.rel (!%p12_p7) target bundleno = 2 (0x2), region = 90 }

// kernel: forward.30
= control target key start
LH: loop header
LB: loop body
LE: loop exit
PB: predicated region body
PF: predicated region fallthrough
CT: control target
= control target key end

     0   :  { %s695_s15 = smov 0   ;;  %s697_s16 = smov 0   ;;  %s746_s0 = inlined_call_operand.vmem [shape: bf16[9,32,64], index: 0, kind: input, shape index: {}]   ;;  %s747_s1 = inlined_call_operand.vmem [shape: bf16[9,64,128], index: 1, kind: input, shape index: {}]   ;;  %s748_s2 = inlined_call_operand.vmem [shape: f32[1,128], index: 2, kind: input, shape index: {}]   ;;  %s749_s3 = inlined_call_operand.vmem [shape: f32[1,128], index: 3, kind: input, shape index: {}]   ;;  %s750_s4 = inlined_call_operand.vmem [shape: bf16[32,128], index: 4, kind: output, shape index: {}]  }
   0x1   :  { %s699_s17 = smov 0  }
   0x2 LB: > { %s26_s18 = sadd.s32 1, %s663_s16  ;;  %p558_p0 = scmp.ge.s32.totalorder %s667_s17, 1  ;;  %s667_s17 = sphi %s699_s17, %s14_s17   ;;  %s663_s16 = sphi %s697_s16, %s752_s16   ;;  %s659_s15 = sphi %s695_s15, %s751_s15  }
   0x3   : > { %p27_p1 = scmp.ge.s32.totalorder %s26_s18, 9  ;;  %p221_p2 = scmp.lt.s32.totalorder %s667_s17, 10 }
   0x5   : > { %s754_s18 = smov (%p27_p1, %s26_s18), 0  ;;  %p222_p3 = pnand %p558_p0, %p221_p2 }
   0x6   : > { %p269_p4 = scmp.lt.s32.totalorder (!%p222_p3), %s659_s15, 8  ;;  %p563_p5 = scmp.ne.s32.totalorder (!%p222_p3), %s659_s15, 0 }
   0x7   : > { %225 = sbr.rel (%p222_p3) target bundleno = 193 (0xc1), region = 36 }
   0xc   : > { %s270_s19 = scalar_select %p269_p4, %s659_s15, 8 }
   0xd   : > { %305 = sbr.rel (%p563_p5) target bundleno = 23 (0x17), region = 40 }
   0xe   : > { %s595_s20 = sshll.u32 %s270_s19, 4  ;;  %s596_s21 = sshll.u32 %s270_s19, 5 }
   0xf   : > { %s276_s24 = scalar_lea.vmem %s746_s0, %s595_s20  ;;  %s285_s27 = scalar_lea.vmem %s747_s1, %s596_s21 }
  0x12   : > { %v669_v0 = vmov 0.0  }
  0x13   : > { %306 = vst [vmem:[#allocation2 + $0x10] sm:$0xff] %v669_v0 }
  0x14   : > { %307 = vst [vmem:[#allocation2] sm:$0xff] %v669_v0 }
  0x15   : > { %308 = vst [vmem:[#allocation2 + $0x18] sm:$0xff] %v669_v0 }
  0x16   : > { %309 = vst [vmem:[#allocation2 + $0x8] sm:$0xff] %v669_v0 }
  0x17 PF: > { %v602_v1 = vld [vmem:[%s285_s27 + $0x18] sm:$0xff]  ;;  %v601_v2 = vld [vmem:[%s285_s27 + $0x10] sm:$0xff]  ;;  %v600_v3 = vld [vmem:[%s285_s27 + $0x8] sm:$0xff]  ;;  %vm360_vm0 = vcmask 523264   ;;  %p590_p6 = scmp.ne.s32.totalorder %s659_s15, 8 }
  0x18   : > { %371 = vmatpush.bf16.msra.mxu0 %v602_v1  ;;  %614 = vmatpush.bf16.msra.mxu1 %v602_v1  ;;  %v599_v4 = vld [vmem:[%s285_s27] sm:$0xff]  ;;  %v598_v6 = vld [vmem:[%s276_s24 + $0x8] sm:$0xff] }
  0x19   : > { %v597_v5 = vld [vmem:[%s276_s24] sm:$0xff] }
  0x1a   : > { %v310_v7 = vld [vmem:[#allocation2 + $0x10] sm:$0xff] }
  0x1b   : > { %v311_v13 = vld [vmem:[#allocation2] sm:$0xff] }
  0x1c   : > { %372 = vmatpush.bf16.msra.mxu0 %v601_v2  ;;  %615 = vmatpush.bf16.msra.mxu1 %v601_v2  ;;  %v312_v8 = vld [vmem:[#allocation2 + $0x18] sm:$0xff] }
  0x1d   : > { %v313_v14 = vld [vmem:[#allocation2 + $0x8] sm:$0xff] }
  0x20   : > { %373 = vmatpush.bf16.msra.mxu0 %v600_v3  ;;  %616 = vmatpush.bf16.msra.mxu1 %v600_v3 }
  0x24   : > { %374 = vmatpush.bf16.msra.mxu0 %v599_v4  ;;  %617 = vmatpush.bf16.msra.mxu1 %v599_v4 }
  0x27   : > { %588 = vmatmul.msk.bf16.vlgmr.msra.gmra.mxu0 %vm360_vm0, %v597_v5  ;;  %589 = vmatmul.msk.bf16.vlgmr.msra.gmra.mxu1 %vm360_vm0, %v598_v6 }
  0xa4   : > { %v376_v9 = vpop.f32.mrf.mxu0  ;;  %v381_v10 = vpop.f32.mrf.mxu1 }
  0xa5   : > { %v386_v11 = vadd.f32 %v376_v9, %v310_v7  ;;  %v388_v12 = vadd.f32 %v381_v10, %v312_v8 }
  0xa7   : > { %390 = vst [vmem:[#allocation2 + $0x10] sm:$0xff] %v386_v11 }
  0xa8   : > { %392 = vst [vmem:[#allocation2 + $0x18] sm:$0xff] %v388_v12 }
  0xac   : > { %v378_v15 = vpop.f32.mrf.mxu0  ;;  %v383_v16 = vpop.f32.mrf.mxu1  ;;  %397 = sbr.rel (%p590_p6) target bundleno = 193 (0xc1), region = 44 }
  0xad   : > { %v387_v17 = vadd.f32 %v378_v15, %v311_v13  ;;  %v389_v18 = vadd.f32 %v383_v16, %v313_v14 }
  0xaf   : > { %391 = vst [vmem:[#allocation2] sm:$0xff] %v387_v17 }
  0xb0   : > { %393 = vst [vmem:[#allocation2 + $0x8] sm:$0xff] %v389_v18 }
  0xb1   : > { %v398_v19 = vld [vmem:[#allocation2 + $0x10] sm:$0xff]  ;;  %v643_v21 = vld [vmem:[%s748_s2] ss:$0 sm:$0xff]  ;;  %v400_v23 = vld [vmem:[#allocation2 + $0x18] sm:$0xff] }
  0xb2   : > { %v644_v22 = vld [vmem:[%s749_s3] ss:$0 sm:$0xff]  ;;  %v406_v25 = vmul.f32 %v643_v21, %v398_v19  ;;  %v408_v27 = vmul.f32 %v643_v21, %v400_v23 }
  0xb4   : > { %v414_v29 = vadd.f32 %v644_v22, %v406_v25  ;;  %v416_v31 = vadd.f32 %v644_v22, %v408_v27 }
  0xb6   : > { %v399_v20 = vld [vmem:[#allocation2] sm:$0xff]  ;;  %v418_v33 = vmax.f32 %v414_v29, 0.0  ;;  %v420_v35 = vmax.f32 %v416_v31, 0.0 }
  0xb7   : > { %v401_v24 = vld [vmem:[#allocation2 + $0x8] sm:$0xff]  ;;  %v407_v26 = vmul.f32 %v643_v21, %v399_v20 }
  0xb8   : > { %v409_v28 = vmul.f32 %v643_v21, %v401_v24 }
  0xb9   : > { %v415_v30 = vadd.f32 %v644_v22, %v407_v26 }
  0xba   : > { %v417_v32 = vadd.f32 %v644_v22, %v409_v28 }
  0xbb   : > { %v419_v34 = vmax.f32 %v415_v30, 0.0 }
  0xbc   : > { %v421_v36 = vmax.f32 %v417_v32, 0.0 }
  0xbd   : > { %v606_v37 = vpack.c.bf16 %v419_v34, %v418_v33 }
  0xbe   : > { %v611_v38 = vpack.c.bf16 %v421_v36, %v420_v35 }
  0xbf   : > { %607 = vst [vmem:[%s750_s4] sm:$0xff] %v606_v37  }
  0xc0   : > { %613 = vst [vmem:[%s750_s4 + $0x8] sm:$0xff] %v611_v38  }
  0xc1 PF: > { %s14_s17 = sadd.s32 1, %s667_s17   ;;  %s751_s15 = smov %s663_s16 }
  0xc2   : > { %p11_p7 = scmp.ge.s32.totalorder %s14_s17, 11   ;;  %s752_s16 = smov %s754_s18 }
  0xc4   :  { %13 = sbr.rel (!%p11_p7) target bundleno = 2 (0x2), region = 83 }

// kernel: forward.33
= control target key start
LH: loop header
LB: loop body
LE: loop exit
PB: predicated region body
PF: predicated region fallthrough
CT: control target
= control target key end

     0   :  { %s743_s15 = smov 0   ;;  %s745_s16 = smov 0   ;;  %s798_s0 = inlined_call_operand.vmem [shape: bf16[9,32,128], index: 0, kind: input, shape index: {}]   ;;  %s799_s1 = inlined_call_operand.vmem [shape: bf16[9,128,128], index: 1, kind: input, shape index: {}]   ;;  %s800_s2 = inlined_call_operand.vmem [shape: f32[1,128], index: 2, kind: input, shape index: {}]   ;;  %s801_s3 = inlined_call_operand.vmem [shape: f32[1,128], index: 3, kind: input, shape index: {}]   ;;  %s802_s4 = inlined_call_operand.vmem [shape: bf16[32,128], index: 4, kind: output, shape index: {}]  }
   0x1   :  { %s747_s17 = smov 0  }
   0x2 LB: > { %s26_s18 = sadd.s32 1, %s711_s16  ;;  %p584_p0 = scmp.ge.s32.totalorder %s715_s17, 1  ;;  %s715_s17 = sphi %s747_s17, %s14_s17   ;;  %s711_s16 = sphi %s745_s16, %s804_s16   ;;  %s707_s15 = sphi %s743_s15, %s803_s15  }
   0x3   : > { %p27_p1 = scmp.ge.s32.totalorder %s26_s18, 9  ;;  %p221_p2 = scmp.lt.s32.totalorder %s715_s17, 10 }
   0x5   : > { %s806_s18 = smov (%p27_p1, %s26_s18), 0  ;;  %p222_p3 = pnand %p584_p0, %p221_p2 }
   0x6   : > { %p269_p4 = scmp.lt.s32.totalorder (!%p222_p3), %s707_s15, 8  ;;  %p589_p5 = scmp.ne.s32.totalorder (!%p222_p3), %s707_s15, 0 }
   0x7   : > { %225 = sbr.rel (%p222_p3) target bundleno = 209 (0xd1), region = 36 }
   0xc   : > { %s270_s19 = scalar_select %p269_p4, %s707_s15, 8 }
   0xd   : > { %304 = sbr.rel (%p589_p5) target bundleno = 23 (0x17), region = 40 }
   0xe   : > { %s635_s20 = sshll.u32 %s270_s19, 4  ;;  %s636_s21 = sshll.u32 %s270_s19, 6 }
   0xf   : > { %s768_s24 = scalar_lea.vmem %s798_s0, %s635_s20  ;;  %s285_s27 = scalar_lea.vmem %s799_s1, %s636_s21 }
  0x12   : > { %v717_v0 = vmov 0.0  }
  0x13   : > { %305 = vst [vmem:[#allocation2 + $0x10] sm:$0xff] %v717_v0 }
  0x14   : > { %306 = vst [vmem:[#allocation2] sm:$0xff] %v717_v0 }
  0x15   : > { %307 = vst [vmem:[#allocation2 + $0x18] sm:$0xff] %v717_v0 }
  0x16   : > { %308 = vst [vmem:[#allocation2 + $0x8] sm:$0xff] %v717_v0 }
  0x17 PF: > { %v646_v1 = vld [vmem:[%s285_s27 + $0x38] sm:$0xff]  ;;  %v645_v2 = vld [vmem:[%s285_s27 + $0x30] sm:$0xff]  ;;  %v644_v3 = vld [vmem:[%s285_s27 + $0x28] sm:$0xff]  ;;  %p630_p6 = scmp.ne.s32.totalorder %s707_s15, 8 }
  0x18   : > { %393 = vmatpush.bf16.msra.mxu0 %v646_v1  ;;  %658 = vmatpush.bf16.msra.mxu1 %v646_v1  ;;  %v643_v4 = vld [vmem:[%s285_s27 + $0x20] sm:$0xff]  ;;  %v642_v5 = vld [vmem:[%s285_s27 + $0x18] sm:$0xff]  ;;  %v641_v6 = vld [vmem:[%s285_s27 + $0x10] sm:$0xff] }
  0x19   : > { %v640_v7 = vld [vmem:[%s285_s27 + $0x8] sm:$0xff]  ;;  %v639_v8 = vld [vmem:[%s285_s27] sm:$0xff] }
  0x1a   : > { %v637_v9 = vld [vmem:[%s768_s24] sm:$0xff]  ;;  %v638_v10 = vld [vmem:[%s768_s24 + $0x8] sm:$0xff]  ;;  %v309_v11 = vld [vmem:[#allocation2 + $0x10] sm:$0xff] }
  0x1b   : > { %v310_v17 = vld [vmem:[#allocation2] sm:$0xff] }
  0x1c   : > { %394 = vmatpush.bf16.msra.mxu0 %v645_v2  ;;  %659 = vmatpush.bf16.msra.mxu1 %v645_v2  ;;  %v311_v12 = vld [vmem:[#allocation2 + $0x18] sm:$0xff] }
  0x1d   : > { %v312_v18 = vld [vmem:[#allocation2 + $0x8] sm:$0xff] }
  0x20   : > { %395 = vmatpush.bf16.msra.mxu0 %v644_v3  ;;  %660 = vmatpush.bf16.msra.mxu1 %v644_v3 }
  0x24   : > { %396 = vmatpush.bf16.msra.mxu0 %v643_v4  ;;  %661 = vmatpush.bf16.msra.mxu1 %v643_v4 }
  0x28   : > { %397 = vmatpush.bf16.msra.mxu0 %v642_v5  ;;  %662 = vmatpush.bf16.msra.mxu1 %v642_v5 }
  0x2c   : > { %398 = vmatpush.bf16.msra.mxu0 %v641_v6  ;;  %663 = vmatpush.bf16.msra.mxu1 %v641_v6 }
  0x30   : > { %399 = vmatpush.bf16.msra.mxu0 %v640_v7  ;;  %664 = vmatpush.bf16.msra.mxu1 %v640_v7 }
  0x34   : > { %400 = vmatpush.bf16.msra.mxu0 %v639_v8  ;;  %665 = vmatpush.bf16.msra.mxu1 %v639_v8 }
  0x37   : > { %401 = vmatmul.bf16.vlgmr.msra.gmra.mxu0 %v637_v9  ;;  %406 = vmatmul.bf16.vlgmr.msra.gmra.mxu1 %v638_v10 }
  0xb4   : > { %v402_v13 = vpop.f32.mrf.mxu0  ;;  %v407_v14 = vpop.f32.mrf.mxu1 }
  0xb5   : > { %v412_v15 = vadd.f32 %v402_v13, %v309_v11  ;;  %v414_v16 = vadd.f32 %v407_v14, %v311_v12 }
  0xb7   : > { %416 = vst [vmem:[#allocation2 + $0x10] sm:$0xff] %v412_v15 }
  0xb8   : > { %418 = vst [vmem:[#allocation2 + $0x18] sm:$0xff] %v414_v16 }
  0xbc   : > { %v404_v19 = vpop.f32.mrf.mxu0  ;;  %v409_v20 = vpop.f32.mrf.mxu1  ;;  %423 = sbr.rel (%p630_p6) target bundleno = 209 (0xd1), region = 44 }
  0xbd   : > { %v413_v21 = vadd.f32 %v404_v19, %v310_v17  ;;  %v415_v22 = vadd.f32 %v409_v20, %v312_v18 }
  0xbf   : > { %417 = vst [vmem:[#allocation2] sm:$0xff] %v413_v21 }
  0xc0   : > { %419 = vst [vmem:[#allocation2 + $0x8] sm:$0xff] %v415_v22 }
  0xc1   : > { %v424_v23 = vld [vmem:[#allocation2 + $0x10] sm:$0xff]  ;;  %v691_v25 = vld [vmem:[%s800_s2] ss:$0 sm:$0xff]  ;;  %v426_v27 = vld [vmem:[#allocation2 + $0x18] sm:$0xff] }
  0xc2   : > { %v692_v26 = vld [vmem:[%s801_s3] ss:$0 sm:$0xff]  ;;  %v432_v29 = vmul.f32 %v691_v25, %v424_v23  ;;  %v434_v31 = vmul.f32 %v691_v25, %v426_v27 }
  0xc4   : > { %v440_v33 = vadd.f32 %v692_v26, %v432_v29  ;;  %v442_v35 = vadd.f32 %v692_v26, %v434_v31 }
  0xc6   : > { %v425_v24 = vld [vmem:[#allocation2] sm:$0xff]  ;;  %v444_v37 = vmax.f32 %v440_v33, 0.0  ;;  %v446_v39 = vmax.f32 %v442_v35, 0.0 }
  0xc7   : > { %v427_v28 = vld [vmem:[#allocation2 + $0x8] sm:$0xff]  ;;  %v433_v30 = vmul.f32 %v691_v25, %v425_v24 }
  0xc8   : > { %v435_v32 = vmul.f32 %v691_v25, %v427_v28 }
  0xc9   : > { %v441_v34 = vadd.f32 %v692_v26, %v433_v30 }
  0xca   : > { %v443_v36 = vadd.f32 %v692_v26, %v435_v32 }
  0xcb   : > { %v445_v38 = vmax.f32 %v441_v34, 0.0 }
  0xcc   : > { %v447_v40 = vmax.f32 %v443_v36, 0.0 }
  0xcd   : > { %v650_v41 = vpack.c.bf16 %v445_v38, %v444_v37 }
  0xce   : > { %v655_v42 = vpack.c.bf16 %v447_v40, %v446_v39 }
  0xcf   : > { %651 = vst [vmem:[%s802_s4] sm:$0xff] %v650_v41  }
  0xd0   : > { %657 = vst [vmem:[%s802_s4 + $0x8] sm:$0xff] %v655_v42  }
  0xd1 PF: > { %s14_s17 = sadd.s32 1, %s715_s17   ;;  %s803_s15 = smov %s711_s16 }
  0xd2   : > { %p11_p7 = scmp.ge.s32.totalorder %s14_s17, 11   ;;  %s804_s16 = smov %s806_s18 }
  0xd4   :  { %13 = sbr.rel (!%p11_p7) target bundleno = 2 (0x2), region = 83 }

// kernel: forward.31
= control target key start
LH: loop header
LB: loop body
LE: loop exit
PB: predicated region body
PF: predicated region fallthrough
CT: control target
= control target key end

     0   :  { %vm76_vm0 = vcmask 523264   ;;  %s249_s1 = inlined_call_operand.vmem [shape: bf16[1,64,128], index: 1, kind: input, shape index: {}]   ;;  %s250_s2 = inlined_call_operand.vmem [shape: f32[1,128], index: 2, kind: input, shape index: {}]   ;;  %s251_s3 = inlined_call_operand.vmem [shape: f32[1,128], index: 3, kind: input, shape index: {}]   ;;  %s252_s0 = inlined_call_operand.vmem [shape: bf16[1,32,64], index: 0, kind: input, shape index: {}]   ;;  %s253_s4 = inlined_call_operand.vmem [shape: bf16[32,128], index: 4, kind: output, shape index: {}]  }
   0x1   :  { %v176_v0 = vld [vmem:[%s249_s1 + $0x18] sm:$0xff]  ;;  %v175_v1 = vld [vmem:[%s249_s1 + $0x10] sm:$0xff]  ;;  %v174_v2 = vld [vmem:[%s249_s1 + $0x8] sm:$0xff] }
   0x2   :  { %87 = vmatpush.bf16.msra.mxu0 %v176_v0  ;;  %188 = vmatpush.bf16.msra.mxu1 %v176_v0  ;;  %v173_v3 = vld [vmem:[%s249_s1] sm:$0xff]  ;;  %v172_v5 = vld [vmem:[%s252_s0 + $0x8] sm:$0xff] }
   0x3   :  { %v171_v4 = vld [vmem:[%s252_s0] sm:$0xff] }
   0x4   :  { %v192_v8 = vld [vmem:[%s250_s2] ss:$0 sm:$0xff] }
   0x5   :  { %v193_v10 = vld [vmem:[%s251_s3] ss:$0 sm:$0xff] }
   0x6   :  { %88 = vmatpush.bf16.msra.mxu0 %v175_v1  ;;  %189 = vmatpush.bf16.msra.mxu1 %v175_v1 }
   0xa   :  { %89 = vmatpush.bf16.msra.mxu0 %v174_v2  ;;  %190 = vmatpush.bf16.msra.mxu1 %v174_v2 }
   0xe   :  { %90 = vmatpush.bf16.msra.mxu0 %v173_v3  ;;  %191 = vmatpush.bf16.msra.mxu1 %v173_v3 }
  0x11   :  { %169 = vmatmul.msk.bf16.vlgmr.msra.gmra.mxu0 %vm76_vm0, %v171_v4  ;;  %170 = vmatmul.msk.bf16.vlgmr.msra.gmra.mxu1 %vm76_vm0, %v172_v5 }
  0x8e   :  { %v92_v6 = vpop.f32.mrf.mxu0  ;;  %v97_v7 = vpop.f32.mrf.mxu1 }
  0x8f   :  { %v121_v9 = vmul.f32 %v192_v8, %v92_v6  ;;  %v123_v11 = vmul.f32 %v192_v8, %v97_v7 }
  0x91   :  { %v129_v16 = vadd.f32 %v193_v10, %v121_v9  ;;  %v131_v17 = vadd.f32 %v193_v10, %v123_v11 }
  0x96   :  { %v94_v12 = vpop.f32.mrf.mxu0  ;;  %v99_v13 = vpop.f32.mrf.mxu1 }
  0x97   :  { %v122_v14 = vmul.f32 %v192_v8, %v94_v12  ;;  %v124_v15 = vmul.f32 %v192_v8, %v99_v13 }
  0x99   :  { %v130_v18 = vadd.f32 %v193_v10, %v122_v14  ;;  %v132_v19 = vadd.f32 %v193_v10, %v124_v15 }
  0x9b   :  { %v180_v20 = vpack.c.bf16 %v130_v18, %v129_v16  ;;  %v185_v21 = vpack.c.bf16 %v132_v19, %v131_v17 }
  0x9d   :  { %181 = vst [vmem:[%s253_s4] sm:$0xff] %v180_v20  }
  0x9e   :  { %187 = vst [vmem:[%s253_s4 + $0x8] sm:$0xff] %v185_v21  }

// kernel: forward.36
= control target key start
LH: loop header
LB: loop body
LE: loop exit
PB: predicated region body
PF: predicated region fallthrough
CT: control target
= control target key end

     0   :  { %s392_s1 = inlined_call_operand.vmem [shape: bf16[1,128,256], index: 1, kind: input, shape index: {}]   ;;  %s393_s0 = inlined_call_operand.vmem [shape: bf16[1,8,128], index: 0, kind: input, shape index: {}]   ;;  %s394_s2 = inlined_call_operand.vmem [shape: f32[1,256], index: 2, kind: input, shape index: {}]   ;;  %s395_s3 = inlined_call_operand.vmem [shape: f32[1,256], index: 3, kind: input, shape index: {}]   ;;  %s396_s4 = inlined_call_operand.vmem [shape: bf16[8,256], index: 4, kind: output, shape index: {}]  }
   0x1   :  { %v237_v0 = vld [vmem:[%s392_s1 + $0x70] sm:$0xf]  ;;  %v258_v1 = vld [vmem:[%s392_s1 + $0x74] sm:$0xf0]  ;;  %v257_v2 = vld [vmem:[%s392_s1 + $0x74] sm:$0xf] }
   0x2   :  { %v238_v3 = vor.u32 %v258_v1, %v237_v0  ;;  %v239_v4 = vld [vmem:[%s392_s1 + $0x78] sm:$0xf0]  ;;  %v229_v5 = vld [vmem:[%s392_s1 + $0x60] sm:$0xf]  ;;  %v256_v6 = vld [vmem:[%s392_s1 + $0x64] sm:$0xf0] }
   0x3   :  { %v242_v7 = vor.u32 %v257_v2, %v239_v4  ;;  %v255_v8 = vld [vmem:[%s392_s1 + $0x64] sm:$0xf]  ;;  %v231_v9 = vld [vmem:[%s392_s1 + $0x68] sm:$0xf0]  ;;  %v230_v10 = vor.u32 %v256_v6, %v229_v5  ;;  %v221_v12 = vld [vmem:[%s392_s1 + $0x50] sm:$0xf] }
   0x4   :  { %122 = vmatpush.bf16.msra.mxu0 %v238_v3  ;;  %v234_v11 = vor.u32 %v255_v8, %v231_v9  ;;  %v254_v13 = vld [vmem:[%s392_s1 + $0x54] sm:$0xf0]  ;;  %v253_v14 = vld [vmem:[%s392_s1 + $0x54] sm:$0xf]  ;;  %v223_v15 = vld [vmem:[%s392_s1 + $0x58] sm:$0xf0] }
   0x5   :  { %135 = vmatpush.bf16.msra.mxu1 %v242_v7  ;;  %v222_v16 = vor.u32 %v254_v13, %v221_v12  ;;  %v226_v17 = vor.u32 %v253_v14, %v223_v15  ;;  %v213_v18 = vld [vmem:[%s392_s1 + $0x40] sm:$0xf]  ;;  %v252_v19 = vld [vmem:[%s392_s1 + $0x44] sm:$0xf0]  ;;  %v251_v20 = vld [vmem:[%s392_s1 + $0x44] sm:$0xf] }
   0x6   :  { %v215_v21 = vld [vmem:[%s392_s1 + $0x48] sm:$0xf0]  ;;  %v214_v22 = vor.u32 %v252_v19, %v213_v18  ;;  %v205_v24 = vld [vmem:[%s392_s1 + $0x30] sm:$0xf]  ;;  %v250_v25 = vld [vmem:[%s392_s1 + $0x34] sm:$0xf0] }
   0x7   :  { %v218_v23 = vor.u32 %v251_v20, %v215_v21  ;;  %v249_v26 = vld [vmem:[%s392_s1 + $0x34] sm:$0xf]  ;;  %v207_v27 = vld [vmem:[%s392_s1 + $0x38] sm:$0xf0]  ;;  %v206_v28 = vor.u32 %v250_v25, %v205_v24  ;;  %v197_v30 = vld [vmem:[%s392_s1 + $0x20] sm:$0xf] }
   0x8   :  { %123 = vmatpush.bf16.msra.mxu0 %v230_v10  ;;  %v210_v29 = vor.u32 %v249_v26, %v207_v27  ;;  %v248_v31 = vld [vmem:[%s392_s1 + $0x24] sm:$0xf0]  ;;  %v247_v32 = vld [vmem:[%s392_s1 + $0x24] sm:$0xf]  ;;  %v199_v33 = vld [vmem:[%s392_s1 + $0x28] sm:$0xf0] }
   0x9   :  { %136 = vmatpush.bf16.msra.mxu1 %v234_v11  ;;  %v198_v34 = vor.u32 %v248_v31, %v197_v30  ;;  %v202_v35 = vor.u32 %v247_v32, %v199_v33  ;;  %v189_v36 = vld [vmem:[%s392_s1 + $0x10] sm:$0xf]  ;;  %v246_v37 = vld [vmem:[%s392_s1 + $0x14] sm:$0xf0]  ;;  %v245_v38 = vld [vmem:[%s392_s1 + $0x14] sm:$0xf] }
   0xa   :  { %v191_v39 = vld [vmem:[%s392_s1 + $0x18] sm:$0xf0]  ;;  %v190_v40 = vor.u32 %v246_v37, %v189_v36  ;;  %v181_v42 = vld [vmem:[%s392_s1] sm:$0xf]  ;;  %v244_v43 = vld [vmem:[%s392_s1 + $0x4] sm:$0xf0] }
   0xb   :  { %v194_v41 = vor.u32 %v245_v38, %v191_v39  ;;  %v243_v44 = vld [vmem:[%s392_s1 + $0x4] sm:$0xf]  ;;  %v183_v45 = vld [vmem:[%s392_s1 + $0x8] sm:$0xf0]  ;;  %v182_v46 = vor.u32 %v244_v43, %v181_v42  ;;  %v25_v48 = vld [vmem:[%s393_s0] sm:$0xf] }
   0xc   :  { %124 = vmatpush.bf16.msra.mxu0 %v222_v16  ;;  %v186_v47 = vor.u32 %v243_v44, %v183_v45  ;;  %v157_v49 = vld [vmem:[%s394_s2] sm:$0x3] }
   0xd   :  { %137 = vmatpush.bf16.msra.mxu1 %v226_v17  ;;  %v165_v50 = vld [vmem:[%s395_s3] sm:$0x3]  ;;  %v159_v51 = vperm.slane %v157_v49, 0  ;;  %v160_v52 = vperm.slane %v157_v49, 1 }
   0xe   :  { %v167_v53 = vperm.slane %v165_v50, 0  ;;  %v168_v55 = vperm.slane %v165_v50, 1 }
  0x10   :  { %125 = vmatpush.bf16.msra.mxu0 %v214_v22 }
  0x11   :  { %138 = vmatpush.bf16.msra.mxu1 %v218_v23 }
  0x14   :  { %126 = vmatpush.bf16.msra.mxu0 %v206_v28 }
  0x15   :  { %139 = vmatpush.bf16.msra.mxu1 %v210_v29 }
  0x18   :  { %127 = vmatpush.bf16.msra.mxu0 %v198_v34 }
  0x19   :  { %140 = vmatpush.bf16.msra.mxu1 %v202_v35 }
  0x1c   :  { %128 = vmatpush.bf16.msra.mxu0 %v190_v40 }
  0x1d   :  { %141 = vmatpush.bf16.msra.mxu1 %v194_v41 }
  0x20   :  { %129 = vmatpush.bf16.msra.mxu0 %v182_v46 }
  0x21   :  { %142 = vmatpush.bf16.msra.mxu1 %v186_v47 }
  0x23   :  { %130 = vmatmul.bf16.vlgmr.msra.gmra.mxu0 %v25_v48 }
  0x24   :  { %143 = vmatmul.bf16.vlgmr.msra.gmra.mxu1 %v25_v48 }
  0xa0   :  { %v131_v54 = vpop.f32.mrf.mxu0 }
  0xa1   :  { %v163_v56 = vmul.f32 %v159_v51, %v131_v54  ;;  %v144_v57 = vpop.f32.mrf.mxu1 }
  0xa2   :  { %v164_v58 = vmul.f32 %v160_v52, %v144_v57 }
  0xa3   :  { %v171_v59 = vadd.f32 %v167_v53, %v163_v56 }
  0xa4   :  { %v172_v60 = vadd.f32 %v168_v55, %v164_v58 }
  0xa6   :  { %v173_v61 = vpack.c.bf16 %v172_v60, %v171_v59 }
  0xa8   :  { %174 = vst [vmem:[%s396_s4] sm:$0xff] %v173_v61  ;;  %v133_v62 = vpop.f32.mrf.mxu0 }
  0xa9   :  { %v146_v63 = vpop.f32.mrf.mxu1 }

// kernel: forward.38
= control target key start
LH: loop header
LB: loop body
LE: loop exit
PB: predicated region body
PF: predicated region fallthrough
CT: control target
= control target key end

     0   :  { %s991_s15 = smov 0   ;;  %s993_s16 = smov 0   ;;  %s1108_s0 = inlined_call_operand.vmem [shape: bf16[9,8,256], index: 0, kind: input, shape index: {}]   ;;  %s1109_s1 = inlined_call_operand.vmem [shape: bf16[9,256,256], index: 1, kind: input, shape index: {}]   ;;  %s1110_s2 = inlined_call_operand.vmem [shape: f32[1,256], index: 2, kind: input, shape index: {}]   ;;  %s1111_s3 = inlined_call_operand.vmem [shape: f32[1,256], index: 3, kind: input, shape index: {}]   ;;  %s1112_s4 = inlined_call_operand.vmem [shape: bf16[8,256], index: 4, kind: output, shape index: {}]  }
   0x1   :  { %s995_s17 = smov 0  }
   0x2 LB: > { %s26_s18 = sadd.s32 1, %s959_s16  ;;  %p743_p0 = scmp.ge.s32.totalorder %s963_s17, 1  ;;  %s963_s17 = sphi %s995_s17, %s14_s17   ;;  %s959_s16 = sphi %s993_s16, %s1114_s16   ;;  %s955_s15 = sphi %s991_s15, %s1113_s15  }
   0x3   : > { %p27_p1 = scmp.ge.s32.totalorder %s26_s18, 9  ;;  %p226_p2 = scmp.lt.s32.totalorder %s963_s17, 10 }
   0x5   : > { %s1116_s18 = smov (%p27_p1, %s26_s18), 0  ;;  %p227_p3 = pnand %p743_p0, %p226_p2 }
   0x6   : > { %p277_p4 = scmp.lt.s32.totalorder (!%p227_p3), %s955_s15, 8  ;;  %p748_p5 = scmp.ne.s32.totalorder (!%p227_p3), %s955_s15, 0 }
   0x7   : > { %230 = sbr.rel (%p227_p3) target bundleno = 210 (0xd2), region = 36 }
   0xc   : > { %s278_s19 = scalar_select %p277_p4, %s955_s15, 8 }
   0xd   : > { %319 = sbr.rel (%p748_p5) target bundleno = 21 (0x15), region = 40 }
   0xe   : > { %s882_s20 = sshll.u32 %s278_s19, 3  ;;  %s883_s21 = sshll.u32 %s278_s19, 8 }
   0xf   : > { %s1016_s24 = scalar_lea.vmem %s1108_s0, %s882_s20  ;;  %s1021_s27 = scalar_lea.vmem %s1109_s1, %s883_s21 }
  0x12   : > { %v965_v0 = vmov 0.0  }
  0x13   : > { %320 = vst [vmem:[#allocation2] sm:$0xff] %v965_v0 }
  0x14   : > { %321 = vst [vmem:[#allocation2 + $0x8] sm:$0xff] %v965_v0 }
  0x15 PF: > { %v807_v1 = vld [vmem:[%s1021_s27 + $0x70] sm:$0xf]  ;;  %v899_v2 = vld [vmem:[%s1021_s27 + $0x74] sm:$0xf0]  ;;  %v898_v6 = vld [vmem:[%s1021_s27 + $0x74] sm:$0xf] }
  0x16   : > { %v871_v3 = vld [vmem:[%s1021_s27 + $0xf0] sm:$0xf]  ;;  %v808_v4 = vor.u32 %v899_v2, %v807_v1  ;;  %v915_v5 = vld [vmem:[%s1021_s27 + $0xf4] sm:$0xf0]  ;;  %v809_v7 = vld [vmem:[%s1021_s27 + $0x78] sm:$0xf0] }
  0x17   : > { %v872_v8 = vor.u32 %v915_v5, %v871_v3  ;;  %v812_v9 = vor.u32 %v898_v6, %v809_v7  ;;  %v914_v10 = vld [vmem:[%s1021_s27 + $0xf4] sm:$0xf]  ;;  %v873_v11 = vld [vmem:[%s1021_s27 + $0xf8] sm:$0xf0]  ;;  %v799_v12 = vld [vmem:[%s1021_s27 + $0x60] sm:$0xf] }
  0x18   : > { %524 = vmatpush.bf16.msra.mxu0 %v808_v4  ;;  %v876_v13 = vor.u32 %v914_v10, %v873_v11  ;;  %v897_v14 = vld [vmem:[%s1021_s27 + $0x64] sm:$0xf0]  ;;  %v863_v15 = vld [vmem:[%s1021_s27 + $0xe0] sm:$0xf]  ;;  %v896_v19 = vld [vmem:[%s1021_s27 + $0x64] sm:$0xf] }
  0x19   : > { %v913_v16 = vld [vmem:[%s1021_s27 + $0xe4] sm:$0xf0]  ;;  %537 = vmatpush.bf16.msra.mxu1 %v872_v8  ;;  %550 = vmatpush.bf16.msra.mxu2 %v812_v9  ;;  %v800_v17 = vor.u32 %v897_v14, %v799_v12  ;;  %v801_v20 = vld [vmem:[%s1021_s27 + $0x68] sm:$0xf0]  ;;  %v912_v21 = vld [vmem:[%s1021_s27 + $0xe4] sm:$0xf] }
  0x1a   : > { %v864_v18 = vor.u32 %v913_v16, %v863_v15  ;;  %563 = vmatpush.bf16.msra.mxu3 %v876_v13  ;;  %v804_v22 = vor.u32 %v896_v19, %v801_v20  ;;  %v865_v23 = vld [vmem:[%s1021_s27 + $0xe8] sm:$0xf0]  ;;  %v791_v24 = vld [vmem:[%s1021_s27 + $0x50] sm:$0xf]  ;;  %v895_v25 = vld [vmem:[%s1021_s27 + $0x54] sm:$0xf0] }
  0x1b   : > { %v868_v26 = vor.u32 %v912_v21, %v865_v23  ;;  %v855_v27 = vld [vmem:[%s1021_s27 + $0xd0] sm:$0xf]  ;;  %v911_v28 = vld [vmem:[%s1021_s27 + $0xd4] sm:$0xf0]  ;;  %v894_v29 = vld [vmem:[%s1021_s27 + $0x54] sm:$0xf]  ;;  %v792_v30 = vor.u32 %v895_v25, %v791_v24 }
  0x1c   : > { %525 = vmatpush.bf16.msra.mxu0 %v800_v17  ;;  %v793_v31 = vld [vmem:[%s1021_s27 + $0x58] sm:$0xf0]  ;;  %v910_v32 = vld [vmem:[%s1021_s27 + $0xd4] sm:$0xf]  ;;  %v856_v34 = vor.u32 %v911_v28, %v855_v27  ;;  %v783_v36 = vld [vmem:[%s1021_s27 + $0x40] sm:$0xf] }
  0x1d   : > { %v857_v33 = vld [vmem:[%s1021_s27 + $0xd8] sm:$0xf0]  ;;  %538 = vmatpush.bf16.msra.mxu1 %v864_v18  ;;  %551 = vmatpush.bf16.msra.mxu2 %v804_v22  ;;  %v796_v35 = vor.u32 %v894_v29, %v793_v31  ;;  %v893_v37 = vld [vmem:[%s1021_s27 + $0x44] sm:$0xf0]  ;;  %v847_v38 = vld [vmem:[%s1021_s27 + $0xc0] sm:$0xf] }
  0x1e   : > { %564 = vmatpush.bf16.msra.mxu3 %v868_v26  ;;  %v860_v39 = vor.u32 %v910_v32, %v857_v33  ;;  %v909_v40 = vld [vmem:[%s1021_s27 + $0xc4] sm:$0xf0]  ;;  %v892_v41 = vld [vmem:[%s1021_s27 + $0x44] sm:$0xf]  ;;  %v785_v42 = vld [vmem:[%s1021_s27 + $0x48] sm:$0xf0]  ;;  %v784_v45 = vor.u32 %v893_v37, %v783_v36 }
  0x1f   : > { %v908_v43 = vld [vmem:[%s1021_s27 + $0xc4] sm:$0xf]  ;;  %v849_v44 = vld [vmem:[%s1021_s27 + $0xc8] sm:$0xf0]  ;;  %v848_v46 = vor.u32 %v909_v40, %v847_v38  ;;  %v788_v47 = vor.u32 %v892_v41, %v785_v42  ;;  %v775_v48 = vld [vmem:[%s1021_s27 + $0x30] sm:$0xf] }
  0x20   : > { %526 = vmatpush.bf16.msra.mxu0 %v792_v30  ;;  %v891_v49 = vld [vmem:[%s1021_s27 + $0x34] sm:$0xf0]  ;;  %v839_v50 = vld [vmem:[%s1021_s27 + $0xb0] sm:$0xf]  ;;  %v852_v51 = vor.u32 %v908_v43, %v849_v44  ;;  %v890_v53 = vld [vmem:[%s1021_s27 + $0x34] sm:$0xf] }
  0x21   : > { %539 = vmatpush.bf16.msra.mxu1 %v856_v34  ;;  %552 = vmatpush.bf16.msra.mxu2 %v796_v35  ;;  %v907_v52 = vld [vmem:[%s1021_s27 + $0xb4] sm:$0xf0]  ;;  %v777_v54 = vld [vmem:[%s1021_s27 + $0x38] sm:$0xf0]  ;;  %v906_v55 = vld [vmem:[%s1021_s27 + $0xb4] sm:$0xf]  ;;  %v776_v57 = vor.u32 %v891_v49, %v775_v48 }
  0x22   : > { %565 = vmatpush.bf16.msra.mxu3 %v860_v39  ;;  %v841_v56 = vld [vmem:[%s1021_s27 + $0xb8] sm:$0xf0]  ;;  %v840_v58 = vor.u32 %v907_v52, %v839_v50  ;;  %v780_v59 = vor.u32 %v890_v53, %v777_v54  ;;  %v767_v60 = vld [vmem:[%s1021_s27 + $0x20] sm:$0xf]  ;;  %v889_v61 = vld [vmem:[%s1021_s27 + $0x24] sm:$0xf0] }
  0x23   : > { %v831_v62 = vld [vmem:[%s1021_s27 + $0xa0] sm:$0xf]  ;;  %v844_v63 = vor.u32 %v906_v55, %v841_v56  ;;  %v905_v0 = vld [vmem:[%s1021_s27 + $0xa4] sm:$0xf0]  ;;  %v888_v1 = vld [vmem:[%s1021_s27 + $0x24] sm:$0xf]  ;;  %v768_v5 = vor.u32 %v889_v61, %v767_v60 }
  0x24   : > { %527 = vmatpush.bf16.msra.mxu0 %v784_v45  ;;  %v769_v2 = vld [vmem:[%s1021_s27 + $0x28] sm:$0xf0]  ;;  %v904_v3 = vld [vmem:[%s1021_s27 + $0xa4] sm:$0xf]  ;;  %v832_v6 = vor.u32 %v905_v0, %v831_v62  ;;  %v759_v8 = vld [vmem:[%s1021_s27 + $0x10] sm:$0xf] }
  0x25   : > { %540 = vmatpush.bf16.msra.mxu1 %v848_v46  ;;  %553 = vmatpush.bf16.msra.mxu2 %v788_v47  ;;  %v833_v4 = vld [vmem:[%s1021_s27 + $0xa8] sm:$0xf0]  ;;  %v772_v7 = vor.u32 %v888_v1, %v769_v2  ;;  %v887_v9 = vld [vmem:[%s1021_s27 + $0x14] sm:$0xf0]  ;;  %v823_v10 = vld [vmem:[%s1021_s27 + $0x90] sm:$0xf] }
  0x26   : > { %566 = vmatpush.bf16.msra.mxu3 %v852_v51  ;;  %v836_v11 = vor.u32 %v904_v3, %v833_v4  ;;  %v903_v12 = vld [vmem:[%s1021_s27 + $0x94] sm:$0xf0]  ;;  %v886_v13 = vld [vmem:[%s1021_s27 + $0x14] sm:$0xf]  ;;  %v761_v14 = vld [vmem:[%s1021_s27 + $0x18] sm:$0xf0]  ;;  %v760_v17 = vor.u32 %v887_v9, %v759_v8 }
  0x27   : > { %v902_v15 = vld [vmem:[%s1021_s27 + $0x94] sm:$0xf]  ;;  %v825_v16 = vld [vmem:[%s1021_s27 + $0x98] sm:$0xf0]  ;;  %v324_v18 = vld [vmem:[%s1016_s24] sm:$0xff]  ;;  %v824_v19 = vor.u32 %v903_v12, %v823_v10  ;;  %v764_v20 = vor.u32 %v886_v13, %v761_v14  ;;  %p877_p6 = scmp.ne.s32.totalorder %s955_s15, 8 }
  0x28   : > { %528 = vmatpush.bf16.msra.mxu0 %v776_v57  ;;  %v751_v21 = vld [vmem:[%s1021_s27] sm:$0xf]  ;;  %v885_v22 = vld [vmem:[%s1021_s27 + $0x4] sm:$0xf0]  ;;  %v828_v24 = vor.u32 %v902_v15, %v825_v16  ;;  %v884_v26 = vld [vmem:[%s1021_s27 + $0x4] sm:$0xf]  ;;  %v358_v30 = vunpack.c.l.b16 %v324_v18  ;;  %v359_v32 = vunpack.c.h.b16 %v324_v18 }
  0x29   : > { %541 = vmatpush.bf16.msra.mxu1 %v840_v58  ;;  %554 = vmatpush.bf16.msra.mxu2 %v780_v59  ;;  %v815_v23 = vld [vmem:[%s1021_s27 + $0x80] sm:$0xf]  ;;  %v901_v25 = vld [vmem:[%s1021_s27 + $0x84] sm:$0xf0]  ;;  %v753_v27 = vld [vmem:[%s1021_s27 + $0x8] sm:$0xf0]  ;;  %v752_v31 = vor.u32 %v885_v22, %v751_v21 }
  0x2a   : > { %567 = vmatpush.bf16.msra.mxu3 %v844_v63  ;;  %v900_v28 = vld [vmem:[%s1021_s27 + $0x84] sm:$0xf]  ;;  %v817_v29 = vld [vmem:[%s1021_s27 + $0x88] sm:$0xf0]  ;;  %v816_v33 = vor.u32 %v901_v25, %v815_v23  ;;  %v756_v34 = vor.u32 %v884_v26, %v753_v27  ;;  %v360_v36 = vpack.c.b16 %v358_v30, %v358_v30  ;;  %v361_v37 = vpack.c.b16 %v359_v32, %v359_v32 }
  0x2b   : > { %v820_v35 = vor.u32 %v900_v28, %v817_v29  ;;  %v322_v39 = vld [vmem:[#allocation2] sm:$0xff]  ;;  %v323_v44 = vld [vmem:[#allocation2 + $0x8] sm:$0xff] }
  0x2c   : > { %529 = vmatpush.bf16.msra.mxu0 %v768_v5 }
  0x2d   : > { %542 = vmatpush.bf16.msra.mxu1 %v832_v6  ;;  %555 = vmatpush.bf16.msra.mxu2 %v772_v7 }
  0x2e   : > { %568 = vmatpush.bf16.msra.mxu3 %v836_v11 }
  0x30   : > { %530 = vmatpush.bf16.msra.mxu0 %v760_v17 }
  0x31   : > { %543 = vmatpush.bf16.msra.mxu1 %v824_v19  ;;  %556 = vmatpush.bf16.msra.mxu2 %v764_v20 }
  0x32   : > { %569 = vmatpush.bf16.msra.mxu3 %v828_v24 }
  0x34   : > { %531 = vmatpush.bf16.msra.mxu0 %v752_v31 }
  0x35   : > { %544 = vmatpush.bf16.msra.mxu1 %v816_v33  ;;  %557 = vmatpush.bf16.msra.mxu2 %v756_v34 }
  0x36   : > { %570 = vmatpush.bf16.msra.mxu3 %v820_v35 }
  0x37   : > { %532 = vmatmul.bf16.vlgmr.msra.gmra.mxu0 %v360_v36 }
  0x38   : > { %545 = vmatmul.bf16.vlgmr.msra.gmra.mxu1 %v361_v37  ;;  %558 = vmatmul.bf16.vlgmr.msra.gmra.mxu2 %v360_v36 }
  0x39   : > { %571 = vmatmul.bf16.vlgmr.msra.gmra.mxu3 %v361_v37 }
  0xb4   : > { %v533_v38 = vpop.f32.mrf.mxu0 }
  0xb5   : > { %v546_v40 = vpop.f32.mrf.mxu1 }
  0xb6   : > { %v547_v41 = vadd.f32 %v546_v40, %v533_v38 }
  0xb8   : > { %v576_v42 = vadd.f32 %v547_v41, %v322_v39 }
  0xba   : > { %578 = vst [vmem:[#allocation2] sm:$0xff] %v576_v42 }
  0xbb   : > { %v559_v43 = vpop.f32.mrf.mxu2 }
  0xbc   : > { %v572_v45 = vpop.f32.mrf.mxu3  ;;  %v535_v46 = vpop.f32.mrf.mxu0 }
  0xbd   : > { %v573_v47 = vadd.f32 %v572_v45, %v559_v43  ;;  %v548_v48 = vpop.f32.mrf.mxu1 }
  0xbf   : > { %v577_v49 = vadd.f32 %v573_v47, %v323_v44 }
  0xc0   : > { %583 = sbr.rel (%p877_p6) target bundleno = 210 (0xd2), region = 44 }
  0xc1   : > { %579 = vst [vmem:[#allocation2 + $0x8] sm:$0xff] %v577_v49 }
  0xc3   : > { %v561_v50 = vpop.f32.mrf.mxu2 }
  0xc4   : > { %v574_v51 = vpop.f32.mrf.mxu3 }
  0xc5   : > { %v584_v52 = vld [vmem:[#allocation2] sm:$0xff] }
  0xc6   : > { %v586_v54 = vld [vmem:[%s1110_s2] sm:$0x3] }
  0xc7   : > { %v588_v55 = vperm.slane %v586_v54, 0  ;;  %v589_v56 = vperm.slane %v586_v54, 1  ;;  %v594_v57 = vld [vmem:[%s1111_s3] sm:$0x3] }
  0xc8   : > { %v585_v53 = vld [vmem:[#allocation2 + $0x8] sm:$0xff]  ;;  %v596_v58 = vperm.slane %v594_v57, 0  ;;  %v597_v59 = vperm.slane %v594_v57, 1 }
  0xc9   : > { %v592_v60 = vmul.f32 %v588_v55, %v584_v52  ;;  %v593_v61 = vmul.f32 %v589_v56, %v585_v53 }
  0xcb   : > { %v600_v62 = vadd.f32 %v596_v58, %v592_v60  ;;  %v601_v63 = vadd.f32 %v597_v59, %v593_v61 }
  0xcd   : > { %v602_v0 = vmax.f32 %v600_v62, 0.0  ;;  %v603_v1 = vmax.f32 %v601_v63, 0.0 }
  0xcf   : > { %v604_v2 = vpack.c.bf16 %v603_v1, %v602_v0 }
  0xd1   : > { %605 = vst [vmem:[%s1112_s4] sm:$0xff] %v604_v2 }
  0xd2 PF: > { %s14_s17 = sadd.s32 1, %s963_s17   ;;  %s1113_s15 = smov %s959_s16 }
  0xd3   : > { %p11_p7 = scmp.ge.s32.totalorder %s14_s17, 11   ;;  %s1114_s16 = smov %s1116_s18 }
  0xd5   :  { %13 = sbr.rel (!%p11_p7) target bundleno = 2 (0x2), region = 83 }

// kernel: forward.35
= control target key start
LH: loop header
LB: loop body
LE: loop exit
PB: predicated region body
PF: predicated region fallthrough
CT: control target
= control target key end

     0   :  { %s768_s15 = smov 0   ;;  %s770_s16 = smov 0   ;;  %s853_s0 = inlined_call_operand.vmem [shape: bf16[9,8,128], index: 0, kind: input, shape index: {}]   ;;  %s854_s1 = inlined_call_operand.vmem [shape: bf16[9,128,256], index: 1, kind: input, shape index: {}]   ;;  %s855_s2 = inlined_call_operand.vmem [shape: f32[1,256], index: 2, kind: input, shape index: {}]   ;;  %s856_s3 = inlined_call_operand.vmem [shape: f32[1,256], index: 3, kind: input, shape index: {}]   ;;  %s857_s4 = inlined_call_operand.vmem [shape: bf16[8,256], index: 4, kind: output, shape index: {}]  }
   0x1   :  { %s772_s17 = smov 0  }
   0x2 LB: > { %s26_s18 = sadd.s32 1, %s736_s16  ;;  %p602_p0 = scmp.ge.s32.totalorder %s740_s17, 1  ;;  %s740_s17 = sphi %s772_s17, %s14_s17   ;;  %s736_s16 = sphi %s770_s16, %s859_s16   ;;  %s732_s15 = sphi %s768_s15, %s858_s15  }
   0x3   : > { %p27_p1 = scmp.ge.s32.totalorder %s26_s18, 9  ;;  %p224_p2 = scmp.lt.s32.totalorder %s740_s17, 10 }
   0x5   : > { %s861_s18 = smov (%p27_p1, %s26_s18), 0  ;;  %p225_p3 = pnand %p602_p0, %p224_p2 }
   0x6   : > { %p273_p4 = scmp.lt.s32.totalorder (!%p225_p3), %s732_s15, 8  ;;  %p606_p5 = scmp.ne.s32.totalorder (!%p225_p3), %s732_s15, 0 }
   0x7   : > { %228 = sbr.rel (%p225_p3) target bundleno = 203 (0xcb), region = 36 }
   0xc   : > { %s274_s19 = scalar_select %p273_p4, %s732_s15, 8 }
   0xd   : > { %313 = sbr.rel (%p606_p5) target bundleno = 21 (0x15), region = 40 }
   0xe   : > { %s603_s20 = sshll.u32 %s274_s19, 2  ;;  %s676_s21 = sshll.u32 %s274_s19, 7 }
   0xf   : > { %s793_s24 = scalar_lea.vmem %s853_s0, %s603_s20  ;;  %s798_s27 = scalar_lea.vmem %s854_s1, %s676_s21 }
  0x12   : > { %v742_v0 = vmov 0.0  }
  0x13   : > { %314 = vst [vmem:[#allocation2] sm:$0xff] %v742_v0 }
  0x14   : > { %315 = vst [vmem:[#allocation2 + $0x8] sm:$0xff] %v742_v0 }
  0x15 PF: > { %v665_v1 = vld [vmem:[%s798_s27 + $0x70] sm:$0xf]  ;;  %v692_v2 = vld [vmem:[%s798_s27 + $0x74] sm:$0xf0]  ;;  %v691_v3 = vld [vmem:[%s798_s27 + $0x74] sm:$0xf] }
  0x16   : > { %v666_v4 = vor.u32 %v692_v2, %v665_v1  ;;  %v667_v5 = vld [vmem:[%s798_s27 + $0x78] sm:$0xf0]  ;;  %v657_v6 = vld [vmem:[%s798_s27 + $0x60] sm:$0xf]  ;;  %v690_v7 = vld [vmem:[%s798_s27 + $0x64] sm:$0xf0] }
  0x17   : > { %v670_v8 = vor.u32 %v691_v3, %v667_v5  ;;  %v689_v9 = vld [vmem:[%s798_s27 + $0x64] sm:$0xf]  ;;  %v659_v10 = vld [vmem:[%s798_s27 + $0x68] sm:$0xf0]  ;;  %v658_v11 = vor.u32 %v690_v7, %v657_v6  ;;  %v649_v13 = vld [vmem:[%s798_s27 + $0x50] sm:$0xf] }
  0x18   : > { %415 = vmatpush.bf16.msra.mxu0 %v666_v4  ;;  %v662_v12 = vor.u32 %v689_v9, %v659_v10  ;;  %v688_v14 = vld [vmem:[%s798_s27 + $0x54] sm:$0xf0]  ;;  %v687_v15 = vld [vmem:[%s798_s27 + $0x54] sm:$0xf]  ;;  %v651_v16 = vld [vmem:[%s798_s27 + $0x58] sm:$0xf0] }
  0x19   : > { %428 = vmatpush.bf16.msra.mxu1 %v670_v8  ;;  %v650_v17 = vor.u32 %v688_v14, %v649_v13  ;;  %v654_v18 = vor.u32 %v687_v15, %v651_v16  ;;  %v641_v19 = vld [vmem:[%s798_s27 + $0x40] sm:$0xf]  ;;  %v686_v20 = vld [vmem:[%s798_s27 + $0x44] sm:$0xf0]  ;;  %v685_v21 = vld [vmem:[%s798_s27 + $0x44] sm:$0xf] }
  0x1a   : > { %v643_v22 = vld [vmem:[%s798_s27 + $0x48] sm:$0xf0]  ;;  %v642_v23 = vor.u32 %v686_v20, %v641_v19  ;;  %v633_v25 = vld [vmem:[%s798_s27 + $0x30] sm:$0xf]  ;;  %v684_v26 = vld [vmem:[%s798_s27 + $0x34] sm:$0xf0] }
  0x1b   : > { %v646_v24 = vor.u32 %v685_v21, %v643_v22  ;;  %v683_v27 = vld [vmem:[%s798_s27 + $0x34] sm:$0xf]  ;;  %v635_v28 = vld [vmem:[%s798_s27 + $0x38] sm:$0xf0]  ;;  %v634_v29 = vor.u32 %v684_v26, %v633_v25  ;;  %v625_v31 = vld [vmem:[%s798_s27 + $0x20] sm:$0xf] }
  0x1c   : > { %416 = vmatpush.bf16.msra.mxu0 %v658_v11  ;;  %v638_v30 = vor.u32 %v683_v27, %v635_v28  ;;  %v682_v32 = vld [vmem:[%s798_s27 + $0x24] sm:$0xf0]  ;;  %v681_v33 = vld [vmem:[%s798_s27 + $0x24] sm:$0xf]  ;;  %v627_v34 = vld [vmem:[%s798_s27 + $0x28] sm:$0xf0] }
  0x1d   : > { %429 = vmatpush.bf16.msra.mxu1 %v662_v12  ;;  %v626_v35 = vor.u32 %v682_v32, %v625_v31  ;;  %v630_v36 = vor.u32 %v681_v33, %v627_v34  ;;  %v617_v37 = vld [vmem:[%s798_s27 + $0x10] sm:$0xf]  ;;  %v680_v38 = vld [vmem:[%s798_s27 + $0x14] sm:$0xf0]  ;;  %v679_v39 = vld [vmem:[%s798_s27 + $0x14] sm:$0xf] }
  0x1e   : > { %v619_v40 = vld [vmem:[%s798_s27 + $0x18] sm:$0xf0]  ;;  %v618_v41 = vor.u32 %v680_v38, %v617_v37  ;;  %v609_v43 = vld [vmem:[%s798_s27] sm:$0xf]  ;;  %v678_v44 = vld [vmem:[%s798_s27 + $0x4] sm:$0xf0] }
  0x1f   : > { %v622_v42 = vor.u32 %v679_v39, %v619_v40  ;;  %v677_v45 = vld [vmem:[%s798_s27 + $0x4] sm:$0xf]  ;;  %v611_v46 = vld [vmem:[%s798_s27 + $0x8] sm:$0xf0]  ;;  %v610_v47 = vor.u32 %v678_v44, %v609_v43  ;;  %v318_v49 = vld [vmem:[%s793_s24] sm:$0xf] }
  0x20   : > { %417 = vmatpush.bf16.msra.mxu0 %v650_v17  ;;  %v614_v48 = vor.u32 %v677_v45, %v611_v46  ;;  %v316_v50 = vld [vmem:[#allocation2] sm:$0xff]  ;;  %v317_v51 = vld [vmem:[#allocation2 + $0x8] sm:$0xff]  ;;  %p671_p6 = scmp.ne.s32.totalorder %s732_s15, 8 }
  0x21   : > { %430 = vmatpush.bf16.msra.mxu1 %v654_v18 }
  0x24   : > { %418 = vmatpush.bf16.msra.mxu0 %v642_v23 }
  0x25   : > { %431 = vmatpush.bf16.msra.mxu1 %v646_v24 }
  0x28   : > { %419 = vmatpush.bf16.msra.mxu0 %v634_v29 }
  0x29   : > { %432 = vmatpush.bf16.msra.mxu1 %v638_v30 }
  0x2c   : > { %420 = vmatpush.bf16.msra.mxu0 %v626_v35 }
  0x2d   : > { %433 = vmatpush.bf16.msra.mxu1 %v630_v36 }
  0x30   : > { %421 = vmatpush.bf16.msra.mxu0 %v618_v41 }
  0x31   : > { %434 = vmatpush.bf16.msra.mxu1 %v622_v42 }
  0x34   : > { %422 = vmatpush.bf16.msra.mxu0 %v610_v47 }
  0x35   : > { %435 = vmatpush.bf16.msra.mxu1 %v614_v48 }
  0x37   : > { %423 = vmatmul.bf16.vlgmr.msra.gmra.mxu0 %v318_v49 }
  0x38   : > { %436 = vmatmul.bf16.vlgmr.msra.gmra.mxu1 %v318_v49 }
  0xb4   : > { %v424_v52 = vpop.f32.mrf.mxu0 }
  0xb5   : > { %v441_v53 = vadd.f32 %v424_v52, %v316_v50  ;;  %v437_v54 = vpop.f32.mrf.mxu1 }
  0xb6   : > { %v442_v55 = vadd.f32 %v437_v54, %v317_v51 }
  0xb7   : > { %443 = vst [vmem:[#allocation2] sm:$0xff] %v441_v53 }
  0xb8   : > { %444 = vst [vmem:[#allocation2 + $0x8] sm:$0xff] %v442_v55 }
  0xb9   : > { %448 = sbr.rel (%p671_p6) target bundleno = 203 (0xcb), region = 44 }
  0xbc   : > { %v426_v56 = vpop.f32.mrf.mxu0 }
  0xbd   : > { %v439_v57 = vpop.f32.mrf.mxu1 }
  0xbe   : > { %v449_v58 = vld [vmem:[#allocation2] sm:$0xff] }
  0xbf   : > { %v450_v59 = vld [vmem:[#allocation2 + $0x8] sm:$0xff]  ;;  %v451_v60 = vld [vmem:[%s855_s2] sm:$0x3] }
  0xc0   : > { %v453_v61 = vperm.slane %v451_v60, 0  ;;  %v454_v62 = vperm.slane %v451_v60, 1  ;;  %v459_v63 = vld [vmem:[%s856_s3] sm:$0x3] }
  0xc1   : > { %v461_v0 = vperm.slane %v459_v63, 0  ;;  %v462_v1 = vperm.slane %v459_v63, 1 }
  0xc2   : > { %v457_v2 = vmul.f32 %v453_v61, %v449_v58  ;;  %v458_v3 = vmul.f32 %v454_v62, %v450_v59 }
  0xc4   : > { %v465_v4 = vadd.f32 %v461_v0, %v457_v2  ;;  %v466_v5 = vadd.f32 %v462_v1, %v458_v3 }
  0xc6   : > { %v467_v6 = vmax.f32 %v465_v4, 0.0  ;;  %v468_v7 = vmax.f32 %v466_v5, 0.0 }
  0xc8   : > { %v469_v8 = vpack.c.bf16 %v468_v7, %v467_v6 }
  0xca   : > { %470 = vst [vmem:[%s857_s4] sm:$0xff] %v469_v8 }
  0xcb PF: > { %s14_s17 = sadd.s32 1, %s740_s17   ;;  %s858_s15 = smov %s736_s16 }
  0xcc   : > { %p11_p7 = scmp.ge.s32.totalorder %s14_s17, 11   ;;  %s859_s16 = smov %s861_s18 }
  0xce   :  { %13 = sbr.rel (!%p11_p7) target bundleno = 2 (0x2), region = 83 }

// kernel: forward.37
= control target key start
LH: loop header
LB: loop body
LE: loop exit
PB: predicated region body
PF: predicated region fallthrough
CT: control target
= control target key end

     0   :  { %s1086_s18 = smov 0   ;;  %s1088_s19 = smov 0   ;;  %s1206_s0 = inlined_call_operand.vmem [shape: bf16[9,8,256], index: 0, kind: input, shape index: {}]   ;;  %s1207_s1 = inlined_call_operand.vmem [shape: bf16[9,256,256], index: 1, kind: input, shape index: {}]   ;;  %s1208_s2 = inlined_call_operand.vmem [shape: f32[1,256], index: 2, kind: input, shape index: {}]   ;;  %s1209_s3 = inlined_call_operand.vmem [shape: f32[1,256], index: 3, kind: input, shape index: {}]   ;;  %s1210_s4 = inlined_call_operand.vmem [shape: bf16[8,256], index: 4, kind: input, shape index: {}]   ;;  %s1211_s5 = inlined_call_operand.vmem [shape: bf16[8,256], index: 5, kind: output, shape index: {}]  }
   0x1   :  { %s1090_s20 = smov 0  }
   0x2 LB: > { %s27_s21 = sadd.s32 1, %s1049_s19  ;;  %p833_p0 = scmp.ge.s32.totalorder %s1053_s20, 1  ;;  %s1053_s20 = sphi %s1090_s20, %s15_s20   ;;  %s1049_s19 = sphi %s1088_s19, %s1213_s19   ;;  %s1045_s18 = sphi %s1086_s18, %s1212_s18  }
   0x3   : > { %p28_p1 = scmp.ge.s32.totalorder %s27_s21, 9  ;;  %p268_p2 = scmp.lt.s32.totalorder %s1053_s20, 10 }
   0x5   : > { %s1215_s21 = smov (%p28_p1, %s27_s21), 0  ;;  %p269_p3 = pnand %p833_p0, %p268_p2 }
   0x6   : > { %p330_p4 = scmp.lt.s32.totalorder (!%p269_p3), %s1045_s18, 8  ;;  %p838_p5 = scmp.ne.s32.totalorder (!%p269_p3), %s1045_s18, 0 }
   0x7   : > { %272 = sbr.rel (%p269_p3) target bundleno = 212 (0xd4), region = 40 }
   0xc   : > { %s331_s22 = scalar_select %p330_p4, %s1045_s18, 8 }
   0xd   : > { %382 = sbr.rel (%p838_p5) target bundleno = 21 (0x15), region = 44 }
   0xe   : > { %s972_s23 = sshll.u32 %s331_s22, 3  ;;  %s973_s24 = sshll.u32 %s331_s22, 8 }
   0xf   : > { %s1111_s27 = scalar_lea.vmem %s1206_s0, %s972_s23  ;;  %s1116_s30 = scalar_lea.vmem %s1207_s1, %s973_s24 }
  0x12   : > { %v1055_v0 = vmov 0.0  }
  0x13   : > { %383 = vst [vmem:[#allocation2] sm:$0xff] %v1055_v0 }
  0x14   : > { %384 = vst [vmem:[#allocation2 + $0x8] sm:$0xff] %v1055_v0 }
  0x15 PF: > { %v897_v1 = vld [vmem:[%s1116_s30 + $0x70] sm:$0xf]  ;;  %v989_v2 = vld [vmem:[%s1116_s30 + $0x74] sm:$0xf0]  ;;  %v988_v6 = vld [vmem:[%s1116_s30 + $0x74] sm:$0xf] }
  0x16   : > { %v961_v3 = vld [vmem:[%s1116_s30 + $0xf0] sm:$0xf]  ;;  %v898_v4 = vor.u32 %v989_v2, %v897_v1  ;;  %v1005_v5 = vld [vmem:[%s1116_s30 + $0xf4] sm:$0xf0]  ;;  %v899_v7 = vld [vmem:[%s1116_s30 + $0x78] sm:$0xf0] }
  0x17   : > { %v962_v8 = vor.u32 %v1005_v5, %v961_v3  ;;  %v902_v9 = vor.u32 %v988_v6, %v899_v7  ;;  %v1004_v10 = vld [vmem:[%s1116_s30 + $0xf4] sm:$0xf]  ;;  %v963_v11 = vld [vmem:[%s1116_s30 + $0xf8] sm:$0xf0]  ;;  %v889_v12 = vld [vmem:[%s1116_s30 + $0x60] sm:$0xf] }
  0x18   : > { %587 = vmatpush.bf16.msra.mxu0 %v898_v4  ;;  %v966_v13 = vor.u32 %v1004_v10, %v963_v11  ;;  %v987_v14 = vld [vmem:[%s1116_s30 + $0x64] sm:$0xf0]  ;;  %v953_v15 = vld [vmem:[%s1116_s30 + $0xe0] sm:$0xf]  ;;  %v986_v19 = vld [vmem:[%s1116_s30 + $0x64] sm:$0xf] }
  0x19   : > { %v1003_v16 = vld [vmem:[%s1116_s30 + $0xe4] sm:$0xf0]  ;;  %600 = vmatpush.bf16.msra.mxu1 %v962_v8  ;;  %613 = vmatpush.bf16.msra.mxu2 %v902_v9  ;;  %v890_v17 = vor.u32 %v987_v14, %v889_v12  ;;  %v891_v20 = vld [vmem:[%s1116_s30 + $0x68] sm:$0xf0]  ;;  %v1002_v21 = vld [vmem:[%s1116_s30 + $0xe4] sm:$0xf] }
  0x1a   : > { %v954_v18 = vor.u32 %v1003_v16, %v953_v15  ;;  %626 = vmatpush.bf16.msra.mxu3 %v966_v13  ;;  %v894_v22 = vor.u32 %v986_v19, %v891_v20  ;;  %v955_v23 = vld [vmem:[%s1116_s30 + $0xe8] sm:$0xf0]  ;;  %v881_v24 = vld [vmem:[%s1116_s30 + $0x50] sm:$0xf]  ;;  %v985_v25 = vld [vmem:[%s1116_s30 + $0x54] sm:$0xf0] }
  0x1b   : > { %v958_v26 = vor.u32 %v1002_v21, %v955_v23  ;;  %v945_v27 = vld [vmem:[%s1116_s30 + $0xd0] sm:$0xf]  ;;  %v1001_v28 = vld [vmem:[%s1116_s30 + $0xd4] sm:$0xf0]  ;;  %v984_v29 = vld [vmem:[%s1116_s30 + $0x54] sm:$0xf]  ;;  %v882_v30 = vor.u32 %v985_v25, %v881_v24 }
  0x1c   : > { %588 = vmatpush.bf16.msra.mxu0 %v890_v17  ;;  %v883_v31 = vld [vmem:[%s1116_s30 + $0x58] sm:$0xf0]  ;;  %v1000_v32 = vld [vmem:[%s1116_s30 + $0xd4] sm:$0xf]  ;;  %v946_v34 = vor.u32 %v1001_v28, %v945_v27  ;;  %v873_v36 = vld [vmem:[%s1116_s30 + $0x40] sm:$0xf] }
  0x1d   : > { %v947_v33 = vld [vmem:[%s1116_s30 + $0xd8] sm:$0xf0]  ;;  %601 = vmatpush.bf16.msra.mxu1 %v954_v18  ;;  %614 = vmatpush.bf16.msra.mxu2 %v894_v22  ;;  %v886_v35 = vor.u32 %v984_v29, %v883_v31  ;;  %v983_v37 = vld [vmem:[%s1116_s30 + $0x44] sm:$0xf0]  ;;  %v937_v38 = vld [vmem:[%s1116_s30 + $0xc0] sm:$0xf] }
  0x1e   : > { %627 = vmatpush.bf16.msra.mxu3 %v958_v26  ;;  %v950_v39 = vor.u32 %v1000_v32, %v947_v33  ;;  %v999_v40 = vld [vmem:[%s1116_s30 + $0xc4] sm:$0xf0]  ;;  %v982_v41 = vld [vmem:[%s1116_s30 + $0x44] sm:$0xf]  ;;  %v875_v42 = vld [vmem:[%s1116_s30 + $0x48] sm:$0xf0]  ;;  %v874_v45 = vor.u32 %v983_v37, %v873_v36 }
  0x1f   : > { %v998_v43 = vld [vmem:[%s1116_s30 + $0xc4] sm:$0xf]  ;;  %v939_v44 = vld [vmem:[%s1116_s30 + $0xc8] sm:$0xf0]  ;;  %v938_v46 = vor.u32 %v999_v40, %v937_v38  ;;  %v878_v47 = vor.u32 %v982_v41, %v875_v42  ;;  %v865_v48 = vld [vmem:[%s1116_s30 + $0x30] sm:$0xf] }
  0x20   : > { %589 = vmatpush.bf16.msra.mxu0 %v882_v30  ;;  %v981_v49 = vld [vmem:[%s1116_s30 + $0x34] sm:$0xf0]  ;;  %v929_v50 = vld [vmem:[%s1116_s30 + $0xb0] sm:$0xf]  ;;  %v942_v51 = vor.u32 %v998_v43, %v939_v44  ;;  %v980_v53 = vld [vmem:[%s1116_s30 + $0x34] sm:$0xf] }
  0x21   : > { %602 = vmatpush.bf16.msra.mxu1 %v946_v34  ;;  %615 = vmatpush.bf16.msra.mxu2 %v886_v35  ;;  %v997_v52 = vld [vmem:[%s1116_s30 + $0xb4] sm:$0xf0]  ;;  %v867_v54 = vld [vmem:[%s1116_s30 + $0x38] sm:$0xf0]  ;;  %v996_v55 = vld [vmem:[%s1116_s30 + $0xb4] sm:$0xf]  ;;  %v866_v57 = vor.u32 %v981_v49, %v865_v48 }
  0x22   : > { %628 = vmatpush.bf16.msra.mxu3 %v950_v39  ;;  %v931_v56 = vld [vmem:[%s1116_s30 + $0xb8] sm:$0xf0]  ;;  %v930_v58 = vor.u32 %v997_v52, %v929_v50  ;;  %v870_v59 = vor.u32 %v980_v53, %v867_v54  ;;  %v857_v60 = vld [vmem:[%s1116_s30 + $0x20] sm:$0xf]  ;;  %v979_v61 = vld [vmem:[%s1116_s30 + $0x24] sm:$0xf0] }
  0x23   : > { %v921_v62 = vld [vmem:[%s1116_s30 + $0xa0] sm:$0xf]  ;;  %v934_v63 = vor.u32 %v996_v55, %v931_v56  ;;  %v995_v0 = vld [vmem:[%s1116_s30 + $0xa4] sm:$0xf0]  ;;  %v978_v1 = vld [vmem:[%s1116_s30 + $0x24] sm:$0xf]  ;;  %v858_v5 = vor.u32 %v979_v61, %v857_v60 }
  0x24   : > { %590 = vmatpush.bf16.msra.mxu0 %v874_v45  ;;  %v859_v2 = vld [vmem:[%s1116_s30 + $0x28] sm:$0xf0]  ;;  %v994_v3 = vld [vmem:[%s1116_s30 + $0xa4] sm:$0xf]  ;;  %v922_v6 = vor.u32 %v995_v0, %v921_v62  ;;  %v849_v8 = vld [vmem:[%s1116_s30 + $0x10] sm:$0xf] }
  0x25   : > { %603 = vmatpush.bf16.msra.mxu1 %v938_v46  ;;  %616 = vmatpush.bf16.msra.mxu2 %v878_v47  ;;  %v923_v4 = vld [vmem:[%s1116_s30 + $0xa8] sm:$0xf0]  ;;  %v862_v7 = vor.u32 %v978_v1, %v859_v2  ;;  %v977_v9 = vld [vmem:[%s1116_s30 + $0x14] sm:$0xf0]  ;;  %v913_v10 = vld [vmem:[%s1116_s30 + $0x90] sm:$0xf] }
  0x26   : > { %629 = vmatpush.bf16.msra.mxu3 %v942_v51  ;;  %v926_v11 = vor.u32 %v994_v3, %v923_v4  ;;  %v993_v12 = vld [vmem:[%s1116_s30 + $0x94] sm:$0xf0]  ;;  %v976_v13 = vld [vmem:[%s1116_s30 + $0x14] sm:$0xf]  ;;  %v851_v14 = vld [vmem:[%s1116_s30 + $0x18] sm:$0xf0]  ;;  %v850_v17 = vor.u32 %v977_v9, %v849_v8 }
  0x27   : > { %v992_v15 = vld [vmem:[%s1116_s30 + $0x94] sm:$0xf]  ;;  %v915_v16 = vld [vmem:[%s1116_s30 + $0x98] sm:$0xf0]  ;;  %v387_v18 = vld [vmem:[%s1111_s27] sm:$0xff]  ;;  %v914_v19 = vor.u32 %v993_v12, %v913_v10  ;;  %v854_v20 = vor.u32 %v976_v13, %v851_v14  ;;  %p967_p6 = scmp.ne.s32.totalorder %s1045_s18, 8 }
  0x28   : > { %591 = vmatpush.bf16.msra.mxu0 %v866_v57  ;;  %v841_v21 = vld [vmem:[%s1116_s30] sm:$0xf]  ;;  %v975_v22 = vld [vmem:[%s1116_s30 + $0x4] sm:$0xf0]  ;;  %v918_v24 = vor.u32 %v992_v15, %v915_v16  ;;  %v974_v26 = vld [vmem:[%s1116_s30 + $0x4] sm:$0xf]  ;;  %v421_v30 = vunpack.c.l.b16 %v387_v18  ;;  %v422_v32 = vunpack.c.h.b16 %v387_v18 }
  0x29   : > { %604 = vmatpush.bf16.msra.mxu1 %v930_v58  ;;  %617 = vmatpush.bf16.msra.mxu2 %v870_v59  ;;  %v905_v23 = vld [vmem:[%s1116_s30 + $0x80] sm:$0xf]  ;;  %v991_v25 = vld [vmem:[%s1116_s30 + $0x84] sm:$0xf0]  ;;  %v843_v27 = vld [vmem:[%s1116_s30 + $0x8] sm:$0xf0]  ;;  %v842_v31 = vor.u32 %v975_v22, %v841_v21 }
  0x2a   : > { %630 = vmatpush.bf16.msra.mxu3 %v934_v63  ;;  %v990_v28 = vld [vmem:[%s1116_s30 + $0x84] sm:$0xf]  ;;  %v907_v29 = vld [vmem:[%s1116_s30 + $0x88] sm:$0xf0]  ;;  %v906_v33 = vor.u32 %v991_v25, %v905_v23  ;;  %v846_v34 = vor.u32 %v974_v26, %v843_v27  ;;  %v423_v36 = vpack.c.b16 %v421_v30, %v421_v30  ;;  %v424_v37 = vpack.c.b16 %v422_v32, %v422_v32 }
  0x2b   : > { %v910_v35 = vor.u32 %v990_v28, %v907_v29  ;;  %v385_v39 = vld [vmem:[#allocation2] sm:$0xff]  ;;  %v386_v44 = vld [vmem:[#allocation2 + $0x8] sm:$0xff] }
  0x2c   : > { %592 = vmatpush.bf16.msra.mxu0 %v858_v5 }
  0x2d   : > { %605 = vmatpush.bf16.msra.mxu1 %v922_v6  ;;  %618 = vmatpush.bf16.msra.mxu2 %v862_v7 }
  0x2e   : > { %631 = vmatpush.bf16.msra.mxu3 %v926_v11 }
  0x30   : > { %593 = vmatpush.bf16.msra.mxu0 %v850_v17 }
  0x31   : > { %606 = vmatpush.bf16.msra.mxu1 %v914_v19  ;;  %619 = vmatpush.bf16.msra.mxu2 %v854_v20 }
  0x32   : > { %632 = vmatpush.bf16.msra.mxu3 %v918_v24 }
  0x34   : > { %594 = vmatpush.bf16.msra.mxu0 %v842_v31 }
  0x35   : > { %607 = vmatpush.bf16.msra.mxu1 %v906_v33  ;;  %620 = vmatpush.bf16.msra.mxu2 %v846_v34 }
  0x36   : > { %633 = vmatpush.bf16.msra.mxu3 %v910_v35 }
  0x37   : > { %595 = vmatmul.bf16.vlgmr.msra.gmra.mxu0 %v423_v36 }
  0x38   : > { %608 = vmatmul.bf16.vlgmr.msra.gmra.mxu1 %v424_v37  ;;  %621 = vmatmul.bf16.vlgmr.msra.gmra.mxu2 %v423_v36 }
  0x39   : > { %634 = vmatmul.bf16.vlgmr.msra.gmra.mxu3 %v424_v37 }
  0xb4   : > { %v596_v38 = vpop.f32.mrf.mxu0 }
  0xb5   : > { %v609_v40 = vpop.f32.mrf.mxu1 }
  0xb6   : > { %v610_v41 = vadd.f32 %v609_v40, %v596_v38 }
  0xb8   : > { %v639_v42 = vadd.f32 %v610_v41, %v385_v39 }
  0xba   : > { %641 = vst [vmem:[#allocation2] sm:$0xff] %v639_v42 }
  0xbb   : > { %v622_v43 = vpop.f32.mrf.mxu2 }
  0xbc   : > { %v635_v45 = vpop.f32.mrf.mxu3  ;;  %v598_v46 = vpop.f32.mrf.mxu0 }
  0xbd   : > { %v636_v47 = vadd.f32 %v635_v45, %v622_v43  ;;  %v611_v48 = vpop.f32.mrf.mxu1 }
  0xbf   : > { %v640_v49 = vadd.f32 %v636_v47, %v386_v44 }
  0xc0   : > { %646 = sbr.rel (%p967_p6) target bundleno = 212 (0xd4), region = 48 }
  0xc1   : > { %642 = vst [vmem:[#allocation2 + $0x8] sm:$0xff] %v640_v49 }
  0xc3   : > { %v624_v50 = vpop.f32.mrf.mxu2 }
  0xc4   : > { %v637_v51 = vpop.f32.mrf.mxu3 }
  0xc5   : > { %v647_v52 = vld [vmem:[#allocation2] sm:$0xff] }
  0xc6   : > { %v649_v54 = vld [vmem:[%s1208_s2] sm:$0x3] }
  0xc7   : > { %v651_v55 = vperm.slane %v649_v54, 0  ;;  %v652_v56 = vperm.slane %v649_v54, 1  ;;  %v657_v57 = vld [vmem:[%s1209_s3] sm:$0x3] }
  0xc8   : > { %v648_v53 = vld [vmem:[#allocation2 + $0x8] sm:$0xff]  ;;  %v665_v58 = vld [vmem:[%s1210_s4] sm:$0xff]  ;;  %v659_v59 = vperm.slane %v657_v57, 0  ;;  %v660_v60 = vperm.slane %v657_v57, 1 }
  0xc9   : > { %v655_v61 = vmul.f32 %v651_v55, %v647_v52  ;;  %v656_v62 = vmul.f32 %v652_v56, %v648_v53  ;;  %v666_v63 = vunpack.c.l.bf16 %v665_v58  ;;  %v667_v0 = vunpack.c.h.bf16 %v665_v58 }
  0xcb   : > { %v663_v1 = vadd.f32 %v659_v59, %v655_v61  ;;  %v664_v2 = vadd.f32 %v660_v60, %v656_v62 }
  0xcd   : > { %v668_v3 = vadd.f32 %v666_v63, %v663_v1  ;;  %v669_v4 = vadd.f32 %v667_v0, %v664_v2 }
  0xcf   : > { %v670_v5 = vmax.f32 %v668_v3, 0.0  ;;  %v671_v6 = vmax.f32 %v669_v4, 0.0 }
  0xd1   : > { %v672_v7 = vpack.c.bf16 %v671_v6, %v670_v5 }
  0xd3   : > { %673 = vst [vmem:[%s1211_s5] sm:$0xff] %v672_v7 }
  0xd4 PF: > { %s15_s20 = sadd.s32 1, %s1053_s20   ;;  %s1212_s18 = smov %s1049_s19 }
  0xd5   : > { %p12_p7 = scmp.ge.s32.totalorder %s15_s20, 11   ;;  %s1213_s19 = smov %s1215_s21 }
  0xd7   :  { %14 = sbr.rel (!%p12_p7) target bundleno = 2 (0x2), region = 90 }

// kernel: forward.40
= control target key start
LH: loop header
LB: loop body
LE: loop exit
PB: predicated region body
PF: predicated region fallthrough
CT: control target
= control target key end

     0   :  { %s1210_s15 = smov 0   ;;  %s1212_s16 = smov 0   ;;  %s1466_s0 = inlined_call_operand.vmem [shape: bf16[9,8,256], index: 0, kind: input, shape index: {}]   ;;  %s1467_s1 = inlined_call_operand.vmem [shape: bf16[9,256,512], index: 1, kind: input, shape index: {}]   ;;  %s1468_s2 = inlined_call_operand.vmem [shape: f32[1,512], index: 2, kind: input, shape index: {}]   ;;  %s1469_s3 = inlined_call_operand.vmem [shape: f32[1,512], index: 3, kind: input, shape index: {}]   ;;  %s1470_s4 = inlined_call_operand.vmem [shape: bf16[8,512], index: 4, kind: output, shape index: {}]  }
   0x1   :  { %s1214_s17 = smov 0   ;;  %s1216_s18 = smov 0  }
   0x2   :  { %s1218_s19 = smov 0   ;;  %s1220_s20 = smov 0  }
   0x3   :  { %s1222_s21 = smov 0  }
   0x4 LB: > { %s26_s22 = sadd.s32 1, %s1174_s19  ;;  %s29_s23 = sadd.s32 1, %s1178_s20  ;;  %s1182_s21 = sphi %s1222_s21, %s14_s21   ;;  %s1178_s20 = sphi %s1220_s20, %s1476_s20   ;;  %s1174_s19 = sphi %s1218_s19, %s1475_s19   ;;  %s1170_s18 = sphi %s1216_s18, %s1474_s18   ;;  %s1166_s17 = sphi %s1214_s17, %s1473_s17   ;;  %s1162_s16 = sphi %s1212_s16, %s1472_s16   ;;  %s1158_s15 = sphi %s1210_s15, %s1471_s15  }
   0x5   : > { %p27_p0 = scmp.ge.s32.totalorder %s26_s22, 9  ;;  %p77_p1 = scmp.ne.s32.totalorder %s1162_s16, %s1158_s15 }
   0x6   : > { %p78_p2 = scmp.eq.s32.totalorder %s1182_s21, 0  ;;  %s70_s27 = sadd.s32 1, %s1162_s16 }
   0x7   : > { %s1478_s22 = smov (%p27_p0, %s26_s22), 0  ;;  %s1480_s23 = smov (!%p27_p0, %s29_s23), %s1178_s20 }
   0x8   : > { %p79_p3 = por %p78_p2, %p77_p1  ;;  %p31_p4 = scmp.ge.s32.totalorder %s1480_s23, 2 }
   0x9   : > { %s65_s24 = ssub.s32 %s1174_s19, %s1478_s22  ;;  %p893_p6 = scmp.ge.s32.totalorder %s1182_s21, 18 }
   0xa   : > { %s1482_s23 = smov (%p31_p4, %s1480_s23), 0 }
   0xb   : > { %s66_s25 = ssub.s32 %s1178_s20, %s1482_s23  ;;  %183 = sbr.rel (%p893_p6) target bundleno = 55 (0x37), region = 16 }
   0xc   : > { %s67_s26 = sor.u32 %s66_s25, %s65_s24 }
   0xd   : > { %p68_p5 = scmp.eq.s32.totalorder %s67_s26, 0 }
   0xf   : > { %s1261_s28 = scalar_select %p68_p5, %s1162_s16, %s70_s27  }
  0x10   : > { %198 = sbr.rel (!%p79_p3) target bundleno = 55 (0x37), region = 24  ;;  %s200_s29 = sand.u32 (%p79_p3), 1, %s1162_s16  }
  0x11   : > { %s895_s30 = sshll.u32 (%p79_p3), %s1178_s20, 1  ;;  %s894_s5 = sshll.u32 (%p79_p3), %s200_s29, 8 }
  0x12   : > { %s896_s6 = sshll.u32 (%p79_p3), %s1174_s19, 7  ;;  %s1275_s12 = scalar_lea.vmem (%p79_p3), [#allocation3], %s894_s5 }
  0x13   : > { %s205_s7 = sadd.s32 (%p79_p3), %s896_s6, %s895_s30 }
  0x14   : > { %s897_s8 = sshll.u32 (%p79_p3), %s205_s7, 2 }
  0x15   : > { %s1270_s11 = scalar_lea.vmem %s1467_s1, %s897_s8 }
  0x16   : > { %v298_v0 = vld [vmem:[%s1270_s11] sm:$0xff]  ;;  %v300_v1 = vld [vmem:[%s1270_s11 + $0x10] sm:$0xff] }
  0x17   : > { %v302_v2 = vld [vmem:[%s1270_s11 + $0x20] sm:$0xff]  ;;  %299 = vst [vmem:[%s1275_s12] sm:$0xff] %v298_v0  ;;  %v304_v3 = vld [vmem:[%s1270_s11 + $0x30] sm:$0xff] }
  0x18   : > { %301 = vst [vmem:[%s1275_s12 + $0x8] sm:$0xff] %v300_v1  ;;  %v306_v4 = vld [vmem:[%s1270_s11 + $0x40] sm:$0xff]  ;;  %v308_v5 = vld [vmem:[%s1270_s11 + $0x50] sm:$0xff] }
  0x19   : > { %303 = vst [vmem:[%s1275_s12 + $0x10] sm:$0xff] %v302_v2  ;;  %v310_v6 = vld [vmem:[%s1270_s11 + $0x60] sm:$0xff]  ;;  %v312_v7 = vld [vmem:[%s1270_s11 + $0x70] sm:$0xff] }
  0x1a   : > { %305 = vst [vmem:[%s1275_s12 + $0x18] sm:$0xff] %v304_v3  ;;  %v314_v8 = vld [vmem:[%s1270_s11 + $0x80] sm:$0xff]  ;;  %v316_v9 = vld [vmem:[%s1270_s11 + $0x90] sm:$0xff] }
  0x1b   : > { %307 = vst [vmem:[%s1275_s12 + $0x20] sm:$0xff] %v306_v4  ;;  %v318_v10 = vld [vmem:[%s1270_s11 + $0xa0] sm:$0xff]  ;;  %v320_v11 = vld [vmem:[%s1270_s11 + $0xb0] sm:$0xff] }
  0x1c   : > { %309 = vst [vmem:[%s1275_s12 + $0x28] sm:$0xff] %v308_v5  ;;  %v322_v12 = vld [vmem:[%s1270_s11 + $0xc0] sm:$0xff]  ;;  %v324_v13 = vld [vmem:[%s1270_s11 + $0xd0] sm:$0xff] }
  0x1d   : > { %311 = vst [vmem:[%s1275_s12 + $0x30] sm:$0xff] %v310_v6  ;;  %v326_v14 = vld [vmem:[%s1270_s11 + $0xe0] sm:$0xff]  ;;  %v328_v15 = vld [vmem:[%s1270_s11 + $0xf0] sm:$0xff] }
  0x1e   : > { %313 = vst [vmem:[%s1275_s12 + $0x38] sm:$0xff] %v312_v7  ;;  %v330_v16 = vld [vmem:[%s1270_s11 + $0x100] sm:$0xff]  ;;  %v332_v17 = vld [vmem:[%s1270_s11 + $0x110] sm:$0xff] }
  0x1f   : > { %315 = vst [vmem:[%s1275_s12 + $0x40] sm:$0xff] %v314_v8  ;;  %v334_v18 = vld [vmem:[%s1270_s11 + $0x120] sm:$0xff]  ;;  %v336_v19 = vld [vmem:[%s1270_s11 + $0x130] sm:$0xff] }
  0x20   : > { %317 = vst [vmem:[%s1275_s12 + $0x48] sm:$0xff] %v316_v9  ;;  %v338_v20 = vld [vmem:[%s1270_s11 + $0x140] sm:$0xff]  ;;  %v340_v21 = vld [vmem:[%s1270_s11 + $0x150] sm:$0xff] }
  0x21   : > { %319 = vst [vmem:[%s1275_s12 + $0x50] sm:$0xff] %v318_v10  ;;  %v342_v22 = vld [vmem:[%s1270_s11 + $0x160] sm:$0xff]  ;;  %v344_v23 = vld [vmem:[%s1270_s11 + $0x170] sm:$0xff] }
  0x22   : > { %321 = vst [vmem:[%s1275_s12 + $0x58] sm:$0xff] %v320_v11  ;;  %v346_v24 = vld [vmem:[%s1270_s11 + $0x180] sm:$0xff]  ;;  %v348_v25 = vld [vmem:[%s1270_s11 + $0x190] sm:$0xff] }
  0x23   : > { %323 = vst [vmem:[%s1275_s12 + $0x60] sm:$0xff] %v322_v12  ;;  %v350_v26 = vld [vmem:[%s1270_s11 + $0x1a0] sm:$0xff]  ;;  %v352_v27 = vld [vmem:[%s1270_s11 + $0x1b0] sm:$0xff] }
  0x24   : > { %325 = vst [vmem:[%s1275_s12 + $0x68] sm:$0xff] %v324_v13  ;;  %v354_v28 = vld [vmem:[%s1270_s11 + $0x1c0] sm:$0xff]  ;;  %v356_v29 = vld [vmem:[%s1270_s11 + $0x1d0] sm:$0xff] }
  0x25   : > { %327 = vst [vmem:[%s1275_s12 + $0x70] sm:$0xff] %v326_v14  ;;  %v358_v30 = vld [vmem:[%s1270_s11 + $0x1e0] sm:$0xff]  ;;  %v360_v31 = vld [vmem:[%s1270_s11 + $0x1f0] sm:$0xff] }
  0x26   : > { %329 = vst [vmem:[%s1275_s12 + $0x78] sm:$0xff] %v328_v15 }
  0x27   : > { %331 = vst [vmem:[%s1275_s12 + $0x80] sm:$0xff] %v330_v16 }
  0x28   : > { %333 = vst [vmem:[%s1275_s12 + $0x88] sm:$0xff] %v332_v17 }
  0x29   : > { %335 = vst [vmem:[%s1275_s12 + $0x90] sm:$0xff] %v334_v18 }
  0x2a   : > { %337 = vst [vmem:[%s1275_s12 + $0x98] sm:$0xff] %v336_v19 }
  0x2b   : > { %339 = vst [vmem:[%s1275_s12 + $0xa0] sm:$0xff] %v338_v20 }
  0x2c   : > { %341 = vst [vmem:[%s1275_s12 + $0xa8] sm:$0xff] %v340_v21 }
  0x2d   : > { %343 = vst [vmem:[%s1275_s12 + $0xb0] sm:$0xff] %v342_v22 }
  0x2e   : > { %345 = vst [vmem:[%s1275_s12 + $0xb8] sm:$0xff] %v344_v23 }
  0x2f   : > { %347 = vst [vmem:[%s1275_s12 + $0xc0] sm:$0xff] %v346_v24 }
  0x30   : > { %349 = vst [vmem:[%s1275_s12 + $0xc8] sm:$0xff] %v348_v25 }
  0x31   : > { %351 = vst [vmem:[%s1275_s12 + $0xd0] sm:$0xff] %v350_v26 }
  0x32   : > { %353 = vst [vmem:[%s1275_s12 + $0xd8] sm:$0xff] %v352_v27 }
  0x33   : > { %355 = vst [vmem:[%s1275_s12 + $0xe0] sm:$0xff] %v354_v28 }
  0x34   : > { %357 = vst [vmem:[%s1275_s12 + $0xe8] sm:$0xff] %v356_v29 }
  0x35   : > { %359 = vst [vmem:[%s1275_s12 + $0xf0] sm:$0xff] %v358_v30 }
  0x36   : > { %361 = vst [vmem:[%s1275_s12 + $0xf8] sm:$0xff] %v360_v31 }
  0x37 PF: > { %p898_p7 = scmp.ge.s32.totalorder %s1182_s21, 1  ;;  %p382_p8 = scmp.lt.s32.totalorder %s1182_s21, 19 }
  0x39   : > { %p383_p9 = pnand %p898_p7, %p382_p8 }
  0x3a   : > { %s389_s13 = sand.u32 (!%p383_p9), 1, %s1158_s15   ;;  %p435_p10 = scmp.lt.s32.totalorder (!%p383_p9), %s1166_s17, 8 }
  0x3b   : > { %386 = sbr.rel (%p383_p9) target bundleno = 262 (0x106), region = 70  ;;  %s899_s14 = sshll.u32 (!%p383_p9), %s389_s13, 8 }
  0x3c   : > { %s902_s24 = sshll.u32 (!%p383_p9), %s1170_s18, 1  ;;  %s1365_s13 = scalar_lea.vmem (!%p383_p9), [#allocation3], %s899_s14 }
  0x3d   : > { %p446_p11 = scmp.lt.s32.totalorder (!%p383_p9), %s902_s24, 3  ;;  %p906_p12 = scmp.ne.s32.totalorder (!%p383_p9), %s1166_s17, 0 }
  0x40   : > { %s436_s25 = scalar_select %p435_p10, %s1166_s17, 8 }
  0x41   : > { %s1484_s24 = smov (!%p446_p11, %s902_s24), 3  ;;  %468 = sbr.rel (%p906_p12) target bundleno = 73 (0x49), region = 78 }
  0x42   : > { %s1038_s26 = sshll.u32 %s436_s25, 3  ;;  %s448_s15 = scalar_lea.vmem %s1468_s2, %s1484_s24 }
  0x43   : > { %s1349_s30 = scalar_lea.vmem %s1466_s0, %s1038_s26  ;;  %s453_s18 = scalar_lea.vmem %s1469_s3, %s1484_s24 }
  0x44   : > { %s905_s9 = sshll.u32 %s1484_s24, 2 }
  0x45   : > { %s1363_s12 = scalar_lea.vmem %s1470_s4, %s905_s9 }
  0x46   : > { %v1184_v32 = vmov 0.0  }
  0x47   : > { %469 = vst [vmem:[#allocation2] sm:$0xff] %v1184_v32 }
  0x48   : > { %470 = vst [vmem:[#allocation2 + $0x8] sm:$0xff] %v1184_v32 }
  0x49 PF: > { %v965_v33 = vld [vmem:[%s1365_s13 + $0x70] sm:$0xf]  ;;  %v1054_v34 = vld [vmem:[%s1365_s13 + $0x74] sm:$0xf0]  ;;  %v1053_v38 = vld [vmem:[%s1365_s13 + $0x74] sm:$0xf] }
  0x4a   : > { %v1029_v35 = vld [vmem:[%s1365_s13 + $0xf0] sm:$0xf]  ;;  %v966_v36 = vor.u32 %v1054_v34, %v965_v33  ;;  %v1070_v37 = vld [vmem:[%s1365_s13 + $0xf4] sm:$0xf0]  ;;  %v967_v39 = vld [vmem:[%s1365_s13 + $0x78] sm:$0xf0] }
  0x4b   : > { %v1030_v40 = vor.u32 %v1070_v37, %v1029_v35  ;;  %v970_v41 = vor.u32 %v1053_v38, %v967_v39  ;;  %v1069_v42 = vld [vmem:[%s1365_s13 + $0xf4] sm:$0xf]  ;;  %v1031_v43 = vld [vmem:[%s1365_s13 + $0xf8] sm:$0xf0]  ;;  %v957_v44 = vld [vmem:[%s1365_s13 + $0x60] sm:$0xf] }
  0x4c   : > { %673 = vmatpush.bf16.msra.mxu0 %v966_v36  ;;  %v1034_v45 = vor.u32 %v1069_v42, %v1031_v43  ;;  %v1052_v46 = vld [vmem:[%s1365_s13 + $0x64] sm:$0xf0]  ;;  %v1021_v47 = vld [vmem:[%s1365_s13 + $0xe0] sm:$0xf]  ;;  %v1051_v51 = vld [vmem:[%s1365_s13 + $0x64] sm:$0xf] }
  0x4d   : > { %v1068_v48 = vld [vmem:[%s1365_s13 + $0xe4] sm:$0xf0]  ;;  %686 = vmatpush.bf16.msra.mxu1 %v1030_v40  ;;  %699 = vmatpush.bf16.msra.mxu2 %v970_v41  ;;  %v958_v49 = vor.u32 %v1052_v46, %v957_v44  ;;  %v959_v52 = vld [vmem:[%s1365_s13 + $0x68] sm:$0xf0]  ;;  %v1067_v53 = vld [vmem:[%s1365_s13 + $0xe4] sm:$0xf] }
  0x4e   : > { %v1022_v50 = vor.u32 %v1068_v48, %v1021_v47  ;;  %712 = vmatpush.bf16.msra.mxu3 %v1034_v45  ;;  %v962_v54 = vor.u32 %v1051_v51, %v959_v52  ;;  %v1023_v55 = vld [vmem:[%s1365_s13 + $0xe8] sm:$0xf0]  ;;  %v949_v56 = vld [vmem:[%s1365_s13 + $0x50] sm:$0xf]  ;;  %v1050_v57 = vld [vmem:[%s1365_s13 + $0x54] sm:$0xf0] }
  0x4f   : > { %v1026_v58 = vor.u32 %v1067_v53, %v1023_v55  ;;  %v1013_v59 = vld [vmem:[%s1365_s13 + $0xd0] sm:$0xf]  ;;  %v1066_v60 = vld [vmem:[%s1365_s13 + $0xd4] sm:$0xf0]  ;;  %v1049_v61 = vld [vmem:[%s1365_s13 + $0x54] sm:$0xf]  ;;  %v950_v62 = vor.u32 %v1050_v57, %v949_v56 }
  0x50   : > { %674 = vmatpush.bf16.msra.mxu0 %v958_v49  ;;  %v951_v63 = vld [vmem:[%s1365_s13 + $0x58] sm:$0xf0]  ;;  %v1065_v0 = vld [vmem:[%s1365_s13 + $0xd4] sm:$0xf]  ;;  %v1014_v2 = vor.u32 %v1066_v60, %v1013_v59  ;;  %v941_v4 = vld [vmem:[%s1365_s13 + $0x40] sm:$0xf] }
  0x51   : > { %v1015_v1 = vld [vmem:[%s1365_s13 + $0xd8] sm:$0xf0]  ;;  %687 = vmatpush.bf16.msra.mxu1 %v1022_v50  ;;  %700 = vmatpush.bf16.msra.mxu2 %v962_v54  ;;  %v954_v3 = vor.u32 %v1049_v61, %v951_v63  ;;  %v1048_v5 = vld [vmem:[%s1365_s13 + $0x44] sm:$0xf0]  ;;  %v1005_v6 = vld [vmem:[%s1365_s13 + $0xc0] sm:$0xf] }
  0x52   : > { %713 = vmatpush.bf16.msra.mxu3 %v1026_v58  ;;  %v1018_v7 = vor.u32 %v1065_v0, %v1015_v1  ;;  %v1064_v8 = vld [vmem:[%s1365_s13 + $0xc4] sm:$0xf0]  ;;  %v1047_v9 = vld [vmem:[%s1365_s13 + $0x44] sm:$0xf]  ;;  %v943_v10 = vld [vmem:[%s1365_s13 + $0x48] sm:$0xf0]  ;;  %v942_v13 = vor.u32 %v1048_v5, %v941_v4 }
  0x53   : > { %v1063_v11 = vld [vmem:[%s1365_s13 + $0xc4] sm:$0xf]  ;;  %v1007_v12 = vld [vmem:[%s1365_s13 + $0xc8] sm:$0xf0]  ;;  %v1006_v14 = vor.u32 %v1064_v8, %v1005_v6  ;;  %v946_v15 = vor.u32 %v1047_v9, %v943_v10  ;;  %v933_v16 = vld [vmem:[%s1365_s13 + $0x30] sm:$0xf] }
  0x54   : > { %675 = vmatpush.bf16.msra.mxu0 %v950_v62  ;;  %v1046_v17 = vld [vmem:[%s1365_s13 + $0x34] sm:$0xf0]  ;;  %v997_v18 = vld [vmem:[%s1365_s13 + $0xb0] sm:$0xf]  ;;  %v1010_v19 = vor.u32 %v1063_v11, %v1007_v12  ;;  %v1045_v21 = vld [vmem:[%s1365_s13 + $0x34] sm:$0xf] }
  0x55   : > { %688 = vmatpush.bf16.msra.mxu1 %v1014_v2  ;;  %701 = vmatpush.bf16.msra.mxu2 %v954_v3  ;;  %v1062_v20 = vld [vmem:[%s1365_s13 + $0xb4] sm:$0xf0]  ;;  %v935_v22 = vld [vmem:[%s1365_s13 + $0x38] sm:$0xf0]  ;;  %v1061_v23 = vld [vmem:[%s1365_s13 + $0xb4] sm:$0xf]  ;;  %v934_v25 = vor.u32 %v1046_v17, %v933_v16 }
  0x56   : > { %714 = vmatpush.bf16.msra.mxu3 %v1018_v7  ;;  %v999_v24 = vld [vmem:[%s1365_s13 + $0xb8] sm:$0xf0]  ;;  %v998_v26 = vor.u32 %v1062_v20, %v997_v18  ;;  %v938_v27 = vor.u32 %v1045_v21, %v935_v22  ;;  %v925_v28 = vld [vmem:[%s1365_s13 + $0x20] sm:$0xf]  ;;  %v1044_v29 = vld [vmem:[%s1365_s13 + $0x24] sm:$0xf0] }
  0x57   : > { %v989_v30 = vld [vmem:[%s1365_s13 + $0xa0] sm:$0xf]  ;;  %v1002_v31 = vor.u32 %v1061_v23, %v999_v24  ;;  %v1060_v32 = vld [vmem:[%s1365_s13 + $0xa4] sm:$0xf0]  ;;  %v1043_v33 = vld [vmem:[%s1365_s13 + $0x24] sm:$0xf]  ;;  %v926_v37 = vor.u32 %v1044_v29, %v925_v28 }
  0x58   : > { %676 = vmatpush.bf16.msra.mxu0 %v942_v13  ;;  %v927_v34 = vld [vmem:[%s1365_s13 + $0x28] sm:$0xf0]  ;;  %v1059_v35 = vld [vmem:[%s1365_s13 + $0xa4] sm:$0xf]  ;;  %v990_v38 = vor.u32 %v1060_v32, %v989_v30  ;;  %v917_v40 = vld [vmem:[%s1365_s13 + $0x10] sm:$0xf] }
  0x59   : > { %689 = vmatpush.bf16.msra.mxu1 %v1006_v14  ;;  %702 = vmatpush.bf16.msra.mxu2 %v946_v15  ;;  %v991_v36 = vld [vmem:[%s1365_s13 + $0xa8] sm:$0xf0]  ;;  %v930_v39 = vor.u32 %v1043_v33, %v927_v34  ;;  %v1042_v41 = vld [vmem:[%s1365_s13 + $0x14] sm:$0xf0]  ;;  %v981_v42 = vld [vmem:[%s1365_s13 + $0x90] sm:$0xf] }
  0x5a   : > { %715 = vmatpush.bf16.msra.mxu3 %v1010_v19  ;;  %v994_v43 = vor.u32 %v1059_v35, %v991_v36  ;;  %v1058_v44 = vld [vmem:[%s1365_s13 + $0x94] sm:$0xf0]  ;;  %v1041_v45 = vld [vmem:[%s1365_s13 + $0x14] sm:$0xf]  ;;  %v919_v46 = vld [vmem:[%s1365_s13 + $0x18] sm:$0xf0]  ;;  %v918_v49 = vor.u32 %v1042_v41, %v917_v40 }
  0x5b   : > { %v1057_v47 = vld [vmem:[%s1365_s13 + $0x94] sm:$0xf]  ;;  %v983_v48 = vld [vmem:[%s1365_s13 + $0x98] sm:$0xf0]  ;;  %v982_v51 = vor.u32 %v1058_v44, %v981_v42  ;;  %v922_v52 = vor.u32 %v1041_v45, %v919_v46  ;;  %v909_v53 = vld [vmem:[%s1365_s13] sm:$0xf] }
  0x5c   : > { %677 = vmatpush.bf16.msra.mxu0 %v934_v25  ;;  %v473_v50 = vld [vmem:[%s1349_s30] sm:$0xff]  ;;  %v1040_v54 = vld [vmem:[%s1365_s13 + $0x4] sm:$0xf0]  ;;  %v973_v55 = vld [vmem:[%s1365_s13 + $0x80] sm:$0xf]  ;;  %v986_v56 = vor.u32 %v1057_v47, %v983_v48  ;;  %p1035_p13 = scmp.ne.s32.totalorder %s1166_s17, 8 }
  0x5d   : > { %690 = vmatpush.bf16.msra.mxu1 %v998_v26  ;;  %703 = vmatpush.bf16.msra.mxu2 %v938_v27  ;;  %v1056_v57 = vld [vmem:[%s1365_s13 + $0x84] sm:$0xf0]  ;;  %v1039_v58 = vld [vmem:[%s1365_s13 + $0x4] sm:$0xf]  ;;  %v911_v59 = vld [vmem:[%s1365_s13 + $0x8] sm:$0xf0]  ;;  %v507_v62 = vunpack.c.l.b16 %v473_v50  ;;  %v910_v63 = vor.u32 %v1040_v54, %v909_v53  ;;  %v508_v0 = vunpack.c.h.b16 %v473_v50 }
  0x5e   : > { %716 = vmatpush.bf16.msra.mxu3 %v1002_v31  ;;  %v1055_v60 = vld [vmem:[%s1365_s13 + $0x84] sm:$0xf]  ;;  %v975_v61 = vld [vmem:[%s1365_s13 + $0x88] sm:$0xf0]  ;;  %v974_v1 = vor.u32 %v1056_v57, %v973_v55  ;;  %v914_v2 = vor.u32 %v1039_v58, %v911_v59  ;;  %v471_v7 = vld [vmem:[#allocation2] sm:$0xff] }
  0x5f   : > { %v978_v3 = vor.u32 %v1055_v60, %v975_v61  ;;  %v509_v4 = vpack.c.b16 %v507_v62, %v507_v62  ;;  %v510_v5 = vpack.c.b16 %v508_v0, %v508_v0  ;;  %v472_v12 = vld [vmem:[#allocation2 + $0x8] sm:$0xff] }
  0x60   : > { %678 = vmatpush.bf16.msra.mxu0 %v926_v37 }
  0x61   : > { %691 = vmatpush.bf16.msra.mxu1 %v990_v38  ;;  %704 = vmatpush.bf16.msra.mxu2 %v930_v39 }
  0x62   : > { %717 = vmatpush.bf16.msra.mxu3 %v994_v43 }
  0x64   : > { %679 = vmatpush.bf16.msra.mxu0 %v918_v49 }
  0x65   : > { %692 = vmatpush.bf16.msra.mxu1 %v982_v51  ;;  %705 = vmatpush.bf16.msra.mxu2 %v922_v52 }
  0x66   : > { %718 = vmatpush.bf16.msra.mxu3 %v986_v56 }
  0x68   : > { %680 = vmatpush.bf16.msra.mxu0 %v910_v63 }
  0x69   : > { %693 = vmatpush.bf16.msra.mxu1 %v974_v1  ;;  %706 = vmatpush.bf16.msra.mxu2 %v914_v2 }
  0x6a   : > { %719 = vmatpush.bf16.msra.mxu3 %v978_v3 }
  0x6b   : > { %681 = vmatmul.bf16.vlgmr.msra.gmra.mxu0 %v509_v4 }
  0x6c   : > { %694 = vmatmul.bf16.vlgmr.msra.gmra.mxu1 %v510_v5  ;;  %707 = vmatmul.bf16.vlgmr.msra.gmra.mxu2 %v509_v4 }
  0x6d   : > { %720 = vmatmul.bf16.vlgmr.msra.gmra.mxu3 %v510_v5 }
  0xe8   : > { %v682_v6 = vpop.f32.mrf.mxu0 }
  0xe9   : > { %v695_v8 = vpop.f32.mrf.mxu1 }
  0xea   : > { %v696_v9 = vadd.f32 %v695_v8, %v682_v6 }
  0xec   : > { %v725_v10 = vadd.f32 %v696_v9, %v471_v7 }
  0xee   : > { %727 = vst [vmem:[#allocation2] sm:$0xff] %v725_v10 }
  0xef   : > { %v708_v11 = vpop.f32.mrf.mxu2 }
  0xf0   : > { %v721_v13 = vpop.f32.mrf.mxu3  ;;  %v684_v14 = vpop.f32.mrf.mxu0 }
  0xf1   : > { %v722_v15 = vadd.f32 %v721_v13, %v708_v11  ;;  %v697_v16 = vpop.f32.mrf.mxu1 }
  0xf3   : > { %v726_v17 = vadd.f32 %v722_v15, %v472_v12 }
  0xf4   : > { %732 = sbr.rel (%p1035_p13) target bundleno = 262 (0x106), region = 82 }
  0xf5   : > { %728 = vst [vmem:[#allocation2 + $0x8] sm:$0xff] %v726_v17 }
  0xf7   : > { %v710_v18 = vpop.f32.mrf.mxu2 }
  0xf8   : > { %v723_v19 = vpop.f32.mrf.mxu3 }
  0xf9   : > { %v733_v20 = vld [vmem:[#allocation2] sm:$0xff] }
  0xfa   : > { %v735_v22 = vld [vmem:[%s448_s15] sm:$0x3] }
  0xfb   : > { %v737_v23 = vperm.slane %v735_v22, 0  ;;  %v738_v24 = vperm.slane %v735_v22, 1  ;;  %v743_v25 = vld [vmem:[%s453_s18] sm:$0x3] }
  0xfc   : > { %v734_v21 = vld [vmem:[#allocation2 + $0x8] sm:$0xff]  ;;  %v745_v26 = vperm.slane %v743_v25, 0  ;;  %v746_v27 = vperm.slane %v743_v25, 1 }
  0xfd   : > { %v741_v28 = vmul.f32 %v737_v23, %v733_v20  ;;  %v742_v29 = vmul.f32 %v738_v24, %v734_v21 }
  0xff   : > { %v749_v30 = vadd.f32 %v745_v26, %v741_v28  ;;  %v750_v31 = vadd.f32 %v746_v27, %v742_v29 }
 0x101   : > { %v751_v32 = vmax.f32 %v749_v30, 0.0  ;;  %v752_v33 = vmax.f32 %v750_v31, 0.0 }
 0x103   : > { %v753_v34 = vpack.c.bf16 %v752_v33, %v751_v32 }
 0x105   : > { %754 = vst [vmem:[%s1363_s12] sm:$0xff] %v753_v34 }
 0x106 PF: > { %s14_s21 = sadd.s32 1, %s1182_s21   ;;  %s1471_s15 = smov %s1162_s16 }
 0x107   : > { %p11_p0 = scmp.ge.s32.totalorder %s14_s21, 20   ;;  %s1472_s16 = smov %s1261_s28 }
 0x108   : > { %s1473_s17 = smov %s1174_s19  ;;  %s1474_s18 = smov %s1178_s20 }
 0x109   : > { %s1475_s19 = smov %s1478_s22  ;;  %s1476_s20 = smov %s1482_s23 }
 0x10a   :  { %13 = sbr.rel (!%p11_p0) target bundleno = 4 (0x4), region = 126 }

// kernel: forward.43
= control target key start
LH: loop header
LB: loop body
LE: loop exit
PB: predicated region body
PF: predicated region fallthrough
CT: control target
= control target key end

     0   :  { %s1750_s15 = smov 0   ;;  %s1752_s16 = smov 0   ;;  %s2151_s0 = inlined_call_operand.vmem [shape: bf16[9,8,512], index: 0, kind: input, shape index: {}]   ;;  %s2152_s1 = inlined_call_operand.vmem [shape: bf16[9,512,512], index: 1, kind: input, shape index: {}]   ;;  %s2153_s2 = inlined_call_operand.vmem [shape: f32[1,512], index: 2, kind: input, shape index: {}]   ;;  %s2154_s3 = inlined_call_operand.vmem [shape: f32[1,512], index: 3, kind: input, shape index: {}]   ;;  %s2155_s4 = inlined_call_operand.vmem [shape: bf16[8,512], index: 4, kind: output, shape index: {}]  }
   0x1   :  { %s1754_s17 = smov 0   ;;  %s1756_s18 = smov 0  }
   0x2   :  { %s1758_s19 = smov 0   ;;  %s1760_s20 = smov 0  }
   0x3   :  { %s1762_s21 = smov 0  }
   0x4 LB: > { %s26_s22 = sadd.s32 1, %s1714_s19  ;;  %s29_s23 = sadd.s32 1, %s1718_s20  ;;  %s1722_s21 = sphi %s1762_s21, %s14_s21   ;;  %s1718_s20 = sphi %s1760_s20, %s2161_s20   ;;  %s1714_s19 = sphi %s1758_s19, %s2160_s19   ;;  %s1710_s18 = sphi %s1756_s18, %s2159_s18   ;;  %s1706_s17 = sphi %s1754_s17, %s2158_s17   ;;  %s1702_s16 = sphi %s1752_s16, %s2157_s16   ;;  %s1698_s15 = sphi %s1750_s15, %s2156_s15  }
   0x5   : > { %p27_p0 = scmp.ge.s32.totalorder %s26_s22, 9  ;;  %p77_p1 = scmp.ne.s32.totalorder %s1702_s16, %s1698_s15 }
   0x6   : > { %p78_p2 = scmp.eq.s32.totalorder %s1722_s21, 0  ;;  %s70_s27 = sadd.s32 1, %s1702_s16 }
   0x7   : > { %s2163_s22 = smov (%p27_p0, %s26_s22), 0  ;;  %s2165_s23 = smov (!%p27_p0, %s29_s23), %s1718_s20 }
   0x8   : > { %p79_p3 = por %p78_p2, %p77_p1  ;;  %p31_p4 = scmp.ge.s32.totalorder %s2165_s23, 2 }
   0x9   : > { %s65_s24 = ssub.s32 %s1714_s19, %s2163_s22  ;;  %p1273_p6 = scmp.ge.s32.totalorder %s1722_s21, 18 }
   0xa   : > { %s2167_s23 = smov (%p31_p4, %s2165_s23), 0 }
   0xb   : > { %s66_s25 = ssub.s32 %s1718_s20, %s2167_s23  ;;  %183 = sbr.rel (%p1273_p6) target bundleno = 87 (0x57), region = 16 }
   0xc   : > { %s67_s26 = sor.u32 %s66_s25, %s65_s24 }
   0xd   : > { %p68_p5 = scmp.eq.s32.totalorder %s67_s26, 0 }
   0xf   : > { %s1801_s28 = scalar_select %p68_p5, %s1702_s16, %s70_s27  }
  0x10   : > { %198 = sbr.rel (!%p79_p3) target bundleno = 87 (0x57), region = 24  ;;  %s200_s29 = sand.u32 (%p79_p3), 1, %s1702_s16  }
  0x11   : > { %s1275_s30 = sshll.u32 (%p79_p3), %s1718_s20, 1  ;;  %s1274_s5 = sshll.u32 (%p79_p3), %s200_s29, 9 }
  0x12   : > { %s1276_s6 = sshll.u32 (%p79_p3), %s1714_s19, 8  ;;  %s1815_s12 = scalar_lea.vmem (%p79_p3), [#allocation3], %s1274_s5 }
  0x13   : > { %s205_s7 = sadd.s32 (%p79_p3), %s1276_s6, %s1275_s30 }
  0x14   : > { %s1277_s8 = sshll.u32 (%p79_p3), %s205_s7, 2 }
  0x15   : > { %s1810_s11 = scalar_lea.vmem %s2152_s1, %s1277_s8 }
  0x16   : > { %v362_v0 = vld [vmem:[%s1810_s11] sm:$0xff]  ;;  %v364_v1 = vld [vmem:[%s1810_s11 + $0x10] sm:$0xff] }
  0x17   : > { %v366_v2 = vld [vmem:[%s1810_s11 + $0x20] sm:$0xff]  ;;  %363 = vst [vmem:[%s1815_s12] sm:$0xff] %v362_v0  ;;  %v368_v3 = vld [vmem:[%s1810_s11 + $0x30] sm:$0xff] }
  0x18   : > { %365 = vst [vmem:[%s1815_s12 + $0x8] sm:$0xff] %v364_v1  ;;  %v370_v4 = vld [vmem:[%s1810_s11 + $0x40] sm:$0xff]  ;;  %v372_v5 = vld [vmem:[%s1810_s11 + $0x50] sm:$0xff] }
  0x19   : > { %367 = vst [vmem:[%s1815_s12 + $0x10] sm:$0xff] %v366_v2  ;;  %v374_v6 = vld [vmem:[%s1810_s11 + $0x60] sm:$0xff]  ;;  %v376_v7 = vld [vmem:[%s1810_s11 + $0x70] sm:$0xff] }
  0x1a   : > { %369 = vst [vmem:[%s1815_s12 + $0x18] sm:$0xff] %v368_v3  ;;  %v378_v8 = vld [vmem:[%s1810_s11 + $0x80] sm:$0xff]  ;;  %v380_v9 = vld [vmem:[%s1810_s11 + $0x90] sm:$0xff] }
  0x1b   : > { %371 = vst [vmem:[%s1815_s12 + $0x20] sm:$0xff] %v370_v4  ;;  %v382_v10 = vld [vmem:[%s1810_s11 + $0xa0] sm:$0xff]  ;;  %v384_v11 = vld [vmem:[%s1810_s11 + $0xb0] sm:$0xff] }
  0x1c   : > { %373 = vst [vmem:[%s1815_s12 + $0x28] sm:$0xff] %v372_v5  ;;  %v386_v12 = vld [vmem:[%s1810_s11 + $0xc0] sm:$0xff]  ;;  %v388_v13 = vld [vmem:[%s1810_s11 + $0xd0] sm:$0xff] }
  0x1d   : > { %375 = vst [vmem:[%s1815_s12 + $0x30] sm:$0xff] %v374_v6  ;;  %v390_v14 = vld [vmem:[%s1810_s11 + $0xe0] sm:$0xff]  ;;  %v392_v15 = vld [vmem:[%s1810_s11 + $0xf0] sm:$0xff] }
  0x1e   : > { %377 = vst [vmem:[%s1815_s12 + $0x38] sm:$0xff] %v376_v7  ;;  %v394_v16 = vld [vmem:[%s1810_s11 + $0x100] sm:$0xff]  ;;  %v396_v17 = vld [vmem:[%s1810_s11 + $0x110] sm:$0xff] }
  0x1f   : > { %379 = vst [vmem:[%s1815_s12 + $0x40] sm:$0xff] %v378_v8  ;;  %v398_v18 = vld [vmem:[%s1810_s11 + $0x120] sm:$0xff]  ;;  %v400_v19 = vld [vmem:[%s1810_s11 + $0x130] sm:$0xff] }
  0x20   : > { %381 = vst [vmem:[%s1815_s12 + $0x48] sm:$0xff] %v380_v9  ;;  %v402_v20 = vld [vmem:[%s1810_s11 + $0x140] sm:$0xff]  ;;  %v404_v21 = vld [vmem:[%s1810_s11 + $0x150] sm:$0xff] }
  0x21   : > { %383 = vst [vmem:[%s1815_s12 + $0x50] sm:$0xff] %v382_v10  ;;  %v406_v22 = vld [vmem:[%s1810_s11 + $0x160] sm:$0xff]  ;;  %v408_v23 = vld [vmem:[%s1810_s11 + $0x170] sm:$0xff] }
  0x22   : > { %385 = vst [vmem:[%s1815_s12 + $0x58] sm:$0xff] %v384_v11  ;;  %v410_v24 = vld [vmem:[%s1810_s11 + $0x180] sm:$0xff]  ;;  %v412_v25 = vld [vmem:[%s1810_s11 + $0x190] sm:$0xff] }
  0x23   : > { %387 = vst [vmem:[%s1815_s12 + $0x60] sm:$0xff] %v386_v12  ;;  %v414_v26 = vld [vmem:[%s1810_s11 + $0x1a0] sm:$0xff]  ;;  %v416_v27 = vld [vmem:[%s1810_s11 + $0x1b0] sm:$0xff] }
  0x24   : > { %389 = vst [vmem:[%s1815_s12 + $0x68] sm:$0xff] %v388_v13  ;;  %v418_v28 = vld [vmem:[%s1810_s11 + $0x1c0] sm:$0xff]  ;;  %v420_v29 = vld [vmem:[%s1810_s11 + $0x1d0] sm:$0xff] }
  0x25   : > { %391 = vst [vmem:[%s1815_s12 + $0x70] sm:$0xff] %v390_v14  ;;  %v422_v30 = vld [vmem:[%s1810_s11 + $0x1e0] sm:$0xff]  ;;  %v424_v31 = vld [vmem:[%s1810_s11 + $0x1f0] sm:$0xff] }
  0x26   : > { %393 = vst [vmem:[%s1815_s12 + $0x78] sm:$0xff] %v392_v15  ;;  %v426_v32 = vld [vmem:[%s1810_s11 + $0x200] sm:$0xff]  ;;  %v428_v33 = vld [vmem:[%s1810_s11 + $0x210] sm:$0xff] }
  0x27   : > { %395 = vst [vmem:[%s1815_s12 + $0x80] sm:$0xff] %v394_v16  ;;  %v430_v34 = vld [vmem:[%s1810_s11 + $0x220] sm:$0xff]  ;;  %v432_v35 = vld [vmem:[%s1810_s11 + $0x230] sm:$0xff] }
  0x28   : > { %397 = vst [vmem:[%s1815_s12 + $0x88] sm:$0xff] %v396_v17  ;;  %v434_v36 = vld [vmem:[%s1810_s11 + $0x240] sm:$0xff]  ;;  %v436_v37 = vld [vmem:[%s1810_s11 + $0x250] sm:$0xff] }
  0x29   : > { %399 = vst [vmem:[%s1815_s12 + $0x90] sm:$0xff] %v398_v18  ;;  %v438_v38 = vld [vmem:[%s1810_s11 + $0x260] sm:$0xff]  ;;  %v440_v39 = vld [vmem:[%s1810_s11 + $0x270] sm:$0xff] }
  0x2a   : > { %401 = vst [vmem:[%s1815_s12 + $0x98] sm:$0xff] %v400_v19  ;;  %v442_v40 = vld [vmem:[%s1810_s11 + $0x280] sm:$0xff]  ;;  %v444_v41 = vld [vmem:[%s1810_s11 + $0x290] sm:$0xff] }
  0x2b   : > { %403 = vst [vmem:[%s1815_s12 + $0xa0] sm:$0xff] %v402_v20  ;;  %v446_v42 = vld [vmem:[%s1810_s11 + $0x2a0] sm:$0xff]  ;;  %v448_v43 = vld [vmem:[%s1810_s11 + $0x2b0] sm:$0xff] }
  0x2c   : > { %405 = vst [vmem:[%s1815_s12 + $0xa8] sm:$0xff] %v404_v21  ;;  %v450_v44 = vld [vmem:[%s1810_s11 + $0x2c0] sm:$0xff]  ;;  %v452_v45 = vld [vmem:[%s1810_s11 + $0x2d0] sm:$0xff] }
  0x2d   : > { %407 = vst [vmem:[%s1815_s12 + $0xb0] sm:$0xff] %v406_v22  ;;  %v454_v46 = vld [vmem:[%s1810_s11 + $0x2e0] sm:$0xff]  ;;  %v456_v47 = vld [vmem:[%s1810_s11 + $0x2f0] sm:$0xff] }
  0x2e   : > { %409 = vst [vmem:[%s1815_s12 + $0xb8] sm:$0xff] %v408_v23  ;;  %v458_v48 = vld [vmem:[%s1810_s11 + $0x300] sm:$0xff]  ;;  %v460_v49 = vld [vmem:[%s1810_s11 + $0x310] sm:$0xff] }
  0x2f   : > { %411 = vst [vmem:[%s1815_s12 + $0xc0] sm:$0xff] %v410_v24  ;;  %v462_v50 = vld [vmem:[%s1810_s11 + $0x320] sm:$0xff]  ;;  %v464_v51 = vld [vmem:[%s1810_s11 + $0x330] sm:$0xff] }
  0x30   : > { %413 = vst [vmem:[%s1815_s12 + $0xc8] sm:$0xff] %v412_v25  ;;  %v466_v52 = vld [vmem:[%s1810_s11 + $0x340] sm:$0xff]  ;;  %v468_v53 = vld [vmem:[%s1810_s11 + $0x350] sm:$0xff] }
  0x31   : > { %415 = vst [vmem:[%s1815_s12 + $0xd0] sm:$0xff] %v414_v26  ;;  %v470_v54 = vld [vmem:[%s1810_s11 + $0x360] sm:$0xff]  ;;  %v472_v55 = vld [vmem:[%s1810_s11 + $0x370] sm:$0xff] }
  0x32   : > { %417 = vst [vmem:[%s1815_s12 + $0xd8] sm:$0xff] %v416_v27  ;;  %v474_v56 = vld [vmem:[%s1810_s11 + $0x380] sm:$0xff]  ;;  %v476_v57 = vld [vmem:[%s1810_s11 + $0x390] sm:$0xff] }
  0x33   : > { %419 = vst [vmem:[%s1815_s12 + $0xe0] sm:$0xff] %v418_v28  ;;  %v478_v58 = vld [vmem:[%s1810_s11 + $0x3a0] sm:$0xff]  ;;  %v480_v59 = vld [vmem:[%s1810_s11 + $0x3b0] sm:$0xff] }
  0x34   : > { %421 = vst [vmem:[%s1815_s12 + $0xe8] sm:$0xff] %v420_v29  ;;  %v482_v60 = vld [vmem:[%s1810_s11 + $0x3c0] sm:$0xff]  ;;  %v484_v61 = vld [vmem:[%s1810_s11 + $0x3d0] sm:$0xff] }
  0x35   : > { %423 = vst [vmem:[%s1815_s12 + $0xf0] sm:$0xff] %v422_v30  ;;  %v486_v62 = vld [vmem:[%s1810_s11 + $0x3e0] sm:$0xff]  ;;  %v488_v63 = vld [vmem:[%s1810_s11 + $0x3f0] sm:$0xff] }
  0x36   : > { %425 = vst [vmem:[%s1815_s12 + $0xf8] sm:$0xff] %v424_v31 }
  0x37   : > { %427 = vst [vmem:[%s1815_s12 + $0x100] sm:$0xff] %v426_v32 }
  0x38   : > { %429 = vst [vmem:[%s1815_s12 + $0x108] sm:$0xff] %v428_v33 }
  0x39   : > { %431 = vst [vmem:[%s1815_s12 + $0x110] sm:$0xff] %v430_v34 }
  0x3a   : > { %433 = vst [vmem:[%s1815_s12 + $0x118] sm:$0xff] %v432_v35 }
  0x3b   : > { %435 = vst [vmem:[%s1815_s12 + $0x120] sm:$0xff] %v434_v36 }
  0x3c   : > { %437 = vst [vmem:[%s1815_s12 + $0x128] sm:$0xff] %v436_v37 }
  0x3d   : > { %439 = vst [vmem:[%s1815_s12 + $0x130] sm:$0xff] %v438_v38 }
  0x3e   : > { %441 = vst [vmem:[%s1815_s12 + $0x138] sm:$0xff] %v440_v39 }
  0x3f   : > { %443 = vst [vmem:[%s1815_s12 + $0x140] sm:$0xff] %v442_v40 }
  0x40   : > { %445 = vst [vmem:[%s1815_s12 + $0x148] sm:$0xff] %v444_v41 }
  0x41   : > { %447 = vst [vmem:[%s1815_s12 + $0x150] sm:$0xff] %v446_v42 }
  0x42   : > { %449 = vst [vmem:[%s1815_s12 + $0x158] sm:$0xff] %v448_v43 }
  0x43   : > { %451 = vst [vmem:[%s1815_s12 + $0x160] sm:$0xff] %v450_v44 }
  0x44   : > { %453 = vst [vmem:[%s1815_s12 + $0x168] sm:$0xff] %v452_v45 }
  0x45   : > { %455 = vst [vmem:[%s1815_s12 + $0x170] sm:$0xff] %v454_v46 }
  0x46   : > { %457 = vst [vmem:[%s1815_s12 + $0x178] sm:$0xff] %v456_v47 }
  0x47   : > { %459 = vst [vmem:[%s1815_s12 + $0x180] sm:$0xff] %v458_v48 }
  0x48   : > { %461 = vst [vmem:[%s1815_s12 + $0x188] sm:$0xff] %v460_v49 }
  0x49   : > { %463 = vst [vmem:[%s1815_s12 + $0x190] sm:$0xff] %v462_v50 }
  0x4a   : > { %465 = vst [vmem:[%s1815_s12 + $0x198] sm:$0xff] %v464_v51 }
  0x4b   : > { %467 = vst [vmem:[%s1815_s12 + $0x1a0] sm:$0xff] %v466_v52 }
  0x4c   : > { %469 = vst [vmem:[%s1815_s12 + $0x1a8] sm:$0xff] %v468_v53 }
  0x4d   : > { %471 = vst [vmem:[%s1815_s12 + $0x1b0] sm:$0xff] %v470_v54 }
  0x4e   : > { %473 = vst [vmem:[%s1815_s12 + $0x1b8] sm:$0xff] %v472_v55 }
  0x4f   : > { %475 = vst [vmem:[%s1815_s12 + $0x1c0] sm:$0xff] %v474_v56 }
  0x50   : > { %477 = vst [vmem:[%s1815_s12 + $0x1c8] sm:$0xff] %v476_v57 }
  0x51   : > { %479 = vst [vmem:[%s1815_s12 + $0x1d0] sm:$0xff] %v478_v58 }
  0x52   : > { %481 = vst [vmem:[%s1815_s12 + $0x1d8] sm:$0xff] %v480_v59 }
  0x53   : > { %483 = vst [vmem:[%s1815_s12 + $0x1e0] sm:$0xff] %v482_v60 }
  0x54   : > { %485 = vst [vmem:[%s1815_s12 + $0x1e8] sm:$0xff] %v484_v61 }
  0x55   : > { %487 = vst [vmem:[%s1815_s12 + $0x1f0] sm:$0xff] %v486_v62 }
  0x56   : > { %489 = vst [vmem:[%s1815_s12 + $0x1f8] sm:$0xff] %v488_v63 }
  0x57 PF: > { %p1278_p7 = scmp.ge.s32.totalorder %s1722_s21, 1  ;;  %p510_p8 = scmp.lt.s32.totalorder %s1722_s21, 19 }
  0x59   : > { %p511_p9 = pnand %p1278_p7, %p510_p8 }
  0x5a   : > { %s517_s13 = sand.u32 (!%p511_p9), 1, %s1698_s15   ;;  %p563_p10 = scmp.lt.s32.totalorder (!%p511_p9), %s1706_s17, 8 }
  0x5b   : > { %514 = sbr.rel (%p511_p9) target bundleno = 328 (0x148), region = 70  ;;  %s1279_s14 = sshll.u32 (!%p511_p9), %s517_s13, 9 }
  0x5c   : > { %s1282_s24 = sshll.u32 (!%p511_p9), %s1710_s18, 1  ;;  %s1969_s13 = scalar_lea.vmem (!%p511_p9), [#allocation3], %s1279_s14 }
  0x5d   : > { %p574_p11 = scmp.lt.s32.totalorder (!%p511_p9), %s1282_s24, 3  ;;  %p1286_p12 = scmp.ne.s32.totalorder (!%p511_p9), %s1706_s17, 0 }
  0x60   : > { %s564_s25 = scalar_select %p563_p10, %s1706_s17, 8 }
  0x61   : > { %s2169_s24 = smov (!%p574_p11, %s1282_s24), 3  ;;  %596 = sbr.rel (%p1286_p12) target bundleno = 105 (0x69), region = 78 }
  0x62   : > { %s1546_s26 = sshll.u32 %s564_s25, 4  ;;  %s576_s15 = scalar_lea.vmem %s2153_s2, %s2169_s24 }
  0x63   : > { %s1953_s30 = scalar_lea.vmem %s2151_s0, %s1546_s26  ;;  %s581_s18 = scalar_lea.vmem %s2154_s3, %s2169_s24 }
  0x64   : > { %s1285_s9 = sshll.u32 %s2169_s24, 2 }
  0x65   : > { %s1967_s12 = scalar_lea.vmem %s2155_s4, %s1285_s9 }
  0x66   : > { %v1724_v0 = vmov 0.0  }
  0x67   : > { %597 = vst [vmem:[#allocation2] sm:$0xff] %v1724_v0 }
  0x68   : > { %598 = vst [vmem:[#allocation2 + $0x8] sm:$0xff] %v1724_v0 }
  0x69 PF: > { %v1345_v1 = vld [vmem:[%s1969_s13 + $0x70] sm:$0xf]  ;;  %v1562_v2 = vld [vmem:[%s1969_s13 + $0x74] sm:$0xf0]  ;;  %v1337_v12 = vld [vmem:[%s1969_s13 + $0x60] sm:$0xf] }
  0x6a   : > { %v1409_v3 = vld [vmem:[%s1969_s13 + $0xf0] sm:$0xf]  ;;  %v1346_v4 = vor.u32 %v1562_v2, %v1345_v1  ;;  %v1578_v5 = vld [vmem:[%s1969_s13 + $0xf4] sm:$0xf0]  ;;  %v1560_v14 = vld [vmem:[%s1969_s13 + $0x64] sm:$0xf0] }
  0x6b   : > { %v1473_v6 = vld [vmem:[%s1969_s13 + $0x170] sm:$0xf]  ;;  %v1594_v7 = vld [vmem:[%s1969_s13 + $0x174] sm:$0xf0]  ;;  %v1410_v8 = vor.u32 %v1578_v5, %v1409_v3  ;;  %v1401_v15 = vld [vmem:[%s1969_s13 + $0xe0] sm:$0xf]  ;;  %v1338_v17 = vor.u32 %v1560_v14, %v1337_v12 }
  0x6c   : > { %v1474_v9 = vor.u32 %v1594_v7, %v1473_v6  ;;  %v1537_v10 = vld [vmem:[%s1969_s13 + $0x1f0] sm:$0xf]  ;;  %v1610_v11 = vld [vmem:[%s1969_s13 + $0x1f4] sm:$0xf0]  ;;  %1001 = vmatpush.bf16.msra.mxu0 %v1346_v4  ;;  %v1576_v16 = vld [vmem:[%s1969_s13 + $0xe4] sm:$0xf0] }
  0x6d   : > { %v1538_v13 = vor.u32 %v1610_v11, %v1537_v10  ;;  %1014 = vmatpush.bf16.msra.mxu1 %v1410_v8  ;;  %v1402_v18 = vor.u32 %v1576_v16, %v1401_v15  ;;  %v1465_v19 = vld [vmem:[%s1969_s13 + $0x160] sm:$0xf]  ;;  %v1592_v20 = vld [vmem:[%s1969_s13 + $0x164] sm:$0xf0]  ;;  %v1329_v24 = vld [vmem:[%s1969_s13 + $0x50] sm:$0xf] }
  0x6e   : > { %1027 = vmatpush.bf16.msra.mxu2 %v1474_v9  ;;  %v1529_v21 = vld [vmem:[%s1969_s13 + $0x1e0] sm:$0xf]  ;;  %v1466_v22 = vor.u32 %v1592_v20, %v1465_v19  ;;  %v1608_v23 = vld [vmem:[%s1969_s13 + $0x1e4] sm:$0xf0]  ;;  %v1558_v25 = vld [vmem:[%s1969_s13 + $0x54] sm:$0xf0] }
  0x6f   : > { %1040 = vmatpush.bf16.msra.mxu3 %v1538_v13  ;;  %v1530_v26 = vor.u32 %v1608_v23, %v1529_v21  ;;  %v1393_v27 = vld [vmem:[%s1969_s13 + $0xd0] sm:$0xf]  ;;  %v1574_v28 = vld [vmem:[%s1969_s13 + $0xd4] sm:$0xf0]  ;;  %v1330_v30 = vor.u32 %v1558_v25, %v1329_v24  ;;  %v1321_v36 = vld [vmem:[%s1969_s13 + $0x40] sm:$0xf] }
  0x70   : > { %v1457_v29 = vld [vmem:[%s1969_s13 + $0x150] sm:$0xf]  ;;  %1002 = vmatpush.bf16.msra.mxu0 %v1338_v17  ;;  %v1590_v31 = vld [vmem:[%s1969_s13 + $0x154] sm:$0xf0]  ;;  %v1394_v34 = vor.u32 %v1574_v28, %v1393_v27  ;;  %v1556_v37 = vld [vmem:[%s1969_s13 + $0x44] sm:$0xf0] }
  0x71   : > { %v1521_v32 = vld [vmem:[%s1969_s13 + $0x1d0] sm:$0xf]  ;;  %v1606_v33 = vld [vmem:[%s1969_s13 + $0x1d4] sm:$0xf0]  ;;  %1015 = vmatpush.bf16.msra.mxu1 %v1402_v18  ;;  %v1458_v35 = vor.u32 %v1590_v31, %v1457_v29  ;;  %v1385_v38 = vld [vmem:[%s1969_s13 + $0xc0] sm:$0xf]  ;;  %v1322_v45 = vor.u32 %v1556_v37, %v1321_v36 }
  0x72   : > { %1028 = vmatpush.bf16.msra.mxu2 %v1466_v22  ;;  %v1522_v39 = vor.u32 %v1606_v33, %v1521_v32  ;;  %v1572_v40 = vld [vmem:[%s1969_s13 + $0xc4] sm:$0xf0]  ;;  %v1449_v41 = vld [vmem:[%s1969_s13 + $0x140] sm:$0xf]  ;;  %v1313_v48 = vld [vmem:[%s1969_s13 + $0x30] sm:$0xf] }
  0x73   : > { %1041 = vmatpush.bf16.msra.mxu3 %v1530_v26  ;;  %v1588_v42 = vld [vmem:[%s1969_s13 + $0x144] sm:$0xf0]  ;;  %v1513_v43 = vld [vmem:[%s1969_s13 + $0x1c0] sm:$0xf]  ;;  %v1386_v46 = vor.u32 %v1572_v40, %v1385_v38  ;;  %v1554_v49 = vld [vmem:[%s1969_s13 + $0x34] sm:$0xf0] }
  0x74   : > { %v1604_v44 = vld [vmem:[%s1969_s13 + $0x1c4] sm:$0xf0]  ;;  %1003 = vmatpush.bf16.msra.mxu0 %v1330_v30  ;;  %v1450_v47 = vor.u32 %v1588_v42, %v1449_v41  ;;  %v1377_v50 = vld [vmem:[%s1969_s13 + $0xb0] sm:$0xf]  ;;  %v1570_v52 = vld [vmem:[%s1969_s13 + $0xb4] sm:$0xf0]  ;;  %v1314_v57 = vor.u32 %v1554_v49, %v1313_v48 }
  0x75   : > { %1016 = vmatpush.bf16.msra.mxu1 %v1394_v34  ;;  %v1514_v51 = vor.u32 %v1604_v44, %v1513_v43  ;;  %v1441_v53 = vld [vmem:[%s1969_s13 + $0x130] sm:$0xf]  ;;  %v1586_v54 = vld [vmem:[%s1969_s13 + $0x134] sm:$0xf0]  ;;  %v1378_v58 = vor.u32 %v1570_v52, %v1377_v50  ;;  %v1305_v60 = vld [vmem:[%s1969_s13 + $0x20] sm:$0xf] }
  0x76   : > { %1029 = vmatpush.bf16.msra.mxu2 %v1458_v35  ;;  %v1505_v55 = vld [vmem:[%s1969_s13 + $0x1b0] sm:$0xf]  ;;  %v1602_v56 = vld [vmem:[%s1969_s13 + $0x1b4] sm:$0xf0]  ;;  %v1442_v59 = vor.u32 %v1586_v54, %v1441_v53  ;;  %v1552_v61 = vld [vmem:[%s1969_s13 + $0x24] sm:$0xf0] }
  0x77   : > { %1042 = vmatpush.bf16.msra.mxu3 %v1522_v39  ;;  %v1369_v62 = vld [vmem:[%s1969_s13 + $0xa0] sm:$0xf]  ;;  %v1506_v63 = vor.u32 %v1602_v56, %v1505_v55  ;;  %v1568_v0 = vld [vmem:[%s1969_s13 + $0xa4] sm:$0xf0]  ;;  %v1306_v5 = vor.u32 %v1552_v61, %v1305_v60  ;;  %v1297_v8 = vld [vmem:[%s1969_s13 + $0x10] sm:$0xf] }
  0x78   : > { %1004 = vmatpush.bf16.msra.mxu0 %v1322_v45  ;;  %v1433_v1 = vld [vmem:[%s1969_s13 + $0x120] sm:$0xf]  ;;  %v1584_v2 = vld [vmem:[%s1969_s13 + $0x124] sm:$0xf0]  ;;  %v1370_v6 = vor.u32 %v1568_v0, %v1369_v62  ;;  %v1550_v9 = vld [vmem:[%s1969_s13 + $0x14] sm:$0xf0] }
  0x79   : > { %1017 = vmatpush.bf16.msra.mxu1 %v1386_v46  ;;  %v1497_v3 = vld [vmem:[%s1969_s13 + $0x1a0] sm:$0xf]  ;;  %v1600_v4 = vld [vmem:[%s1969_s13 + $0x1a4] sm:$0xf0]  ;;  %v1434_v7 = vor.u32 %v1584_v2, %v1433_v1  ;;  %v1361_v10 = vld [vmem:[%s1969_s13 + $0x90] sm:$0xf]  ;;  %v1298_v17 = vor.u32 %v1550_v9, %v1297_v8 }
  0x7a   : > { %1030 = vmatpush.bf16.msra.mxu2 %v1450_v47  ;;  %v1498_v11 = vor.u32 %v1600_v4, %v1497_v3  ;;  %v1566_v12 = vld [vmem:[%s1969_s13 + $0x94] sm:$0xf0]  ;;  %v1425_v13 = vld [vmem:[%s1969_s13 + $0x110] sm:$0xf]  ;;  %v1289_v18 = vld [vmem:[%s1969_s13] sm:$0xf] }
  0x7b   : > { %1043 = vmatpush.bf16.msra.mxu3 %v1514_v51  ;;  %v1582_v14 = vld [vmem:[%s1969_s13 + $0x114] sm:$0xf0]  ;;  %v1489_v15 = vld [vmem:[%s1969_s13 + $0x190] sm:$0xf]  ;;  %v1548_v19 = vld [vmem:[%s1969_s13 + $0x4] sm:$0xf0]  ;;  %v1362_v21 = vor.u32 %v1566_v12, %v1361_v10 }
  0x7c   : > { %1005 = vmatpush.bf16.msra.mxu0 %v1314_v57  ;;  %v1598_v16 = vld [vmem:[%s1969_s13 + $0x194] sm:$0xf0]  ;;  %v1353_v20 = vld [vmem:[%s1969_s13 + $0x80] sm:$0xf]  ;;  %v1426_v22 = vor.u32 %v1582_v14, %v1425_v13  ;;  %v1564_v23 = vld [vmem:[%s1969_s13 + $0x84] sm:$0xf0]  ;;  %v1290_v33 = vor.u32 %v1548_v19, %v1289_v18 }
  0x7d   : > { %1018 = vmatpush.bf16.msra.mxu1 %v1378_v58  ;;  %v1417_v24 = vld [vmem:[%s1969_s13 + $0x100] sm:$0xf]  ;;  %v1580_v25 = vld [vmem:[%s1969_s13 + $0x104] sm:$0xf0]  ;;  %v1490_v26 = vor.u32 %v1598_v16, %v1489_v15  ;;  %v1561_v29 = vld [vmem:[%s1969_s13 + $0x74] sm:$0xf]  ;;  %v1354_v38 = vor.u32 %v1564_v23, %v1353_v20 }
  0x7e   : > { %1031 = vmatpush.bf16.msra.mxu2 %v1442_v59  ;;  %v1481_v27 = vld [vmem:[%s1969_s13 + $0x180] sm:$0xf]  ;;  %v1596_v28 = vld [vmem:[%s1969_s13 + $0x184] sm:$0xf0]  ;;  %v1347_v30 = vld [vmem:[%s1969_s13 + $0x78] sm:$0xf0]  ;;  %v1418_v39 = vor.u32 %v1580_v25, %v1417_v24 }
  0x7f   : > { %1044 = vmatpush.bf16.msra.mxu3 %v1506_v63  ;;  %v1577_v31 = vld [vmem:[%s1969_s13 + $0xf4] sm:$0xf]  ;;  %v602_v32 = vld [vmem:[%s1953_s30 + $0x8] sm:$0xff]  ;;  %v1482_v43 = vor.u32 %v1596_v28, %v1481_v27  ;;  %v1350_v44 = vor.u32 %v1561_v29, %v1347_v30  ;;  %v1559_v48 = vld [vmem:[%s1969_s13 + $0x64] sm:$0xf]  ;;  %p1543_p13 = scmp.ne.s32.totalorder %s1706_s17, 8 }
  0x80   : > { %1006 = vmatpush.bf16.msra.mxu0 %v1306_v5  ;;  %v1411_v34 = vld [vmem:[%s1969_s13 + $0xf8] sm:$0xf0]  ;;  %v1593_v35 = vld [vmem:[%s1969_s13 + $0x174] sm:$0xf]  ;;  %v671_v37 = vunpack.c.l.b16 %v602_v32  ;;  %v672_v42 = vunpack.c.h.b16 %v602_v32  ;;  %v1339_v49 = vld [vmem:[%s1969_s13 + $0x68] sm:$0xf0] }
  0x81   : > { %1019 = vmatpush.bf16.msra.mxu1 %v1370_v6  ;;  %v1475_v36 = vld [vmem:[%s1969_s13 + $0x178] sm:$0xf0]  ;;  %v1609_v40 = vld [vmem:[%s1969_s13 + $0x1f4] sm:$0xf]  ;;  %v1414_v46 = vor.u32 %v1577_v31, %v1411_v34  ;;  %v1575_v50 = vld [vmem:[%s1969_s13 + $0xe4] sm:$0xf]  ;;  %v1342_v62 = vor.u32 %v1559_v48, %v1339_v49 }
  0x82   : > { %1032 = vmatpush.bf16.msra.mxu2 %v1434_v7  ;;  %v1539_v41 = vld [vmem:[%s1969_s13 + $0x1f8] sm:$0xf0]  ;;  %v601_v45 = vld [vmem:[%s1953_s30] sm:$0xff]  ;;  %v1478_v47 = vor.u32 %v1593_v35, %v1475_v36  ;;  %v1403_v54 = vld [vmem:[%s1969_s13 + $0xe8] sm:$0xf0]  ;;  %v2052_v57 = vpack.c.b16 %v671_v37, %v671_v37  ;;  %v2056_v60 = vpack.c.b16 %v672_v42, %v672_v42 }
  0x83   : > { %1045 = vmatpush.bf16.msra.mxu3 %v1498_v11  ;;  %v669_v51 = vunpack.c.l.b16 %v601_v45  ;;  %v670_v52 = vunpack.c.h.b16 %v601_v45  ;;  %v1542_v53 = vor.u32 %v1609_v40, %v1539_v41  ;;  %v1591_v55 = vld [vmem:[%s1969_s13 + $0x164] sm:$0xf]  ;;  %v1467_v56 = vld [vmem:[%s1969_s13 + $0x168] sm:$0xf0]  ;;  %v1406_v0 = vor.u32 %v1575_v50, %v1403_v54  ;;  %v1557_v2 = vld [vmem:[%s1969_s13 + $0x54] sm:$0xf] }
  0x84   : > { %1007 = vmatpush.bf16.msra.mxu0 %v1298_v17  ;;  %v1607_v58 = vld [vmem:[%s1969_s13 + $0x1e4] sm:$0xf]  ;;  %v1531_v59 = vld [vmem:[%s1969_s13 + $0x1e8] sm:$0xf0]  ;;  %v1470_v1 = vor.u32 %v1591_v55, %v1467_v56  ;;  %v1331_v3 = vld [vmem:[%s1969_s13 + $0x58] sm:$0xf0] }
  0x85   : > { %1020 = vmatpush.bf16.msra.mxu1 %v1362_v21  ;;  %v2058_v61 = vpack.c.b16 %v669_v51, %v669_v51  ;;  %v2060_v63 = vpack.c.b16 %v670_v52, %v670_v52  ;;  %v1573_v4 = vld [vmem:[%s1969_s13 + $0xd4] sm:$0xf]  ;;  %v1534_v5 = vor.u32 %v1607_v58, %v1531_v59  ;;  %v1395_v6 = vld [vmem:[%s1969_s13 + $0xd8] sm:$0xf0]  ;;  %v1334_v11 = vor.u32 %v1557_v2, %v1331_v3  ;;  %v1555_v14 = vld [vmem:[%s1969_s13 + $0x44] sm:$0xf] }
  0x86   : > { %1033 = vmatpush.bf16.msra.mxu2 %v1426_v22  ;;  %v1589_v7 = vld [vmem:[%s1969_s13 + $0x154] sm:$0xf]  ;;  %v1459_v8 = vld [vmem:[%s1969_s13 + $0x158] sm:$0xf0]  ;;  %v1398_v12 = vor.u32 %v1573_v4, %v1395_v6  ;;  %v1323_v15 = vld [vmem:[%s1969_s13 + $0x48] sm:$0xf0] }
  0x87   : > { %1046 = vmatpush.bf16.msra.mxu3 %v1490_v26  ;;  %v1605_v9 = vld [vmem:[%s1969_s13 + $0x1d4] sm:$0xf]  ;;  %v1523_v10 = vld [vmem:[%s1969_s13 + $0x1d8] sm:$0xf0]  ;;  %v1462_v13 = vor.u32 %v1589_v7, %v1459_v8  ;;  %v1571_v16 = vld [vmem:[%s1969_s13 + $0xc4] sm:$0xf]  ;;  %v1326_v23 = vor.u32 %v1555_v14, %v1323_v15 }
  0x88   : > { %1008 = vmatpush.bf16.msra.mxu0 %v1290_v33  ;;  %v1526_v17 = vor.u32 %v1605_v9, %v1523_v10  ;;  %v1387_v18 = vld [vmem:[%s1969_s13 + $0xc8] sm:$0xf0]  ;;  %v1587_v19 = vld [vmem:[%s1969_s13 + $0x144] sm:$0xf]  ;;  %v1553_v26 = vld [vmem:[%s1969_s13 + $0x34] sm:$0xf] }
  0x89   : > { %1021 = vmatpush.bf16.msra.mxu1 %v1354_v38  ;;  %v1451_v20 = vld [vmem:[%s1969_s13 + $0x148] sm:$0xf0]  ;;  %v1603_v21 = vld [vmem:[%s1969_s13 + $0x1c4] sm:$0xf]  ;;  %v1390_v24 = vor.u32 %v1571_v16, %v1387_v18  ;;  %v1315_v27 = vld [vmem:[%s1969_s13 + $0x38] sm:$0xf0] }
  0x8a   : > { %1034 = vmatpush.bf16.msra.mxu2 %v1418_v39  ;;  %v1515_v22 = vld [vmem:[%s1969_s13 + $0x1c8] sm:$0xf0]  ;;  %v1454_v25 = vor.u32 %v1587_v19, %v1451_v20  ;;  %v1569_v28 = vld [vmem:[%s1969_s13 + $0xb4] sm:$0xf]  ;;  %v1379_v30 = vld [vmem:[%s1969_s13 + $0xb8] sm:$0xf0]  ;;  %v1318_v35 = vor.u32 %v1553_v26, %v1315_v27 }
  0x8b   : > { %1047 = vmatpush.bf16.msra.mxu3 %v1482_v43  ;;  %1009 = vmatmul.bf16.vlgmr.msra.gmra.mxu0 %v2058_v61  ;;  %v1518_v29 = vor.u32 %v1603_v21, %v1515_v22  ;;  %v1585_v31 = vld [vmem:[%s1969_s13 + $0x134] sm:$0xf]  ;;  %v1443_v32 = vld [vmem:[%s1969_s13 + $0x138] sm:$0xf0]  ;;  %v1382_v36 = vor.u32 %v1569_v28, %v1379_v30  ;;  %v1551_v38 = vld [vmem:[%s1969_s13 + $0x24] sm:$0xf] }
  0x8c   : > { %1053 = vmatpush.bf16.msrb.mxu0 %v1350_v44  ;;  %1022 = vmatmul.bf16.vlgmr.msra.gmra.mxu1 %v2060_v63  ;;  %v1601_v33 = vld [vmem:[%s1969_s13 + $0x1b4] sm:$0xf]  ;;  %v1507_v34 = vld [vmem:[%s1969_s13 + $0x1b8] sm:$0xf0]  ;;  %v1446_v37 = vor.u32 %v1585_v31, %v1443_v32  ;;  %v1307_v39 = vld [vmem:[%s1969_s13 + $0x28] sm:$0xf0] }
  0x8d   : > { %1066 = vmatpush.bf16.msrb.mxu1 %v1414_v46  ;;  %1035 = vmatmul.bf16.vlgmr.msra.gmra.mxu2 %v2052_v57  ;;  %v1567_v40 = vld [vmem:[%s1969_s13 + $0xa4] sm:$0xf]  ;;  %v1510_v41 = vor.u32 %v1601_v33, %v1507_v34  ;;  %v1371_v42 = vld [vmem:[%s1969_s13 + $0xa8] sm:$0xf0]  ;;  %v1549_v50 = vld [vmem:[%s1969_s13 + $0x14] sm:$0xf] }
  0x8e   : > { %1079 = vmatpush.bf16.msrb.mxu2 %v1478_v47  ;;  %1048 = vmatmul.bf16.vlgmr.msra.gmra.mxu3 %v2056_v60  ;;  %v1583_v43 = vld [vmem:[%s1969_s13 + $0x124] sm:$0xf]  ;;  %v1435_v44 = vld [vmem:[%s1969_s13 + $0x128] sm:$0xf0]  ;;  %v1310_v47 = vor.u32 %v1551_v38, %v1307_v39  ;;  %v1374_v48 = vor.u32 %v1567_v40, %v1371_v42  ;;  %v1299_v51 = vld [vmem:[%s1969_s13 + $0x18] sm:$0xf0] }
  0x8f   : > { %1092 = vmatpush.bf16.msrb.mxu3 %v1542_v53  ;;  %v1599_v45 = vld [vmem:[%s1969_s13 + $0x1a4] sm:$0xf]  ;;  %v1499_v46 = vld [vmem:[%s1969_s13 + $0x1a8] sm:$0xf0]  ;;  %v1438_v49 = vor.u32 %v1583_v43, %v1435_v44  ;;  %v1565_v52 = vld [vmem:[%s1969_s13 + $0x94] sm:$0xf] }
  0x90   : > { %1054 = vmatpush.bf16.msrb.mxu0 %v1342_v62  ;;  %v1502_v53 = vor.u32 %v1599_v45, %v1499_v46  ;;  %v1363_v54 = vld [vmem:[%s1969_s13 + $0x98] sm:$0xf0]  ;;  %v1581_v55 = vld [vmem:[%s1969_s13 + $0x114] sm:$0xf]  ;;  %v1302_v62 = vor.u32 %v1549_v50, %v1299_v51  ;;  %v1547_v2 = vld [vmem:[%s1969_s13 + $0x4] sm:$0xf] }
  0x91   : > { %1067 = vmatpush.bf16.msrb.mxu1 %v1406_v0  ;;  %v1427_v56 = vld [vmem:[%s1969_s13 + $0x118] sm:$0xf0]  ;;  %v1597_v58 = vld [vmem:[%s1969_s13 + $0x194] sm:$0xf]  ;;  %v1366_v0 = vor.u32 %v1565_v52, %v1363_v54  ;;  %v1291_v3 = vld [vmem:[%s1969_s13 + $0x8] sm:$0xf0] }
  0x92   : > { %1080 = vmatpush.bf16.msrb.mxu2 %v1470_v1  ;;  %v1491_v59 = vld [vmem:[%s1969_s13 + $0x198] sm:$0xf0]  ;;  %v1430_v1 = vor.u32 %v1581_v55, %v1427_v56  ;;  %v1563_v4 = vld [vmem:[%s1969_s13 + $0x84] sm:$0xf]  ;;  %v1355_v6 = vld [vmem:[%s1969_s13 + $0x88] sm:$0xf0] }
  0x93   : > { %1093 = vmatpush.bf16.msrb.mxu3 %v1534_v5  ;;  %v1494_v5 = vor.u32 %v1597_v58, %v1491_v59  ;;  %v1579_v7 = vld [vmem:[%s1969_s13 + $0x104] sm:$0xf]  ;;  %v1419_v8 = vld [vmem:[%s1969_s13 + $0x108] sm:$0xf0]  ;;  %v599_v21 = vld [vmem:[#allocation2] sm:$0xff] }
  0x94   : > { %1055 = vmatpush.bf16.msrb.mxu0 %v1334_v11  ;;  %v1595_v9 = vld [vmem:[%s1969_s13 + $0x184] sm:$0xf]  ;;  %v1483_v10 = vld [vmem:[%s1969_s13 + $0x188] sm:$0xf0]  ;;  %v1294_v11 = vor.u32 %v1547_v2, %v1291_v3  ;;  %v600_v31 = vld [vmem:[#allocation2 + $0x8] sm:$0xff] }
  0x95   : > { %1068 = vmatpush.bf16.msrb.mxu1 %v1398_v12  ;;  %v1358_v12 = vor.u32 %v1563_v4, %v1355_v6  ;;  %v1486_v14 = vor.u32 %v1595_v9, %v1483_v10 }
  0x96   : > { %1081 = vmatpush.bf16.msrb.mxu2 %v1462_v13  ;;  %v1422_v13 = vor.u32 %v1579_v7, %v1419_v8 }
  0x97   : > { %1094 = vmatpush.bf16.msrb.mxu3 %v1526_v17 }
  0x98   : > { %1056 = vmatpush.bf16.msrb.mxu0 %v1326_v23 }
  0x99   : > { %1069 = vmatpush.bf16.msrb.mxu1 %v1390_v24 }
  0x9a   : > { %1082 = vmatpush.bf16.msrb.mxu2 %v1454_v25 }
  0x9b   : > { %1095 = vmatpush.bf16.msrb.mxu3 %v1518_v29 }
  0x9c   : > { %1057 = vmatpush.bf16.msrb.mxu0 %v1318_v35 }
  0x9d   : > { %1070 = vmatpush.bf16.msrb.mxu1 %v1382_v36 }
  0x9e   : > { %1083 = vmatpush.bf16.msrb.mxu2 %v1446_v37 }
  0x9f   : > { %1096 = vmatpush.bf16.msrb.mxu3 %v1510_v41 }
  0xa0   : > { %1058 = vmatpush.bf16.msrb.mxu0 %v1310_v47 }
  0xa1   : > { %1071 = vmatpush.bf16.msrb.mxu1 %v1374_v48 }
  0xa2   : > { %1084 = vmatpush.bf16.msrb.mxu2 %v1438_v49 }
  0xa3   : > { %1097 = vmatpush.bf16.msrb.mxu3 %v1502_v53 }
  0xa4   : > { %1059 = vmatpush.bf16.msrb.mxu0 %v1302_v62 }
  0xa5   : > { %1072 = vmatpush.bf16.msrb.mxu1 %v1366_v0 }
  0xa6   : > { %1085 = vmatpush.bf16.msrb.mxu2 %v1430_v1 }
  0xa7   : > { %1098 = vmatpush.bf16.msrb.mxu3 %v1494_v5 }
  0xa8   : > { %1060 = vmatpush.bf16.msrb.mxu0 %v1294_v11 }
  0xa9   : > { %1073 = vmatpush.bf16.msrb.mxu1 %v1358_v12 }
  0xaa   : > { %1086 = vmatpush.bf16.msrb.mxu2 %v1422_v13 }
  0xab   : > { %1099 = vmatpush.bf16.msrb.mxu3 %v1486_v14  ;;  %1061 = vmatmul.bf16.vlgmr.msrb.gmra.mxu0 %v2058_v61 }
  0xac   : > { %1074 = vmatmul.bf16.vlgmr.msrb.gmra.mxu1 %v2060_v63 }
  0xad   : > { %1087 = vmatmul.bf16.vlgmr.msrb.gmra.mxu2 %v2052_v57 }
  0xae   : > { %1100 = vmatmul.bf16.vlgmr.msrb.gmra.mxu3 %v2056_v60 }
 0x108   : > { %v1010_v15 = vpop.f32.mrf.mxu0 }
 0x109   : > { %v1023_v16 = vpop.f32.mrf.mxu1 }
 0x10a   : > { %v1024_v17 = vadd.f32 %v1023_v16, %v1010_v15 }
 0x110   : > { %v1036_v18 = vpop.f32.mrf.mxu2  ;;  %v1012_v23 = vpop.f32.mrf.mxu0 }
 0x111   : > { %v1037_v19 = vadd.f32 %v1036_v18, %v1024_v17  ;;  %v1049_v20 = vpop.f32.mrf.mxu3  ;;  %v1025_v24 = vpop.f32.mrf.mxu1 }
 0x113   : > { %v1050_v22 = vadd.f32 %v1049_v20, %v1037_v19 }
 0x115   : > { %v1105_v25 = vadd.f32 %v1050_v22, %v599_v21 }
 0x117   : > { %1107 = vst [vmem:[#allocation2] sm:$0xff] %v1105_v25 }
 0x118   : > { %v1038_v26 = vpop.f32.mrf.mxu2 }
 0x119   : > { %v1051_v61 = vpop.f32.mrf.mxu3 }
 0x128   : > { %v1062_v27 = vpop.f32.mrf.mxu0 }
 0x129   : > { %v1075_v63 = vpop.f32.mrf.mxu1 }
 0x12a   : > { %v1076_v28 = vadd.f32 %v1075_v63, %v1062_v27 }
 0x130   : > { %v1088_v57 = vpop.f32.mrf.mxu2  ;;  %v1064_v30 = vpop.f32.mrf.mxu0 }
 0x131   : > { %v1089_v29 = vadd.f32 %v1088_v57, %v1076_v28  ;;  %v1101_v60 = vpop.f32.mrf.mxu3  ;;  %v1077_v32 = vpop.f32.mrf.mxu1 }
 0x133   : > { %v1102_v33 = vadd.f32 %v1101_v60, %v1089_v29 }
 0x135   : > { %v1106_v34 = vadd.f32 %v1102_v33, %v600_v31  ;;  %1112 = sbr.rel (%p1543_p13) target bundleno = 328 (0x148), region = 82 }
 0x137   : > { %1108 = vst [vmem:[#allocation2 + $0x8] sm:$0xff] %v1106_v34 }
 0x138   : > { %v1090_v35 = vpop.f32.mrf.mxu2 }
 0x139   : > { %v1103_v36 = vpop.f32.mrf.mxu3 }
 0x13a   : > { %v1113_v37 = vld [vmem:[#allocation2] sm:$0xff] }
 0x13b   : > { %v1115_v39 = vld [vmem:[%s576_s15] sm:$0x3] }
 0x13c   : > { %v1117_v40 = vperm.slane %v1115_v39, 0  ;;  %v1118_v41 = vperm.slane %v1115_v39, 1  ;;  %v1123_v42 = vld [vmem:[%s581_s18] sm:$0x3] }
 0x13d   : > { %v1125_v43 = vperm.slane %v1123_v42, 0  ;;  %v1126_v44 = vperm.slane %v1123_v42, 1 }
 0x13e   : > { %v1114_v38 = vld [vmem:[#allocation2 + $0x8] sm:$0xff]  ;;  %v1121_v45 = vmul.f32 %v1117_v40, %v1113_v37 }
 0x13f   : > { %v1122_v46 = vmul.f32 %v1118_v41, %v1114_v38 }
 0x140   : > { %v1129_v47 = vadd.f32 %v1125_v43, %v1121_v45 }
 0x141   : > { %v1130_v48 = vadd.f32 %v1126_v44, %v1122_v46 }
 0x142   : > { %v1131_v49 = vmax.f32 %v1129_v47, 0.0 }
 0x143   : > { %v1132_v50 = vmax.f32 %v1130_v48, 0.0 }
 0x145   : > { %v1133_v51 = vpack.c.bf16 %v1132_v50, %v1131_v49 }
 0x147   : > { %1134 = vst [vmem:[%s1967_s12] sm:$0xff] %v1133_v51 }
 0x148 PF: > { %s14_s21 = sadd.s32 1, %s1722_s21   ;;  %s2156_s15 = smov %s1702_s16 }
 0x149   : > { %p11_p0 = scmp.ge.s32.totalorder %s14_s21, 20   ;;  %s2157_s16 = smov %s1801_s28 }
 0x14a   : > { %s2158_s17 = smov %s1714_s19  ;;  %s2159_s18 = smov %s1718_s20 }
 0x14b   : > { %s2160_s19 = smov %s2163_s22  ;;  %s2161_s20 = smov %s2167_s23 }
 0x14c   :  { %13 = sbr.rel (!%p11_p0) target bundleno = 4 (0x4), region = 126 }

// kernel: forward.45
= control target key start
LH: loop header
LB: loop body
LE: loop exit
PB: predicated region body
PF: predicated region fallthrough
CT: control target
= control target key end

     0   :  { %s219_s6 = smov 0   ;;  %s230_s0 = inlined_call_operand.vmem [shape: bf16[2,1,512], index: 0, kind: input, shape index: {}]   ;;  %s231_s1 = inlined_call_operand.vmem [shape: f32[2,1,512], index: 1, kind: output, shape index: {}]  }
   0x1 LB: > { %s184_s7 = sadd.s32 4294967295, %s207_s6   ;;  %p188_p0 = scmp.ge.s32.totalorder %s207_s6, 1  ;;  %s207_s6 = sphi %s219_s6, %s11_s6  }
   0x2   : > { %p86_p1 = scmp.lt.s32.totalorder %s207_s6, 3 }
   0x4   : > { %p87_p2 = pnand %p188_p0, %p86_p1 }
   0x5   : > { %p104_p3 = scmp.lt.s32.totalorder (!%p87_p2), %s184_s7, 1 }
   0x6   : > { %90 = sbr.rel (%p87_p2) target bundleno = 22 (0x16), region = 24 }
   0xb   : > { %s233_s7 = smov (!%p104_p3, %s184_s7), 1  ;;  %v126_v1 = vlaneseq  ;;  %vm119_vm0 = vcmask 1040384   ;;  %vm121_vm1 = vcmask 1042434   ;;  %vm123_vm2 = vcmask 1041408  }
   0xc   : > { %s189_s8 = sshll.u32 %s233_s7, 2 }
   0xd   : > { %s107_s11 = scalar_lea.vmem %s230_s0, %s189_s8  ;;  %s111_s14 = scalar_lea.vmem %s231_s1, %s189_s8  ;;  %vm128_vm3 = vcmp.lt.s32.totalorder %v126_v1, 512 }
   0xe   : > { %v112_v0 = vld [vmem:[%s107_s11] sm:$0xf] }
   0xf   : > { %v113_v2 = vunpack.c.l.bf16 %v112_v0 }
  0x11   : > { %v116_v3 = vrot.slane %v113_v2, 1  ;;  %v117_v4 = vrot.slane %v113_v2, 2  ;;  %v118_v5 = vrot.slane %v113_v2, 3 }
  0x13   : > { %v120_v6 = vsel %vm119_vm0, %v113_v2, %v116_v3  ;;  %v122_v7 = vsel %vm121_vm1, %v117_v4, %v118_v5 }
  0x14   : > { %v124_v8 = vsel %vm123_vm2, %v120_v6, %v122_v7 }
  0x15   : > { %130 = vst.msk [vmem:[%s111_s14] sm:$0xf] %vm128_vm3, %v124_v8 }
  0x16 PF: > { %s11_s6 = sadd.s32 1, %s207_s6  }
  0x17   : > { %p8_p4 = scmp.ge.s32.totalorder %s11_s6, 4  }
  0x19   :  { %10 = sbr.rel (!%p8_p4) target bundleno = 1 (0x1), region = 54 }

// kernel: forward.41
= control target key start
LH: loop header
LB: loop body
LE: loop exit
PB: predicated region body
PF: predicated region fallthrough
CT: control target
= control target key end

     0   :  { %s1169_s15 = smov 0   ;;  %s1171_s16 = smov 0   ;;  %s1377_s0 = inlined_call_operand.vmem [shape: bf16[1,8,256], index: 0, kind: input, shape index: {}]   ;;  %s1378_s1 = inlined_call_operand.vmem [shape: bf16[1,256,512], index: 1, kind: input, shape index: {}]   ;;  %s1379_s2 = inlined_call_operand.vmem [shape: f32[1,512], index: 2, kind: input, shape index: {}]   ;;  %s1380_s3 = inlined_call_operand.vmem [shape: f32[1,512], index: 3, kind: input, shape index: {}]   ;;  %s1381_s4 = inlined_call_operand.vmem [shape: bf16[8,512], index: 4, kind: output, shape index: {}]  }
   0x1   :  { %s1173_s17 = smov 0   ;;  %s1175_s18 = smov 0  }
   0x2   :  { %s1177_s19 = smov 0  }
   0x3 LB: > { %s29_s20 = sadd.s32 1, %s1138_s18  ;;  %p77_p1 = scmp.ne.s32.totalorder %s1130_s16, %s1126_s15  ;;  %s1142_s19 = sphi %s1177_s19, %s14_s19   ;;  %s1138_s18 = sphi %s1175_s18, %s1385_s18   ;;  %s1134_s17 = sphi %s1173_s17, %s1384_s17   ;;  %s1130_s16 = sphi %s1171_s16, %s1383_s16   ;;  %s1126_s15 = sphi %s1169_s15, %s1382_s15  }
   0x4   : > { %p31_p0 = scmp.ge.s32.totalorder %s29_s20, 2  ;;  %p78_p2 = scmp.eq.s32.totalorder %s1142_s19, 0 }
   0x5   : > { %s70_s22 = sadd.s32 1, %s1130_s16  ;;  %p891_p5 = scmp.ge.s32.totalorder %s1142_s19, 2 }
   0x6   : > { %s1387_s20 = smov (%p31_p0, %s29_s20), 0  ;;  %p79_p3 = por %p78_p2, %p77_p1 }
   0x7   : > { %s66_s21 = ssub.s32 %s1138_s18, %s1387_s20  ;;  %195 = sbr.rel (%p891_p5) target bundleno = 48 (0x30), region = 20 }
   0x8   : > { %p68_p4 = scmp.eq.s32.totalorder %s66_s21, 0 }
   0xa   : > { %s1204_s23 = scalar_select %p68_p4, %s1130_s16, %s70_s22  }
   0xc   : > { %198 = sbr.rel (!%p79_p3) target bundleno = 48 (0x30), region = 24  ;;  %s200_s24 = sand.u32 (%p79_p3), 1, %s1130_s16  }
   0xd   : > { %s1031_s25 = sshll.u32 (%p79_p3), %s1138_s18, 3  ;;  %s892_s26 = sshll.u32 (%p79_p3), %s200_s24, 8 }
   0xe   : > { %s1212_s29 = scalar_lea.vmem (%p79_p3), %s1378_s1, %s1031_s25  ;;  %s1217_s30 = scalar_lea.vmem (%p79_p3), [#allocation3], %s892_s26 }
   0xf   : > { %v298_v0 = vld [vmem:[%s1212_s29] sm:$0xff] (%p79_p3)  ;;  %v300_v1 = vld [vmem:[%s1212_s29 + $0x10] sm:$0xff] (%p79_p3) }
  0x10   : > { %v302_v2 = vld [vmem:[%s1212_s29 + $0x20] sm:$0xff] (%p79_p3)  ;;  %299 = vst [vmem:[%s1217_s30] sm:$0xff] (%p79_p3), %v298_v0  ;;  %v304_v3 = vld [vmem:[%s1212_s29 + $0x30] sm:$0xff] (%p79_p3) }
  0x11   : > { %301 = vst [vmem:[%s1217_s30 + $0x8] sm:$0xff] %v300_v1  ;;  %v306_v4 = vld [vmem:[%s1212_s29 + $0x40] sm:$0xff]  ;;  %v308_v5 = vld [vmem:[%s1212_s29 + $0x50] sm:$0xff] }
  0x12   : > { %303 = vst [vmem:[%s1217_s30 + $0x10] sm:$0xff] %v302_v2  ;;  %v310_v6 = vld [vmem:[%s1212_s29 + $0x60] sm:$0xff]  ;;  %v312_v7 = vld [vmem:[%s1212_s29 + $0x70] sm:$0xff] }
  0x13   : > { %305 = vst [vmem:[%s1217_s30 + $0x18] sm:$0xff] %v304_v3  ;;  %v314_v8 = vld [vmem:[%s1212_s29 + $0x80] sm:$0xff]  ;;  %v316_v9 = vld [vmem:[%s1212_s29 + $0x90] sm:$0xff] }
  0x14   : > { %307 = vst [vmem:[%s1217_s30 + $0x20] sm:$0xff] %v306_v4  ;;  %v318_v10 = vld [vmem:[%s1212_s29 + $0xa0] sm:$0xff]  ;;  %v320_v11 = vld [vmem:[%s1212_s29 + $0xb0] sm:$0xff] }
  0x15   : > { %309 = vst [vmem:[%s1217_s30 + $0x28] sm:$0xff] %v308_v5  ;;  %v322_v12 = vld [vmem:[%s1212_s29 + $0xc0] sm:$0xff]  ;;  %v324_v13 = vld [vmem:[%s1212_s29 + $0xd0] sm:$0xff] }
  0x16   : > { %311 = vst [vmem:[%s1217_s30 + $0x30] sm:$0xff] %v310_v6  ;;  %v326_v14 = vld [vmem:[%s1212_s29 + $0xe0] sm:$0xff]  ;;  %v328_v15 = vld [vmem:[%s1212_s29 + $0xf0] sm:$0xff] }
  0x17   : > { %313 = vst [vmem:[%s1217_s30 + $0x38] sm:$0xff] %v312_v7  ;;  %v330_v16 = vld [vmem:[%s1212_s29 + $0x100] sm:$0xff]  ;;  %v332_v17 = vld [vmem:[%s1212_s29 + $0x110] sm:$0xff] }
  0x18   : > { %315 = vst [vmem:[%s1217_s30 + $0x40] sm:$0xff] %v314_v8  ;;  %v334_v18 = vld [vmem:[%s1212_s29 + $0x120] sm:$0xff]  ;;  %v336_v19 = vld [vmem:[%s1212_s29 + $0x130] sm:$0xff] }
  0x19   : > { %317 = vst [vmem:[%s1217_s30 + $0x48] sm:$0xff] %v316_v9  ;;  %v338_v20 = vld [vmem:[%s1212_s29 + $0x140] sm:$0xff]  ;;  %v340_v21 = vld [vmem:[%s1212_s29 + $0x150] sm:$0xff] }
  0x1a   : > { %319 = vst [vmem:[%s1217_s30 + $0x50] sm:$0xff] %v318_v10  ;;  %v342_v22 = vld [vmem:[%s1212_s29 + $0x160] sm:$0xff]  ;;  %v344_v23 = vld [vmem:[%s1212_s29 + $0x170] sm:$0xff] }
  0x1b   : > { %321 = vst [vmem:[%s1217_s30 + $0x58] sm:$0xff] %v320_v11  ;;  %v346_v24 = vld [vmem:[%s1212_s29 + $0x180] sm:$0xff]  ;;  %v348_v25 = vld [vmem:[%s1212_s29 + $0x190] sm:$0xff] }
  0x1c   : > { %323 = vst [vmem:[%s1217_s30 + $0x60] sm:$0xff] %v322_v12  ;;  %v350_v26 = vld [vmem:[%s1212_s29 + $0x1a0] sm:$0xff]  ;;  %v352_v27 = vld [vmem:[%s1212_s29 + $0x1b0] sm:$0xff] }
  0x1d   : > { %325 = vst [vmem:[%s1217_s30 + $0x68] sm:$0xff] %v324_v13  ;;  %v354_v28 = vld [vmem:[%s1212_s29 + $0x1c0] sm:$0xff]  ;;  %v356_v29 = vld [vmem:[%s1212_s29 + $0x1d0] sm:$0xff] }
  0x1e   : > { %327 = vst [vmem:[%s1217_s30 + $0x70] sm:$0xff] %v326_v14  ;;  %v358_v30 = vld [vmem:[%s1212_s29 + $0x1e0] sm:$0xff]  ;;  %v360_v31 = vld [vmem:[%s1212_s29 + $0x1f0] sm:$0xff] }
  0x1f   : > { %329 = vst [vmem:[%s1217_s30 + $0x78] sm:$0xff] %v328_v15 }
  0x20   : > { %331 = vst [vmem:[%s1217_s30 + $0x80] sm:$0xff] %v330_v16 }
  0x21   : > { %333 = vst [vmem:[%s1217_s30 + $0x88] sm:$0xff] %v332_v17 }
  0x22   : > { %335 = vst [vmem:[%s1217_s30 + $0x90] sm:$0xff] %v334_v18 }
  0x23   : > { %337 = vst [vmem:[%s1217_s30 + $0x98] sm:$0xff] %v336_v19 }
  0x24   : > { %339 = vst [vmem:[%s1217_s30 + $0xa0] sm:$0xff] %v338_v20 }
  0x25   : > { %341 = vst [vmem:[%s1217_s30 + $0xa8] sm:$0xff] %v340_v21 }
  0x26   : > { %343 = vst [vmem:[%s1217_s30 + $0xb0] sm:$0xff] %v342_v22 }
  0x27   : > { %345 = vst [vmem:[%s1217_s30 + $0xb8] sm:$0xff] %v344_v23 }
  0x28   : > { %347 = vst [vmem:[%s1217_s30 + $0xc0] sm:$0xff] %v346_v24 }
  0x29   : > { %349 = vst [vmem:[%s1217_s30 + $0xc8] sm:$0xff] %v348_v25 }
  0x2a   : > { %351 = vst [vmem:[%s1217_s30 + $0xd0] sm:$0xff] %v350_v26 }
  0x2b   : > { %353 = vst [vmem:[%s1217_s30 + $0xd8] sm:$0xff] %v352_v27 }
  0x2c   : > { %355 = vst [vmem:[%s1217_s30 + $0xe0] sm:$0xff] %v354_v28 }
  0x2d   : > { %357 = vst [vmem:[%s1217_s30 + $0xe8] sm:$0xff] %v356_v29 }
  0x2e   : > { %359 = vst [vmem:[%s1217_s30 + $0xf0] sm:$0xff] %v358_v30 }
  0x2f   : > { %361 = vst [vmem:[%s1217_s30 + $0xf8] sm:$0xff] %v360_v31 }
  0x30 PF: > { %p895_p6 = scmp.ge.s32.totalorder %s1142_s19, 1  ;;  %p382_p7 = scmp.lt.s32.totalorder %s1142_s19, 3 }
  0x32   : > { %p383_p8 = pnand %p895_p6, %p382_p7 }
  0x33   : > { %s389_s5 = sand.u32 (!%p383_p8), 1, %s1126_s15   ;;  %s897_s10 = sshll.u32 (!%p383_p8), %s1134_s17, 1 }
  0x34   : > { %386 = sbr.rel (%p383_p8) target bundleno = 234 (0xea), region = 70  ;;  %s896_s6 = sshll.u32 (!%p383_p8), %s389_s5, 8 }
  0x35   : > { %s1283_s7 = scalar_lea.vmem (!%p383_p8), [#allocation3], %s896_s6  ;;  %p446_p9 = scmp.lt.s32.totalorder (!%p383_p8), %s897_s10, 3 }
  0x39   : > { %v959_v32 = vld [vmem:[%s1283_s7 + $0x70] sm:$0xf]  ;;  %v1047_v33 = vld [vmem:[%s1283_s7 + $0x74] sm:$0xf0]  ;;  %v1046_v37 = vld [vmem:[%s1283_s7 + $0x74] sm:$0xf] }
  0x3a   : > { %v1023_v34 = vld [vmem:[%s1283_s7 + $0xf0] sm:$0xf]  ;;  %v960_v35 = vor.u32 %v1047_v33, %v959_v32  ;;  %v1063_v36 = vld [vmem:[%s1283_s7 + $0xf4] sm:$0xf0]  ;;  %v961_v38 = vld [vmem:[%s1283_s7 + $0x78] sm:$0xf0] }
  0x3b   : > { %v1024_v39 = vor.u32 %v1063_v36, %v1023_v34  ;;  %v964_v40 = vor.u32 %v1046_v37, %v961_v38  ;;  %v1062_v41 = vld [vmem:[%s1283_s7 + $0xf4] sm:$0xf]  ;;  %v1025_v42 = vld [vmem:[%s1283_s7 + $0xf8] sm:$0xf0]  ;;  %v951_v43 = vld [vmem:[%s1283_s7 + $0x60] sm:$0xf] }
  0x3c   : > { %673 = vmatpush.bf16.msra.mxu0 %v960_v35  ;;  %v1028_v44 = vor.u32 %v1062_v41, %v1025_v42  ;;  %v1045_v45 = vld [vmem:[%s1283_s7 + $0x64] sm:$0xf0]  ;;  %v1015_v46 = vld [vmem:[%s1283_s7 + $0xe0] sm:$0xf]  ;;  %v1044_v50 = vld [vmem:[%s1283_s7 + $0x64] sm:$0xf] }
  0x3d   : > { %v1061_v47 = vld [vmem:[%s1283_s7 + $0xe4] sm:$0xf0]  ;;  %686 = vmatpush.bf16.msra.mxu1 %v1024_v39  ;;  %699 = vmatpush.bf16.msra.mxu2 %v964_v40  ;;  %v952_v48 = vor.u32 %v1045_v45, %v951_v43  ;;  %v953_v51 = vld [vmem:[%s1283_s7 + $0x68] sm:$0xf0]  ;;  %v1060_v52 = vld [vmem:[%s1283_s7 + $0xe4] sm:$0xf] }
  0x3e   : > { %v1016_v49 = vor.u32 %v1061_v47, %v1015_v46  ;;  %712 = vmatpush.bf16.msra.mxu3 %v1028_v44  ;;  %v956_v53 = vor.u32 %v1044_v50, %v953_v51  ;;  %v1017_v54 = vld [vmem:[%s1283_s7 + $0xe8] sm:$0xf0]  ;;  %v943_v55 = vld [vmem:[%s1283_s7 + $0x50] sm:$0xf]  ;;  %v1043_v56 = vld [vmem:[%s1283_s7 + $0x54] sm:$0xf0] }
  0x3f   : > { %v1020_v57 = vor.u32 %v1060_v52, %v1017_v54  ;;  %v1007_v58 = vld [vmem:[%s1283_s7 + $0xd0] sm:$0xf]  ;;  %v1059_v59 = vld [vmem:[%s1283_s7 + $0xd4] sm:$0xf0]  ;;  %v1042_v60 = vld [vmem:[%s1283_s7 + $0x54] sm:$0xf]  ;;  %v944_v61 = vor.u32 %v1043_v56, %v943_v55 }
  0x40   : > { %674 = vmatpush.bf16.msra.mxu0 %v952_v48  ;;  %v945_v62 = vld [vmem:[%s1283_s7 + $0x58] sm:$0xf0]  ;;  %v1058_v63 = vld [vmem:[%s1283_s7 + $0xd4] sm:$0xf]  ;;  %v1008_v1 = vor.u32 %v1059_v59, %v1007_v58  ;;  %v935_v3 = vld [vmem:[%s1283_s7 + $0x40] sm:$0xf] }
  0x41   : > { %v1009_v0 = vld [vmem:[%s1283_s7 + $0xd8] sm:$0xf0]  ;;  %687 = vmatpush.bf16.msra.mxu1 %v1016_v49  ;;  %700 = vmatpush.bf16.msra.mxu2 %v956_v53  ;;  %v948_v2 = vor.u32 %v1042_v60, %v945_v62  ;;  %v1041_v4 = vld [vmem:[%s1283_s7 + $0x44] sm:$0xf0]  ;;  %v999_v5 = vld [vmem:[%s1283_s7 + $0xc0] sm:$0xf] }
  0x42   : > { %713 = vmatpush.bf16.msra.mxu3 %v1020_v57  ;;  %v1012_v6 = vor.u32 %v1058_v63, %v1009_v0  ;;  %v1057_v7 = vld [vmem:[%s1283_s7 + $0xc4] sm:$0xf0]  ;;  %v1040_v8 = vld [vmem:[%s1283_s7 + $0x44] sm:$0xf]  ;;  %v937_v9 = vld [vmem:[%s1283_s7 + $0x48] sm:$0xf0]  ;;  %v936_v12 = vor.u32 %v1041_v4, %v935_v3 }
  0x43   : > { %v1056_v10 = vld [vmem:[%s1283_s7 + $0xc4] sm:$0xf]  ;;  %v1001_v11 = vld [vmem:[%s1283_s7 + $0xc8] sm:$0xf0]  ;;  %v1000_v13 = vor.u32 %v1057_v7, %v999_v5  ;;  %v940_v14 = vor.u32 %v1040_v8, %v937_v9  ;;  %v927_v15 = vld [vmem:[%s1283_s7 + $0x30] sm:$0xf] }
  0x44   : > { %675 = vmatpush.bf16.msra.mxu0 %v944_v61  ;;  %v1039_v16 = vld [vmem:[%s1283_s7 + $0x34] sm:$0xf0]  ;;  %v991_v17 = vld [vmem:[%s1283_s7 + $0xb0] sm:$0xf]  ;;  %v1004_v18 = vor.u32 %v1056_v10, %v1001_v11  ;;  %v1038_v20 = vld [vmem:[%s1283_s7 + $0x34] sm:$0xf] }
  0x45   : > { %688 = vmatpush.bf16.msra.mxu1 %v1008_v1  ;;  %701 = vmatpush.bf16.msra.mxu2 %v948_v2  ;;  %v1055_v19 = vld [vmem:[%s1283_s7 + $0xb4] sm:$0xf0]  ;;  %v929_v21 = vld [vmem:[%s1283_s7 + $0x38] sm:$0xf0]  ;;  %v1054_v22 = vld [vmem:[%s1283_s7 + $0xb4] sm:$0xf]  ;;  %v928_v24 = vor.u32 %v1039_v16, %v927_v15 }
  0x46   : > { %714 = vmatpush.bf16.msra.mxu3 %v1012_v6  ;;  %v993_v23 = vld [vmem:[%s1283_s7 + $0xb8] sm:$0xf0]  ;;  %v992_v25 = vor.u32 %v1055_v19, %v991_v17  ;;  %v932_v26 = vor.u32 %v1038_v20, %v929_v21  ;;  %v919_v27 = vld [vmem:[%s1283_s7 + $0x20] sm:$0xf]  ;;  %v1037_v28 = vld [vmem:[%s1283_s7 + $0x24] sm:$0xf0] }
  0x47   : > { %v983_v29 = vld [vmem:[%s1283_s7 + $0xa0] sm:$0xf]  ;;  %v996_v30 = vor.u32 %v1054_v22, %v993_v23  ;;  %v1053_v31 = vld [vmem:[%s1283_s7 + $0xa4] sm:$0xf0]  ;;  %v1036_v32 = vld [vmem:[%s1283_s7 + $0x24] sm:$0xf]  ;;  %v920_v36 = vor.u32 %v1037_v28, %v919_v27 }
  0x48   : > { %676 = vmatpush.bf16.msra.mxu0 %v936_v12  ;;  %v921_v33 = vld [vmem:[%s1283_s7 + $0x28] sm:$0xf0]  ;;  %v1052_v34 = vld [vmem:[%s1283_s7 + $0xa4] sm:$0xf]  ;;  %v984_v37 = vor.u32 %v1053_v31, %v983_v29  ;;  %v911_v39 = vld [vmem:[%s1283_s7 + $0x10] sm:$0xf] }
  0x49   : > { %689 = vmatpush.bf16.msra.mxu1 %v1000_v13  ;;  %702 = vmatpush.bf16.msra.mxu2 %v940_v14  ;;  %v985_v35 = vld [vmem:[%s1283_s7 + $0xa8] sm:$0xf0]  ;;  %v924_v38 = vor.u32 %v1036_v32, %v921_v33  ;;  %v1035_v40 = vld [vmem:[%s1283_s7 + $0x14] sm:$0xf0]  ;;  %v975_v41 = vld [vmem:[%s1283_s7 + $0x90] sm:$0xf] }
  0x4a   : > { %715 = vmatpush.bf16.msra.mxu3 %v1004_v18  ;;  %v988_v42 = vor.u32 %v1052_v34, %v985_v35  ;;  %v1051_v43 = vld [vmem:[%s1283_s7 + $0x94] sm:$0xf0]  ;;  %v1034_v44 = vld [vmem:[%s1283_s7 + $0x14] sm:$0xf]  ;;  %v913_v45 = vld [vmem:[%s1283_s7 + $0x18] sm:$0xf0]  ;;  %v912_v48 = vor.u32 %v1035_v40, %v911_v39 }
  0x4b   : > { %v1050_v46 = vld [vmem:[%s1283_s7 + $0x94] sm:$0xf]  ;;  %v977_v47 = vld [vmem:[%s1283_s7 + $0x98] sm:$0xf0]  ;;  %v473_v49 = vld [vmem:[%s1377_s0] sm:$0xff]  ;;  %v976_v50 = vor.u32 %v1051_v43, %v975_v41  ;;  %v916_v51 = vor.u32 %v1034_v44, %v913_v45  ;;  %s1389_s10 = smov (!%p446_p9, %s897_s10), 3 }
  0x4c   : > { %677 = vmatpush.bf16.msra.mxu0 %v928_v24  ;;  %v903_v52 = vld [vmem:[%s1283_s7] sm:$0xf]  ;;  %v1033_v53 = vld [vmem:[%s1283_s7 + $0x4] sm:$0xf0]  ;;  %v980_v55 = vor.u32 %v1050_v46, %v977_v47  ;;  %v1032_v57 = vld [vmem:[%s1283_s7 + $0x4] sm:$0xf]  ;;  %v507_v61 = vunpack.c.l.b16 %v473_v49  ;;  %v508_v63 = vunpack.c.h.b16 %v473_v49  ;;  %s448_s13 = scalar_lea.vmem %s1379_s2, %s1389_s10  ;;  %s453_s21 = scalar_lea.vmem %s1380_s3, %s1389_s10 }
  0x4d   : > { %690 = vmatpush.bf16.msra.mxu1 %v992_v25  ;;  %703 = vmatpush.bf16.msra.mxu2 %v932_v26  ;;  %v967_v54 = vld [vmem:[%s1283_s7 + $0x80] sm:$0xf]  ;;  %v1049_v56 = vld [vmem:[%s1283_s7 + $0x84] sm:$0xf0]  ;;  %v905_v58 = vld [vmem:[%s1283_s7 + $0x8] sm:$0xf0]  ;;  %v904_v62 = vor.u32 %v1033_v53, %v903_v52 }
  0x4e   : > { %716 = vmatpush.bf16.msra.mxu3 %v996_v30  ;;  %v1048_v59 = vld [vmem:[%s1283_s7 + $0x84] sm:$0xf]  ;;  %v969_v60 = vld [vmem:[%s1283_s7 + $0x88] sm:$0xf0]  ;;  %v968_v0 = vor.u32 %v1049_v56, %v967_v54  ;;  %v908_v1 = vor.u32 %v1032_v57, %v905_v58  ;;  %v509_v3 = vpack.c.b16 %v507_v61, %v507_v61  ;;  %v510_v4 = vpack.c.b16 %v508_v63, %v508_v63  ;;  %v734_v6 = vld [vmem:[%s448_s13] sm:$0x3] }
  0x4f   : > { %v972_v2 = vor.u32 %v1048_v59, %v969_v60  ;;  %v736_v9 = vperm.slane %v734_v6, 0  ;;  %v742_v10 = vld [vmem:[%s453_s21] sm:$0x3]  ;;  %v737_v14 = vperm.slane %v734_v6, 1  ;;  %s900_s17 = sshll.u32 %s1389_s10, 2 }
  0x50   : > { %678 = vmatpush.bf16.msra.mxu0 %v920_v36  ;;  %v744_v12 = vperm.slane %v742_v10, 0  ;;  %v745_v18 = vperm.slane %v742_v10, 1  ;;  %s463_s25 = scalar_lea.vmem %s1381_s4, %s900_s17 }
  0x51   : > { %691 = vmatpush.bf16.msra.mxu1 %v984_v37  ;;  %704 = vmatpush.bf16.msra.mxu2 %v924_v38 }
  0x52   : > { %717 = vmatpush.bf16.msra.mxu3 %v988_v42 }
  0x54   : > { %679 = vmatpush.bf16.msra.mxu0 %v912_v48 }
  0x55   : > { %692 = vmatpush.bf16.msra.mxu1 %v976_v50  ;;  %705 = vmatpush.bf16.msra.mxu2 %v916_v51 }
  0x56   : > { %718 = vmatpush.bf16.msra.mxu3 %v980_v55 }
  0x58   : > { %680 = vmatpush.bf16.msra.mxu0 %v904_v62 }
  0x59   : > { %693 = vmatpush.bf16.msra.mxu1 %v968_v0  ;;  %706 = vmatpush.bf16.msra.mxu2 %v908_v1 }
  0x5a   : > { %719 = vmatpush.bf16.msra.mxu3 %v972_v2 }
  0x5b   : > { %681 = vmatmul.bf16.vlgmr.msra.gmra.mxu0 %v509_v3 }
  0x5c   : > { %694 = vmatmul.bf16.vlgmr.msra.gmra.mxu1 %v510_v4  ;;  %707 = vmatmul.bf16.vlgmr.msra.gmra.mxu2 %v509_v3 }
  0x5d   : > { %720 = vmatmul.bf16.vlgmr.msra.gmra.mxu3 %v510_v4 }
  0xd8   : > { %v682_v5 = vpop.f32.mrf.mxu0 }
  0xd9   : > { %v695_v7 = vpop.f32.mrf.mxu1 }
  0xda   : > { %v696_v8 = vadd.f32 %v695_v7, %v682_v5 }
  0xdc   : > { %v740_v11 = vmul.f32 %v736_v9, %v696_v8 }
  0xde   : > { %v748_v20 = vadd.f32 %v744_v12, %v740_v11 }
  0xdf   : > { %v708_v13 = vpop.f32.mrf.mxu2 }
  0xe0   : > { %v721_v15 = vpop.f32.mrf.mxu3  ;;  %v684_v16 = vpop.f32.mrf.mxu0 }
  0xe1   : > { %v722_v17 = vadd.f32 %v721_v15, %v708_v13  ;;  %v697_v19 = vpop.f32.mrf.mxu1 }
  0xe3   : > { %v741_v21 = vmul.f32 %v737_v14, %v722_v17 }
  0xe5   : > { %v749_v22 = vadd.f32 %v745_v18, %v741_v21 }
  0xe7   : > { %v750_v23 = vpack.c.bf16 %v749_v22, %v748_v20  ;;  %v710_v24 = vpop.f32.mrf.mxu2 }
  0xe8   : > { %v723_v25 = vpop.f32.mrf.mxu3 }
  0xe9   : > { %751 = vst [vmem:[%s463_s25] sm:$0xff] %v750_v23 }
  0xea PF: > { %s14_s19 = sadd.s32 1, %s1142_s19   ;;  %s1382_s15 = smov %s1130_s16 }
  0xeb   : > { %p11_p10 = scmp.ge.s32.totalorder %s14_s19, 4   ;;  %s1383_s16 = smov %s1204_s23 }
  0xec   : > { %s1384_s17 = smov %s1138_s18  ;;  %s1385_s18 = smov %s1387_s20 }
  0xed   :  { %13 = sbr.rel (!%p11_p10) target bundleno = 3 (0x3), region = 126 }

// kernel: forward.42
= control target key start
LH: loop header
LB: loop body
LE: loop exit
PB: predicated region body
PF: predicated region fallthrough
CT: control target
= control target key end

     0   :  { %s2250_s0 = inlined_call_operand.vmem [shape: bf16[9,8,512], index: 0, kind: input, shape index: {}]   ;;  %s2251_s1 = inlined_call_operand.vmem [shape: bf16[9,512,512], index: 1, kind: input, shape index: {}]   ;;  %s2252_s2 = inlined_call_operand.vmem [shape: f32[1,512], index: 2, kind: input, shape index: {}]   ;;  %s2253_s3 = inlined_call_operand.vmem [shape: f32[1,512], index: 3, kind: input, shape index: {}]   ;;  %s2254_s4 = inlined_call_operand.vmem [shape: bf16[8,512], index: 4, kind: input, shape index: {}]   ;;  %s2255_s5 = inlined_call_operand.vmem [shape: bf16[8,512], index: 5, kind: output, shape index: {}]  }
   0x1   :  { %2256 = sst [smem:[#allocation4_spill]] %s2251_s1 }
   0x2   :  { %s1843_s18 = smov 0   ;;  %s1845_s19 = smov 0  }
   0x3   :  { %s1847_s20 = smov 0   ;;  %s1849_s21 = smov 0  }
   0x4   :  { %s1851_s22 = smov 0   ;;  %s1853_s23 = smov 0  }
   0x5   :  { %s1855_s24 = smov 0  }
   0x6 LB: > { %s27_s25 = sadd.s32 1, %s1802_s22  ;;  %s30_s26 = sadd.s32 1, %s1806_s23  ;;  %s1810_s24 = sphi %s1855_s24, %s15_s24   ;;  %s1806_s23 = sphi %s1853_s23, %s2263_s23   ;;  %s1802_s22 = sphi %s1851_s22, %s2262_s22   ;;  %s1798_s21 = sphi %s1849_s21, %s2261_s21   ;;  %s1794_s20 = sphi %s1847_s20, %s2260_s20   ;;  %s1790_s19 = sphi %s1845_s19, %s2259_s19   ;;  %s1786_s18 = sphi %s1843_s18, %s2258_s18  }
   0x7   : > { %p28_p0 = scmp.ge.s32.totalorder %s27_s25, 9  ;;  %p78_p1 = scmp.ne.s32.totalorder %s1790_s19, %s1786_s18 }
   0x8   : > { %p79_p2 = scmp.eq.s32.totalorder %s1810_s24, 0  ;;  %s71_s30 = sadd.s32 1, %s1790_s19 }
   0x9   : > { %s2265_s25 = smov (%p28_p0, %s27_s25), 0  ;;  %s2267_s26 = smov (!%p28_p0, %s30_s26), %s1806_s23 }
   0xa   : > { %p80_p3 = por %p79_p2, %p78_p1  ;;  %p32_p4 = scmp.ge.s32.totalorder %s2267_s26, 2 }
   0xb   : > { %s66_s27 = ssub.s32 %s1802_s22, %s2265_s25  ;;  %p1359_p6 = scmp.ge.s32.totalorder %s1810_s24, 18 }
   0xc   : > { %s2269_s26 = smov (%p32_p4, %s2267_s26), 0 }
   0xd   : > { %s67_s28 = ssub.s32 %s1806_s23, %s2269_s26  ;;  %212 = sbr.rel (%p1359_p6) target bundleno = 92 (0x5c), region = 16 }
   0xe   : > { %s68_s29 = sor.u32 %s67_s28, %s66_s27 }
   0xf   : > { %p69_p5 = scmp.eq.s32.totalorder %s68_s29, 0 }
  0x11   : > { %s1894_s6 = scalar_select %p69_p5, %s1790_s19, %s71_s30  }
  0x12   : > { %227 = sbr.rel (!%p80_p3) target bundleno = 92 (0x5c), region = 24  ;;  %s229_s7 = sand.u32 (%p80_p3), 1, %s1790_s19  }
  0x13   : > { %s1361_s8 = sshll.u32 (%p80_p3), %s1806_s23, 1  ;;  %s1360_s9 = sshll.u32 (%p80_p3), %s229_s7, 9 }
  0x14   : > { %s1362_s10 = sshll.u32 (%p80_p3), %s1802_s22, 8  ;;  %s2257_s1 = sld [smem:[#allocation4_spill]] (%p80_p3) }
  0x15   : > { %s234_s11 = sadd.s32 (%p80_p3), %s1362_s10, %s1361_s8  ;;  %s1908_s16 = scalar_lea.vmem (%p80_p3), [#allocation3], %s1360_s9 }
  0x16   : > { %s1363_s12 = sshll.u32 (%p80_p3), %s234_s11, 2 }
  0x1a   : > { %s1903_s15 = scalar_lea.vmem %s2257_s1, %s1363_s12 }
  0x1b   : > { %v391_v0 = vld [vmem:[%s1903_s15] sm:$0xff]  ;;  %v393_v1 = vld [vmem:[%s1903_s15 + $0x10] sm:$0xff] }
  0x1c   : > { %v395_v2 = vld [vmem:[%s1903_s15 + $0x20] sm:$0xff]  ;;  %392 = vst [vmem:[%s1908_s16] sm:$0xff] %v391_v0  ;;  %v397_v3 = vld [vmem:[%s1903_s15 + $0x30] sm:$0xff] }
  0x1d   : > { %394 = vst [vmem:[%s1908_s16 + $0x8] sm:$0xff] %v393_v1  ;;  %v399_v4 = vld [vmem:[%s1903_s15 + $0x40] sm:$0xff]  ;;  %v401_v5 = vld [vmem:[%s1903_s15 + $0x50] sm:$0xff] }
  0x1e   : > { %396 = vst [vmem:[%s1908_s16 + $0x10] sm:$0xff] %v395_v2  ;;  %v403_v6 = vld [vmem:[%s1903_s15 + $0x60] sm:$0xff]  ;;  %v405_v7 = vld [vmem:[%s1903_s15 + $0x70] sm:$0xff] }
  0x1f   : > { %398 = vst [vmem:[%s1908_s16 + $0x18] sm:$0xff] %v397_v3  ;;  %v407_v8 = vld [vmem:[%s1903_s15 + $0x80] sm:$0xff]  ;;  %v409_v9 = vld [vmem:[%s1903_s15 + $0x90] sm:$0xff] }
  0x20   : > { %400 = vst [vmem:[%s1908_s16 + $0x20] sm:$0xff] %v399_v4  ;;  %v411_v10 = vld [vmem:[%s1903_s15 + $0xa0] sm:$0xff]  ;;  %v413_v11 = vld [vmem:[%s1903_s15 + $0xb0] sm:$0xff] }
  0x21   : > { %402 = vst [vmem:[%s1908_s16 + $0x28] sm:$0xff] %v401_v5  ;;  %v415_v12 = vld [vmem:[%s1903_s15 + $0xc0] sm:$0xff]  ;;  %v417_v13 = vld [vmem:[%s1903_s15 + $0xd0] sm:$0xff] }
  0x22   : > { %404 = vst [vmem:[%s1908_s16 + $0x30] sm:$0xff] %v403_v6  ;;  %v419_v14 = vld [vmem:[%s1903_s15 + $0xe0] sm:$0xff]  ;;  %v421_v15 = vld [vmem:[%s1903_s15 + $0xf0] sm:$0xff] }
  0x23   : > { %406 = vst [vmem:[%s1908_s16 + $0x38] sm:$0xff] %v405_v7  ;;  %v423_v16 = vld [vmem:[%s1903_s15 + $0x100] sm:$0xff]  ;;  %v425_v17 = vld [vmem:[%s1903_s15 + $0x110] sm:$0xff] }
  0x24   : > { %408 = vst [vmem:[%s1908_s16 + $0x40] sm:$0xff] %v407_v8  ;;  %v427_v18 = vld [vmem:[%s1903_s15 + $0x120] sm:$0xff]  ;;  %v429_v19 = vld [vmem:[%s1903_s15 + $0x130] sm:$0xff] }
  0x25   : > { %410 = vst [vmem:[%s1908_s16 + $0x48] sm:$0xff] %v409_v9  ;;  %v431_v20 = vld [vmem:[%s1903_s15 + $0x140] sm:$0xff]  ;;  %v433_v21 = vld [vmem:[%s1903_s15 + $0x150] sm:$0xff] }
  0x26   : > { %412 = vst [vmem:[%s1908_s16 + $0x50] sm:$0xff] %v411_v10  ;;  %v435_v22 = vld [vmem:[%s1903_s15 + $0x160] sm:$0xff]  ;;  %v437_v23 = vld [vmem:[%s1903_s15 + $0x170] sm:$0xff] }
  0x27   : > { %414 = vst [vmem:[%s1908_s16 + $0x58] sm:$0xff] %v413_v11  ;;  %v439_v24 = vld [vmem:[%s1903_s15 + $0x180] sm:$0xff]  ;;  %v441_v25 = vld [vmem:[%s1903_s15 + $0x190] sm:$0xff] }
  0x28   : > { %416 = vst [vmem:[%s1908_s16 + $0x60] sm:$0xff] %v415_v12  ;;  %v443_v26 = vld [vmem:[%s1903_s15 + $0x1a0] sm:$0xff]  ;;  %v445_v27 = vld [vmem:[%s1903_s15 + $0x1b0] sm:$0xff] }
  0x29   : > { %418 = vst [vmem:[%s1908_s16 + $0x68] sm:$0xff] %v417_v13  ;;  %v447_v28 = vld [vmem:[%s1903_s15 + $0x1c0] sm:$0xff]  ;;  %v449_v29 = vld [vmem:[%s1903_s15 + $0x1d0] sm:$0xff] }
  0x2a   : > { %420 = vst [vmem:[%s1908_s16 + $0x70] sm:$0xff] %v419_v14  ;;  %v451_v30 = vld [vmem:[%s1903_s15 + $0x1e0] sm:$0xff]  ;;  %v453_v31 = vld [vmem:[%s1903_s15 + $0x1f0] sm:$0xff] }
  0x2b   : > { %422 = vst [vmem:[%s1908_s16 + $0x78] sm:$0xff] %v421_v15  ;;  %v455_v32 = vld [vmem:[%s1903_s15 + $0x200] sm:$0xff]  ;;  %v457_v33 = vld [vmem:[%s1903_s15 + $0x210] sm:$0xff] }
  0x2c   : > { %424 = vst [vmem:[%s1908_s16 + $0x80] sm:$0xff] %v423_v16  ;;  %v459_v34 = vld [vmem:[%s1903_s15 + $0x220] sm:$0xff]  ;;  %v461_v35 = vld [vmem:[%s1903_s15 + $0x230] sm:$0xff] }
  0x2d   : > { %426 = vst [vmem:[%s1908_s16 + $0x88] sm:$0xff] %v425_v17  ;;  %v463_v36 = vld [vmem:[%s1903_s15 + $0x240] sm:$0xff]  ;;  %v465_v37 = vld [vmem:[%s1903_s15 + $0x250] sm:$0xff] }
  0x2e   : > { %428 = vst [vmem:[%s1908_s16 + $0x90] sm:$0xff] %v427_v18  ;;  %v467_v38 = vld [vmem:[%s1903_s15 + $0x260] sm:$0xff]  ;;  %v469_v39 = vld [vmem:[%s1903_s15 + $0x270] sm:$0xff] }
  0x2f   : > { %430 = vst [vmem:[%s1908_s16 + $0x98] sm:$0xff] %v429_v19  ;;  %v471_v40 = vld [vmem:[%s1903_s15 + $0x280] sm:$0xff]  ;;  %v473_v41 = vld [vmem:[%s1903_s15 + $0x290] sm:$0xff] }
  0x30   : > { %432 = vst [vmem:[%s1908_s16 + $0xa0] sm:$0xff] %v431_v20  ;;  %v475_v42 = vld [vmem:[%s1903_s15 + $0x2a0] sm:$0xff]  ;;  %v477_v43 = vld [vmem:[%s1903_s15 + $0x2b0] sm:$0xff] }
  0x31   : > { %434 = vst [vmem:[%s1908_s16 + $0xa8] sm:$0xff] %v433_v21  ;;  %v479_v44 = vld [vmem:[%s1903_s15 + $0x2c0] sm:$0xff]  ;;  %v481_v45 = vld [vmem:[%s1903_s15 + $0x2d0] sm:$0xff] }
  0x32   : > { %436 = vst [vmem:[%s1908_s16 + $0xb0] sm:$0xff] %v435_v22  ;;  %v483_v46 = vld [vmem:[%s1903_s15 + $0x2e0] sm:$0xff]  ;;  %v485_v47 = vld [vmem:[%s1903_s15 + $0x2f0] sm:$0xff] }
  0x33   : > { %438 = vst [vmem:[%s1908_s16 + $0xb8] sm:$0xff] %v437_v23  ;;  %v487_v48 = vld [vmem:[%s1903_s15 + $0x300] sm:$0xff]  ;;  %v489_v49 = vld [vmem:[%s1903_s15 + $0x310] sm:$0xff] }
  0x34   : > { %440 = vst [vmem:[%s1908_s16 + $0xc0] sm:$0xff] %v439_v24  ;;  %v491_v50 = vld [vmem:[%s1903_s15 + $0x320] sm:$0xff]  ;;  %v493_v51 = vld [vmem:[%s1903_s15 + $0x330] sm:$0xff] }
  0x35   : > { %442 = vst [vmem:[%s1908_s16 + $0xc8] sm:$0xff] %v441_v25  ;;  %v495_v52 = vld [vmem:[%s1903_s15 + $0x340] sm:$0xff]  ;;  %v497_v53 = vld [vmem:[%s1903_s15 + $0x350] sm:$0xff] }
  0x36   : > { %444 = vst [vmem:[%s1908_s16 + $0xd0] sm:$0xff] %v443_v26  ;;  %v499_v54 = vld [vmem:[%s1903_s15 + $0x360] sm:$0xff]  ;;  %v501_v55 = vld [vmem:[%s1903_s15 + $0x370] sm:$0xff] }
  0x37   : > { %446 = vst [vmem:[%s1908_s16 + $0xd8] sm:$0xff] %v445_v27  ;;  %v503_v56 = vld [vmem:[%s1903_s15 + $0x380] sm:$0xff]  ;;  %v505_v57 = vld [vmem:[%s1903_s15 + $0x390] sm:$0xff] }
  0x38   : > { %448 = vst [vmem:[%s1908_s16 + $0xe0] sm:$0xff] %v447_v28  ;;  %v507_v58 = vld [vmem:[%s1903_s15 + $0x3a0] sm:$0xff]  ;;  %v509_v59 = vld [vmem:[%s1903_s15 + $0x3b0] sm:$0xff] }
  0x39   : > { %450 = vst [vmem:[%s1908_s16 + $0xe8] sm:$0xff] %v449_v29  ;;  %v511_v60 = vld [vmem:[%s1903_s15 + $0x3c0] sm:$0xff]  ;;  %v513_v61 = vld [vmem:[%s1903_s15 + $0x3d0] sm:$0xff] }
  0x3a   : > { %452 = vst [vmem:[%s1908_s16 + $0xf0] sm:$0xff] %v451_v30  ;;  %v515_v62 = vld [vmem:[%s1903_s15 + $0x3e0] sm:$0xff]  ;;  %v517_v63 = vld [vmem:[%s1903_s15 + $0x3f0] sm:$0xff] }
  0x3b   : > { %454 = vst [vmem:[%s1908_s16 + $0xf8] sm:$0xff] %v453_v31 }
  0x3c   : > { %456 = vst [vmem:[%s1908_s16 + $0x100] sm:$0xff] %v455_v32 }
  0x3d   : > { %458 = vst [vmem:[%s1908_s16 + $0x108] sm:$0xff] %v457_v33 }
  0x3e   : > { %460 = vst [vmem:[%s1908_s16 + $0x110] sm:$0xff] %v459_v34 }
  0x3f   : > { %462 = vst [vmem:[%s1908_s16 + $0x118] sm:$0xff] %v461_v35 }
  0x40   : > { %464 = vst [vmem:[%s1908_s16 + $0x120] sm:$0xff] %v463_v36 }
  0x41   : > { %466 = vst [vmem:[%s1908_s16 + $0x128] sm:$0xff] %v465_v37 }
  0x42   : > { %468 = vst [vmem:[%s1908_s16 + $0x130] sm:$0xff] %v467_v38 }
  0x43   : > { %470 = vst [vmem:[%s1908_s16 + $0x138] sm:$0xff] %v469_v39 }
  0x44   : > { %472 = vst [vmem:[%s1908_s16 + $0x140] sm:$0xff] %v471_v40 }
  0x45   : > { %474 = vst [vmem:[%s1908_s16 + $0x148] sm:$0xff] %v473_v41 }
  0x46   : > { %476 = vst [vmem:[%s1908_s16 + $0x150] sm:$0xff] %v475_v42 }
  0x47   : > { %478 = vst [vmem:[%s1908_s16 + $0x158] sm:$0xff] %v477_v43 }
  0x48   : > { %480 = vst [vmem:[%s1908_s16 + $0x160] sm:$0xff] %v479_v44 }
  0x49   : > { %482 = vst [vmem:[%s1908_s16 + $0x168] sm:$0xff] %v481_v45 }
  0x4a   : > { %484 = vst [vmem:[%s1908_s16 + $0x170] sm:$0xff] %v483_v46 }
  0x4b   : > { %486 = vst [vmem:[%s1908_s16 + $0x178] sm:$0xff] %v485_v47 }
  0x4c   : > { %488 = vst [vmem:[%s1908_s16 + $0x180] sm:$0xff] %v487_v48 }
  0x4d   : > { %490 = vst [vmem:[%s1908_s16 + $0x188] sm:$0xff] %v489_v49 }
  0x4e   : > { %492 = vst [vmem:[%s1908_s16 + $0x190] sm:$0xff] %v491_v50 }
  0x4f   : > { %494 = vst [vmem:[%s1908_s16 + $0x198] sm:$0xff] %v493_v51 }
  0x50   : > { %496 = vst [vmem:[%s1908_s16 + $0x1a0] sm:$0xff] %v495_v52 }
  0x51   : > { %498 = vst [vmem:[%s1908_s16 + $0x1a8] sm:$0xff] %v497_v53 }
  0x52   : > { %500 = vst [vmem:[%s1908_s16 + $0x1b0] sm:$0xff] %v499_v54 }
  0x53   : > { %502 = vst [vmem:[%s1908_s16 + $0x1b8] sm:$0xff] %v501_v55 }
  0x54   : > { %504 = vst [vmem:[%s1908_s16 + $0x1c0] sm:$0xff] %v503_v56 }
  0x55   : > { %506 = vst [vmem:[%s1908_s16 + $0x1c8] sm:$0xff] %v505_v57 }
  0x56   : > { %508 = vst [vmem:[%s1908_s16 + $0x1d0] sm:$0xff] %v507_v58 }
  0x57   : > { %510 = vst [vmem:[%s1908_s16 + $0x1d8] sm:$0xff] %v509_v59 }
  0x58   : > { %512 = vst [vmem:[%s1908_s16 + $0x1e0] sm:$0xff] %v511_v60 }
  0x59   : > { %514 = vst [vmem:[%s1908_s16 + $0x1e8] sm:$0xff] %v513_v61 }
  0x5a   : > { %516 = vst [vmem:[%s1908_s16 + $0x1f0] sm:$0xff] %v515_v62 }
  0x5b   : > { %518 = vst [vmem:[%s1908_s16 + $0x1f8] sm:$0xff] %v517_v63 }
  0x5c PF: > { %p1364_p7 = scmp.ge.s32.totalorder %s1810_s24, 1  ;;  %p552_p8 = scmp.lt.s32.totalorder %s1810_s24, 19 }
  0x5e   : > { %p553_p9 = pnand %p1364_p7, %p552_p8 }
  0x5f   : > { %s559_s17 = sand.u32 (!%p553_p9), 1, %s1786_s18   ;;  %p616_p10 = scmp.lt.s32.totalorder (!%p553_p9), %s1794_s20, 8 }
  0x60   : > { %556 = sbr.rel (%p553_p9) target bundleno = 335 (0x14f), region = 74  ;;  %s1365_s27 = sshll.u32 (!%p553_p9), %s559_s17, 9 }
  0x61   : > { %s1368_s28 = sshll.u32 (!%p553_p9), %s1798_s21, 1  ;;  %p1374_p12 = scmp.ne.s32.totalorder (!%p553_p9), %s1794_s20, 0 }
  0x62   : > { %p627_p11 = scmp.lt.s32.totalorder (!%p553_p9), %s1368_s28, 3 }
  0x65   : > { %s617_s29 = scalar_select %p616_p10, %s1794_s20, 8 }
  0x66   : > { %s2271_s28 = smov (!%p627_p11, %s1368_s28), 3  ;;  %659 = sbr.rel (%p1374_p12) target bundleno = 110 (0x6e), region = 82 }
  0x67   : > { %s1634_s30 = sshll.u32 %s617_s29, 4  ;;  %s629_s18 = scalar_lea.vmem %s2252_s2, %s2271_s28 }
  0x68   : > { %s2046_s9 = scalar_lea.vmem %s2250_s0, %s1634_s30  ;;  %s634_s21 = scalar_lea.vmem %s2253_s3, %s2271_s28 }
  0x69   : > { %s1371_s14 = sshll.u32 %s2271_s28, 2  ;;  %s2067_s30 = scalar_lea.vmem [#allocation3], %s1365_s27 }
  0x6a   : > { %s2060_s17 = scalar_lea.vmem %s2254_s4, %s1371_s14  ;;  %s2065_s7 = scalar_lea.vmem %s2255_s5, %s1371_s14 }
  0x6b   : > { %v1812_v0 = vmov 0.0  }
  0x6c   : > { %660 = vst [vmem:[#allocation2] sm:$0xff] %v1812_v0 }
  0x6d   : > { %661 = vst [vmem:[#allocation2 + $0x8] sm:$0xff] %v1812_v0 }
  0x6e PF: > { %v1433_v1 = vld [vmem:[%s2067_s30 + $0x70] sm:$0xf]  ;;  %v1650_v2 = vld [vmem:[%s2067_s30 + $0x74] sm:$0xf0]  ;;  %v1425_v12 = vld [vmem:[%s2067_s30 + $0x60] sm:$0xf] }
  0x6f   : > { %v1497_v3 = vld [vmem:[%s2067_s30 + $0xf0] sm:$0xf]  ;;  %v1434_v4 = vor.u32 %v1650_v2, %v1433_v1  ;;  %v1666_v5 = vld [vmem:[%s2067_s30 + $0xf4] sm:$0xf0]  ;;  %v1648_v14 = vld [vmem:[%s2067_s30 + $0x64] sm:$0xf0] }
  0x70   : > { %v1561_v6 = vld [vmem:[%s2067_s30 + $0x170] sm:$0xf]  ;;  %v1682_v7 = vld [vmem:[%s2067_s30 + $0x174] sm:$0xf0]  ;;  %v1498_v8 = vor.u32 %v1666_v5, %v1497_v3  ;;  %v1489_v15 = vld [vmem:[%s2067_s30 + $0xe0] sm:$0xf]  ;;  %v1426_v17 = vor.u32 %v1648_v14, %v1425_v12 }
  0x71   : > { %v1562_v9 = vor.u32 %v1682_v7, %v1561_v6  ;;  %v1625_v10 = vld [vmem:[%s2067_s30 + $0x1f0] sm:$0xf]  ;;  %v1698_v11 = vld [vmem:[%s2067_s30 + $0x1f4] sm:$0xf0]  ;;  %1064 = vmatpush.bf16.msra.mxu0 %v1434_v4  ;;  %v1664_v16 = vld [vmem:[%s2067_s30 + $0xe4] sm:$0xf0] }
  0x72   : > { %v1626_v13 = vor.u32 %v1698_v11, %v1625_v10  ;;  %1077 = vmatpush.bf16.msra.mxu1 %v1498_v8  ;;  %v1490_v18 = vor.u32 %v1664_v16, %v1489_v15  ;;  %v1553_v19 = vld [vmem:[%s2067_s30 + $0x160] sm:$0xf]  ;;  %v1680_v20 = vld [vmem:[%s2067_s30 + $0x164] sm:$0xf0]  ;;  %v1417_v24 = vld [vmem:[%s2067_s30 + $0x50] sm:$0xf] }
  0x73   : > { %1090 = vmatpush.bf16.msra.mxu2 %v1562_v9  ;;  %v1617_v21 = vld [vmem:[%s2067_s30 + $0x1e0] sm:$0xf]  ;;  %v1554_v22 = vor.u32 %v1680_v20, %v1553_v19  ;;  %v1696_v23 = vld [vmem:[%s2067_s30 + $0x1e4] sm:$0xf0]  ;;  %v1646_v25 = vld [vmem:[%s2067_s30 + $0x54] sm:$0xf0] }
  0x74   : > { %1103 = vmatpush.bf16.msra.mxu3 %v1626_v13  ;;  %v1618_v26 = vor.u32 %v1696_v23, %v1617_v21  ;;  %v1481_v27 = vld [vmem:[%s2067_s30 + $0xd0] sm:$0xf]  ;;  %v1662_v28 = vld [vmem:[%s2067_s30 + $0xd4] sm:$0xf0]  ;;  %v1418_v30 = vor.u32 %v1646_v25, %v1417_v24  ;;  %v1409_v36 = vld [vmem:[%s2067_s30 + $0x40] sm:$0xf] }
  0x75   : > { %v1545_v29 = vld [vmem:[%s2067_s30 + $0x150] sm:$0xf]  ;;  %1065 = vmatpush.bf16.msra.mxu0 %v1426_v17  ;;  %v1678_v31 = vld [vmem:[%s2067_s30 + $0x154] sm:$0xf0]  ;;  %v1482_v34 = vor.u32 %v1662_v28, %v1481_v27  ;;  %v1644_v37 = vld [vmem:[%s2067_s30 + $0x44] sm:$0xf0] }
  0x76   : > { %v1609_v32 = vld [vmem:[%s2067_s30 + $0x1d0] sm:$0xf]  ;;  %v1694_v33 = vld [vmem:[%s2067_s30 + $0x1d4] sm:$0xf0]  ;;  %1078 = vmatpush.bf16.msra.mxu1 %v1490_v18  ;;  %v1546_v35 = vor.u32 %v1678_v31, %v1545_v29  ;;  %v1473_v38 = vld [vmem:[%s2067_s30 + $0xc0] sm:$0xf]  ;;  %v1410_v45 = vor.u32 %v1644_v37, %v1409_v36 }
  0x77   : > { %1091 = vmatpush.bf16.msra.mxu2 %v1554_v22  ;;  %v1610_v39 = vor.u32 %v1694_v33, %v1609_v32  ;;  %v1660_v40 = vld [vmem:[%s2067_s30 + $0xc4] sm:$0xf0]  ;;  %v1537_v41 = vld [vmem:[%s2067_s30 + $0x140] sm:$0xf]  ;;  %v1401_v48 = vld [vmem:[%s2067_s30 + $0x30] sm:$0xf] }
  0x78   : > { %1104 = vmatpush.bf16.msra.mxu3 %v1618_v26  ;;  %v1676_v42 = vld [vmem:[%s2067_s30 + $0x144] sm:$0xf0]  ;;  %v1601_v43 = vld [vmem:[%s2067_s30 + $0x1c0] sm:$0xf]  ;;  %v1474_v46 = vor.u32 %v1660_v40, %v1473_v38  ;;  %v1642_v49 = vld [vmem:[%s2067_s30 + $0x34] sm:$0xf0] }
  0x79   : > { %v1692_v44 = vld [vmem:[%s2067_s30 + $0x1c4] sm:$0xf0]  ;;  %1066 = vmatpush.bf16.msra.mxu0 %v1418_v30  ;;  %v1538_v47 = vor.u32 %v1676_v42, %v1537_v41  ;;  %v1465_v50 = vld [vmem:[%s2067_s30 + $0xb0] sm:$0xf]  ;;  %v1658_v52 = vld [vmem:[%s2067_s30 + $0xb4] sm:$0xf0]  ;;  %v1402_v57 = vor.u32 %v1642_v49, %v1401_v48 }
  0x7a   : > { %1079 = vmatpush.bf16.msra.mxu1 %v1482_v34  ;;  %v1602_v51 = vor.u32 %v1692_v44, %v1601_v43  ;;  %v1529_v53 = vld [vmem:[%s2067_s30 + $0x130] sm:$0xf]  ;;  %v1674_v54 = vld [vmem:[%s2067_s30 + $0x134] sm:$0xf0]  ;;  %v1466_v58 = vor.u32 %v1658_v52, %v1465_v50  ;;  %v1393_v60 = vld [vmem:[%s2067_s30 + $0x20] sm:$0xf] }
  0x7b   : > { %1092 = vmatpush.bf16.msra.mxu2 %v1546_v35  ;;  %v1593_v55 = vld [vmem:[%s2067_s30 + $0x1b0] sm:$0xf]  ;;  %v1690_v56 = vld [vmem:[%s2067_s30 + $0x1b4] sm:$0xf0]  ;;  %v1530_v59 = vor.u32 %v1674_v54, %v1529_v53  ;;  %v1640_v61 = vld [vmem:[%s2067_s30 + $0x24] sm:$0xf0] }
  0x7c   : > { %1105 = vmatpush.bf16.msra.mxu3 %v1610_v39  ;;  %v1457_v62 = vld [vmem:[%s2067_s30 + $0xa0] sm:$0xf]  ;;  %v1594_v63 = vor.u32 %v1690_v56, %v1593_v55  ;;  %v1656_v0 = vld [vmem:[%s2067_s30 + $0xa4] sm:$0xf0]  ;;  %v1394_v5 = vor.u32 %v1640_v61, %v1393_v60  ;;  %v1385_v8 = vld [vmem:[%s2067_s30 + $0x10] sm:$0xf] }
  0x7d   : > { %1067 = vmatpush.bf16.msra.mxu0 %v1410_v45  ;;  %v1521_v1 = vld [vmem:[%s2067_s30 + $0x120] sm:$0xf]  ;;  %v1672_v2 = vld [vmem:[%s2067_s30 + $0x124] sm:$0xf0]  ;;  %v1458_v6 = vor.u32 %v1656_v0, %v1457_v62  ;;  %v1638_v9 = vld [vmem:[%s2067_s30 + $0x14] sm:$0xf0] }
  0x7e   : > { %1080 = vmatpush.bf16.msra.mxu1 %v1474_v46  ;;  %v1585_v3 = vld [vmem:[%s2067_s30 + $0x1a0] sm:$0xf]  ;;  %v1688_v4 = vld [vmem:[%s2067_s30 + $0x1a4] sm:$0xf0]  ;;  %v1522_v7 = vor.u32 %v1672_v2, %v1521_v1  ;;  %v1449_v10 = vld [vmem:[%s2067_s30 + $0x90] sm:$0xf]  ;;  %v1386_v17 = vor.u32 %v1638_v9, %v1385_v8 }
  0x7f   : > { %1093 = vmatpush.bf16.msra.mxu2 %v1538_v47  ;;  %v1586_v11 = vor.u32 %v1688_v4, %v1585_v3  ;;  %v1654_v12 = vld [vmem:[%s2067_s30 + $0x94] sm:$0xf0]  ;;  %v1513_v13 = vld [vmem:[%s2067_s30 + $0x110] sm:$0xf]  ;;  %v1377_v18 = vld [vmem:[%s2067_s30] sm:$0xf] }
  0x80   : > { %1106 = vmatpush.bf16.msra.mxu3 %v1602_v51  ;;  %v1670_v14 = vld [vmem:[%s2067_s30 + $0x114] sm:$0xf0]  ;;  %v1577_v15 = vld [vmem:[%s2067_s30 + $0x190] sm:$0xf]  ;;  %v1636_v19 = vld [vmem:[%s2067_s30 + $0x4] sm:$0xf0]  ;;  %v1450_v21 = vor.u32 %v1654_v12, %v1449_v10 }
  0x81   : > { %1068 = vmatpush.bf16.msra.mxu0 %v1402_v57  ;;  %v1686_v16 = vld [vmem:[%s2067_s30 + $0x194] sm:$0xf0]  ;;  %v1441_v20 = vld [vmem:[%s2067_s30 + $0x80] sm:$0xf]  ;;  %v1514_v22 = vor.u32 %v1670_v14, %v1513_v13  ;;  %v1652_v23 = vld [vmem:[%s2067_s30 + $0x84] sm:$0xf0]  ;;  %v1378_v33 = vor.u32 %v1636_v19, %v1377_v18 }
  0x82   : > { %1081 = vmatpush.bf16.msra.mxu1 %v1466_v58  ;;  %v1505_v24 = vld [vmem:[%s2067_s30 + $0x100] sm:$0xf]  ;;  %v1668_v25 = vld [vmem:[%s2067_s30 + $0x104] sm:$0xf0]  ;;  %v1578_v26 = vor.u32 %v1686_v16, %v1577_v15  ;;  %v1649_v29 = vld [vmem:[%s2067_s30 + $0x74] sm:$0xf]  ;;  %v1442_v38 = vor.u32 %v1652_v23, %v1441_v20 }
  0x83   : > { %1094 = vmatpush.bf16.msra.mxu2 %v1530_v59  ;;  %v1569_v27 = vld [vmem:[%s2067_s30 + $0x180] sm:$0xf]  ;;  %v1684_v28 = vld [vmem:[%s2067_s30 + $0x184] sm:$0xf0]  ;;  %v1435_v30 = vld [vmem:[%s2067_s30 + $0x78] sm:$0xf0]  ;;  %v1506_v39 = vor.u32 %v1668_v25, %v1505_v24 }
  0x84   : > { %1107 = vmatpush.bf16.msra.mxu3 %v1594_v63  ;;  %v1665_v31 = vld [vmem:[%s2067_s30 + $0xf4] sm:$0xf]  ;;  %v665_v32 = vld [vmem:[%s2046_s9 + $0x8] sm:$0xff]  ;;  %v1570_v43 = vor.u32 %v1684_v28, %v1569_v27  ;;  %v1438_v44 = vor.u32 %v1649_v29, %v1435_v30  ;;  %v1647_v48 = vld [vmem:[%s2067_s30 + $0x64] sm:$0xf]  ;;  %p1631_p13 = scmp.ne.s32.totalorder %s1794_s20, 8 }
  0x85   : > { %1069 = vmatpush.bf16.msra.mxu0 %v1394_v5  ;;  %v1499_v34 = vld [vmem:[%s2067_s30 + $0xf8] sm:$0xf0]  ;;  %v1681_v35 = vld [vmem:[%s2067_s30 + $0x174] sm:$0xf]  ;;  %v734_v37 = vunpack.c.l.b16 %v665_v32  ;;  %v735_v42 = vunpack.c.h.b16 %v665_v32  ;;  %v1427_v49 = vld [vmem:[%s2067_s30 + $0x68] sm:$0xf0] }
  0x86   : > { %1082 = vmatpush.bf16.msra.mxu1 %v1458_v6  ;;  %v1563_v36 = vld [vmem:[%s2067_s30 + $0x178] sm:$0xf0]  ;;  %v1697_v40 = vld [vmem:[%s2067_s30 + $0x1f4] sm:$0xf]  ;;  %v1502_v46 = vor.u32 %v1665_v31, %v1499_v34  ;;  %v1663_v50 = vld [vmem:[%s2067_s30 + $0xe4] sm:$0xf]  ;;  %v1430_v62 = vor.u32 %v1647_v48, %v1427_v49 }
  0x87   : > { %1095 = vmatpush.bf16.msra.mxu2 %v1522_v7  ;;  %v1627_v41 = vld [vmem:[%s2067_s30 + $0x1f8] sm:$0xf0]  ;;  %v664_v45 = vld [vmem:[%s2046_s9] sm:$0xff]  ;;  %v1566_v47 = vor.u32 %v1681_v35, %v1563_v36  ;;  %v1491_v54 = vld [vmem:[%s2067_s30 + $0xe8] sm:$0xf0]  ;;  %v2150_v57 = vpack.c.b16 %v734_v37, %v734_v37  ;;  %v2154_v60 = vpack.c.b16 %v735_v42, %v735_v42 }
  0x88   : > { %1108 = vmatpush.bf16.msra.mxu3 %v1586_v11  ;;  %v732_v51 = vunpack.c.l.b16 %v664_v45  ;;  %v733_v52 = vunpack.c.h.b16 %v664_v45  ;;  %v1630_v53 = vor.u32 %v1697_v40, %v1627_v41  ;;  %v1679_v55 = vld [vmem:[%s2067_s30 + $0x164] sm:$0xf]  ;;  %v1555_v56 = vld [vmem:[%s2067_s30 + $0x168] sm:$0xf0]  ;;  %v1494_v0 = vor.u32 %v1663_v50, %v1491_v54  ;;  %v1645_v2 = vld [vmem:[%s2067_s30 + $0x54] sm:$0xf] }
  0x89   : > { %1070 = vmatpush.bf16.msra.mxu0 %v1386_v17  ;;  %v1695_v58 = vld [vmem:[%s2067_s30 + $0x1e4] sm:$0xf]  ;;  %v1619_v59 = vld [vmem:[%s2067_s30 + $0x1e8] sm:$0xf0]  ;;  %v1558_v1 = vor.u32 %v1679_v55, %v1555_v56  ;;  %v1419_v3 = vld [vmem:[%s2067_s30 + $0x58] sm:$0xf0] }
  0x8a   : > { %1083 = vmatpush.bf16.msra.mxu1 %v1450_v21  ;;  %v2156_v61 = vpack.c.b16 %v732_v51, %v732_v51  ;;  %v2158_v63 = vpack.c.b16 %v733_v52, %v733_v52  ;;  %v1661_v4 = vld [vmem:[%s2067_s30 + $0xd4] sm:$0xf]  ;;  %v1622_v5 = vor.u32 %v1695_v58, %v1619_v59  ;;  %v1483_v6 = vld [vmem:[%s2067_s30 + $0xd8] sm:$0xf0]  ;;  %v1422_v11 = vor.u32 %v1645_v2, %v1419_v3  ;;  %v1643_v14 = vld [vmem:[%s2067_s30 + $0x44] sm:$0xf] }
  0x8b   : > { %1096 = vmatpush.bf16.msra.mxu2 %v1514_v22  ;;  %v1677_v7 = vld [vmem:[%s2067_s30 + $0x154] sm:$0xf]  ;;  %v1547_v8 = vld [vmem:[%s2067_s30 + $0x158] sm:$0xf0]  ;;  %v1486_v12 = vor.u32 %v1661_v4, %v1483_v6  ;;  %v1411_v15 = vld [vmem:[%s2067_s30 + $0x48] sm:$0xf0] }
  0x8c   : > { %1109 = vmatpush.bf16.msra.mxu3 %v1578_v26  ;;  %v1693_v9 = vld [vmem:[%s2067_s30 + $0x1d4] sm:$0xf]  ;;  %v1611_v10 = vld [vmem:[%s2067_s30 + $0x1d8] sm:$0xf0]  ;;  %v1550_v13 = vor.u32 %v1677_v7, %v1547_v8  ;;  %v1659_v16 = vld [vmem:[%s2067_s30 + $0xc4] sm:$0xf]  ;;  %v1414_v23 = vor.u32 %v1643_v14, %v1411_v15 }
  0x8d   : > { %1071 = vmatpush.bf16.msra.mxu0 %v1378_v33  ;;  %v1614_v17 = vor.u32 %v1693_v9, %v1611_v10  ;;  %v1475_v18 = vld [vmem:[%s2067_s30 + $0xc8] sm:$0xf0]  ;;  %v1675_v19 = vld [vmem:[%s2067_s30 + $0x144] sm:$0xf]  ;;  %v1641_v26 = vld [vmem:[%s2067_s30 + $0x34] sm:$0xf] }
  0x8e   : > { %1084 = vmatpush.bf16.msra.mxu1 %v1442_v38  ;;  %v1539_v20 = vld [vmem:[%s2067_s30 + $0x148] sm:$0xf0]  ;;  %v1691_v21 = vld [vmem:[%s2067_s30 + $0x1c4] sm:$0xf]  ;;  %v1478_v24 = vor.u32 %v1659_v16, %v1475_v18  ;;  %v1403_v27 = vld [vmem:[%s2067_s30 + $0x38] sm:$0xf0] }
  0x8f   : > { %1097 = vmatpush.bf16.msra.mxu2 %v1506_v39  ;;  %v1603_v22 = vld [vmem:[%s2067_s30 + $0x1c8] sm:$0xf0]  ;;  %v1542_v25 = vor.u32 %v1675_v19, %v1539_v20  ;;  %v1657_v28 = vld [vmem:[%s2067_s30 + $0xb4] sm:$0xf]  ;;  %v1467_v30 = vld [vmem:[%s2067_s30 + $0xb8] sm:$0xf0]  ;;  %v1406_v35 = vor.u32 %v1641_v26, %v1403_v27 }
  0x90   : > { %1110 = vmatpush.bf16.msra.mxu3 %v1570_v43  ;;  %1072 = vmatmul.bf16.vlgmr.msra.gmra.mxu0 %v2156_v61  ;;  %v1606_v29 = vor.u32 %v1691_v21, %v1603_v22  ;;  %v1673_v31 = vld [vmem:[%s2067_s30 + $0x134] sm:$0xf]  ;;  %v1531_v32 = vld [vmem:[%s2067_s30 + $0x138] sm:$0xf0]  ;;  %v1470_v36 = vor.u32 %v1657_v28, %v1467_v30  ;;  %v1639_v38 = vld [vmem:[%s2067_s30 + $0x24] sm:$0xf] }
  0x91   : > { %1116 = vmatpush.bf16.msrb.mxu0 %v1438_v44  ;;  %1085 = vmatmul.bf16.vlgmr.msra.gmra.mxu1 %v2158_v63  ;;  %v1689_v33 = vld [vmem:[%s2067_s30 + $0x1b4] sm:$0xf]  ;;  %v1595_v34 = vld [vmem:[%s2067_s30 + $0x1b8] sm:$0xf0]  ;;  %v1534_v37 = vor.u32 %v1673_v31, %v1531_v32  ;;  %v1395_v39 = vld [vmem:[%s2067_s30 + $0x28] sm:$0xf0] }
  0x92   : > { %1129 = vmatpush.bf16.msrb.mxu1 %v1502_v46  ;;  %1098 = vmatmul.bf16.vlgmr.msra.gmra.mxu2 %v2150_v57  ;;  %v1655_v40 = vld [vmem:[%s2067_s30 + $0xa4] sm:$0xf]  ;;  %v1598_v41 = vor.u32 %v1689_v33, %v1595_v34  ;;  %v1459_v42 = vld [vmem:[%s2067_s30 + $0xa8] sm:$0xf0]  ;;  %v1637_v50 = vld [vmem:[%s2067_s30 + $0x14] sm:$0xf] }
  0x93   : > { %1142 = vmatpush.bf16.msrb.mxu2 %v1566_v47  ;;  %1111 = vmatmul.bf16.vlgmr.msra.gmra.mxu3 %v2154_v60  ;;  %v1671_v43 = vld [vmem:[%s2067_s30 + $0x124] sm:$0xf]  ;;  %v1523_v44 = vld [vmem:[%s2067_s30 + $0x128] sm:$0xf0]  ;;  %v1398_v47 = vor.u32 %v1639_v38, %v1395_v39  ;;  %v1462_v48 = vor.u32 %v1655_v40, %v1459_v42  ;;  %v1387_v51 = vld [vmem:[%s2067_s30 + $0x18] sm:$0xf0] }
  0x94   : > { %1155 = vmatpush.bf16.msrb.mxu3 %v1630_v53  ;;  %v1687_v45 = vld [vmem:[%s2067_s30 + $0x1a4] sm:$0xf]  ;;  %v1587_v46 = vld [vmem:[%s2067_s30 + $0x1a8] sm:$0xf0]  ;;  %v1526_v49 = vor.u32 %v1671_v43, %v1523_v44  ;;  %v1653_v52 = vld [vmem:[%s2067_s30 + $0x94] sm:$0xf] }
  0x95   : > { %1117 = vmatpush.bf16.msrb.mxu0 %v1430_v62  ;;  %v1590_v53 = vor.u32 %v1687_v45, %v1587_v46  ;;  %v1451_v54 = vld [vmem:[%s2067_s30 + $0x98] sm:$0xf0]  ;;  %v1669_v55 = vld [vmem:[%s2067_s30 + $0x114] sm:$0xf]  ;;  %v1390_v62 = vor.u32 %v1637_v50, %v1387_v51  ;;  %v1635_v2 = vld [vmem:[%s2067_s30 + $0x4] sm:$0xf] }
  0x96   : > { %1130 = vmatpush.bf16.msrb.mxu1 %v1494_v0  ;;  %v1515_v56 = vld [vmem:[%s2067_s30 + $0x118] sm:$0xf0]  ;;  %v1685_v58 = vld [vmem:[%s2067_s30 + $0x194] sm:$0xf]  ;;  %v1454_v0 = vor.u32 %v1653_v52, %v1451_v54  ;;  %v1379_v3 = vld [vmem:[%s2067_s30 + $0x8] sm:$0xf0] }
  0x97   : > { %1143 = vmatpush.bf16.msrb.mxu2 %v1558_v1  ;;  %v1579_v59 = vld [vmem:[%s2067_s30 + $0x198] sm:$0xf0]  ;;  %v1518_v1 = vor.u32 %v1669_v55, %v1515_v56  ;;  %v1651_v4 = vld [vmem:[%s2067_s30 + $0x84] sm:$0xf]  ;;  %v1443_v6 = vld [vmem:[%s2067_s30 + $0x88] sm:$0xf0] }
  0x98   : > { %1156 = vmatpush.bf16.msrb.mxu3 %v1622_v5  ;;  %v1582_v5 = vor.u32 %v1685_v58, %v1579_v59  ;;  %v1667_v7 = vld [vmem:[%s2067_s30 + $0x104] sm:$0xf]  ;;  %v1507_v8 = vld [vmem:[%s2067_s30 + $0x108] sm:$0xf0]  ;;  %v662_v21 = vld [vmem:[#allocation2] sm:$0xff] }
  0x99   : > { %1118 = vmatpush.bf16.msrb.mxu0 %v1422_v11  ;;  %v1683_v9 = vld [vmem:[%s2067_s30 + $0x184] sm:$0xf]  ;;  %v1571_v10 = vld [vmem:[%s2067_s30 + $0x188] sm:$0xf0]  ;;  %v1382_v11 = vor.u32 %v1635_v2, %v1379_v3  ;;  %v663_v31 = vld [vmem:[#allocation2 + $0x8] sm:$0xff] }
  0x9a   : > { %1131 = vmatpush.bf16.msrb.mxu1 %v1486_v12  ;;  %v1446_v12 = vor.u32 %v1651_v4, %v1443_v6  ;;  %v1574_v14 = vor.u32 %v1683_v9, %v1571_v10 }
  0x9b   : > { %1144 = vmatpush.bf16.msrb.mxu2 %v1550_v13  ;;  %v1510_v13 = vor.u32 %v1667_v7, %v1507_v8 }
  0x9c   : > { %1157 = vmatpush.bf16.msrb.mxu3 %v1614_v17 }
  0x9d   : > { %1119 = vmatpush.bf16.msrb.mxu0 %v1414_v23 }
  0x9e   : > { %1132 = vmatpush.bf16.msrb.mxu1 %v1478_v24 }
  0x9f   : > { %1145 = vmatpush.bf16.msrb.mxu2 %v1542_v25 }
  0xa0   : > { %1158 = vmatpush.bf16.msrb.mxu3 %v1606_v29 }
  0xa1   : > { %1120 = vmatpush.bf16.msrb.mxu0 %v1406_v35 }
  0xa2   : > { %1133 = vmatpush.bf16.msrb.mxu1 %v1470_v36 }
  0xa3   : > { %1146 = vmatpush.bf16.msrb.mxu2 %v1534_v37 }
  0xa4   : > { %1159 = vmatpush.bf16.msrb.mxu3 %v1598_v41 }
  0xa5   : > { %1121 = vmatpush.bf16.msrb.mxu0 %v1398_v47 }
  0xa6   : > { %1134 = vmatpush.bf16.msrb.mxu1 %v1462_v48 }
  0xa7   : > { %1147 = vmatpush.bf16.msrb.mxu2 %v1526_v49 }
  0xa8   : > { %1160 = vmatpush.bf16.msrb.mxu3 %v1590_v53 }
  0xa9   : > { %1122 = vmatpush.bf16.msrb.mxu0 %v1390_v62 }
  0xaa   : > { %1135 = vmatpush.bf16.msrb.mxu1 %v1454_v0 }
  0xab   : > { %1148 = vmatpush.bf16.msrb.mxu2 %v1518_v1 }
  0xac   : > { %1161 = vmatpush.bf16.msrb.mxu3 %v1582_v5 }
  0xad   : > { %1123 = vmatpush.bf16.msrb.mxu0 %v1382_v11 }
  0xae   : > { %1136 = vmatpush.bf16.msrb.mxu1 %v1446_v12 }
  0xaf   : > { %1149 = vmatpush.bf16.msrb.mxu2 %v1510_v13 }
  0xb0   : > { %1162 = vmatpush.bf16.msrb.mxu3 %v1574_v14  ;;  %1124 = vmatmul.bf16.vlgmr.msrb.gmra.mxu0 %v2156_v61 }
  0xb1   : > { %1137 = vmatmul.bf16.vlgmr.msrb.gmra.mxu1 %v2158_v63 }
  0xb2   : > { %1150 = vmatmul.bf16.vlgmr.msrb.gmra.mxu2 %v2150_v57 }
  0xb3   : > { %1163 = vmatmul.bf16.vlgmr.msrb.gmra.mxu3 %v2154_v60 }
 0x10d   : > { %v1073_v15 = vpop.f32.mrf.mxu0 }
 0x10e   : > { %v1086_v16 = vpop.f32.mrf.mxu1 }
 0x10f   : > { %v1087_v17 = vadd.f32 %v1086_v16, %v1073_v15 }
 0x115   : > { %v1099_v18 = vpop.f32.mrf.mxu2  ;;  %v1075_v23 = vpop.f32.mrf.mxu0 }
 0x116   : > { %v1100_v19 = vadd.f32 %v1099_v18, %v1087_v17  ;;  %v1112_v20 = vpop.f32.mrf.mxu3  ;;  %v1088_v24 = vpop.f32.mrf.mxu1 }
 0x118   : > { %v1113_v22 = vadd.f32 %v1112_v20, %v1100_v19 }
 0x11a   : > { %v1168_v25 = vadd.f32 %v1113_v22, %v662_v21 }
 0x11c   : > { %1170 = vst [vmem:[#allocation2] sm:$0xff] %v1168_v25 }
 0x11d   : > { %v1101_v26 = vpop.f32.mrf.mxu2 }
 0x11e   : > { %v1114_v61 = vpop.f32.mrf.mxu3 }
 0x12d   : > { %v1125_v27 = vpop.f32.mrf.mxu0 }
 0x12e   : > { %v1138_v63 = vpop.f32.mrf.mxu1 }
 0x12f   : > { %v1139_v28 = vadd.f32 %v1138_v63, %v1125_v27 }
 0x135   : > { %v1151_v57 = vpop.f32.mrf.mxu2  ;;  %v1127_v30 = vpop.f32.mrf.mxu0 }
 0x136   : > { %v1152_v29 = vadd.f32 %v1151_v57, %v1139_v28  ;;  %v1164_v60 = vpop.f32.mrf.mxu3  ;;  %v1140_v32 = vpop.f32.mrf.mxu1 }
 0x138   : > { %v1165_v33 = vadd.f32 %v1164_v60, %v1152_v29 }
 0x13a   : > { %v1169_v34 = vadd.f32 %v1165_v33, %v663_v31  ;;  %1175 = sbr.rel (%p1631_p13) target bundleno = 335 (0x14f), region = 86 }
 0x13c   : > { %1171 = vst [vmem:[#allocation2 + $0x8] sm:$0xff] %v1169_v34 }
 0x13d   : > { %v1153_v35 = vpop.f32.mrf.mxu2 }
 0x13e   : > { %v1166_v36 = vpop.f32.mrf.mxu3 }
 0x13f   : > { %v1176_v37 = vld [vmem:[#allocation2] sm:$0xff] }
 0x140   : > { %v1178_v39 = vld [vmem:[%s629_s18] sm:$0x3] }
 0x141   : > { %v1180_v40 = vperm.slane %v1178_v39, 0  ;;  %v1181_v41 = vperm.slane %v1178_v39, 1  ;;  %v1186_v42 = vld [vmem:[%s634_s21] sm:$0x3] }
 0x142   : > { %v1194_v43 = vld [vmem:[%s2060_s17] sm:$0xff]  ;;  %v1188_v44 = vperm.slane %v1186_v42, 0  ;;  %v1189_v45 = vperm.slane %v1186_v42, 1 }
 0x143   : > { %v1177_v38 = vld [vmem:[#allocation2 + $0x8] sm:$0xff]  ;;  %v1184_v46 = vmul.f32 %v1180_v40, %v1176_v37  ;;  %v1195_v48 = vunpack.c.l.bf16 %v1194_v43  ;;  %v1196_v49 = vunpack.c.h.bf16 %v1194_v43 }
 0x144   : > { %v1185_v47 = vmul.f32 %v1181_v41, %v1177_v38 }
 0x145   : > { %v1192_v50 = vadd.f32 %v1188_v44, %v1184_v46 }
 0x146   : > { %v1193_v51 = vadd.f32 %v1189_v45, %v1185_v47 }
 0x147   : > { %v1197_v52 = vadd.f32 %v1195_v48, %v1192_v50 }
 0x148   : > { %v1198_v53 = vadd.f32 %v1196_v49, %v1193_v51 }
 0x149   : > { %v1199_v54 = vmax.f32 %v1197_v52, 0.0 }
 0x14a   : > { %v1200_v55 = vmax.f32 %v1198_v53, 0.0 }
 0x14c   : > { %v1201_v56 = vpack.c.bf16 %v1200_v55, %v1199_v54 }
 0x14e   : > { %1202 = vst [vmem:[%s2065_s7] sm:$0xff] %v1201_v56 }
 0x14f PF: > { %s15_s24 = sadd.s32 1, %s1810_s24   ;;  %s2258_s18 = smov %s1790_s19 }
 0x150   : > { %p12_p0 = scmp.ge.s32.totalorder %s15_s24, 20   ;;  %s2259_s19 = smov %s1894_s6 }
 0x151   : > { %s2260_s20 = smov %s1802_s22  ;;  %s2261_s21 = smov %s1806_s23 }
 0x152   : > { %s2262_s22 = smov %s2265_s25  ;;  %s2263_s23 = smov %s2269_s26 }
 0x153   :  { %14 = sbr.rel (!%p12_p0) target bundleno = 6 (0x6), region = 133 }

// kernel: forward.47
= control target key start
LH: loop header
LB: loop body
LE: loop exit
PB: predicated region body
PF: predicated region fallthrough
CT: control target
= control target key end

     0   :  { %s666_s1 = inlined_call_operand.vmem [shape: bf16[1,512,128], index: 1, kind: input, shape index: {}]   ;;  %s667_s0 = inlined_call_operand.vmem [shape: bf16[1,8,512], index: 0, kind: input, shape index: {}]   ;;  %s668_s2 = inlined_call_operand.vmem [shape: f32[1,128], index: 2, kind: input, shape index: {}]   ;;  %s669_s3 = inlined_call_operand.vmem [shape: f32[1,128], index: 3, kind: input, shape index: {}]   ;;  %s670_s4 = inlined_call_operand.vmem [shape: f32[8,128], index: 4, kind: output, shape index: {}]  }
   0x1   :  { %v503_v0 = vld [vmem:[%s666_s1 + $0x38] sm:$0xff]  ;;  %v502_v4 = vld [vmem:[%s666_s1 + $0x30] sm:$0xff]  ;;  %v501_v8 = vld [vmem:[%s666_s1 + $0x28] sm:$0xff] }
   0x2   :  { %v511_v1 = vld [vmem:[%s666_s1 + $0x78] sm:$0xff]  ;;  %295 = vmatpush.bf16.msra.mxu0 %v503_v0  ;;  %v510_v5 = vld [vmem:[%s666_s1 + $0x70] sm:$0xff]  ;;  %v509_v9 = vld [vmem:[%s666_s1 + $0x68] sm:$0xff] }
   0x3   :  { %v519_v2 = vld [vmem:[%s666_s1 + $0xb8] sm:$0xff]  ;;  %308 = vmatpush.bf16.msra.mxu1 %v511_v1  ;;  %v518_v6 = vld [vmem:[%s666_s1 + $0xb0] sm:$0xff]  ;;  %v517_v10 = vld [vmem:[%s666_s1 + $0xa8] sm:$0xff] }
   0x4   :  { %v527_v3 = vld [vmem:[%s666_s1 + $0xf8] sm:$0xff]  ;;  %321 = vmatpush.bf16.msra.mxu2 %v519_v2  ;;  %v526_v7 = vld [vmem:[%s666_s1 + $0xf0] sm:$0xff]  ;;  %v525_v11 = vld [vmem:[%s666_s1 + $0xe8] sm:$0xff] }
   0x5   :  { %334 = vmatpush.bf16.msra.mxu3 %v527_v3  ;;  %v500_v12 = vld [vmem:[%s666_s1 + $0x20] sm:$0xff]  ;;  %v499_v16 = vld [vmem:[%s666_s1 + $0x18] sm:$0xff]  ;;  %v498_v20 = vld [vmem:[%s666_s1 + $0x10] sm:$0xff] }
   0x6   :  { %296 = vmatpush.bf16.msra.mxu0 %v502_v4  ;;  %v508_v13 = vld [vmem:[%s666_s1 + $0x60] sm:$0xff]  ;;  %v507_v17 = vld [vmem:[%s666_s1 + $0x58] sm:$0xff]  ;;  %v506_v21 = vld [vmem:[%s666_s1 + $0x50] sm:$0xff] }
   0x7   :  { %309 = vmatpush.bf16.msra.mxu1 %v510_v5  ;;  %v516_v14 = vld [vmem:[%s666_s1 + $0xa0] sm:$0xff]  ;;  %v515_v18 = vld [vmem:[%s666_s1 + $0x98] sm:$0xff]  ;;  %v514_v22 = vld [vmem:[%s666_s1 + $0x90] sm:$0xff] }
   0x8   :  { %322 = vmatpush.bf16.msra.mxu2 %v518_v6  ;;  %v524_v15 = vld [vmem:[%s666_s1 + $0xe0] sm:$0xff]  ;;  %v523_v19 = vld [vmem:[%s666_s1 + $0xd8] sm:$0xff]  ;;  %v522_v23 = vld [vmem:[%s666_s1 + $0xd0] sm:$0xff] }
   0x9   :  { %335 = vmatpush.bf16.msra.mxu3 %v526_v7  ;;  %v497_v24 = vld [vmem:[%s666_s1 + $0x8] sm:$0xff]  ;;  %v23_v26 = vld [vmem:[%s667_s0] sm:$0xff] }
   0xa   :  { %297 = vmatpush.bf16.msra.mxu0 %v501_v8  ;;  %v505_v25 = vld [vmem:[%s666_s1 + $0x48] sm:$0xff]  ;;  %v91_v30 = vunpack.c.l.b16 %v23_v26  ;;  %v92_v31 = vunpack.c.h.b16 %v23_v26  ;;  %v496_v32 = vld [vmem:[%s666_s1] sm:$0xff] }
   0xb   :  { %310 = vmatpush.bf16.msra.mxu1 %v509_v9  ;;  %v513_v27 = vld [vmem:[%s666_s1 + $0x88] sm:$0xff]  ;;  %v504_v33 = vld [vmem:[%s666_s1 + $0x40] sm:$0xff] }
   0xc   :  { %323 = vmatpush.bf16.msra.mxu2 %v517_v10  ;;  %v521_v28 = vld [vmem:[%s666_s1 + $0xc8] sm:$0xff]  ;;  %v512_v36 = vld [vmem:[%s666_s1 + $0x80] sm:$0xff]  ;;  %v95_v38 = vpack.c.b16 %v91_v30, %v91_v30  ;;  %v96_v39 = vpack.c.b16 %v92_v31, %v92_v31 }
   0xd   :  { %336 = vmatpush.bf16.msra.mxu3 %v525_v11  ;;  %v24_v29 = vld [vmem:[%s667_s0 + $0x8] sm:$0xff]  ;;  %v520_v37 = vld [vmem:[%s666_s1 + $0xc0] sm:$0xff] }
   0xe   :  { %298 = vmatpush.bf16.msra.mxu0 %v500_v12  ;;  %v93_v34 = vunpack.c.l.b16 %v24_v29  ;;  %v94_v35 = vunpack.c.h.b16 %v24_v29  ;;  %v528_v48 = vld [vmem:[%s668_s2] ss:$0 sm:$0xff] }
   0xf   :  { %311 = vmatpush.bf16.msra.mxu1 %v508_v13  ;;  %v529_v52 = vld [vmem:[%s669_s3] ss:$0 sm:$0xff] }
  0x10   :  { %324 = vmatpush.bf16.msra.mxu2 %v516_v14  ;;  %v97_v40 = vpack.c.b16 %v93_v34, %v93_v34  ;;  %v98_v41 = vpack.c.b16 %v94_v35, %v94_v35 }
  0x11   :  { %337 = vmatpush.bf16.msra.mxu3 %v524_v15 }
  0x12   :  { %299 = vmatpush.bf16.msra.mxu0 %v499_v16 }
  0x13   :  { %312 = vmatpush.bf16.msra.mxu1 %v507_v17 }
  0x14   :  { %325 = vmatpush.bf16.msra.mxu2 %v515_v18 }
  0x15   :  { %338 = vmatpush.bf16.msra.mxu3 %v523_v19 }
  0x16   :  { %300 = vmatpush.bf16.msra.mxu0 %v498_v20 }
  0x17   :  { %313 = vmatpush.bf16.msra.mxu1 %v506_v21 }
  0x18   :  { %326 = vmatpush.bf16.msra.mxu2 %v514_v22 }
  0x19   :  { %339 = vmatpush.bf16.msra.mxu3 %v522_v23 }
  0x1a   :  { %301 = vmatpush.bf16.msra.mxu0 %v497_v24 }
  0x1b   :  { %314 = vmatpush.bf16.msra.mxu1 %v505_v25 }
  0x1c   :  { %327 = vmatpush.bf16.msra.mxu2 %v513_v27 }
  0x1d   :  { %340 = vmatpush.bf16.msra.mxu3 %v521_v28 }
  0x1e   :  { %302 = vmatpush.bf16.msra.mxu0 %v496_v32 }
  0x1f   :  { %315 = vmatpush.bf16.msra.mxu1 %v504_v33 }
  0x20   :  { %328 = vmatpush.bf16.msra.mxu2 %v512_v36 }
  0x21   :  { %341 = vmatpush.bf16.msra.mxu3 %v520_v37  ;;  %303 = vmatmul.bf16.vlgmr.msra.gmra.mxu0 %v95_v38 }
  0x22   :  { %316 = vmatmul.bf16.vlgmr.msra.gmra.mxu1 %v96_v39 }
  0x23   :  { %329 = vmatmul.bf16.vlgmr.msra.gmra.mxu2 %v97_v40 }
  0x24   :  { %342 = vmatmul.bf16.vlgmr.msra.gmra.mxu3 %v98_v41 }
  0x9e   :  { %v304_v42 = vpop.f32.mrf.mxu0 }
  0x9f   :  { %v317_v43 = vpop.f32.mrf.mxu1 }
  0xa0   :  { %v318_v44 = vadd.f32 %v317_v43, %v304_v42 }
  0xa6   :  { %v330_v45 = vpop.f32.mrf.mxu2  ;;  %v306_v49 = vpop.f32.mrf.mxu0 }
  0xa7   :  { %v343_v46 = vpop.f32.mrf.mxu3  ;;  %v331_v47 = vadd.f32 %v330_v45, %v318_v44  ;;  %v319_v50 = vpop.f32.mrf.mxu1 }
  0xa9   :  { %v344_v51 = vadd.f32 %v343_v46, %v331_v47 }
  0xab   :  { %v357_v53 = vmul.f32 %v528_v48, %v344_v51 }
  0xad   :  { %v362_v54 = vadd.f32 %v529_v52, %v357_v53 }
  0xae   :  { %v332_v55 = vpop.f32.mrf.mxu2 }
  0xaf   :  { %v345_v56 = vpop.f32.mrf.mxu3  ;;  %363 = vst [vmem:[%s670_s4] sm:$0xff] %v362_v54 }

// kernel: forward.46
= control target key start
LH: loop header
LB: loop body
LE: loop exit
PB: predicated region body
PF: predicated region fallthrough
CT: control target
= control target key end

     0   :  { %s1711_s15 = smov 0   ;;  %s1713_s16 = smov 0   ;;  %s2071_s0 = inlined_call_operand.vmem [shape: bf16[1,8,512], index: 0, kind: input, shape index: {}]   ;;  %s2072_s1 = inlined_call_operand.vmem [shape: bf16[1,512,512], index: 1, kind: input, shape index: {}]   ;;  %s2073_s2 = inlined_call_operand.vmem [shape: f32[1,512], index: 2, kind: input, shape index: {}]   ;;  %s2074_s3 = inlined_call_operand.vmem [shape: f32[1,512], index: 3, kind: input, shape index: {}]   ;;  %s2075_s4 = inlined_call_operand.vmem [shape: bf16[8,512], index: 4, kind: output, shape index: {}]  }
   0x1   :  { %s1715_s17 = smov 0   ;;  %s1717_s18 = smov 0  }
   0x2   :  { %s1719_s19 = smov 0  }
   0x3 LB: > { %s29_s20 = sadd.s32 1, %s1680_s18  ;;  %p77_p1 = scmp.ne.s32.totalorder %s1672_s16, %s1668_s15  ;;  %s1684_s19 = sphi %s1719_s19, %s14_s19   ;;  %s1680_s18 = sphi %s1717_s18, %s2079_s18   ;;  %s1676_s17 = sphi %s1715_s17, %s2078_s17   ;;  %s1672_s16 = sphi %s1713_s16, %s2077_s16   ;;  %s1668_s15 = sphi %s1711_s15, %s2076_s15  }
   0x4   : > { %p31_p0 = scmp.ge.s32.totalorder %s29_s20, 2  ;;  %p78_p2 = scmp.eq.s32.totalorder %s1684_s19, 0 }
   0x5   : > { %s70_s22 = sadd.s32 1, %s1672_s16  ;;  %p1273_p5 = scmp.ge.s32.totalorder %s1684_s19, 2 }
   0x6   : > { %s2081_s20 = smov (%p31_p0, %s29_s20), 0  ;;  %p79_p3 = por %p78_p2, %p77_p1 }
   0x7   : > { %s66_s21 = ssub.s32 %s1680_s18, %s2081_s20  ;;  %195 = sbr.rel (%p1273_p5) target bundleno = 80 (0x50), region = 20 }
   0x8   : > { %p68_p4 = scmp.eq.s32.totalorder %s66_s21, 0 }
   0xa   : > { %s1746_s23 = scalar_select %p68_p4, %s1672_s16, %s70_s22  }
   0xc   : > { %198 = sbr.rel (!%p79_p3) target bundleno = 80 (0x50), region = 24  ;;  %s200_s24 = sand.u32 (%p79_p3), 1, %s1672_s16  }
   0xd   : > { %s1541_s25 = sshll.u32 (%p79_p3), %s1680_s18, 3  ;;  %s1274_s26 = sshll.u32 (%p79_p3), %s200_s24, 9 }
   0xe   : > { %s1754_s29 = scalar_lea.vmem (%p79_p3), %s2072_s1, %s1541_s25  ;;  %s1759_s30 = scalar_lea.vmem (%p79_p3), [#allocation3], %s1274_s26 }
   0xf   : > { %v362_v0 = vld [vmem:[%s1754_s29] sm:$0xff] (%p79_p3)  ;;  %v364_v1 = vld [vmem:[%s1754_s29 + $0x10] sm:$0xff] (%p79_p3) }
  0x10   : > { %v366_v2 = vld [vmem:[%s1754_s29 + $0x20] sm:$0xff] (%p79_p3)  ;;  %363 = vst [vmem:[%s1759_s30] sm:$0xff] (%p79_p3), %v362_v0  ;;  %v368_v3 = vld [vmem:[%s1754_s29 + $0x30] sm:$0xff] (%p79_p3) }
  0x11   : > { %365 = vst [vmem:[%s1759_s30 + $0x8] sm:$0xff] %v364_v1  ;;  %v370_v4 = vld [vmem:[%s1754_s29 + $0x40] sm:$0xff]  ;;  %v372_v5 = vld [vmem:[%s1754_s29 + $0x50] sm:$0xff] }
  0x12   : > { %367 = vst [vmem:[%s1759_s30 + $0x10] sm:$0xff] %v366_v2  ;;  %v374_v6 = vld [vmem:[%s1754_s29 + $0x60] sm:$0xff]  ;;  %v376_v7 = vld [vmem:[%s1754_s29 + $0x70] sm:$0xff] }
  0x13   : > { %369 = vst [vmem:[%s1759_s30 + $0x18] sm:$0xff] %v368_v3  ;;  %v378_v8 = vld [vmem:[%s1754_s29 + $0x80] sm:$0xff]  ;;  %v380_v9 = vld [vmem:[%s1754_s29 + $0x90] sm:$0xff] }
  0x14   : > { %371 = vst [vmem:[%s1759_s30 + $0x20] sm:$0xff] %v370_v4  ;;  %v382_v10 = vld [vmem:[%s1754_s29 + $0xa0] sm:$0xff]  ;;  %v384_v11 = vld [vmem:[%s1754_s29 + $0xb0] sm:$0xff] }
  0x15   : > { %373 = vst [vmem:[%s1759_s30 + $0x28] sm:$0xff] %v372_v5  ;;  %v386_v12 = vld [vmem:[%s1754_s29 + $0xc0] sm:$0xff]  ;;  %v388_v13 = vld [vmem:[%s1754_s29 + $0xd0] sm:$0xff] }
  0x16   : > { %375 = vst [vmem:[%s1759_s30 + $0x30] sm:$0xff] %v374_v6  ;;  %v390_v14 = vld [vmem:[%s1754_s29 + $0xe0] sm:$0xff]  ;;  %v392_v15 = vld [vmem:[%s1754_s29 + $0xf0] sm:$0xff] }
  0x17   : > { %377 = vst [vmem:[%s1759_s30 + $0x38] sm:$0xff] %v376_v7  ;;  %v394_v16 = vld [vmem:[%s1754_s29 + $0x100] sm:$0xff]  ;;  %v396_v17 = vld [vmem:[%s1754_s29 + $0x110] sm:$0xff] }
  0x18   : > { %379 = vst [vmem:[%s1759_s30 + $0x40] sm:$0xff] %v378_v8  ;;  %v398_v18 = vld [vmem:[%s1754_s29 + $0x120] sm:$0xff]  ;;  %v400_v19 = vld [vmem:[%s1754_s29 + $0x130] sm:$0xff] }
  0x19   : > { %381 = vst [vmem:[%s1759_s30 + $0x48] sm:$0xff] %v380_v9  ;;  %v402_v20 = vld [vmem:[%s1754_s29 + $0x140] sm:$0xff]  ;;  %v404_v21 = vld [vmem:[%s1754_s29 + $0x150] sm:$0xff] }
  0x1a   : > { %383 = vst [vmem:[%s1759_s30 + $0x50] sm:$0xff] %v382_v10  ;;  %v406_v22 = vld [vmem:[%s1754_s29 + $0x160] sm:$0xff]  ;;  %v408_v23 = vld [vmem:[%s1754_s29 + $0x170] sm:$0xff] }
  0x1b   : > { %385 = vst [vmem:[%s1759_s30 + $0x58] sm:$0xff] %v384_v11  ;;  %v410_v24 = vld [vmem:[%s1754_s29 + $0x180] sm:$0xff]  ;;  %v412_v25 = vld [vmem:[%s1754_s29 + $0x190] sm:$0xff] }
  0x1c   : > { %387 = vst [vmem:[%s1759_s30 + $0x60] sm:$0xff] %v386_v12  ;;  %v414_v26 = vld [vmem:[%s1754_s29 + $0x1a0] sm:$0xff]  ;;  %v416_v27 = vld [vmem:[%s1754_s29 + $0x1b0] sm:$0xff] }
  0x1d   : > { %389 = vst [vmem:[%s1759_s30 + $0x68] sm:$0xff] %v388_v13  ;;  %v418_v28 = vld [vmem:[%s1754_s29 + $0x1c0] sm:$0xff]  ;;  %v420_v29 = vld [vmem:[%s1754_s29 + $0x1d0] sm:$0xff] }
  0x1e   : > { %391 = vst [vmem:[%s1759_s30 + $0x70] sm:$0xff] %v390_v14  ;;  %v422_v30 = vld [vmem:[%s1754_s29 + $0x1e0] sm:$0xff]  ;;  %v424_v31 = vld [vmem:[%s1754_s29 + $0x1f0] sm:$0xff] }
  0x1f   : > { %393 = vst [vmem:[%s1759_s30 + $0x78] sm:$0xff] %v392_v15  ;;  %v426_v32 = vld [vmem:[%s1754_s29 + $0x200] sm:$0xff]  ;;  %v428_v33 = vld [vmem:[%s1754_s29 + $0x210] sm:$0xff] }
  0x20   : > { %395 = vst [vmem:[%s1759_s30 + $0x80] sm:$0xff] %v394_v16  ;;  %v430_v34 = vld [vmem:[%s1754_s29 + $0x220] sm:$0xff]  ;;  %v432_v35 = vld [vmem:[%s1754_s29 + $0x230] sm:$0xff] }
  0x21   : > { %397 = vst [vmem:[%s1759_s30 + $0x88] sm:$0xff] %v396_v17  ;;  %v434_v36 = vld [vmem:[%s1754_s29 + $0x240] sm:$0xff]  ;;  %v436_v37 = vld [vmem:[%s1754_s29 + $0x250] sm:$0xff] }
  0x22   : > { %399 = vst [vmem:[%s1759_s30 + $0x90] sm:$0xff] %v398_v18  ;;  %v438_v38 = vld [vmem:[%s1754_s29 + $0x260] sm:$0xff]  ;;  %v440_v39 = vld [vmem:[%s1754_s29 + $0x270] sm:$0xff] }
  0x23   : > { %401 = vst [vmem:[%s1759_s30 + $0x98] sm:$0xff] %v400_v19  ;;  %v442_v40 = vld [vmem:[%s1754_s29 + $0x280] sm:$0xff]  ;;  %v444_v41 = vld [vmem:[%s1754_s29 + $0x290] sm:$0xff] }
  0x24   : > { %403 = vst [vmem:[%s1759_s30 + $0xa0] sm:$0xff] %v402_v20  ;;  %v446_v42 = vld [vmem:[%s1754_s29 + $0x2a0] sm:$0xff]  ;;  %v448_v43 = vld [vmem:[%s1754_s29 + $0x2b0] sm:$0xff] }
  0x25   : > { %405 = vst [vmem:[%s1759_s30 + $0xa8] sm:$0xff] %v404_v21  ;;  %v450_v44 = vld [vmem:[%s1754_s29 + $0x2c0] sm:$0xff]  ;;  %v452_v45 = vld [vmem:[%s1754_s29 + $0x2d0] sm:$0xff] }
  0x26   : > { %407 = vst [vmem:[%s1759_s30 + $0xb0] sm:$0xff] %v406_v22  ;;  %v454_v46 = vld [vmem:[%s1754_s29 + $0x2e0] sm:$0xff]  ;;  %v456_v47 = vld [vmem:[%s1754_s29 + $0x2f0] sm:$0xff] }
  0x27   : > { %409 = vst [vmem:[%s1759_s30 + $0xb8] sm:$0xff] %v408_v23  ;;  %v458_v48 = vld [vmem:[%s1754_s29 + $0x300] sm:$0xff]  ;;  %v460_v49 = vld [vmem:[%s1754_s29 + $0x310] sm:$0xff] }
  0x28   : > { %411 = vst [vmem:[%s1759_s30 + $0xc0] sm:$0xff] %v410_v24  ;;  %v462_v50 = vld [vmem:[%s1754_s29 + $0x320] sm:$0xff]  ;;  %v464_v51 = vld [vmem:[%s1754_s29 + $0x330] sm:$0xff] }
  0x29   : > { %413 = vst [vmem:[%s1759_s30 + $0xc8] sm:$0xff] %v412_v25  ;;  %v466_v52 = vld [vmem:[%s1754_s29 + $0x340] sm:$0xff]  ;;  %v468_v53 = vld [vmem:[%s1754_s29 + $0x350] sm:$0xff] }
  0x2a   : > { %415 = vst [vmem:[%s1759_s30 + $0xd0] sm:$0xff] %v414_v26  ;;  %v470_v54 = vld [vmem:[%s1754_s29 + $0x360] sm:$0xff]  ;;  %v472_v55 = vld [vmem:[%s1754_s29 + $0x370] sm:$0xff] }
  0x2b   : > { %417 = vst [vmem:[%s1759_s30 + $0xd8] sm:$0xff] %v416_v27  ;;  %v474_v56 = vld [vmem:[%s1754_s29 + $0x380] sm:$0xff]  ;;  %v476_v57 = vld [vmem:[%s1754_s29 + $0x390] sm:$0xff] }
  0x2c   : > { %419 = vst [vmem:[%s1759_s30 + $0xe0] sm:$0xff] %v418_v28  ;;  %v478_v58 = vld [vmem:[%s1754_s29 + $0x3a0] sm:$0xff]  ;;  %v480_v59 = vld [vmem:[%s1754_s29 + $0x3b0] sm:$0xff] }
  0x2d   : > { %421 = vst [vmem:[%s1759_s30 + $0xe8] sm:$0xff] %v420_v29  ;;  %v482_v60 = vld [vmem:[%s1754_s29 + $0x3c0] sm:$0xff]  ;;  %v484_v61 = vld [vmem:[%s1754_s29 + $0x3d0] sm:$0xff] }
  0x2e   : > { %423 = vst [vmem:[%s1759_s30 + $0xf0] sm:$0xff] %v422_v30  ;;  %v486_v62 = vld [vmem:[%s1754_s29 + $0x3e0] sm:$0xff]  ;;  %v488_v63 = vld [vmem:[%s1754_s29 + $0x3f0] sm:$0xff] }
  0x2f   : > { %425 = vst [vmem:[%s1759_s30 + $0xf8] sm:$0xff] %v424_v31 }
  0x30   : > { %427 = vst [vmem:[%s1759_s30 + $0x100] sm:$0xff] %v426_v32 }
  0x31   : > { %429 = vst [vmem:[%s1759_s30 + $0x108] sm:$0xff] %v428_v33 }
  0x32   : > { %431 = vst [vmem:[%s1759_s30 + $0x110] sm:$0xff] %v430_v34 }
  0x33   : > { %433 = vst [vmem:[%s1759_s30 + $0x118] sm:$0xff] %v432_v35 }
  0x34   : > { %435 = vst [vmem:[%s1759_s30 + $0x120] sm:$0xff] %v434_v36 }
  0x35   : > { %437 = vst [vmem:[%s1759_s30 + $0x128] sm:$0xff] %v436_v37 }
  0x36   : > { %439 = vst [vmem:[%s1759_s30 + $0x130] sm:$0xff] %v438_v38 }
  0x37   : > { %441 = vst [vmem:[%s1759_s30 + $0x138] sm:$0xff] %v440_v39 }
  0x38   : > { %443 = vst [vmem:[%s1759_s30 + $0x140] sm:$0xff] %v442_v40 }
  0x39   : > { %445 = vst [vmem:[%s1759_s30 + $0x148] sm:$0xff] %v444_v41 }
  0x3a   : > { %447 = vst [vmem:[%s1759_s30 + $0x150] sm:$0xff] %v446_v42 }
  0x3b   : > { %449 = vst [vmem:[%s1759_s30 + $0x158] sm:$0xff] %v448_v43 }
  0x3c   : > { %451 = vst [vmem:[%s1759_s30 + $0x160] sm:$0xff] %v450_v44 }
  0x3d   : > { %453 = vst [vmem:[%s1759_s30 + $0x168] sm:$0xff] %v452_v45 }
  0x3e   : > { %455 = vst [vmem:[%s1759_s30 + $0x170] sm:$0xff] %v454_v46 }
  0x3f   : > { %457 = vst [vmem:[%s1759_s30 + $0x178] sm:$0xff] %v456_v47 }
  0x40   : > { %459 = vst [vmem:[%s1759_s30 + $0x180] sm:$0xff] %v458_v48 }
  0x41   : > { %461 = vst [vmem:[%s1759_s30 + $0x188] sm:$0xff] %v460_v49 }
  0x42   : > { %463 = vst [vmem:[%s1759_s30 + $0x190] sm:$0xff] %v462_v50 }
  0x43   : > { %465 = vst [vmem:[%s1759_s30 + $0x198] sm:$0xff] %v464_v51 }
  0x44   : > { %467 = vst [vmem:[%s1759_s30 + $0x1a0] sm:$0xff] %v466_v52 }
  0x45   : > { %469 = vst [vmem:[%s1759_s30 + $0x1a8] sm:$0xff] %v468_v53 }
  0x46   : > { %471 = vst [vmem:[%s1759_s30 + $0x1b0] sm:$0xff] %v470_v54 }
  0x47   : > { %473 = vst [vmem:[%s1759_s30 + $0x1b8] sm:$0xff] %v472_v55 }
  0x48   : > { %475 = vst [vmem:[%s1759_s30 + $0x1c0] sm:$0xff] %v474_v56 }
  0x49   : > { %477 = vst [vmem:[%s1759_s30 + $0x1c8] sm:$0xff] %v476_v57 }
  0x4a   : > { %479 = vst [vmem:[%s1759_s30 + $0x1d0] sm:$0xff] %v478_v58 }
  0x4b   : > { %481 = vst [vmem:[%s1759_s30 + $0x1d8] sm:$0xff] %v480_v59 }
  0x4c   : > { %483 = vst [vmem:[%s1759_s30 + $0x1e0] sm:$0xff] %v482_v60 }
  0x4d   : > { %485 = vst [vmem:[%s1759_s30 + $0x1e8] sm:$0xff] %v484_v61 }
  0x4e   : > { %487 = vst [vmem:[%s1759_s30 + $0x1f0] sm:$0xff] %v486_v62 }
  0x4f   : > { %489 = vst [vmem:[%s1759_s30 + $0x1f8] sm:$0xff] %v488_v63 }
  0x50 PF: > { %p1277_p6 = scmp.ge.s32.totalorder %s1684_s19, 1  ;;  %p510_p7 = scmp.lt.s32.totalorder %s1684_s19, 3 }
  0x52   : > { %p511_p8 = pnand %p1277_p6, %p510_p7 }
  0x53   : > { %s517_s5 = sand.u32 (!%p511_p8), 1, %s1668_s15   ;;  %s1279_s12 = sshll.u32 (!%p511_p8), %s1676_s17, 1 }
  0x54   : > { %514 = sbr.rel (%p511_p8) target bundleno = 302 (0x12e), region = 70  ;;  %s1278_s6 = sshll.u32 (!%p511_p8), %s517_s5, 9 }
  0x55   : > { %s1889_s7 = scalar_lea.vmem (!%p511_p8), [#allocation3], %s1278_s6  ;;  %p574_p9 = scmp.lt.s32.totalorder (!%p511_p8), %s1279_s12, 3 }
  0x59   : > { %v1341_v0 = vld [vmem:[%s1889_s7 + $0x70] sm:$0xf]  ;;  %v1557_v1 = vld [vmem:[%s1889_s7 + $0x74] sm:$0xf0]  ;;  %v1333_v11 = vld [vmem:[%s1889_s7 + $0x60] sm:$0xf] }
  0x5a   : > { %v1405_v2 = vld [vmem:[%s1889_s7 + $0xf0] sm:$0xf]  ;;  %v1342_v3 = vor.u32 %v1557_v1, %v1341_v0  ;;  %v1573_v4 = vld [vmem:[%s1889_s7 + $0xf4] sm:$0xf0]  ;;  %v1555_v13 = vld [vmem:[%s1889_s7 + $0x64] sm:$0xf0] }
  0x5b   : > { %v1469_v5 = vld [vmem:[%s1889_s7 + $0x170] sm:$0xf]  ;;  %v1589_v6 = vld [vmem:[%s1889_s7 + $0x174] sm:$0xf0]  ;;  %v1406_v7 = vor.u32 %v1573_v4, %v1405_v2  ;;  %v1397_v14 = vld [vmem:[%s1889_s7 + $0xe0] sm:$0xf]  ;;  %v1334_v16 = vor.u32 %v1555_v13, %v1333_v11 }
  0x5c   : > { %v1470_v8 = vor.u32 %v1589_v6, %v1469_v5  ;;  %v1533_v9 = vld [vmem:[%s1889_s7 + $0x1f0] sm:$0xf]  ;;  %v1605_v10 = vld [vmem:[%s1889_s7 + $0x1f4] sm:$0xf0]  ;;  %1001 = vmatpush.bf16.msra.mxu0 %v1342_v3  ;;  %v1571_v15 = vld [vmem:[%s1889_s7 + $0xe4] sm:$0xf0] }
  0x5d   : > { %v1534_v12 = vor.u32 %v1605_v10, %v1533_v9  ;;  %1014 = vmatpush.bf16.msra.mxu1 %v1406_v7  ;;  %v1398_v17 = vor.u32 %v1571_v15, %v1397_v14  ;;  %v1461_v18 = vld [vmem:[%s1889_s7 + $0x160] sm:$0xf]  ;;  %v1587_v19 = vld [vmem:[%s1889_s7 + $0x164] sm:$0xf0]  ;;  %v1325_v23 = vld [vmem:[%s1889_s7 + $0x50] sm:$0xf] }
  0x5e   : > { %1027 = vmatpush.bf16.msra.mxu2 %v1470_v8  ;;  %v1525_v20 = vld [vmem:[%s1889_s7 + $0x1e0] sm:$0xf]  ;;  %v1462_v21 = vor.u32 %v1587_v19, %v1461_v18  ;;  %v1603_v22 = vld [vmem:[%s1889_s7 + $0x1e4] sm:$0xf0]  ;;  %v1553_v24 = vld [vmem:[%s1889_s7 + $0x54] sm:$0xf0] }
  0x5f   : > { %1040 = vmatpush.bf16.msra.mxu3 %v1534_v12  ;;  %v1526_v25 = vor.u32 %v1603_v22, %v1525_v20  ;;  %v1389_v26 = vld [vmem:[%s1889_s7 + $0xd0] sm:$0xf]  ;;  %v1569_v27 = vld [vmem:[%s1889_s7 + $0xd4] sm:$0xf0]  ;;  %v1326_v29 = vor.u32 %v1553_v24, %v1325_v23  ;;  %v1317_v35 = vld [vmem:[%s1889_s7 + $0x40] sm:$0xf] }
  0x60   : > { %v1453_v28 = vld [vmem:[%s1889_s7 + $0x150] sm:$0xf]  ;;  %1002 = vmatpush.bf16.msra.mxu0 %v1334_v16  ;;  %v1585_v30 = vld [vmem:[%s1889_s7 + $0x154] sm:$0xf0]  ;;  %v1390_v33 = vor.u32 %v1569_v27, %v1389_v26  ;;  %v1551_v36 = vld [vmem:[%s1889_s7 + $0x44] sm:$0xf0] }
  0x61   : > { %v1517_v31 = vld [vmem:[%s1889_s7 + $0x1d0] sm:$0xf]  ;;  %v1601_v32 = vld [vmem:[%s1889_s7 + $0x1d4] sm:$0xf0]  ;;  %1015 = vmatpush.bf16.msra.mxu1 %v1398_v17  ;;  %v1454_v34 = vor.u32 %v1585_v30, %v1453_v28  ;;  %v1381_v37 = vld [vmem:[%s1889_s7 + $0xc0] sm:$0xf]  ;;  %v1318_v44 = vor.u32 %v1551_v36, %v1317_v35 }
  0x62   : > { %1028 = vmatpush.bf16.msra.mxu2 %v1462_v21  ;;  %v1518_v38 = vor.u32 %v1601_v32, %v1517_v31  ;;  %v1567_v39 = vld [vmem:[%s1889_s7 + $0xc4] sm:$0xf0]  ;;  %v1445_v40 = vld [vmem:[%s1889_s7 + $0x140] sm:$0xf]  ;;  %v1309_v47 = vld [vmem:[%s1889_s7 + $0x30] sm:$0xf] }
  0x63   : > { %1041 = vmatpush.bf16.msra.mxu3 %v1526_v25  ;;  %v1583_v41 = vld [vmem:[%s1889_s7 + $0x144] sm:$0xf0]  ;;  %v1509_v42 = vld [vmem:[%s1889_s7 + $0x1c0] sm:$0xf]  ;;  %v1382_v45 = vor.u32 %v1567_v39, %v1381_v37  ;;  %v1549_v48 = vld [vmem:[%s1889_s7 + $0x34] sm:$0xf0] }
  0x64   : > { %v1599_v43 = vld [vmem:[%s1889_s7 + $0x1c4] sm:$0xf0]  ;;  %1003 = vmatpush.bf16.msra.mxu0 %v1326_v29  ;;  %v1446_v46 = vor.u32 %v1583_v41, %v1445_v40  ;;  %v1373_v49 = vld [vmem:[%s1889_s7 + $0xb0] sm:$0xf]  ;;  %v1565_v51 = vld [vmem:[%s1889_s7 + $0xb4] sm:$0xf0]  ;;  %v1310_v56 = vor.u32 %v1549_v48, %v1309_v47 }
  0x65   : > { %1016 = vmatpush.bf16.msra.mxu1 %v1390_v33  ;;  %v1510_v50 = vor.u32 %v1599_v43, %v1509_v42  ;;  %v1437_v52 = vld [vmem:[%s1889_s7 + $0x130] sm:$0xf]  ;;  %v1581_v53 = vld [vmem:[%s1889_s7 + $0x134] sm:$0xf0]  ;;  %v1374_v57 = vor.u32 %v1565_v51, %v1373_v49  ;;  %v1301_v59 = vld [vmem:[%s1889_s7 + $0x20] sm:$0xf] }
  0x66   : > { %1029 = vmatpush.bf16.msra.mxu2 %v1454_v34  ;;  %v1501_v54 = vld [vmem:[%s1889_s7 + $0x1b0] sm:$0xf]  ;;  %v1597_v55 = vld [vmem:[%s1889_s7 + $0x1b4] sm:$0xf0]  ;;  %v1438_v58 = vor.u32 %v1581_v53, %v1437_v52  ;;  %v1547_v60 = vld [vmem:[%s1889_s7 + $0x24] sm:$0xf0] }
  0x67   : > { %1042 = vmatpush.bf16.msra.mxu3 %v1518_v38  ;;  %v1365_v61 = vld [vmem:[%s1889_s7 + $0xa0] sm:$0xf]  ;;  %v1502_v62 = vor.u32 %v1597_v55, %v1501_v54  ;;  %v1563_v63 = vld [vmem:[%s1889_s7 + $0xa4] sm:$0xf0]  ;;  %v1302_v4 = vor.u32 %v1547_v60, %v1301_v59  ;;  %v1293_v7 = vld [vmem:[%s1889_s7 + $0x10] sm:$0xf] }
  0x68   : > { %1004 = vmatpush.bf16.msra.mxu0 %v1318_v44  ;;  %v1429_v0 = vld [vmem:[%s1889_s7 + $0x120] sm:$0xf]  ;;  %v1579_v1 = vld [vmem:[%s1889_s7 + $0x124] sm:$0xf0]  ;;  %v1366_v5 = vor.u32 %v1563_v63, %v1365_v61  ;;  %v1545_v8 = vld [vmem:[%s1889_s7 + $0x14] sm:$0xf0] }
  0x69   : > { %1017 = vmatpush.bf16.msra.mxu1 %v1382_v45  ;;  %v1493_v2 = vld [vmem:[%s1889_s7 + $0x1a0] sm:$0xf]  ;;  %v1595_v3 = vld [vmem:[%s1889_s7 + $0x1a4] sm:$0xf0]  ;;  %v1430_v6 = vor.u32 %v1579_v1, %v1429_v0  ;;  %v1357_v9 = vld [vmem:[%s1889_s7 + $0x90] sm:$0xf]  ;;  %v1294_v16 = vor.u32 %v1545_v8, %v1293_v7 }
  0x6a   : > { %1030 = vmatpush.bf16.msra.mxu2 %v1446_v46  ;;  %v1494_v10 = vor.u32 %v1595_v3, %v1493_v2  ;;  %v1561_v11 = vld [vmem:[%s1889_s7 + $0x94] sm:$0xf0]  ;;  %v1421_v12 = vld [vmem:[%s1889_s7 + $0x110] sm:$0xf]  ;;  %v1285_v17 = vld [vmem:[%s1889_s7] sm:$0xf] }
  0x6b   : > { %1043 = vmatpush.bf16.msra.mxu3 %v1510_v50  ;;  %v1577_v13 = vld [vmem:[%s1889_s7 + $0x114] sm:$0xf0]  ;;  %v1485_v14 = vld [vmem:[%s1889_s7 + $0x190] sm:$0xf]  ;;  %v1543_v18 = vld [vmem:[%s1889_s7 + $0x4] sm:$0xf0]  ;;  %v1358_v20 = vor.u32 %v1561_v11, %v1357_v9 }
  0x6c   : > { %1005 = vmatpush.bf16.msra.mxu0 %v1310_v56  ;;  %v1593_v15 = vld [vmem:[%s1889_s7 + $0x194] sm:$0xf0]  ;;  %v1349_v19 = vld [vmem:[%s1889_s7 + $0x80] sm:$0xf]  ;;  %v1422_v21 = vor.u32 %v1577_v13, %v1421_v12  ;;  %v1559_v22 = vld [vmem:[%s1889_s7 + $0x84] sm:$0xf0]  ;;  %v1286_v32 = vor.u32 %v1543_v18, %v1285_v17 }
  0x6d   : > { %1018 = vmatpush.bf16.msra.mxu1 %v1374_v57  ;;  %v1413_v23 = vld [vmem:[%s1889_s7 + $0x100] sm:$0xf]  ;;  %v1575_v24 = vld [vmem:[%s1889_s7 + $0x104] sm:$0xf0]  ;;  %v1486_v25 = vor.u32 %v1593_v15, %v1485_v14  ;;  %v1556_v28 = vld [vmem:[%s1889_s7 + $0x74] sm:$0xf]  ;;  %v1350_v37 = vor.u32 %v1559_v22, %v1349_v19 }
  0x6e   : > { %1031 = vmatpush.bf16.msra.mxu2 %v1438_v58  ;;  %v1477_v26 = vld [vmem:[%s1889_s7 + $0x180] sm:$0xf]  ;;  %v1591_v27 = vld [vmem:[%s1889_s7 + $0x184] sm:$0xf0]  ;;  %v1343_v29 = vld [vmem:[%s1889_s7 + $0x78] sm:$0xf0]  ;;  %v1414_v38 = vor.u32 %v1575_v24, %v1413_v23 }
  0x6f   : > { %1044 = vmatpush.bf16.msra.mxu3 %v1502_v62  ;;  %v1572_v30 = vld [vmem:[%s1889_s7 + $0xf4] sm:$0xf]  ;;  %v602_v31 = vld [vmem:[%s2071_s0 + $0x8] sm:$0xff]  ;;  %v1407_v33 = vld [vmem:[%s1889_s7 + $0xf8] sm:$0xf0]  ;;  %v1478_v42 = vor.u32 %v1591_v27, %v1477_v26  ;;  %v1346_v43 = vor.u32 %v1556_v28, %v1343_v29  ;;  %s2083_s12 = smov (!%p574_p9, %s1279_s12), 3 }
  0x70   : > { %1006 = vmatpush.bf16.msra.mxu0 %v1302_v4  ;;  %v1588_v34 = vld [vmem:[%s1889_s7 + $0x174] sm:$0xf]  ;;  %v1471_v35 = vld [vmem:[%s1889_s7 + $0x178] sm:$0xf0]  ;;  %v671_v36 = vunpack.c.l.b16 %v602_v31  ;;  %v672_v41 = vunpack.c.h.b16 %v602_v31  ;;  %v601_v44 = vld [vmem:[%s2071_s0] sm:$0xff]  ;;  %v1410_v45 = vor.u32 %v1572_v30, %v1407_v33  ;;  %s576_s15 = scalar_lea.vmem %s2073_s2, %s2083_s12  ;;  %s581_s24 = scalar_lea.vmem %s2074_s3, %s2083_s12 }
  0x71   : > { %1019 = vmatpush.bf16.msra.mxu1 %v1366_v5  ;;  %v1604_v39 = vld [vmem:[%s1889_s7 + $0x1f4] sm:$0xf]  ;;  %v1535_v40 = vld [vmem:[%s1889_s7 + $0x1f8] sm:$0xf0]  ;;  %v1474_v46 = vor.u32 %v1588_v34, %v1471_v35  ;;  %v1554_v47 = vld [vmem:[%s1889_s7 + $0x64] sm:$0xf]  ;;  %v669_v50 = vunpack.c.l.b16 %v601_v44  ;;  %v670_v51 = vunpack.c.h.b16 %v601_v44 }
  0x72   : > { %1032 = vmatpush.bf16.msra.mxu2 %v1430_v6  ;;  %v1335_v48 = vld [vmem:[%s1889_s7 + $0x68] sm:$0xf0]  ;;  %v1570_v49 = vld [vmem:[%s1889_s7 + $0xe4] sm:$0xf]  ;;  %v1538_v52 = vor.u32 %v1604_v39, %v1535_v40  ;;  %v1975_v56 = vpack.c.b16 %v671_v36, %v671_v36  ;;  %v1979_v59 = vpack.c.b16 %v672_v41, %v672_v41  ;;  %v1552_v1 = vld [vmem:[%s1889_s7 + $0x54] sm:$0xf] }
  0x73   : > { %1045 = vmatpush.bf16.msra.mxu3 %v1494_v10  ;;  %v1399_v53 = vld [vmem:[%s1889_s7 + $0xe8] sm:$0xf0]  ;;  %v1586_v54 = vld [vmem:[%s1889_s7 + $0x164] sm:$0xf]  ;;  %v1981_v60 = vpack.c.b16 %v669_v50, %v669_v50  ;;  %v1338_v61 = vor.u32 %v1554_v47, %v1335_v48  ;;  %v1983_v62 = vpack.c.b16 %v670_v51, %v670_v51  ;;  %v1327_v2 = vld [vmem:[%s1889_s7 + $0x58] sm:$0xf0] }
  0x74   : > { %1007 = vmatpush.bf16.msra.mxu0 %v1294_v16  ;;  %v1463_v55 = vld [vmem:[%s1889_s7 + $0x168] sm:$0xf0]  ;;  %v1602_v57 = vld [vmem:[%s1889_s7 + $0x1e4] sm:$0xf]  ;;  %v1402_v63 = vor.u32 %v1570_v49, %v1399_v53  ;;  %v1568_v3 = vld [vmem:[%s1889_s7 + $0xd4] sm:$0xf]  ;;  %v1330_v10 = vor.u32 %v1552_v1, %v1327_v2 }
  0x75   : > { %1020 = vmatpush.bf16.msra.mxu1 %v1358_v20  ;;  %v1527_v58 = vld [vmem:[%s1889_s7 + $0x1e8] sm:$0xf0]  ;;  %v1466_v0 = vor.u32 %v1586_v54, %v1463_v55  ;;  %v1391_v5 = vld [vmem:[%s1889_s7 + $0xd8] sm:$0xf0]  ;;  %v1584_v6 = vld [vmem:[%s1889_s7 + $0x154] sm:$0xf] }
  0x76   : > { %1033 = vmatpush.bf16.msra.mxu2 %v1422_v21  ;;  %v1530_v4 = vor.u32 %v1602_v57, %v1527_v58  ;;  %v1455_v7 = vld [vmem:[%s1889_s7 + $0x158] sm:$0xf0]  ;;  %v1600_v8 = vld [vmem:[%s1889_s7 + $0x1d4] sm:$0xf]  ;;  %v1394_v11 = vor.u32 %v1568_v3, %v1391_v5  ;;  %v1550_v13 = vld [vmem:[%s1889_s7 + $0x44] sm:$0xf] }
  0x77   : > { %1046 = vmatpush.bf16.msra.mxu3 %v1486_v25  ;;  %v1519_v9 = vld [vmem:[%s1889_s7 + $0x1d8] sm:$0xf0]  ;;  %v1458_v12 = vor.u32 %v1584_v6, %v1455_v7  ;;  %v1319_v14 = vld [vmem:[%s1889_s7 + $0x48] sm:$0xf0]  ;;  %v1566_v15 = vld [vmem:[%s1889_s7 + $0xc4] sm:$0xf] }
  0x78   : > { %1008 = vmatpush.bf16.msra.mxu0 %v1286_v32  ;;  %v1522_v16 = vor.u32 %v1600_v8, %v1519_v9  ;;  %v1383_v17 = vld [vmem:[%s1889_s7 + $0xc8] sm:$0xf0]  ;;  %v1582_v18 = vld [vmem:[%s1889_s7 + $0x144] sm:$0xf]  ;;  %v1322_v22 = vor.u32 %v1550_v13, %v1319_v14  ;;  %v1548_v25 = vld [vmem:[%s1889_s7 + $0x34] sm:$0xf] }
  0x79   : > { %1021 = vmatpush.bf16.msra.mxu1 %v1350_v37  ;;  %v1447_v19 = vld [vmem:[%s1889_s7 + $0x148] sm:$0xf0]  ;;  %v1598_v20 = vld [vmem:[%s1889_s7 + $0x1c4] sm:$0xf]  ;;  %v1386_v23 = vor.u32 %v1566_v15, %v1383_v17  ;;  %v1311_v26 = vld [vmem:[%s1889_s7 + $0x38] sm:$0xf0] }
  0x7a   : > { %1034 = vmatpush.bf16.msra.mxu2 %v1414_v38  ;;  %v1511_v21 = vld [vmem:[%s1889_s7 + $0x1c8] sm:$0xf0]  ;;  %v1450_v24 = vor.u32 %v1582_v18, %v1447_v19  ;;  %v1564_v27 = vld [vmem:[%s1889_s7 + $0xb4] sm:$0xf]  ;;  %v1375_v29 = vld [vmem:[%s1889_s7 + $0xb8] sm:$0xf0]  ;;  %v1314_v34 = vor.u32 %v1548_v25, %v1311_v26 }
  0x7b   : > { %1047 = vmatpush.bf16.msra.mxu3 %v1478_v42  ;;  %1009 = vmatmul.bf16.vlgmr.msra.gmra.mxu0 %v1981_v60  ;;  %v1514_v28 = vor.u32 %v1598_v20, %v1511_v21  ;;  %v1580_v30 = vld [vmem:[%s1889_s7 + $0x134] sm:$0xf]  ;;  %v1439_v31 = vld [vmem:[%s1889_s7 + $0x138] sm:$0xf0]  ;;  %v1378_v35 = vor.u32 %v1564_v27, %v1375_v29  ;;  %v1546_v37 = vld [vmem:[%s1889_s7 + $0x24] sm:$0xf] }
  0x7c   : > { %1053 = vmatpush.bf16.msrb.mxu0 %v1346_v43  ;;  %1022 = vmatmul.bf16.vlgmr.msra.gmra.mxu1 %v1983_v62  ;;  %v1596_v32 = vld [vmem:[%s1889_s7 + $0x1b4] sm:$0xf]  ;;  %v1503_v33 = vld [vmem:[%s1889_s7 + $0x1b8] sm:$0xf0]  ;;  %v1442_v36 = vor.u32 %v1580_v30, %v1439_v31  ;;  %v1303_v38 = vld [vmem:[%s1889_s7 + $0x28] sm:$0xf0] }
  0x7d   : > { %1066 = vmatpush.bf16.msrb.mxu1 %v1410_v45  ;;  %1035 = vmatmul.bf16.vlgmr.msra.gmra.mxu2 %v1975_v56  ;;  %v1562_v39 = vld [vmem:[%s1889_s7 + $0xa4] sm:$0xf]  ;;  %v1506_v40 = vor.u32 %v1596_v32, %v1503_v33  ;;  %v1367_v41 = vld [vmem:[%s1889_s7 + $0xa8] sm:$0xf0]  ;;  %v1544_v49 = vld [vmem:[%s1889_s7 + $0x14] sm:$0xf] }
  0x7e   : > { %1079 = vmatpush.bf16.msrb.mxu2 %v1474_v46  ;;  %1048 = vmatmul.bf16.vlgmr.msra.gmra.mxu3 %v1979_v59  ;;  %v1578_v42 = vld [vmem:[%s1889_s7 + $0x124] sm:$0xf]  ;;  %v1431_v43 = vld [vmem:[%s1889_s7 + $0x128] sm:$0xf0]  ;;  %v1306_v46 = vor.u32 %v1546_v37, %v1303_v38  ;;  %v1370_v47 = vor.u32 %v1562_v39, %v1367_v41  ;;  %v1295_v50 = vld [vmem:[%s1889_s7 + $0x18] sm:$0xf0] }
  0x7f   : > { %1092 = vmatpush.bf16.msrb.mxu3 %v1538_v52  ;;  %v1594_v44 = vld [vmem:[%s1889_s7 + $0x1a4] sm:$0xf]  ;;  %v1495_v45 = vld [vmem:[%s1889_s7 + $0x1a8] sm:$0xf0]  ;;  %v1434_v48 = vor.u32 %v1578_v42, %v1431_v43  ;;  %v1560_v51 = vld [vmem:[%s1889_s7 + $0x94] sm:$0xf] }
  0x80   : > { %1054 = vmatpush.bf16.msrb.mxu0 %v1338_v61  ;;  %v1498_v52 = vor.u32 %v1594_v44, %v1495_v45  ;;  %v1359_v53 = vld [vmem:[%s1889_s7 + $0x98] sm:$0xf0]  ;;  %v1576_v54 = vld [vmem:[%s1889_s7 + $0x114] sm:$0xf]  ;;  %v1298_v61 = vor.u32 %v1544_v49, %v1295_v50  ;;  %v1542_v1 = vld [vmem:[%s1889_s7 + $0x4] sm:$0xf] }
  0x81   : > { %1067 = vmatpush.bf16.msrb.mxu1 %v1402_v63  ;;  %v1423_v55 = vld [vmem:[%s1889_s7 + $0x118] sm:$0xf0]  ;;  %v1592_v57 = vld [vmem:[%s1889_s7 + $0x194] sm:$0xf]  ;;  %v1362_v63 = vor.u32 %v1560_v51, %v1359_v53  ;;  %v1287_v2 = vld [vmem:[%s1889_s7 + $0x8] sm:$0xf0] }
  0x82   : > { %1080 = vmatpush.bf16.msrb.mxu2 %v1466_v0  ;;  %v1487_v58 = vld [vmem:[%s1889_s7 + $0x198] sm:$0xf0]  ;;  %v1426_v0 = vor.u32 %v1576_v54, %v1423_v55  ;;  %v1558_v3 = vld [vmem:[%s1889_s7 + $0x84] sm:$0xf]  ;;  %v1351_v5 = vld [vmem:[%s1889_s7 + $0x88] sm:$0xf0] }
  0x83   : > { %1093 = vmatpush.bf16.msrb.mxu3 %v1530_v4  ;;  %v1490_v4 = vor.u32 %v1592_v57, %v1487_v58  ;;  %v1574_v6 = vld [vmem:[%s1889_s7 + $0x104] sm:$0xf]  ;;  %v1415_v7 = vld [vmem:[%s1889_s7 + $0x108] sm:$0xf0]  ;;  %v1122_v26 = vld [vmem:[%s581_s24] sm:$0x3] }
  0x84   : > { %1055 = vmatpush.bf16.msrb.mxu0 %v1330_v10  ;;  %v1590_v8 = vld [vmem:[%s1889_s7 + $0x184] sm:$0xf]  ;;  %v1479_v9 = vld [vmem:[%s1889_s7 + $0x188] sm:$0xf0]  ;;  %v1290_v10 = vor.u32 %v1542_v1, %v1287_v2  ;;  %v1124_v29 = vperm.slane %v1122_v26, 0  ;;  %s1282_s17 = sshll.u32 %s2083_s12, 2 }
  0x85   : > { %1068 = vmatpush.bf16.msrb.mxu1 %v1394_v11  ;;  %v1354_v11 = vor.u32 %v1558_v3, %v1351_v5  ;;  %v1482_v13 = vor.u32 %v1590_v8, %v1479_v9  ;;  %s591_s27 = scalar_lea.vmem %s2075_s4, %s1282_s17 }
  0x86   : > { %1081 = vmatpush.bf16.msrb.mxu2 %v1458_v12  ;;  %v1418_v12 = vor.u32 %v1574_v6, %v1415_v7 }
  0x87   : > { %1094 = vmatpush.bf16.msrb.mxu3 %v1522_v16 }
  0x88   : > { %1056 = vmatpush.bf16.msrb.mxu0 %v1322_v22 }
  0x89   : > { %1069 = vmatpush.bf16.msrb.mxu1 %v1386_v23 }
  0x8a   : > { %1082 = vmatpush.bf16.msrb.mxu2 %v1450_v24 }
  0x8b   : > { %1095 = vmatpush.bf16.msrb.mxu3 %v1514_v28 }
  0x8c   : > { %1057 = vmatpush.bf16.msrb.mxu0 %v1314_v34 }
  0x8d   : > { %1070 = vmatpush.bf16.msrb.mxu1 %v1378_v35 }
  0x8e   : > { %1083 = vmatpush.bf16.msrb.mxu2 %v1442_v36  ;;  %v1125_v36 = vperm.slane %v1122_v26, 1 }
  0x8f   : > { %1096 = vmatpush.bf16.msrb.mxu3 %v1506_v40 }
  0x90   : > { %1058 = vmatpush.bf16.msrb.mxu0 %v1306_v46 }
  0x91   : > { %1071 = vmatpush.bf16.msrb.mxu1 %v1370_v47 }
  0x92   : > { %1084 = vmatpush.bf16.msrb.mxu2 %v1434_v48 }
  0x93   : > { %1097 = vmatpush.bf16.msrb.mxu3 %v1498_v52 }
  0x94   : > { %1059 = vmatpush.bf16.msrb.mxu0 %v1298_v61 }
  0x95   : > { %1072 = vmatpush.bf16.msrb.mxu1 %v1362_v63 }
  0x96   : > { %1085 = vmatpush.bf16.msrb.mxu2 %v1426_v0 }
  0x97   : > { %1098 = vmatpush.bf16.msrb.mxu3 %v1490_v4 }
  0x98   : > { %1060 = vmatpush.bf16.msrb.mxu0 %v1290_v10 }
  0x99   : > { %1073 = vmatpush.bf16.msrb.mxu1 %v1354_v11 }
  0x9a   : > { %1086 = vmatpush.bf16.msrb.mxu2 %v1418_v12 }
  0x9b   : > { %1099 = vmatpush.bf16.msrb.mxu3 %v1482_v13  ;;  %1061 = vmatmul.bf16.vlgmr.msrb.gmra.mxu0 %v1981_v60 }
  0x9c   : > { %1074 = vmatmul.bf16.vlgmr.msrb.gmra.mxu1 %v1983_v62  ;;  %v1114_v62 = vld [vmem:[%s576_s15] sm:$0x3] }
  0x9d   : > { %1087 = vmatmul.bf16.vlgmr.msrb.gmra.mxu2 %v1975_v56  ;;  %v1116_v24 = vperm.slane %v1114_v62, 0  ;;  %v1117_v32 = vperm.slane %v1114_v62, 1 }
  0x9e   : > { %1100 = vmatmul.bf16.vlgmr.msrb.gmra.mxu3 %v1979_v59 }
  0xf8   : > { %v1010_v14 = vpop.f32.mrf.mxu0 }
  0xf9   : > { %v1023_v15 = vpop.f32.mrf.mxu1 }
  0xfa   : > { %v1024_v60 = vadd.f32 %v1023_v15, %v1010_v14 }
 0x100   : > { %v1036_v16 = vpop.f32.mrf.mxu2  ;;  %v1012_v18 = vpop.f32.mrf.mxu0 }
 0x101   : > { %v1049_v17 = vpop.f32.mrf.mxu3  ;;  %v1025_v19 = vpop.f32.mrf.mxu1  ;;  %v1037_v56 = vadd.f32 %v1036_v16, %v1024_v60 }
 0x103   : > { %v1050_v23 = vadd.f32 %v1049_v17, %v1037_v56 }
 0x105   : > { %v1120_v28 = vmul.f32 %v1116_v24, %v1050_v23 }
 0x107   : > { %v1128_v37 = vadd.f32 %v1124_v29, %v1120_v28 }
 0x108   : > { %v1038_v20 = vpop.f32.mrf.mxu2 }
 0x109   : > { %v1051_v21 = vpop.f32.mrf.mxu3  ;;  %v1130_v41 = vmax.f32 %v1128_v37, 0.0 }
 0x118   : > { %v1062_v59 = vpop.f32.mrf.mxu0 }
 0x119   : > { %v1075_v22 = vpop.f32.mrf.mxu1 }
 0x11a   : > { %v1076_v25 = vadd.f32 %v1075_v22, %v1062_v59 }
 0x120   : > { %v1088_v27 = vpop.f32.mrf.mxu2  ;;  %v1064_v33 = vpop.f32.mrf.mxu0 }
 0x121   : > { %v1089_v30 = vadd.f32 %v1088_v27, %v1076_v25  ;;  %v1101_v31 = vpop.f32.mrf.mxu3  ;;  %v1077_v34 = vpop.f32.mrf.mxu1 }
 0x123   : > { %v1102_v35 = vadd.f32 %v1101_v31, %v1089_v30 }
 0x125   : > { %v1121_v38 = vmul.f32 %v1117_v32, %v1102_v35 }
 0x127   : > { %v1129_v39 = vadd.f32 %v1125_v36, %v1121_v38 }
 0x128   : > { %v1090_v40 = vpop.f32.mrf.mxu2 }
 0x129   : > { %v1131_v42 = vmax.f32 %v1129_v39, 0.0  ;;  %v1103_v43 = vpop.f32.mrf.mxu3 }
 0x12b   : > { %v1132_v44 = vpack.c.bf16 %v1131_v42, %v1130_v41 }
 0x12d   : > { %1133 = vst [vmem:[%s591_s27] sm:$0xff] %v1132_v44 }
 0x12e PF: > { %s14_s19 = sadd.s32 1, %s1684_s19   ;;  %s2076_s15 = smov %s1672_s16 }
 0x12f   : > { %p11_p10 = scmp.ge.s32.totalorder %s14_s19, 4   ;;  %s2077_s16 = smov %s1746_s23 }
 0x130   : > { %s2078_s17 = smov %s1680_s18  ;;  %s2079_s18 = smov %s2081_s20 }
 0x131   :  { %13 = sbr.rel (!%p11_p10) target bundleno = 3 (0x3), region = 126 }

</bundles_post_ra>
